<compile_context>
chip_gen: v5e
topology: v5e:2x2
jax: 0.10.0
libtpu: 0.0.40
codegen_flags: <defaults>
</compile_context>

<pallas_src>
import functools

import jax
import jax.numpy as jnp
from jax.experimental import pallas as pl
from jax.experimental.pallas import tpu as pltpu


NUM_COLORS = 7


def _round_up(v, m):
    return (v + m - 1) // m * m


# ----------------------------------------------------------------------------
# Pallas kernel: tiled matmul with fused bias (+ residual) (+ ReLU) epilogue
# ----------------------------------------------------------------------------
def _mm_kernel(*refs, relu, has_residual):
    if has_residual:
        x_ref, w_ref, b_ref, r_ref, o_ref = refs
    else:
        x_ref, w_ref, b_ref, o_ref = refs
        r_ref = None

    # Output block index is constant along the k grid axis, so o_ref stays
    # VMEM-resident and acts as the f32 accumulator (no scratch needed).
    @pl.when(pl.program_id(2) == 0)
    def _():
        o_ref[...] = jnp.zeros_like(o_ref)

    o_ref[...] += jnp.dot(x_ref[...], w_ref[...],
                          preferred_element_type=jnp.float32)

    @pl.when(pl.program_id(2) == pl.num_programs(2) - 1)
    def _():
        y = o_ref[...] + b_ref[...]          # f32 epilogue (fast on v5e too)
        if has_residual:
            y = y + r_ref[...]
        if relu:
            y = jnp.maximum(y, 0.0)
        o_ref[...] = y


def matmul_bias_act(x, w, b, residual=None, relu=False):
    """out = act(x @ w + b [+ residual]).

    x: (M, Kp) bf16, w: (Kp, N) bf16 (K already padded at param-prep time),
    b: (1, N) f32, residual: (M, N) f32 or None.  Returns (M, N) f32.
    """
    M, Kp = x.shape
    _, N = w.shape

    # Tile selection.  N and Kp are either <128 (use full-dim blocks, legal per
    # the (8,128) rule) or multiples of 128; prefer 256/512-aligned tiles for
    # the v6e/v7x 256x256 MXU.  tm tracks the real M so tiny late-stage
    # matmuls (M = 2..32) do not pad up to 128 rows.
    tk = next((c for c in (512, 256, 128) if Kp % c == 0), Kp)
    tn = next((c for c in (256, 128) if N % c == 0), N)
    tm = min(256, _round_up(M, 16))
    Mp = _round_up(M, tm)
    # Ensure >=2 parallel grid steps where it is cheap, so both v7x TensorCores
    # get work (no-op on single-TC chips).
    if Mp // tm == 1 and N // tn == 1 and tm >= 32:
        tm //= 2
    grid = (Mp // tm, N // tn, Kp // tk)

    xp = jnp.pad(x, ((0, Mp - M), (0, 0)))

    inputs = [xp, w, b]
    in_specs = [
        pl.BlockSpec((tm, tk), lambda i, j, k: (i, k)),
        pl.BlockSpec((tk, tn), lambda i, j, k: (k, j)),
        pl.BlockSpec((1, tn), lambda i, j, k: (0, j)),
    ]
    has_residual = residual is not None
    if has_residual:
        rp = jnp.pad(residual.astype(jnp.float32), ((0, Mp - M), (0, 0)))
        inputs.append(rp)
        in_specs.append(pl.BlockSpec((tm, tn), lambda i, j, k: (i, j)))

    out = pl.pallas_call(
        functools.partial(_mm_kernel, relu=relu, has_residual=has_residual),
        out_shape=jax.ShapeDtypeStruct((Mp, N), jnp.float32),
        grid_spec=pltpu.PrefetchScalarGridSpec(
            num_scalar_prefetch=0,
            grid=grid,
            in_specs=in_specs,
            out_specs=pl.BlockSpec((tm, tn), lambda i, j, k: (i, j)),
        ),
        compiler_params=pltpu.CompilerParams(
            dimension_semantics=("parallel", "parallel", "arbitrary")),
    )(*inputs)
    return out[:M]


# ----------------------------------------------------------------------------
# Conv / pooling built on the kernel above
# ----------------------------------------------------------------------------
def extract_patches(x, kh, kw, stride, pad):
    """im2col for NHWC input; K ordering is (kh, kw, Cin), matching the PyTorch
    weight (Cout,Cin,kh,kw) transposed to (kh,kw,Cin,Cout).  All slice bounds
    are static Python ints."""
    N, H, W, C = x.shape
    OH = (H + 2 * pad - kh) // stride + 1
    OW = (W + 2 * pad - kw) // stride + 1
    xp = jnp.pad(x, ((0, 0), (pad, pad), (pad, pad), (0, 0)))
    cols = []
    for dh in range(kh):
        for dw in range(kw):
            s = xp[:, dh:dh + stride * (OH - 1) + 1:stride,
                   dw:dw + stride * (OW - 1) + 1:stride, :]
            cols.append(s)
    patches = jnp.concatenate(cols, axis=-1)       # bf16: half the HBM bytes
    return patches.reshape(N * OH * OW, kh * kw * C), OH, OW


def conv_bn(x, conv, kh, stride, pad, relu, residual=None):
    """Conv2d (no bias) + eval-mode BatchNorm folded into the matmul kernel;
    optional fused residual add + ReLU.  `conv` holds pre-folded, pre-padded
    bf16 weights and the f32 bias (see prepare_params)."""
    w_mat, bias = conv["w"], conv["b"]
    Kp, Cout = w_mat.shape
    xm, OH, OW = extract_patches(x.astype(jnp.bfloat16), kh, kh, stride, pad)
    M, K = xm.shape
    if K < Kp:
        xm = jnp.pad(xm, ((0, 0), (0, Kp - K)))
    rm = None if residual is None else residual.reshape(M, Cout)
    out = matmul_bias_act(xm, w_mat, bias, residual=rm, relu=relu)
    return out.reshape(x.shape[0], OH, OW, Cout)


def maxpool2d_3x3_s2_p1(x):
    """nn.MaxPool2d(kernel_size=3, stride=2, padding=1), NHWC.  Implemented as
    a pairwise jnp.maximum tree over the 9 taps (XLA fuses it; no 9x stack)."""
    N, H, W, C = x.shape
    OH = (H + 2 - 3) // 2 + 1
    OW = (W + 2 - 3) // 2 + 1
    neg = jnp.finfo(x.dtype).min
    xp = jnp.pad(x, ((0, 0), (1, 1), (1, 1), (0, 0)), constant_values=neg)
    out = None
    for dh in range(3):
        for dw in range(3):
            s = xp[:, dh:dh + 2 * (OH - 1) + 1:2,
                   dw:dw + 2 * (OW - 1) + 1:2, :]
            out = s if out is None else jnp.maximum(out, s)
    return out


# ----------------------------------------------------------------------------
# ResNet18Film (fuse='early') forward
# ----------------------------------------------------------------------------
def basic_block(x, blk, stride):
    if blk["down"] is not None:
        identity = conv_bn(x, blk["down"], kh=1, stride=stride, pad=0, relu=False)
    else:
        identity = x
    out = conv_bn(x, blk["conv1"], kh=3, stride=stride, pad=1, relu=True)
    out = conv_bn(out, blk["conv2"], kh=3, stride=1, pad=1, relu=True,
                  residual=identity)
    return out


def forward(prep, observations):
    """observations: (B, T, H, W) int32 color indices in [0, 7)."""
    B, T, H, W = observations.shape
    # one-hot embedding (torch.eye(7) buffer), early fuse: channel c = t*7+color.
    onehot = jnp.eye(NUM_COLORS, dtype=jnp.float32)[observations]   # (B,T,H,W,7)
    image = jnp.transpose(onehot, (0, 2, 3, 1, 4)).reshape(B, H, W, T * NUM_COLORS)

    # stem: conv7x7/s2/p3 (no bias) + BN + ReLU + maxpool3x3/s2/p1
    x = conv_bn(image, prep["stem"], kh=7, stride=2, pad=3, relu=True)
    x = maxpool2d_3x3_s2_p1(x)

    # stages: resnet18 layer1..layer4 (BasicBlock x2 each); strides are static.
    for si, stage in enumerate(prep["stages"]):
        for bi, blk in enumerate(stage):
            stride = 2 if (si > 0 and bi == 0) else 1
            x = basic_block(x, blk, stride)

    # adaptive_max_pool2d(1) + flatten + Linear(512, 1): tiny ops, plain jnp.
    feat = jnp.max(x, axis=(1, 2))                                  # (B, 512)
    logits = feat @ prep["reason_w"].T + prep["reason_b"]           # (B, 1)
    return logits[:, 0]


# ----------------------------------------------------------------------------
# Parameter preparation (BN folding, weight reshape, padding, bf16) - done once
# ----------------------------------------------------------------------------
def prepare_params(params):
    def prep_conv(w, bn):
        gamma, beta, mean, var = bn
        scale = gamma / jnp.sqrt(var + 1e-5)
        wf = w * scale[:, None, None, None]                 # (Cout,Cin,kh,kw)
        bf = beta - mean * scale
        Cout, Cin, kh, kw = w.shape
        K = kh * kw * Cin
        Kp = K if K <= 128 else _round_up(K, 128)
        w_mat = jnp.transpose(wf, (2, 3, 1, 0)).reshape(K, Cout)
        w_mat = jnp.pad(w_mat, ((0, Kp - K), (0, 0))).astype(jnp.bfloat16)
        return {"w": w_mat, "b": bf.reshape(1, Cout).astype(jnp.float32)}

    prep = {
        "stem": prep_conv(params["conv1_w"], params["bn1"]),
        "stages": [],
        "reason_w": params["reason_w"].astype(jnp.float32),
        "reason_b": params["reason_b"].astype(jnp.float32),
    }
    for stage in params["stages"]:
        pstage = []
        for blk in stage:
            pblk = {
                "conv1": prep_conv(blk["conv1_w"], blk["bn1"]),
                "conv2": prep_conv(blk["conv2_w"], blk["bn2"]),
                "down": (prep_conv(blk["down_w"], blk["down_bn"])
                         if blk["down_w"] is not None else None),
            }
            pstage.append(pblk)
        prep["stages"].append(pstage)
    return prep


# ----------------------------------------------------------------------------
# Deterministic synthetic parameters (shapes from the module's __init__)
# ----------------------------------------------------------------------------
def init_params(key, data_format):
    keys = iter(jax.random.split(key, 256))

    def conv_w(cout, cin, k):
        fan_in = cin * k * k
        std = 0.5 * (2.0 / fan_in) ** 0.5
        return std * jax.random.normal(next(keys), (cout, cin, k, k), jnp.float32)

    def bn_p(c):
        gamma = 1.0 + 0.1 * jax.random.normal(next(keys), (c,), jnp.float32)
        beta = 0.1 * jax.random.normal(next(keys), (c,), jnp.float32)
        return (gamma, beta, jnp.zeros((c,), jnp.float32), jnp.ones((c,), jnp.float32))

    params = {
        "conv1_w": conv_w(64, NUM_COLORS * data_format, 7),
        "bn1": bn_p(64),
        "stages": [],
    }
    stage_channels = [64, 128, 256, 512]
    in_ch = 64
    for si, out_ch in enumerate(stage_channels):
        stage = []
        for bi in range(2):
            stride = 2 if (si > 0 and bi == 0) else 1
            need_down = (stride != 1) or (in_ch != out_ch)
            blk = {
                "conv1_w": conv_w(out_ch, in_ch, 3),
                "bn1": bn_p(out_ch),
                "conv2_w": conv_w(out_ch, out_ch, 3),
                "bn2": bn_p(out_ch),
                "down_w": conv_w(out_ch, in_ch, 1) if need_down else None,
                "down_bn": bn_p(out_ch) if need_down else None,
            }
            stage.append(blk)
            in_ch = out_ch
        params["stages"].append(stage)

    params["reason_w"] = 0.02 * jax.random.normal(next(keys), (1, 512), jnp.float32)
    params["reason_b"] = 0.01 * jax.random.normal(next(keys), (1,), jnp.float32)
    return params


# ----------------------------------------------------------------------------
if __name__ == "__main__":
    key = jax.random.PRNGKey(0)
    k_param, k_obs = jax.random.split(key)

    data_format = 2      # time_step; fuse == 'early'
    B, H, W = 2, 32, 32  # stem + 4 stages -> 1x1 features

    params = init_params(k_param, data_format)
    prep = prepare_params(params)    # one-time: BN fold, reshape, pad, bf16
    observations = jax.random.randint(
        k_obs, (B, data_format, H, W), minval=0, maxval=NUM_COLORS, dtype=jnp.int32)

    fwd = jax.jit(forward)
    out = fwd(prep, observations)
    out = jax.block_until_ready(out)

    assert out.shape == (B,), out.shape
    assert jnp.all(jnp.isfinite(out))
    print("KERNEL_OK")
</pallas_src>

<mosaic_0001>
module attributes {stable_mosaic.version = 11 : i64} {
  func.func @_mm_kernel(%arg0: i32, %arg1: i32, %arg2: i32, %arg3: memref<256x256xbf16, #tpu.memory_space<vmem>>, %arg4: memref<256x64xbf16, #tpu.memory_space<vmem>>, %arg5: memref<1x64xf32, #tpu.memory_space<vmem>>, %arg6: memref<256x64xf32, #tpu.memory_space<vmem>>) attributes {dimension_semantics = [#tpu.dimension_semantics<parallel>, #tpu.dimension_semantics<parallel>, #tpu.dimension_semantics<arbitrary>], iteration_bounds = array<i64: 2, 1, 3>, scalar_prefetch = 0 : i64, scratch_operands = 0 : i64, tpu.core_type = #tpu.core_type<tc>, window_params = [{transform_indices = @transform_0, window_bounds = array<i64: 256, 256>}, {transform_indices = @transform_1, window_bounds = array<i64: 256, 64>}, {transform_indices = @transform_2, window_bounds = array<i64: 1, 64>}, {transform_indices = @transform_3, window_bounds = array<i64: 256, 64>}]} {
    %c0_i32 = arith.constant 0 : i32
    %0 = arith.cmpi eq, %arg2, %c0_i32 : i32
    %1 = arith.extui %0 : i1 to i32
    %c0_i32_0 = arith.constant 0 : i32
    %2 = arith.cmpi ne, %1, %c0_i32_0 : i32
    scf.if %2 {
      %cst_9 = arith.constant 0.000000e+00 : f32
      %12 = vector.broadcast %cst_9 : f32 to vector<256x64xf32>
      %c0_10 = arith.constant 0 : index
      %c0_11 = arith.constant 0 : index
      %13 = vector.load %arg6[%c0_10, %c0_11] : memref<256x64xf32, #tpu.memory_space<vmem>>, vector<256x64xf32>
      tpu.vector_store %arg6[%c0_10, %c0_11], %12 {strides = array<i32>} : memref<256x64xf32, #tpu.memory_space<vmem>>, vector<256x64xf32>,
    } else {
    }
    %c0 = arith.constant 0 : index
    %c0_1 = arith.constant 0 : index
    %3 = vector.load %arg6[%c0, %c0_1] : memref<256x64xf32, #tpu.memory_space<vmem>>, vector<256x64xf32>
    %c0_2 = arith.constant 0 : index
    %c0_3 = arith.constant 0 : index
    %4 = vector.load %arg3[%c0_2, %c0_3] : memref<256x256xbf16, #tpu.memory_space<vmem>>, vector<256x256xbf16>
    %c0_4 = arith.constant 0 : index
    %c0_5 = arith.constant 0 : index
    %5 = vector.load %arg4[%c0_4, %c0_5] : memref<256x64xbf16, #tpu.memory_space<vmem>>, vector<256x64xbf16>
    %cst = arith.constant dense<0.000000e+00> : vector<256x64xf32>
    %6 = tpu.matmul %4, %5, %cst {dimension_numbers = #tpu.dot_dimension_numbers<[1], [0], [0], [1], [0, 0, 1, 1], [], []>} : vector<256x256xbf16>, vector<256x64xbf16>, vector<256x64xf32> -> vector<256x64xf32>
    %7 = arith.addf %3, %6 : vector<256x64xf32>
    %c0_6 = arith.constant 0 : index
    %c0_7 = arith.constant 0 : index
    %8 = vector.load %arg6[%c0_6, %c0_7] : memref<256x64xf32, #tpu.memory_space<vmem>>, vector<256x64xf32>
    tpu.vector_store %arg6[%c0_6, %c0_7], %7 {strides = array<i32>} : memref<256x64xf32, #tpu.memory_space<vmem>>, vector<256x64xf32>,
    %c2_i32 = arith.constant 2 : i32
    %9 = arith.cmpi eq, %arg2, %c2_i32 : i32
    %10 = arith.extui %9 : i1 to i32
    %c0_i32_8 = arith.constant 0 : i32
    %11 = arith.cmpi ne, %10, %c0_i32_8 : i32
    scf.if %11 {
      %c0_9 = arith.constant 0 : index
      %c0_10 = arith.constant 0 : index
      %12 = vector.load %arg6[%c0_9, %c0_10] : memref<256x64xf32, #tpu.memory_space<vmem>>, vector<256x64xf32>
      %c0_11 = arith.constant 0 : index
      %c0_12 = arith.constant 0 : index
      %13 = vector.load %arg5[%c0_11, %c0_12] : memref<1x64xf32, #tpu.memory_space<vmem>>, vector<1x64xf32>
      %14 = vector.broadcast %13 : vector<1x64xf32> to vector<256x64xf32>
      %15 = arith.addf %12, %14 : vector<256x64xf32>
      %cst_13 = arith.constant 0.000000e+00 : f32
      %16 = vector.broadcast %cst_13 : f32 to vector<256x64xf32>
      %17 = arith.maximumf %15, %16 : vector<256x64xf32>
      %c0_14 = arith.constant 0 : index
      %c0_15 = arith.constant 0 : index
      %18 = vector.load %arg6[%c0_14, %c0_15] : memref<256x64xf32, #tpu.memory_space<vmem>>, vector<256x64xf32>
      tpu.vector_store %arg6[%c0_14, %c0_15], %17 {strides = array<i32>} : memref<256x64xf32, #tpu.memory_space<vmem>>, vector<256x64xf32>,
    } else {
    }
    return
  }
  func.func @transform_0(%arg0: i32, %arg1: i32, %arg2: i32) -> (i32, i32) {
    %c0_i32 = arith.constant 0 : i32
    return %arg0, %arg2 : i32, i32
  }
  func.func @transform_1(%arg0: i32, %arg1: i32, %arg2: i32) -> (i32, i32) {
    %c0_i32 = arith.constant 0 : i32
    return %arg2, %arg1 : i32, i32
  }
  func.func @transform_2(%arg0: i32, %arg1: i32, %arg2: i32) -> (i32, i32) {
    %c0_i32 = arith.constant 0 : i32
    %c0_i32_0 = arith.constant 0 : i32
    return %c0_i32, %arg1 : i32, i32
  }
  func.func @transform_3(%arg0: i32, %arg1: i32, %arg2: i32) -> (i32, i32) {
    %c0_i32 = arith.constant 0 : i32
    return %arg0, %arg1 : i32, i32
  }
}

module attributes {stable_mosaic.version = 11 : i64} {
  func.func @_mm_kernel(%arg0: i32, %arg1: i32, %arg2: i32, %arg3: memref<64x128xbf16, #tpu.memory_space<vmem>>, %arg4: memref<128x64xbf16, #tpu.memory_space<vmem>>, %arg5: memref<1x64xf32, #tpu.memory_space<vmem>>, %arg6: memref<64x64xf32, #tpu.memory_space<vmem>>) attributes {dimension_semantics = [#tpu.dimension_semantics<parallel>, #tpu.dimension_semantics<parallel>, #tpu.dimension_semantics<arbitrary>], iteration_bounds = array<i64: 2, 1, 5>, scalar_prefetch = 0 : i64, scratch_operands = 0 : i64, tpu.core_type = #tpu.core_type<tc>, window_params = [{transform_indices = @transform_0, window_bounds = array<i64: 64, 128>}, {transform_indices = @transform_1, window_bounds = array<i64: 128, 64>}, {transform_indices = @transform_2, window_bounds = array<i64: 1, 64>}, {transform_indices = @transform_3, window_bounds = array<i64: 64, 64>}]} {
    %c0_i32 = arith.constant 0 : i32
    %0 = arith.cmpi eq, %arg2, %c0_i32 : i32
    %1 = arith.extui %0 : i1 to i32
    %c0_i32_0 = arith.constant 0 : i32
    %2 = arith.cmpi ne, %1, %c0_i32_0 : i32
    scf.if %2 {
      %cst_9 = arith.constant 0.000000e+00 : f32
      %12 = vector.broadcast %cst_9 : f32 to vector<64x64xf32>
      %c0_10 = arith.constant 0 : index
      %c0_11 = arith.constant 0 : index
      %13 = vector.load %arg6[%c0_10, %c0_11] : memref<64x64xf32, #tpu.memory_space<vmem>>, vector<64x64xf32>
      tpu.vector_store %arg6[%c0_10, %c0_11], %12 {strides = array<i32>} : memref<64x64xf32, #tpu.memory_space<vmem>>, vector<64x64xf32>,
    } else {
    }
    %c0 = arith.constant 0 : index
    %c0_1 = arith.constant 0 : index
    %3 = vector.load %arg6[%c0, %c0_1] : memref<64x64xf32, #tpu.memory_space<vmem>>, vector<64x64xf32>
    %c0_2 = arith.constant 0 : index
    %c0_3 = arith.constant 0 : index
    %4 = vector.load %arg3[%c0_2, %c0_3] : memref<64x128xbf16, #tpu.memory_space<vmem>>, vector<64x128xbf16>
    %c0_4 = arith.constant 0 : index
    %c0_5 = arith.constant 0 : index
    %5 = vector.load %arg4[%c0_4, %c0_5] : memref<128x64xbf16, #tpu.memory_space<vmem>>, vector<128x64xbf16>
    %cst = arith.constant dense<0.000000e+00> : vector<64x64xf32>
    %6 = tpu.matmul %4, %5, %cst {dimension_numbers = #tpu.dot_dimension_numbers<[1], [0], [0], [1], [0, 0, 1, 1], [], []>} : vector<64x128xbf16>, vector<128x64xbf16>, vector<64x64xf32> -> vector<64x64xf32>
    %7 = arith.addf %3, %6 : vector<64x64xf32>
    %c0_6 = arith.constant 0 : index
    %c0_7 = arith.constant 0 : index
    %8 = vector.load %arg6[%c0_6, %c0_7] : memref<64x64xf32, #tpu.memory_space<vmem>>, vector<64x64xf32>
    tpu.vector_store %arg6[%c0_6, %c0_7], %7 {strides = array<i32>} : memref<64x64xf32, #tpu.memory_space<vmem>>, vector<64x64xf32>,
    %c4_i32 = arith.constant 4 : i32
    %9 = arith.cmpi eq, %arg2, %c4_i32 : i32
    %10 = arith.extui %9 : i1 to i32
    %c0_i32_8 = arith.constant 0 : i32
    %11 = arith.cmpi ne, %10, %c0_i32_8 : i32
    scf.if %11 {
      %c0_9 = arith.constant 0 : index
      %c0_10 = arith.constant 0 : index
      %12 = vector.load %arg6[%c0_9, %c0_10] : memref<64x64xf32, #tpu.memory_space<vmem>>, vector<64x64xf32>
      %c0_11 = arith.constant 0 : index
      %c0_12 = arith.constant 0 : index
      %13 = vector.load %arg5[%c0_11, %c0_12] : memref<1x64xf32, #tpu.memory_space<vmem>>, vector<1x64xf32>
      %14 = vector.broadcast %13 : vector<1x64xf32> to vector<64x64xf32>
      %15 = arith.addf %12, %14 : vector<64x64xf32>
      %cst_13 = arith.constant 0.000000e+00 : f32
      %16 = vector.broadcast %cst_13 : f32 to vector<64x64xf32>
      %17 = arith.maximumf %15, %16 : vector<64x64xf32>
      %c0_14 = arith.constant 0 : index
      %c0_15 = arith.constant 0 : index
      %18 = vector.load %arg6[%c0_14, %c0_15] : memref<64x64xf32, #tpu.memory_space<vmem>>, vector<64x64xf32>
      tpu.vector_store %arg6[%c0_14, %c0_15], %17 {strides = array<i32>} : memref<64x64xf32, #tpu.memory_space<vmem>>, vector<64x64xf32>,
    } else {
    }
    return
  }
  func.func @transform_0(%arg0: i32, %arg1: i32, %arg2: i32) -> (i32, i32) {
    %c0_i32 = arith.constant 0 : i32
    return %arg0, %arg2 : i32, i32
  }
  func.func @transform_1(%arg0: i32, %arg1: i32, %arg2: i32) -> (i32, i32) {
    %c0_i32 = arith.constant 0 : i32
    return %arg2, %arg1 : i32, i32
  }
  func.func @transform_2(%arg0: i32, %arg1: i32, %arg2: i32) -> (i32, i32) {
    %c0_i32 = arith.constant 0 : i32
    %c0_i32_0 = arith.constant 0 : i32
    return %c0_i32, %arg1 : i32, i32
  }
  func.func @transform_3(%arg0: i32, %arg1: i32, %arg2: i32) -> (i32, i32) {
    %c0_i32 = arith.constant 0 : i32
    return %arg0, %arg1 : i32, i32
  }
}

module attributes {stable_mosaic.version = 11 : i64} {
  func.func @_mm_kernel(%arg0: i32, %arg1: i32, %arg2: i32, %arg3: memref<64x128xbf16, #tpu.memory_space<vmem>>, %arg4: memref<128x64xbf16, #tpu.memory_space<vmem>>, %arg5: memref<1x64xf32, #tpu.memory_space<vmem>>, %arg6: memref<64x64xf32, #tpu.memory_space<vmem>>, %arg7: memref<64x64xf32, #tpu.memory_space<vmem>>) attributes {dimension_semantics = [#tpu.dimension_semantics<parallel>, #tpu.dimension_semantics<parallel>, #tpu.dimension_semantics<arbitrary>], iteration_bounds = array<i64: 2, 1, 5>, scalar_prefetch = 0 : i64, scratch_operands = 0 : i64, tpu.core_type = #tpu.core_type<tc>, window_params = [{transform_indices = @transform_0, window_bounds = array<i64: 64, 128>}, {transform_indices = @transform_1, window_bounds = array<i64: 128, 64>}, {transform_indices = @transform_2, window_bounds = array<i64: 1, 64>}, {transform_indices = @transform_3, window_bounds = array<i64: 64, 64>}, {transform_indices = @transform_4, window_bounds = array<i64: 64, 64>}]} {
    %c0_i32 = arith.constant 0 : i32
    %0 = arith.cmpi eq, %arg2, %c0_i32 : i32
    %1 = arith.extui %0 : i1 to i32
    %c0_i32_0 = arith.constant 0 : i32
    %2 = arith.cmpi ne, %1, %c0_i32_0 : i32
    scf.if %2 {
      %cst_9 = arith.constant 0.000000e+00 : f32
      %12 = vector.broadcast %cst_9 : f32 to vector<64x64xf32>
      %c0_10 = arith.constant 0 : index
      %c0_11 = arith.constant 0 : index
      %13 = vector.load %arg7[%c0_10, %c0_11] : memref<64x64xf32, #tpu.memory_space<vmem>>, vector<64x64xf32>
      tpu.vector_store %arg7[%c0_10, %c0_11], %12 {strides = array<i32>} : memref<64x64xf32, #tpu.memory_space<vmem>>, vector<64x64xf32>,
    } else {
    }
    %c0 = arith.constant 0 : index
    %c0_1 = arith.constant 0 : index
    %3 = vector.load %arg7[%c0, %c0_1] : memref<64x64xf32, #tpu.memory_space<vmem>>, vector<64x64xf32>
    %c0_2 = arith.constant 0 : index
    %c0_3 = arith.constant 0 : index
    %4 = vector.load %arg3[%c0_2, %c0_3] : memref<64x128xbf16, #tpu.memory_space<vmem>>, vector<64x128xbf16>
    %c0_4 = arith.constant 0 : index
    %c0_5 = arith.constant 0 : index
    %5 = vector.load %arg4[%c0_4, %c0_5] : memref<128x64xbf16, #tpu.memory_space<vmem>>, vector<128x64xbf16>
    %cst = arith.constant dense<0.000000e+00> : vector<64x64xf32>
    %6 = tpu.matmul %4, %5, %cst {dimension_numbers = #tpu.dot_dimension_numbers<[1], [0], [0], [1], [0, 0, 1, 1], [], []>} : vector<64x128xbf16>, vector<128x64xbf16>, vector<64x64xf32> -> vector<64x64xf32>
    %7 = arith.addf %3, %6 : vector<64x64xf32>
    %c0_6 = arith.constant 0 : index
    %c0_7 = arith.constant 0 : index
    %8 = vector.load %arg7[%c0_6, %c0_7] : memref<64x64xf32, #tpu.memory_space<vmem>>, vector<64x64xf32>
    tpu.vector_store %arg7[%c0_6, %c0_7], %7 {strides = array<i32>} : memref<64x64xf32, #tpu.memory_space<vmem>>, vector<64x64xf32>,
    %c4_i32 = arith.constant 4 : i32
    %9 = arith.cmpi eq, %arg2, %c4_i32 : i32
    %10 = arith.extui %9 : i1 to i32
    %c0_i32_8 = arith.constant 0 : i32
    %11 = arith.cmpi ne, %10, %c0_i32_8 : i32
    scf.if %11 {
      %c0_9 = arith.constant 0 : index
      %c0_10 = arith.constant 0 : index
      %12 = vector.load %arg7[%c0_9, %c0_10] : memref<64x64xf32, #tpu.memory_space<vmem>>, vector<64x64xf32>
      %c0_11 = arith.constant 0 : index
      %c0_12 = arith.constant 0 : index
      %13 = vector.load %arg5[%c0_11, %c0_12] : memref<1x64xf32, #tpu.memory_space<vmem>>, vector<1x64xf32>
      %14 = vector.broadcast %13 : vector<1x64xf32> to vector<64x64xf32>
      %15 = arith.addf %12, %14 : vector<64x64xf32>
      %c0_13 = arith.constant 0 : index
      %c0_14 = arith.constant 0 : index
      %16 = vector.load %arg6[%c0_13, %c0_14] : memref<64x64xf32, #tpu.memory_space<vmem>>, vector<64x64xf32>
      %17 = arith.addf %15, %16 : vector<64x64xf32>
      %cst_15 = arith.constant 0.000000e+00 : f32
      %18 = vector.broadcast %cst_15 : f32 to vector<64x64xf32>
      %19 = arith.maximumf %17, %18 : vector<64x64xf32>
      %c0_16 = arith.constant 0 : index
      %c0_17 = arith.constant 0 : index
      %20 = vector.load %arg7[%c0_16, %c0_17] : memref<64x64xf32, #tpu.memory_space<vmem>>, vector<64x64xf32>
      tpu.vector_store %arg7[%c0_16, %c0_17], %19 {strides = array<i32>} : memref<64x64xf32, #tpu.memory_space<vmem>>, vector<64x64xf32>,
    } else {
    }
    return
  }
  func.func @transform_0(%arg0: i32, %arg1: i32, %arg2: i32) -> (i32, i32) {
    %c0_i32 = arith.constant 0 : i32
    return %arg0, %arg2 : i32, i32
  }
  func.func @transform_1(%arg0: i32, %arg1: i32, %arg2: i32) -> (i32, i32) {
    %c0_i32 = arith.constant 0 : i32
    return %arg2, %arg1 : i32, i32
  }
  func.func @transform_2(%arg0: i32, %arg1: i32, %arg2: i32) -> (i32, i32) {
    %c0_i32 = arith.constant 0 : i32
    %c0_i32_0 = arith.constant 0 : i32
    return %c0_i32, %arg1 : i32, i32
  }
  func.func @transform_3(%arg0: i32, %arg1: i32, %arg2: i32) -> (i32, i32) {
    %c0_i32 = arith.constant 0 : i32
    return %arg0, %arg1 : i32, i32
  }
  func.func @transform_4(%arg0: i32, %arg1: i32, %arg2: i32) -> (i32, i32) {
    %c0_i32 = arith.constant 0 : i32
    return %arg0, %arg1 : i32, i32
  }
}

module attributes {stable_mosaic.version = 11 : i64} {
  func.func @_mm_kernel(%arg0: i32, %arg1: i32, %arg2: i32, %arg3: memref<64x128xbf16, #tpu.memory_space<vmem>>, %arg4: memref<128x64xbf16, #tpu.memory_space<vmem>>, %arg5: memref<1x64xf32, #tpu.memory_space<vmem>>, %arg6: memref<64x64xf32, #tpu.memory_space<vmem>>) attributes {dimension_semantics = [#tpu.dimension_semantics<parallel>, #tpu.dimension_semantics<parallel>, #tpu.dimension_semantics<arbitrary>], iteration_bounds = array<i64: 2, 1, 5>, scalar_prefetch = 0 : i64, scratch_operands = 0 : i64, tpu.core_type = #tpu.core_type<tc>, window_params = [{transform_indices = @transform_0, window_bounds = array<i64: 64, 128>}, {transform_indices = @transform_1, window_bounds = array<i64: 128, 64>}, {transform_indices = @transform_2, window_bounds = array<i64: 1, 64>}, {transform_indices = @transform_3, window_bounds = array<i64: 64, 64>}]} {
    %c0_i32 = arith.constant 0 : i32
    %0 = arith.cmpi eq, %arg2, %c0_i32 : i32
    %1 = arith.extui %0 : i1 to i32
    %c0_i32_0 = arith.constant 0 : i32
    %2 = arith.cmpi ne, %1, %c0_i32_0 : i32
    scf.if %2 {
      %cst_9 = arith.constant 0.000000e+00 : f32
      %12 = vector.broadcast %cst_9 : f32 to vector<64x64xf32>
      %c0_10 = arith.constant 0 : index
      %c0_11 = arith.constant 0 : index
      %13 = vector.load %arg6[%c0_10, %c0_11] : memref<64x64xf32, #tpu.memory_space<vmem>>, vector<64x64xf32>
      tpu.vector_store %arg6[%c0_10, %c0_11], %12 {strides = array<i32>} : memref<64x64xf32, #tpu.memory_space<vmem>>, vector<64x64xf32>,
    } else {
    }
    %c0 = arith.constant 0 : index
    %c0_1 = arith.constant 0 : index
    %3 = vector.load %arg6[%c0, %c0_1] : memref<64x64xf32, #tpu.memory_space<vmem>>, vector<64x64xf32>
    %c0_2 = arith.constant 0 : index
    %c0_3 = arith.constant 0 : index
    %4 = vector.load %arg3[%c0_2, %c0_3] : memref<64x128xbf16, #tpu.memory_space<vmem>>, vector<64x128xbf16>
    %c0_4 = arith.constant 0 : index
    %c0_5 = arith.constant 0 : index
    %5 = vector.load %arg4[%c0_4, %c0_5] : memref<128x64xbf16, #tpu.memory_space<vmem>>, vector<128x64xbf16>
    %cst = arith.constant dense<0.000000e+00> : vector<64x64xf32>
    %6 = tpu.matmul %4, %5, %cst {dimension_numbers = #tpu.dot_dimension_numbers<[1], [0], [0], [1], [0, 0, 1, 1], [], []>} : vector<64x128xbf16>, vector<128x64xbf16>, vector<64x64xf32> -> vector<64x64xf32>
    %7 = arith.addf %3, %6 : vector<64x64xf32>
    %c0_6 = arith.constant 0 : index
    %c0_7 = arith.constant 0 : index
    %8 = vector.load %arg6[%c0_6, %c0_7] : memref<64x64xf32, #tpu.memory_space<vmem>>, vector<64x64xf32>
    tpu.vector_store %arg6[%c0_6, %c0_7], %7 {strides = array<i32>} : memref<64x64xf32, #tpu.memory_space<vmem>>, vector<64x64xf32>,
    %c4_i32 = arith.constant 4 : i32
    %9 = arith.cmpi eq, %arg2, %c4_i32 : i32
    %10 = arith.extui %9 : i1 to i32
    %c0_i32_8 = arith.constant 0 : i32
    %11 = arith.cmpi ne, %10, %c0_i32_8 : i32
    scf.if %11 {
      %c0_9 = arith.constant 0 : index
      %c0_10 = arith.constant 0 : index
      %12 = vector.load %arg6[%c0_9, %c0_10] : memref<64x64xf32, #tpu.memory_space<vmem>>, vector<64x64xf32>
      %c0_11 = arith.constant 0 : index
      %c0_12 = arith.constant 0 : index
      %13 = vector.load %arg5[%c0_11, %c0_12] : memref<1x64xf32, #tpu.memory_space<vmem>>, vector<1x64xf32>
      %14 = vector.broadcast %13 : vector<1x64xf32> to vector<64x64xf32>
      %15 = arith.addf %12, %14 : vector<64x64xf32>
      %cst_13 = arith.constant 0.000000e+00 : f32
      %16 = vector.broadcast %cst_13 : f32 to vector<64x64xf32>
      %17 = arith.maximumf %15, %16 : vector<64x64xf32>
      %c0_14 = arith.constant 0 : index
      %c0_15 = arith.constant 0 : index
      %18 = vector.load %arg6[%c0_14, %c0_15] : memref<64x64xf32, #tpu.memory_space<vmem>>, vector<64x64xf32>
      tpu.vector_store %arg6[%c0_14, %c0_15], %17 {strides = array<i32>} : memref<64x64xf32, #tpu.memory_space<vmem>>, vector<64x64xf32>,
    } else {
    }
    return
  }
  func.func @transform_0(%arg0: i32, %arg1: i32, %arg2: i32) -> (i32, i32) {
    %c0_i32 = arith.constant 0 : i32
    return %arg0, %arg2 : i32, i32
  }
  func.func @transform_1(%arg0: i32, %arg1: i32, %arg2: i32) -> (i32, i32) {
    %c0_i32 = arith.constant 0 : i32
    return %arg2, %arg1 : i32, i32
  }
  func.func @transform_2(%arg0: i32, %arg1: i32, %arg2: i32) -> (i32, i32) {
    %c0_i32 = arith.constant 0 : i32
    %c0_i32_0 = arith.constant 0 : i32
    return %c0_i32, %arg1 : i32, i32
  }
  func.func @transform_3(%arg0: i32, %arg1: i32, %arg2: i32) -> (i32, i32) {
    %c0_i32 = arith.constant 0 : i32
    return %arg0, %arg1 : i32, i32
  }
}

module attributes {stable_mosaic.version = 11 : i64} {
  func.func @_mm_kernel(%arg0: i32, %arg1: i32, %arg2: i32, %arg3: memref<64x128xbf16, #tpu.memory_space<vmem>>, %arg4: memref<128x64xbf16, #tpu.memory_space<vmem>>, %arg5: memref<1x64xf32, #tpu.memory_space<vmem>>, %arg6: memref<64x64xf32, #tpu.memory_space<vmem>>, %arg7: memref<64x64xf32, #tpu.memory_space<vmem>>) attributes {dimension_semantics = [#tpu.dimension_semantics<parallel>, #tpu.dimension_semantics<parallel>, #tpu.dimension_semantics<arbitrary>], iteration_bounds = array<i64: 2, 1, 5>, scalar_prefetch = 0 : i64, scratch_operands = 0 : i64, tpu.core_type = #tpu.core_type<tc>, window_params = [{transform_indices = @transform_0, window_bounds = array<i64: 64, 128>}, {transform_indices = @transform_1, window_bounds = array<i64: 128, 64>}, {transform_indices = @transform_2, window_bounds = array<i64: 1, 64>}, {transform_indices = @transform_3, window_bounds = array<i64: 64, 64>}, {transform_indices = @transform_4, window_bounds = array<i64: 64, 64>}]} {
    %c0_i32 = arith.constant 0 : i32
    %0 = arith.cmpi eq, %arg2, %c0_i32 : i32
    %1 = arith.extui %0 : i1 to i32
    %c0_i32_0 = arith.constant 0 : i32
    %2 = arith.cmpi ne, %1, %c0_i32_0 : i32
    scf.if %2 {
      %cst_9 = arith.constant 0.000000e+00 : f32
      %12 = vector.broadcast %cst_9 : f32 to vector<64x64xf32>
      %c0_10 = arith.constant 0 : index
      %c0_11 = arith.constant 0 : index
      %13 = vector.load %arg7[%c0_10, %c0_11] : memref<64x64xf32, #tpu.memory_space<vmem>>, vector<64x64xf32>
      tpu.vector_store %arg7[%c0_10, %c0_11], %12 {strides = array<i32>} : memref<64x64xf32, #tpu.memory_space<vmem>>, vector<64x64xf32>,
    } else {
    }
    %c0 = arith.constant 0 : index
    %c0_1 = arith.constant 0 : index
    %3 = vector.load %arg7[%c0, %c0_1] : memref<64x64xf32, #tpu.memory_space<vmem>>, vector<64x64xf32>
    %c0_2 = arith.constant 0 : index
    %c0_3 = arith.constant 0 : index
    %4 = vector.load %arg3[%c0_2, %c0_3] : memref<64x128xbf16, #tpu.memory_space<vmem>>, vector<64x128xbf16>
    %c0_4 = arith.constant 0 : index
    %c0_5 = arith.constant 0 : index
    %5 = vector.load %arg4[%c0_4, %c0_5] : memref<128x64xbf16, #tpu.memory_space<vmem>>, vector<128x64xbf16>
    %cst = arith.constant dense<0.000000e+00> : vector<64x64xf32>
    %6 = tpu.matmul %4, %5, %cst {dimension_numbers = #tpu.dot_dimension_numbers<[1], [0], [0], [1], [0, 0, 1, 1], [], []>} : vector<64x128xbf16>, vector<128x64xbf16>, vector<64x64xf32> -> vector<64x64xf32>
    %7 = arith.addf %3, %6 : vector<64x64xf32>
    %c0_6 = arith.constant 0 : index
    %c0_7 = arith.constant 0 : index
    %8 = vector.load %arg7[%c0_6, %c0_7] : memref<64x64xf32, #tpu.memory_space<vmem>>, vector<64x64xf32>
    tpu.vector_store %arg7[%c0_6, %c0_7], %7 {strides = array<i32>} : memref<64x64xf32, #tpu.memory_space<vmem>>, vector<64x64xf32>,
    %c4_i32 = arith.constant 4 : i32
    %9 = arith.cmpi eq, %arg2, %c4_i32 : i32
    %10 = arith.extui %9 : i1 to i32
    %c0_i32_8 = arith.constant 0 : i32
    %11 = arith.cmpi ne, %10, %c0_i32_8 : i32
    scf.if %11 {
      %c0_9 = arith.constant 0 : index
      %c0_10 = arith.constant 0 : index
      %12 = vector.load %arg7[%c0_9, %c0_10] : memref<64x64xf32, #tpu.memory_space<vmem>>, vector<64x64xf32>
      %c0_11 = arith.constant 0 : index
      %c0_12 = arith.constant 0 : index
      %13 = vector.load %arg5[%c0_11, %c0_12] : memref<1x64xf32, #tpu.memory_space<vmem>>, vector<1x64xf32>
      %14 = vector.broadcast %13 : vector<1x64xf32> to vector<64x64xf32>
      %15 = arith.addf %12, %14 : vector<64x64xf32>
      %c0_13 = arith.constant 0 : index
      %c0_14 = arith.constant 0 : index
      %16 = vector.load %arg6[%c0_13, %c0_14] : memref<64x64xf32, #tpu.memory_space<vmem>>, vector<64x64xf32>
      %17 = arith.addf %15, %16 : vector<64x64xf32>
      %cst_15 = arith.constant 0.000000e+00 : f32
      %18 = vector.broadcast %cst_15 : f32 to vector<64x64xf32>
      %19 = arith.maximumf %17, %18 : vector<64x64xf32>
      %c0_16 = arith.constant 0 : index
      %c0_17 = arith.constant 0 : index
      %20 = vector.load %arg7[%c0_16, %c0_17] : memref<64x64xf32, #tpu.memory_space<vmem>>, vector<64x64xf32>
      tpu.vector_store %arg7[%c0_16, %c0_17], %19 {strides = array<i32>} : memref<64x64xf32, #tpu.memory_space<vmem>>, vector<64x64xf32>,
    } else {
    }
    return
  }
  func.func @transform_0(%arg0: i32, %arg1: i32, %arg2: i32) -> (i32, i32) {
    %c0_i32 = arith.constant 0 : i32
    return %arg0, %arg2 : i32, i32
  }
  func.func @transform_1(%arg0: i32, %arg1: i32, %arg2: i32) -> (i32, i32) {
    %c0_i32 = arith.constant 0 : i32
    return %arg2, %arg1 : i32, i32
  }
  func.func @transform_2(%arg0: i32, %arg1: i32, %arg2: i32) -> (i32, i32) {
    %c0_i32 = arith.constant 0 : i32
    %c0_i32_0 = arith.constant 0 : i32
    return %c0_i32, %arg1 : i32, i32
  }
  func.func @transform_3(%arg0: i32, %arg1: i32, %arg2: i32) -> (i32, i32) {
    %c0_i32 = arith.constant 0 : i32
    return %arg0, %arg1 : i32, i32
  }
  func.func @transform_4(%arg0: i32, %arg1: i32, %arg2: i32) -> (i32, i32) {
    %c0_i32 = arith.constant 0 : i32
    return %arg0, %arg1 : i32, i32
  }
}

module attributes {stable_mosaic.version = 11 : i64} {
  func.func @_mm_kernel(%arg0: i32, %arg1: i32, %arg2: i32, %arg3: memref<16x128xbf16, #tpu.memory_space<vmem>>, %arg4: memref<128x128xbf16, #tpu.memory_space<vmem>>, %arg5: memref<1x128xf32, #tpu.memory_space<vmem>>, %arg6: memref<16x128xf32, #tpu.memory_space<vmem>>) attributes {dimension_semantics = [#tpu.dimension_semantics<parallel>, #tpu.dimension_semantics<parallel>, #tpu.dimension_semantics<arbitrary>], iteration_bounds = array<i64: 2, 1, 5>, scalar_prefetch = 0 : i64, scratch_operands = 0 : i64, tpu.core_type = #tpu.core_type<tc>, window_params = [{transform_indices = @transform_0, window_bounds = array<i64: 16, 128>}, {transform_indices = @transform_1, window_bounds = array<i64: 128, 128>}, {transform_indices = @transform_2, window_bounds = array<i64: 1, 128>}, {transform_indices = @transform_3, window_bounds = array<i64: 16, 128>}]} {
    %c0_i32 = arith.constant 0 : i32
    %0 = arith.cmpi eq, %arg2, %c0_i32 : i32
    %1 = arith.extui %0 : i1 to i32
    %c0_i32_0 = arith.constant 0 : i32
    %2 = arith.cmpi ne, %1, %c0_i32_0 : i32
    scf.if %2 {
      %cst_9 = arith.constant 0.000000e+00 : f32
      %12 = vector.broadcast %cst_9 : f32 to vector<16x128xf32>
      %c0_10 = arith.constant 0 : index
      %c0_11 = arith.constant 0 : index
      %13 = vector.load %arg6[%c0_10, %c0_11] : memref<16x128xf32, #tpu.memory_space<vmem>>, vector<16x128xf32>
      tpu.vector_store %arg6[%c0_10, %c0_11], %12 {strides = array<i32>} : memref<16x128xf32, #tpu.memory_space<vmem>>, vector<16x128xf32>,
    } else {
    }
    %c0 = arith.constant 0 : index
    %c0_1 = arith.constant 0 : index
    %3 = vector.load %arg6[%c0, %c0_1] : memref<16x128xf32, #tpu.memory_space<vmem>>, vector<16x128xf32>
    %c0_2 = arith.constant 0 : index
    %c0_3 = arith.constant 0 : index
    %4 = vector.load %arg3[%c0_2, %c0_3] : memref<16x128xbf16, #tpu.memory_space<vmem>>, vector<16x128xbf16>
    %c0_4 = arith.constant 0 : index
    %c0_5 = arith.constant 0 : index
    %5 = vector.load %arg4[%c0_4, %c0_5] : memref<128x128xbf16, #tpu.memory_space<vmem>>, vector<128x128xbf16>
    %cst = arith.constant dense<0.000000e+00> : vector<16x128xf32>
    %6 = tpu.matmul %4, %5, %cst {dimension_numbers = #tpu.dot_dimension_numbers<[1], [0], [0], [1], [0, 0, 1, 1], [], []>} : vector<16x128xbf16>, vector<128x128xbf16>, vector<16x128xf32> -> vector<16x128xf32>
    %7 = arith.addf %3, %6 : vector<16x128xf32>
    %c0_6 = arith.constant 0 : index
    %c0_7 = arith.constant 0 : index
    %8 = vector.load %arg6[%c0_6, %c0_7] : memref<16x128xf32, #tpu.memory_space<vmem>>, vector<16x128xf32>
    tpu.vector_store %arg6[%c0_6, %c0_7], %7 {strides = array<i32>} : memref<16x128xf32, #tpu.memory_space<vmem>>, vector<16x128xf32>,
    %c4_i32 = arith.constant 4 : i32
    %9 = arith.cmpi eq, %arg2, %c4_i32 : i32
    %10 = arith.extui %9 : i1 to i32
    %c0_i32_8 = arith.constant 0 : i32
    %11 = arith.cmpi ne, %10, %c0_i32_8 : i32
    scf.if %11 {
      %c0_9 = arith.constant 0 : index
      %c0_10 = arith.constant 0 : index
      %12 = vector.load %arg6[%c0_9, %c0_10] : memref<16x128xf32, #tpu.memory_space<vmem>>, vector<16x128xf32>
      %c0_11 = arith.constant 0 : index
      %c0_12 = arith.constant 0 : index
      %13 = vector.load %arg5[%c0_11, %c0_12] : memref<1x128xf32, #tpu.memory_space<vmem>>, vector<1x128xf32>
      %14 = vector.broadcast %13 : vector<1x128xf32> to vector<16x128xf32>
      %15 = arith.addf %12, %14 : vector<16x128xf32>
      %cst_13 = arith.constant 0.000000e+00 : f32
      %16 = vector.broadcast %cst_13 : f32 to vector<16x128xf32>
      %17 = arith.maximumf %15, %16 : vector<16x128xf32>
      %c0_14 = arith.constant 0 : index
      %c0_15 = arith.constant 0 : index
      %18 = vector.load %arg6[%c0_14, %c0_15] : memref<16x128xf32, #tpu.memory_space<vmem>>, vector<16x128xf32>
      tpu.vector_store %arg6[%c0_14, %c0_15], %17 {strides = array<i32>} : memref<16x128xf32, #tpu.memory_space<vmem>>, vector<16x128xf32>,
    } else {
    }
    return
  }
  func.func @transform_0(%arg0: i32, %arg1: i32, %arg2: i32) -> (i32, i32) {
    %c0_i32 = arith.constant 0 : i32
    return %arg0, %arg2 : i32, i32
  }
  func.func @transform_1(%arg0: i32, %arg1: i32, %arg2: i32) -> (i32, i32) {
    %c0_i32 = arith.constant 0 : i32
    return %arg2, %arg1 : i32, i32
  }
  func.func @transform_2(%arg0: i32, %arg1: i32, %arg2: i32) -> (i32, i32) {
    %c0_i32 = arith.constant 0 : i32
    %c0_i32_0 = arith.constant 0 : i32
    return %c0_i32, %arg1 : i32, i32
  }
  func.func @transform_3(%arg0: i32, %arg1: i32, %arg2: i32) -> (i32, i32) {
    %c0_i32 = arith.constant 0 : i32
    return %arg0, %arg1 : i32, i32
  }
}

module attributes {stable_mosaic.version = 11 : i64} {
  func.func @_mm_kernel(%arg0: i32, %arg1: i32, %arg2: i32, %arg3: memref<16x64xbf16, #tpu.memory_space<vmem>>, %arg4: memref<64x128xbf16, #tpu.memory_space<vmem>>, %arg5: memref<1x128xf32, #tpu.memory_space<vmem>>, %arg6: memref<16x128xf32, #tpu.memory_space<vmem>>) attributes {dimension_semantics = [#tpu.dimension_semantics<parallel>, #tpu.dimension_semantics<parallel>, #tpu.dimension_semantics<arbitrary>], iteration_bounds = array<i64: 2, 1, 1>, scalar_prefetch = 0 : i64, scratch_operands = 0 : i64, tpu.core_type = #tpu.core_type<tc>, window_params = [{transform_indices = @transform_0, window_bounds = array<i64: 16, 64>}, {transform_indices = @transform_1, window_bounds = array<i64: 64, 128>}, {transform_indices = @transform_2, window_bounds = array<i64: 1, 128>}, {transform_indices = @transform_3, window_bounds = array<i64: 16, 128>}]} {
    %c0_i32 = arith.constant 0 : i32
    %0 = arith.cmpi eq, %arg2, %c0_i32 : i32
    %1 = arith.extui %0 : i1 to i32
    %c0_i32_0 = arith.constant 0 : i32
    %2 = arith.cmpi ne, %1, %c0_i32_0 : i32
    scf.if %2 {
      %cst_10 = arith.constant 0.000000e+00 : f32
      %12 = vector.broadcast %cst_10 : f32 to vector<16x128xf32>
      %c0_11 = arith.constant 0 : index
      %c0_12 = arith.constant 0 : index
      %13 = vector.load %arg6[%c0_11, %c0_12] : memref<16x128xf32, #tpu.memory_space<vmem>>, vector<16x128xf32>
      tpu.vector_store %arg6[%c0_11, %c0_12], %12 {strides = array<i32>} : memref<16x128xf32, #tpu.memory_space<vmem>>, vector<16x128xf32>,
    } else {
    }
    %c0 = arith.constant 0 : index
    %c0_1 = arith.constant 0 : index
    %3 = vector.load %arg6[%c0, %c0_1] : memref<16x128xf32, #tpu.memory_space<vmem>>, vector<16x128xf32>
    %c0_2 = arith.constant 0 : index
    %c0_3 = arith.constant 0 : index
    %4 = vector.load %arg3[%c0_2, %c0_3] : memref<16x64xbf16, #tpu.memory_space<vmem>>, vector<16x64xbf16>
    %c0_4 = arith.constant 0 : index
    %c0_5 = arith.constant 0 : index
    %5 = vector.load %arg4[%c0_4, %c0_5] : memref<64x128xbf16, #tpu.memory_space<vmem>>, vector<64x128xbf16>
    %cst = arith.constant dense<0.000000e+00> : vector<16x128xf32>
    %6 = tpu.matmul %4, %5, %cst {dimension_numbers = #tpu.dot_dimension_numbers<[1], [0], [0], [1], [0, 0, 1, 1], [], []>} : vector<16x64xbf16>, vector<64x128xbf16>, vector<16x128xf32> -> vector<16x128xf32>
    %7 = arith.addf %3, %6 : vector<16x128xf32>
    %c0_6 = arith.constant 0 : index
    %c0_7 = arith.constant 0 : index
    %8 = vector.load %arg6[%c0_6, %c0_7] : memref<16x128xf32, #tpu.memory_space<vmem>>, vector<16x128xf32>
    tpu.vector_store %arg6[%c0_6, %c0_7], %7 {strides = array<i32>} : memref<16x128xf32, #tpu.memory_space<vmem>>, vector<16x128xf32>,
    %c0_i32_8 = arith.constant 0 : i32
    %9 = arith.cmpi eq, %arg2, %c0_i32_8 : i32
    %10 = arith.extui %9 : i1 to i32
    %c0_i32_9 = arith.constant 0 : i32
    %11 = arith.cmpi ne, %10, %c0_i32_9 : i32
    scf.if %11 {
      %c0_10 = arith.constant 0 : index
      %c0_11 = arith.constant 0 : index
      %12 = vector.load %arg6[%c0_10, %c0_11] : memref<16x128xf32, #tpu.memory_space<vmem>>, vector<16x128xf32>
      %c0_12 = arith.constant 0 : index
      %c0_13 = arith.constant 0 : index
      %13 = vector.load %arg5[%c0_12, %c0_13] : memref<1x128xf32, #tpu.memory_space<vmem>>, vector<1x128xf32>
      %14 = vector.broadcast %13 : vector<1x128xf32> to vector<16x128xf32>
      %15 = arith.addf %12, %14 : vector<16x128xf32>
      %c0_14 = arith.constant 0 : index
      %c0_15 = arith.constant 0 : index
      %16 = vector.load %arg6[%c0_14, %c0_15] : memref<16x128xf32, #tpu.memory_space<vmem>>, vector<16x128xf32>
      tpu.vector_store %arg6[%c0_14, %c0_15], %15 {strides = array<i32>} : memref<16x128xf32, #tpu.memory_space<vmem>>, vector<16x128xf32>,
    } else {
    }
    return
  }
  func.func @transform_0(%arg0: i32, %arg1: i32, %arg2: i32) -> (i32, i32) {
    %c0_i32 = arith.constant 0 : i32
    return %arg0, %arg2 : i32, i32
  }
  func.func @transform_1(%arg0: i32, %arg1: i32, %arg2: i32) -> (i32, i32) {
    %c0_i32 = arith.constant 0 : i32
    return %arg2, %arg1 : i32, i32
  }
  func.func @transform_2(%arg0: i32, %arg1: i32, %arg2: i32) -> (i32, i32) {
    %c0_i32 = arith.constant 0 : i32
    %c0_i32_0 = arith.constant 0 : i32
    return %c0_i32, %arg1 : i32, i32
  }
  func.func @transform_3(%arg0: i32, %arg1: i32, %arg2: i32) -> (i32, i32) {
    %c0_i32 = arith.constant 0 : i32
    return %arg0, %arg1 : i32, i32
  }
}

module attributes {stable_mosaic.version = 11 : i64} {
  func.func @_mm_kernel(%arg0: i32, %arg1: i32, %arg2: i32, %arg3: memref<16x128xbf16, #tpu.memory_space<vmem>>, %arg4: memref<128x128xbf16, #tpu.memory_space<vmem>>, %arg5: memref<1x128xf32, #tpu.memory_space<vmem>>, %arg6: memref<16x128xf32, #tpu.memory_space<vmem>>, %arg7: memref<16x128xf32, #tpu.memory_space<vmem>>) attributes {dimension_semantics = [#tpu.dimension_semantics<parallel>, #tpu.dimension_semantics<parallel>, #tpu.dimension_semantics<arbitrary>], iteration_bounds = array<i64: 2, 1, 9>, scalar_prefetch = 0 : i64, scratch_operands = 0 : i64, tpu.core_type = #tpu.core_type<tc>, window_params = [{transform_indices = @transform_0, window_bounds = array<i64: 16, 128>}, {transform_indices = @transform_1, window_bounds = array<i64: 128, 128>}, {transform_indices = @transform_2, window_bounds = array<i64: 1, 128>}, {transform_indices = @transform_3, window_bounds = array<i64: 16, 128>}, {transform_indices = @transform_4, window_bounds = array<i64: 16, 128>}]} {
    %c0_i32 = arith.constant 0 : i32
    %0 = arith.cmpi eq, %arg2, %c0_i32 : i32
    %1 = arith.extui %0 : i1 to i32
    %c0_i32_0 = arith.constant 0 : i32
    %2 = arith.cmpi ne, %1, %c0_i32_0 : i32
    scf.if %2 {
      %cst_9 = arith.constant 0.000000e+00 : f32
      %12 = vector.broadcast %cst_9 : f32 to vector<16x128xf32>
      %c0_10 = arith.constant 0 : index
      %c0_11 = arith.constant 0 : index
      %13 = vector.load %arg7[%c0_10, %c0_11] : memref<16x128xf32, #tpu.memory_space<vmem>>, vector<16x128xf32>
      tpu.vector_store %arg7[%c0_10, %c0_11], %12 {strides = array<i32>} : memref<16x128xf32, #tpu.memory_space<vmem>>, vector<16x128xf32>,
    } else {
    }
    %c0 = arith.constant 0 : index
    %c0_1 = arith.constant 0 : index
    %3 = vector.load %arg7[%c0, %c0_1] : memref<16x128xf32, #tpu.memory_space<vmem>>, vector<16x128xf32>
    %c0_2 = arith.constant 0 : index
    %c0_3 = arith.constant 0 : index
    %4 = vector.load %arg3[%c0_2, %c0_3] : memref<16x128xbf16, #tpu.memory_space<vmem>>, vector<16x128xbf16>
    %c0_4 = arith.constant 0 : index
    %c0_5 = arith.constant 0 : index
    %5 = vector.load %arg4[%c0_4, %c0_5] : memref<128x128xbf16, #tpu.memory_space<vmem>>, vector<128x128xbf16>
    %cst = arith.constant dense<0.000000e+00> : vector<16x128xf32>
    %6 = tpu.matmul %4, %5, %cst {dimension_numbers = #tpu.dot_dimension_numbers<[1], [0], [0], [1], [0, 0, 1, 1], [], []>} : vector<16x128xbf16>, vector<128x128xbf16>, vector<16x128xf32> -> vector<16x128xf32>
    %7 = arith.addf %3, %6 : vector<16x128xf32>
    %c0_6 = arith.constant 0 : index
    %c0_7 = arith.constant 0 : index
    %8 = vector.load %arg7[%c0_6, %c0_7] : memref<16x128xf32, #tpu.memory_space<vmem>>, vector<16x128xf32>
    tpu.vector_store %arg7[%c0_6, %c0_7], %7 {strides = array<i32>} : memref<16x128xf32, #tpu.memory_space<vmem>>, vector<16x128xf32>,
    %c8_i32 = arith.constant 8 : i32
    %9 = arith.cmpi eq, %arg2, %c8_i32 : i32
    %10 = arith.extui %9 : i1 to i32
    %c0_i32_8 = arith.constant 0 : i32
    %11 = arith.cmpi ne, %10, %c0_i32_8 : i32
    scf.if %11 {
      %c0_9 = arith.constant 0 : index
      %c0_10 = arith.constant 0 : index
      %12 = vector.load %arg7[%c0_9, %c0_10] : memref<16x128xf32, #tpu.memory_space<vmem>>, vector<16x128xf32>
      %c0_11 = arith.constant 0 : index
      %c0_12 = arith.constant 0 : index
      %13 = vector.load %arg5[%c0_11, %c0_12] : memref<1x128xf32, #tpu.memory_space<vmem>>, vector<1x128xf32>
      %14 = vector.broadcast %13 : vector<1x128xf32> to vector<16x128xf32>
      %15 = arith.addf %12, %14 : vector<16x128xf32>
      %c0_13 = arith.constant 0 : index
      %c0_14 = arith.constant 0 : index
      %16 = vector.load %arg6[%c0_13, %c0_14] : memref<16x128xf32, #tpu.memory_space<vmem>>, vector<16x128xf32>
      %17 = arith.addf %15, %16 : vector<16x128xf32>
      %cst_15 = arith.constant 0.000000e+00 : f32
      %18 = vector.broadcast %cst_15 : f32 to vector<16x128xf32>
      %19 = arith.maximumf %17, %18 : vector<16x128xf32>
      %c0_16 = arith.constant 0 : index
      %c0_17 = arith.constant 0 : index
      %20 = vector.load %arg7[%c0_16, %c0_17] : memref<16x128xf32, #tpu.memory_space<vmem>>, vector<16x128xf32>
      tpu.vector_store %arg7[%c0_16, %c0_17], %19 {strides = array<i32>} : memref<16x128xf32, #tpu.memory_space<vmem>>, vector<16x128xf32>,
    } else {
    }
    return
  }
  func.func @transform_0(%arg0: i32, %arg1: i32, %arg2: i32) -> (i32, i32) {
    %c0_i32 = arith.constant 0 : i32
    return %arg0, %arg2 : i32, i32
  }
  func.func @transform_1(%arg0: i32, %arg1: i32, %arg2: i32) -> (i32, i32) {
    %c0_i32 = arith.constant 0 : i32
    return %arg2, %arg1 : i32, i32
  }
  func.func @transform_2(%arg0: i32, %arg1: i32, %arg2: i32) -> (i32, i32) {
    %c0_i32 = arith.constant 0 : i32
    %c0_i32_0 = arith.constant 0 : i32
    return %c0_i32, %arg1 : i32, i32
  }
  func.func @transform_3(%arg0: i32, %arg1: i32, %arg2: i32) -> (i32, i32) {
    %c0_i32 = arith.constant 0 : i32
    return %arg0, %arg1 : i32, i32
  }
  func.func @transform_4(%arg0: i32, %arg1: i32, %arg2: i32) -> (i32, i32) {
    %c0_i32 = arith.constant 0 : i32
    return %arg0, %arg1 : i32, i32
  }
}

module attributes {stable_mosaic.version = 11 : i64} {
  func.func @_mm_kernel(%arg0: i32, %arg1: i32, %arg2: i32, %arg3: memref<16x128xbf16, #tpu.memory_space<vmem>>, %arg4: memref<128x128xbf16, #tpu.memory_space<vmem>>, %arg5: memref<1x128xf32, #tpu.memory_space<vmem>>, %arg6: memref<16x128xf32, #tpu.memory_space<vmem>>) attributes {dimension_semantics = [#tpu.dimension_semantics<parallel>, #tpu.dimension_semantics<parallel>, #tpu.dimension_semantics<arbitrary>], iteration_bounds = array<i64: 2, 1, 9>, scalar_prefetch = 0 : i64, scratch_operands = 0 : i64, tpu.core_type = #tpu.core_type<tc>, window_params = [{transform_indices = @transform_0, window_bounds = array<i64: 16, 128>}, {transform_indices = @transform_1, window_bounds = array<i64: 128, 128>}, {transform_indices = @transform_2, window_bounds = array<i64: 1, 128>}, {transform_indices = @transform_3, window_bounds = array<i64: 16, 128>}]} {
    %c0_i32 = arith.constant 0 : i32
    %0 = arith.cmpi eq, %arg2, %c0_i32 : i32
    %1 = arith.extui %0 : i1 to i32
    %c0_i32_0 = arith.constant 0 : i32
    %2 = arith.cmpi ne, %1, %c0_i32_0 : i32
    scf.if %2 {
      %cst_9 = arith.constant 0.000000e+00 : f32
      %12 = vector.broadcast %cst_9 : f32 to vector<16x128xf32>
      %c0_10 = arith.constant 0 : index
      %c0_11 = arith.constant 0 : index
      %13 = vector.load %arg6[%c0_10, %c0_11] : memref<16x128xf32, #tpu.memory_space<vmem>>, vector<16x128xf32>
      tpu.vector_store %arg6[%c0_10, %c0_11], %12 {strides = array<i32>} : memref<16x128xf32, #tpu.memory_space<vmem>>, vector<16x128xf32>,
    } else {
    }
    %c0 = arith.constant 0 : index
    %c0_1 = arith.constant 0 : index
    %3 = vector.load %arg6[%c0, %c0_1] : memref<16x128xf32, #tpu.memory_space<vmem>>, vector<16x128xf32>
    %c0_2 = arith.constant 0 : index
    %c0_3 = arith.constant 0 : index
    %4 = vector.load %arg3[%c0_2, %c0_3] : memref<16x128xbf16, #tpu.memory_space<vmem>>, vector<16x128xbf16>
    %c0_4 = arith.constant 0 : index
    %c0_5 = arith.constant 0 : index
    %5 = vector.load %arg4[%c0_4, %c0_5] : memref<128x128xbf16, #tpu.memory_space<vmem>>, vector<128x128xbf16>
    %cst = arith.constant dense<0.000000e+00> : vector<16x128xf32>
    %6 = tpu.matmul %4, %5, %cst {dimension_numbers = #tpu.dot_dimension_numbers<[1], [0], [0], [1], [0, 0, 1, 1], [], []>} : vector<16x128xbf16>, vector<128x128xbf16>, vector<16x128xf32> -> vector<16x128xf32>
    %7 = arith.addf %3, %6 : vector<16x128xf32>
    %c0_6 = arith.constant 0 : index
    %c0_7 = arith.constant 0 : index
    %8 = vector.load %arg6[%c0_6, %c0_7] : memref<16x128xf32, #tpu.memory_space<vmem>>, vector<16x128xf32>
    tpu.vector_store %arg6[%c0_6, %c0_7], %7 {strides = array<i32>} : memref<16x128xf32, #tpu.memory_space<vmem>>, vector<16x128xf32>,
    %c8_i32 = arith.constant 8 : i32
    %9 = arith.cmpi eq, %arg2, %c8_i32 : i32
    %10 = arith.extui %9 : i1 to i32
    %c0_i32_8 = arith.constant 0 : i32
    %11 = arith.cmpi ne, %10, %c0_i32_8 : i32
    scf.if %11 {
      %c0_9 = arith.constant 0 : index
      %c0_10 = arith.constant 0 : index
      %12 = vector.load %arg6[%c0_9, %c0_10] : memref<16x128xf32, #tpu.memory_space<vmem>>, vector<16x128xf32>
      %c0_11 = arith.constant 0 : index
      %c0_12 = arith.constant 0 : index
      %13 = vector.load %arg5[%c0_11, %c0_12] : memref<1x128xf32, #tpu.memory_space<vmem>>, vector<1x128xf32>
      %14 = vector.broadcast %13 : vector<1x128xf32> to vector<16x128xf32>
      %15 = arith.addf %12, %14 : vector<16x128xf32>
      %cst_13 = arith.constant 0.000000e+00 : f32
      %16 = vector.broadcast %cst_13 : f32 to vector<16x128xf32>
      %17 = arith.maximumf %15, %16 : vector<16x128xf32>
      %c0_14 = arith.constant 0 : index
      %c0_15 = arith.constant 0 : index
      %18 = vector.load %arg6[%c0_14, %c0_15] : memref<16x128xf32, #tpu.memory_space<vmem>>, vector<16x128xf32>
      tpu.vector_store %arg6[%c0_14, %c0_15], %17 {strides = array<i32>} : memref<16x128xf32, #tpu.memory_space<vmem>>, vector<16x128xf32>,
    } else {
    }
    return
  }
  func.func @transform_0(%arg0: i32, %arg1: i32, %arg2: i32) -> (i32, i32) {
    %c0_i32 = arith.constant 0 : i32
    return %arg0, %arg2 : i32, i32
  }
  func.func @transform_1(%arg0: i32, %arg1: i32, %arg2: i32) -> (i32, i32) {
    %c0_i32 = arith.constant 0 : i32
    return %arg2, %arg1 : i32, i32
  }
  func.func @transform_2(%arg0: i32, %arg1: i32, %arg2: i32) -> (i32, i32) {
    %c0_i32 = arith.constant 0 : i32
    %c0_i32_0 = arith.constant 0 : i32
    return %c0_i32, %arg1 : i32, i32
  }
  func.func @transform_3(%arg0: i32, %arg1: i32, %arg2: i32) -> (i32, i32) {
    %c0_i32 = arith.constant 0 : i32
    return %arg0, %arg1 : i32, i32
  }
}

module attributes {stable_mosaic.version = 11 : i64} {
  func.func @_mm_kernel(%arg0: i32, %arg1: i32, %arg2: i32, %arg3: memref<16x128xbf16, #tpu.memory_space<vmem>>, %arg4: memref<128x256xbf16, #tpu.memory_space<vmem>>, %arg5: memref<1x256xf32, #tpu.memory_space<vmem>>, %arg6: memref<16x256xf32, #tpu.memory_space<vmem>>) attributes {dimension_semantics = [#tpu.dimension_semantics<parallel>, #tpu.dimension_semantics<parallel>, #tpu.dimension_semantics<arbitrary>], iteration_bounds = array<i64: 1, 1, 9>, scalar_prefetch = 0 : i64, scratch_operands = 0 : i64, tpu.core_type = #tpu.core_type<tc>, window_params = [{transform_indices = @transform_0, window_bounds = array<i64: 16, 128>}, {transform_indices = @transform_1, window_bounds = array<i64: 128, 256>}, {transform_indices = @transform_2, window_bounds = array<i64: 1, 256>}, {transform_indices = @transform_3, window_bounds = array<i64: 16, 256>}]} {
    %c0_i32 = arith.constant 0 : i32
    %0 = arith.cmpi eq, %arg2, %c0_i32 : i32
    %1 = arith.extui %0 : i1 to i32
    %c0_i32_0 = arith.constant 0 : i32
    %2 = arith.cmpi ne, %1, %c0_i32_0 : i32
    scf.if %2 {
      %cst_9 = arith.constant 0.000000e+00 : f32
      %12 = vector.broadcast %cst_9 : f32 to vector<16x256xf32>
      %c0_10 = arith.constant 0 : index
      %c0_11 = arith.constant 0 : index
      %13 = vector.load %arg6[%c0_10, %c0_11] : memref<16x256xf32, #tpu.memory_space<vmem>>, vector<16x256xf32>
      tpu.vector_store %arg6[%c0_10, %c0_11], %12 {strides = array<i32>} : memref<16x256xf32, #tpu.memory_space<vmem>>, vector<16x256xf32>,
    } else {
    }
    %c0 = arith.constant 0 : index
    %c0_1 = arith.constant 0 : index
    %3 = vector.load %arg6[%c0, %c0_1] : memref<16x256xf32, #tpu.memory_space<vmem>>, vector<16x256xf32>
    %c0_2 = arith.constant 0 : index
    %c0_3 = arith.constant 0 : index
    %4 = vector.load %arg3[%c0_2, %c0_3] : memref<16x128xbf16, #tpu.memory_space<vmem>>, vector<16x128xbf16>
    %c0_4 = arith.constant 0 : index
    %c0_5 = arith.constant 0 : index
    %5 = vector.load %arg4[%c0_4, %c0_5] : memref<128x256xbf16, #tpu.memory_space<vmem>>, vector<128x256xbf16>
    %cst = arith.constant dense<0.000000e+00> : vector<16x256xf32>
    %6 = tpu.matmul %4, %5, %cst {dimension_numbers = #tpu.dot_dimension_numbers<[1], [0], [0], [1], [0, 0, 1, 1], [], []>} : vector<16x128xbf16>, vector<128x256xbf16>, vector<16x256xf32> -> vector<16x256xf32>
    %7 = arith.addf %3, %6 : vector<16x256xf32>
    %c0_6 = arith.constant 0 : index
    %c0_7 = arith.constant 0 : index
    %8 = vector.load %arg6[%c0_6, %c0_7] : memref<16x256xf32, #tpu.memory_space<vmem>>, vector<16x256xf32>
    tpu.vector_store %arg6[%c0_6, %c0_7], %7 {strides = array<i32>} : memref<16x256xf32, #tpu.memory_space<vmem>>, vector<16x256xf32>,
    %c8_i32 = arith.constant 8 : i32
    %9 = arith.cmpi eq, %arg2, %c8_i32 : i32
    %10 = arith.extui %9 : i1 to i32
    %c0_i32_8 = arith.constant 0 : i32
    %11 = arith.cmpi ne, %10, %c0_i32_8 : i32
    scf.if %11 {
      %c0_9 = arith.constant 0 : index
      %c0_10 = arith.constant 0 : index
      %12 = vector.load %arg6[%c0_9, %c0_10] : memref<16x256xf32, #tpu.memory_space<vmem>>, vector<16x256xf32>
      %c0_11 = arith.constant 0 : index
      %c0_12 = arith.constant 0 : index
      %13 = vector.load %arg5[%c0_11, %c0_12] : memref<1x256xf32, #tpu.memory_space<vmem>>, vector<1x256xf32>
      %14 = vector.broadcast %13 : vector<1x256xf32> to vector<16x256xf32>
      %15 = arith.addf %12, %14 : vector<16x256xf32>
      %cst_13 = arith.constant 0.000000e+00 : f32
      %16 = vector.broadcast %cst_13 : f32 to vector<16x256xf32>
      %17 = arith.maximumf %15, %16 : vector<16x256xf32>
      %c0_14 = arith.constant 0 : index
      %c0_15 = arith.constant 0 : index
      %18 = vector.load %arg6[%c0_14, %c0_15] : memref<16x256xf32, #tpu.memory_space<vmem>>, vector<16x256xf32>
      tpu.vector_store %arg6[%c0_14, %c0_15], %17 {strides = array<i32>} : memref<16x256xf32, #tpu.memory_space<vmem>>, vector<16x256xf32>,
    } else {
    }
    return
  }
  func.func @transform_0(%arg0: i32, %arg1: i32, %arg2: i32) -> (i32, i32) {
    %c0_i32 = arith.constant 0 : i32
    return %arg0, %arg2 : i32, i32
  }
  func.func @transform_1(%arg0: i32, %arg1: i32, %arg2: i32) -> (i32, i32) {
    %c0_i32 = arith.constant 0 : i32
    return %arg2, %arg1 : i32, i32
  }
  func.func @transform_2(%arg0: i32, %arg1: i32, %arg2: i32) -> (i32, i32) {
    %c0_i32 = arith.constant 0 : i32
    %c0_i32_0 = arith.constant 0 : i32
    return %c0_i32, %arg1 : i32, i32
  }
  func.func @transform_3(%arg0: i32, %arg1: i32, %arg2: i32) -> (i32, i32) {
    %c0_i32 = arith.constant 0 : i32
    return %arg0, %arg1 : i32, i32
  }
}

module attributes {stable_mosaic.version = 11 : i64} {
  func.func @_mm_kernel(%arg0: i32, %arg1: i32, %arg2: i32, %arg3: memref<16x256xbf16, #tpu.memory_space<vmem>>, %arg4: memref<256x256xbf16, #tpu.memory_space<vmem>>, %arg5: memref<1x256xf32, #tpu.memory_space<vmem>>, %arg6: memref<16x256xf32, #tpu.memory_space<vmem>>) attributes {dimension_semantics = [#tpu.dimension_semantics<parallel>, #tpu.dimension_semantics<parallel>, #tpu.dimension_semantics<arbitrary>], iteration_bounds = array<i64: 1, 1, 9>, scalar_prefetch = 0 : i64, scratch_operands = 0 : i64, tpu.core_type = #tpu.core_type<tc>, window_params = [{transform_indices = @transform_0, window_bounds = array<i64: 16, 256>}, {transform_indices = @transform_1, window_bounds = array<i64: 256, 256>}, {transform_indices = @transform_2, window_bounds = array<i64: 1, 256>}, {transform_indices = @transform_3, window_bounds = array<i64: 16, 256>}]} {
    %c0_i32 = arith.constant 0 : i32
    %0 = arith.cmpi eq, %arg2, %c0_i32 : i32
    %1 = arith.extui %0 : i1 to i32
    %c0_i32_0 = arith.constant 0 : i32
    %2 = arith.cmpi ne, %1, %c0_i32_0 : i32
    scf.if %2 {
      %cst_9 = arith.constant 0.000000e+00 : f32
      %12 = vector.broadcast %cst_9 : f32 to vector<16x256xf32>
      %c0_10 = arith.constant 0 : index
      %c0_11 = arith.constant 0 : index
      %13 = vector.load %arg6[%c0_10, %c0_11] : memref<16x256xf32, #tpu.memory_space<vmem>>, vector<16x256xf32>
      tpu.vector_store %arg6[%c0_10, %c0_11], %12 {strides = array<i32>} : memref<16x256xf32, #tpu.memory_space<vmem>>, vector<16x256xf32>,
    } else {
    }
    %c0 = arith.constant 0 : index
    %c0_1 = arith.constant 0 : index
    %3 = vector.load %arg6[%c0, %c0_1] : memref<16x256xf32, #tpu.memory_space<vmem>>, vector<16x256xf32>
    %c0_2 = arith.constant 0 : index
    %c0_3 = arith.constant 0 : index
    %4 = vector.load %arg3[%c0_2, %c0_3] : memref<16x256xbf16, #tpu.memory_space<vmem>>, vector<16x256xbf16>
    %c0_4 = arith.constant 0 : index
    %c0_5 = arith.constant 0 : index
    %5 = vector.load %arg4[%c0_4, %c0_5] : memref<256x256xbf16, #tpu.memory_space<vmem>>, vector<256x256xbf16>
    %cst = arith.constant dense<0.000000e+00> : vector<16x256xf32>
    %6 = tpu.matmul %4, %5, %cst {dimension_numbers = #tpu.dot_dimension_numbers<[1], [0], [0], [1], [0, 0, 1, 1], [], []>} : vector<16x256xbf16>, vector<256x256xbf16>, vector<16x256xf32> -> vector<16x256xf32>
    %7 = arith.addf %3, %6 : vector<16x256xf32>
    %c0_6 = arith.constant 0 : index
    %c0_7 = arith.constant 0 : index
    %8 = vector.load %arg6[%c0_6, %c0_7] : memref<16x256xf32, #tpu.memory_space<vmem>>, vector<16x256xf32>
    tpu.vector_store %arg6[%c0_6, %c0_7], %7 {strides = array<i32>} : memref<16x256xf32, #tpu.memory_space<vmem>>, vector<16x256xf32>,
    %c8_i32 = arith.constant 8 : i32
    %9 = arith.cmpi eq, %arg2, %c8_i32 : i32
    %10 = arith.extui %9 : i1 to i32
    %c0_i32_8 = arith.constant 0 : i32
    %11 = arith.cmpi ne, %10, %c0_i32_8 : i32
    scf.if %11 {
      %c0_9 = arith.constant 0 : index
      %c0_10 = arith.constant 0 : index
      %12 = vector.load %arg6[%c0_9, %c0_10] : memref<16x256xf32, #tpu.memory_space<vmem>>, vector<16x256xf32>
      %c0_11 = arith.constant 0 : index
      %c0_12 = arith.constant 0 : index
      %13 = vector.load %arg5[%c0_11, %c0_12] : memref<1x256xf32, #tpu.memory_space<vmem>>, vector<1x256xf32>
      %14 = vector.broadcast %13 : vector<1x256xf32> to vector<16x256xf32>
      %15 = arith.addf %12, %14 : vector<16x256xf32>
      %cst_13 = arith.constant 0.000000e+00 : f32
      %16 = vector.broadcast %cst_13 : f32 to vector<16x256xf32>
      %17 = arith.maximumf %15, %16 : vector<16x256xf32>
      %c0_14 = arith.constant 0 : index
      %c0_15 = arith.constant 0 : index
      %18 = vector.load %arg6[%c0_14, %c0_15] : memref<16x256xf32, #tpu.memory_space<vmem>>, vector<16x256xf32>
      tpu.vector_store %arg6[%c0_14, %c0_15], %17 {strides = array<i32>} : memref<16x256xf32, #tpu.memory_space<vmem>>, vector<16x256xf32>,
    } else {
    }
    return
  }
  func.func @transform_0(%arg0: i32, %arg1: i32, %arg2: i32) -> (i32, i32) {
    %c0_i32 = arith.constant 0 : i32
    return %arg0, %arg2 : i32, i32
  }
  func.func @transform_1(%arg0: i32, %arg1: i32, %arg2: i32) -> (i32, i32) {
    %c0_i32 = arith.constant 0 : i32
    return %arg2, %arg1 : i32, i32
  }
  func.func @transform_2(%arg0: i32, %arg1: i32, %arg2: i32) -> (i32, i32) {
    %c0_i32 = arith.constant 0 : i32
    %c0_i32_0 = arith.constant 0 : i32
    return %c0_i32, %arg1 : i32, i32
  }
  func.func @transform_3(%arg0: i32, %arg1: i32, %arg2: i32) -> (i32, i32) {
    %c0_i32 = arith.constant 0 : i32
    return %arg0, %arg1 : i32, i32
  }
}

module attributes {stable_mosaic.version = 11 : i64} {
  func.func @_mm_kernel(%arg0: i32, %arg1: i32, %arg2: i32, %arg3: memref<16x256xbf16, #tpu.memory_space<vmem>>, %arg4: memref<256x256xbf16, #tpu.memory_space<vmem>>, %arg5: memref<1x256xf32, #tpu.memory_space<vmem>>, %arg6: memref<16x256xf32, #tpu.memory_space<vmem>>, %arg7: memref<16x256xf32, #tpu.memory_space<vmem>>) attributes {dimension_semantics = [#tpu.dimension_semantics<parallel>, #tpu.dimension_semantics<parallel>, #tpu.dimension_semantics<arbitrary>], iteration_bounds = array<i64: 1, 1, 9>, scalar_prefetch = 0 : i64, scratch_operands = 0 : i64, tpu.core_type = #tpu.core_type<tc>, window_params = [{transform_indices = @transform_0, window_bounds = array<i64: 16, 256>}, {transform_indices = @transform_1, window_bounds = array<i64: 256, 256>}, {transform_indices = @transform_2, window_bounds = array<i64: 1, 256>}, {transform_indices = @transform_3, window_bounds = array<i64: 16, 256>}, {transform_indices = @transform_4, window_bounds = array<i64: 16, 256>}]} {
    %c0_i32 = arith.constant 0 : i32
    %0 = arith.cmpi eq, %arg2, %c0_i32 : i32
    %1 = arith.extui %0 : i1 to i32
    %c0_i32_0 = arith.constant 0 : i32
    %2 = arith.cmpi ne, %1, %c0_i32_0 : i32
    scf.if %2 {
      %cst_9 = arith.constant 0.000000e+00 : f32
      %12 = vector.broadcast %cst_9 : f32 to vector<16x256xf32>
      %c0_10 = arith.constant 0 : index
      %c0_11 = arith.constant 0 : index
      %13 = vector.load %arg7[%c0_10, %c0_11] : memref<16x256xf32, #tpu.memory_space<vmem>>, vector<16x256xf32>
      tpu.vector_store %arg7[%c0_10, %c0_11], %12 {strides = array<i32>} : memref<16x256xf32, #tpu.memory_space<vmem>>, vector<16x256xf32>,
    } else {
    }
    %c0 = arith.constant 0 : index
    %c0_1 = arith.constant 0 : index
    %3 = vector.load %arg7[%c0, %c0_1] : memref<16x256xf32, #tpu.memory_space<vmem>>, vector<16x256xf32>
    %c0_2 = arith.constant 0 : index
    %c0_3 = arith.constant 0 : index
    %4 = vector.load %arg3[%c0_2, %c0_3] : memref<16x256xbf16, #tpu.memory_space<vmem>>, vector<16x256xbf16>
    %c0_4 = arith.constant 0 : index
    %c0_5 = arith.constant 0 : index
    %5 = vector.load %arg4[%c0_4, %c0_5] : memref<256x256xbf16, #tpu.memory_space<vmem>>, vector<256x256xbf16>
    %cst = arith.constant dense<0.000000e+00> : vector<16x256xf32>
    %6 = tpu.matmul %4, %5, %cst {dimension_numbers = #tpu.dot_dimension_numbers<[1], [0], [0], [1], [0, 0, 1, 1], [], []>} : vector<16x256xbf16>, vector<256x256xbf16>, vector<16x256xf32> -> vector<16x256xf32>
    %7 = arith.addf %3, %6 : vector<16x256xf32>
    %c0_6 = arith.constant 0 : index
    %c0_7 = arith.constant 0 : index
    %8 = vector.load %arg7[%c0_6, %c0_7] : memref<16x256xf32, #tpu.memory_space<vmem>>, vector<16x256xf32>
    tpu.vector_store %arg7[%c0_6, %c0_7], %7 {strides = array<i32>} : memref<16x256xf32, #tpu.memory_space<vmem>>, vector<16x256xf32>,
    %c8_i32 = arith.constant 8 : i32
    %9 = arith.cmpi eq, %arg2, %c8_i32 : i32
    %10 = arith.extui %9 : i1 to i32
    %c0_i32_8 = arith.constant 0 : i32
    %11 = arith.cmpi ne, %10, %c0_i32_8 : i32
    scf.if %11 {
      %c0_9 = arith.constant 0 : index
      %c0_10 = arith.constant 0 : index
      %12 = vector.load %arg7[%c0_9, %c0_10] : memref<16x256xf32, #tpu.memory_space<vmem>>, vector<16x256xf32>
      %c0_11 = arith.constant 0 : index
      %c0_12 = arith.constant 0 : index
      %13 = vector.load %arg5[%c0_11, %c0_12] : memref<1x256xf32, #tpu.memory_space<vmem>>, vector<1x256xf32>
      %14 = vector.broadcast %13 : vector<1x256xf32> to vector<16x256xf32>
      %15 = arith.addf %12, %14 : vector<16x256xf32>
      %c0_13 = arith.constant 0 : index
      %c0_14 = arith.constant 0 : index
      %16 = vector.load %arg6[%c0_13, %c0_14] : memref<16x256xf32, #tpu.memory_space<vmem>>, vector<16x256xf32>
      %17 = arith.addf %15, %16 : vector<16x256xf32>
      %cst_15 = arith.constant 0.000000e+00 : f32
      %18 = vector.broadcast %cst_15 : f32 to vector<16x256xf32>
      %19 = arith.maximumf %17, %18 : vector<16x256xf32>
      %c0_16 = arith.constant 0 : index
      %c0_17 = arith.constant 0 : index
      %20 = vector.load %arg7[%c0_16, %c0_17] : memref<16x256xf32, #tpu.memory_space<vmem>>, vector<16x256xf32>
      tpu.vector_store %arg7[%c0_16, %c0_17], %19 {strides = array<i32>} : memref<16x256xf32, #tpu.memory_space<vmem>>, vector<16x256xf32>,
    } else {
    }
    return
  }
  func.func @transform_0(%arg0: i32, %arg1: i32, %arg2: i32) -> (i32, i32) {
    %c0_i32 = arith.constant 0 : i32
    return %arg0, %arg2 : i32, i32
  }
  func.func @transform_1(%arg0: i32, %arg1: i32, %arg2: i32) -> (i32, i32) {
    %c0_i32 = arith.constant 0 : i32
    return %arg2, %arg1 : i32, i32
  }
  func.func @transform_2(%arg0: i32, %arg1: i32, %arg2: i32) -> (i32, i32) {
    %c0_i32 = arith.constant 0 : i32
    %c0_i32_0 = arith.constant 0 : i32
    return %c0_i32, %arg1 : i32, i32
  }
  func.func @transform_3(%arg0: i32, %arg1: i32, %arg2: i32) -> (i32, i32) {
    %c0_i32 = arith.constant 0 : i32
    return %arg0, %arg1 : i32, i32
  }
  func.func @transform_4(%arg0: i32, %arg1: i32, %arg2: i32) -> (i32, i32) {
    %c0_i32 = arith.constant 0 : i32
    return %arg0, %arg1 : i32, i32
  }
}

module attributes {stable_mosaic.version = 11 : i64} {
  func.func @_mm_kernel(%arg0: i32, %arg1: i32, %arg2: i32, %arg3: memref<16x128xbf16, #tpu.memory_space<vmem>>, %arg4: memref<128x256xbf16, #tpu.memory_space<vmem>>, %arg5: memref<1x256xf32, #tpu.memory_space<vmem>>, %arg6: memref<16x256xf32, #tpu.memory_space<vmem>>) attributes {dimension_semantics = [#tpu.dimension_semantics<parallel>, #tpu.dimension_semantics<parallel>, #tpu.dimension_semantics<arbitrary>], iteration_bounds = array<i64: 1, 1, 1>, scalar_prefetch = 0 : i64, scratch_operands = 0 : i64, tpu.core_type = #tpu.core_type<tc>, window_params = [{transform_indices = @transform_0, window_bounds = array<i64: 16, 128>}, {transform_indices = @transform_1, window_bounds = array<i64: 128, 256>}, {transform_indices = @transform_2, window_bounds = array<i64: 1, 256>}, {transform_indices = @transform_3, window_bounds = array<i64: 16, 256>}]} {
    %c0_i32 = arith.constant 0 : i32
    %0 = arith.cmpi eq, %arg2, %c0_i32 : i32
    %1 = arith.extui %0 : i1 to i32
    %c0_i32_0 = arith.constant 0 : i32
    %2 = arith.cmpi ne, %1, %c0_i32_0 : i32
    scf.if %2 {
      %cst_10 = arith.constant 0.000000e+00 : f32
      %12 = vector.broadcast %cst_10 : f32 to vector<16x256xf32>
      %c0_11 = arith.constant 0 : index
      %c0_12 = arith.constant 0 : index
      %13 = vector.load %arg6[%c0_11, %c0_12] : memref<16x256xf32, #tpu.memory_space<vmem>>, vector<16x256xf32>
      tpu.vector_store %arg6[%c0_11, %c0_12], %12 {strides = array<i32>} : memref<16x256xf32, #tpu.memory_space<vmem>>, vector<16x256xf32>,
    } else {
    }
    %c0 = arith.constant 0 : index
    %c0_1 = arith.constant 0 : index
    %3 = vector.load %arg6[%c0, %c0_1] : memref<16x256xf32, #tpu.memory_space<vmem>>, vector<16x256xf32>
    %c0_2 = arith.constant 0 : index
    %c0_3 = arith.constant 0 : index
    %4 = vector.load %arg3[%c0_2, %c0_3] : memref<16x128xbf16, #tpu.memory_space<vmem>>, vector<16x128xbf16>
    %c0_4 = arith.constant 0 : index
    %c0_5 = arith.constant 0 : index
    %5 = vector.load %arg4[%c0_4, %c0_5] : memref<128x256xbf16, #tpu.memory_space<vmem>>, vector<128x256xbf16>
    %cst = arith.constant dense<0.000000e+00> : vector<16x256xf32>
    %6 = tpu.matmul %4, %5, %cst {dimension_numbers = #tpu.dot_dimension_numbers<[1], [0], [0], [1], [0, 0, 1, 1], [], []>} : vector<16x128xbf16>, vector<128x256xbf16>, vector<16x256xf32> -> vector<16x256xf32>
    %7 = arith.addf %3, %6 : vector<16x256xf32>
    %c0_6 = arith.constant 0 : index
    %c0_7 = arith.constant 0 : index
    %8 = vector.load %arg6[%c0_6, %c0_7] : memref<16x256xf32, #tpu.memory_space<vmem>>, vector<16x256xf32>
    tpu.vector_store %arg6[%c0_6, %c0_7], %7 {strides = array<i32>} : memref<16x256xf32, #tpu.memory_space<vmem>>, vector<16x256xf32>,
    %c0_i32_8 = arith.constant 0 : i32
    %9 = arith.cmpi eq, %arg2, %c0_i32_8 : i32
    %10 = arith.extui %9 : i1 to i32
    %c0_i32_9 = arith.constant 0 : i32
    %11 = arith.cmpi ne, %10, %c0_i32_9 : i32
    scf.if %11 {
      %c0_10 = arith.constant 0 : index
      %c0_11 = arith.constant 0 : index
      %12 = vector.load %arg6[%c0_10, %c0_11] : memref<16x256xf32, #tpu.memory_space<vmem>>, vector<16x256xf32>
      %c0_12 = arith.constant 0 : index
      %c0_13 = arith.constant 0 : index
      %13 = vector.load %arg5[%c0_12, %c0_13] : memref<1x256xf32, #tpu.memory_space<vmem>>, vector<1x256xf32>
      %14 = vector.broadcast %13 : vector<1x256xf32> to vector<16x256xf32>
      %15 = arith.addf %12, %14 : vector<16x256xf32>
      %c0_14 = arith.constant 0 : index
      %c0_15 = arith.constant 0 : index
      %16 = vector.load %arg6[%c0_14, %c0_15] : memref<16x256xf32, #tpu.memory_space<vmem>>, vector<16x256xf32>
      tpu.vector_store %arg6[%c0_14, %c0_15], %15 {strides = array<i32>} : memref<16x256xf32, #tpu.memory_space<vmem>>, vector<16x256xf32>,
    } else {
    }
    return
  }
  func.func @transform_0(%arg0: i32, %arg1: i32, %arg2: i32) -> (i32, i32) {
    %c0_i32 = arith.constant 0 : i32
    return %arg0, %arg2 : i32, i32
  }
  func.func @transform_1(%arg0: i32, %arg1: i32, %arg2: i32) -> (i32, i32) {
    %c0_i32 = arith.constant 0 : i32
    return %arg2, %arg1 : i32, i32
  }
  func.func @transform_2(%arg0: i32, %arg1: i32, %arg2: i32) -> (i32, i32) {
    %c0_i32 = arith.constant 0 : i32
    %c0_i32_0 = arith.constant 0 : i32
    return %c0_i32, %arg1 : i32, i32
  }
  func.func @transform_3(%arg0: i32, %arg1: i32, %arg2: i32) -> (i32, i32) {
    %c0_i32 = arith.constant 0 : i32
    return %arg0, %arg1 : i32, i32
  }
}

module attributes {stable_mosaic.version = 11 : i64} {
  func.func @_mm_kernel(%arg0: i32, %arg1: i32, %arg2: i32, %arg3: memref<16x256xbf16, #tpu.memory_space<vmem>>, %arg4: memref<256x256xbf16, #tpu.memory_space<vmem>>, %arg5: memref<1x256xf32, #tpu.memory_space<vmem>>, %arg6: memref<16x256xf32, #tpu.memory_space<vmem>>) attributes {dimension_semantics = [#tpu.dimension_semantics<parallel>, #tpu.dimension_semantics<parallel>, #tpu.dimension_semantics<arbitrary>], iteration_bounds = array<i64: 1, 2, 9>, scalar_prefetch = 0 : i64, scratch_operands = 0 : i64, tpu.core_type = #tpu.core_type<tc>, window_params = [{transform_indices = @transform_0, window_bounds = array<i64: 16, 256>}, {transform_indices = @transform_1, window_bounds = array<i64: 256, 256>}, {transform_indices = @transform_2, window_bounds = array<i64: 1, 256>}, {transform_indices = @transform_3, window_bounds = array<i64: 16, 256>}]} {
    %c0_i32 = arith.constant 0 : i32
    %0 = arith.cmpi eq, %arg2, %c0_i32 : i32
    %1 = arith.extui %0 : i1 to i32
    %c0_i32_0 = arith.constant 0 : i32
    %2 = arith.cmpi ne, %1, %c0_i32_0 : i32
    scf.if %2 {
      %cst_9 = arith.constant 0.000000e+00 : f32
      %12 = vector.broadcast %cst_9 : f32 to vector<16x256xf32>
      %c0_10 = arith.constant 0 : index
      %c0_11 = arith.constant 0 : index
      %13 = vector.load %arg6[%c0_10, %c0_11] : memref<16x256xf32, #tpu.memory_space<vmem>>, vector<16x256xf32>
      tpu.vector_store %arg6[%c0_10, %c0_11], %12 {strides = array<i32>} : memref<16x256xf32, #tpu.memory_space<vmem>>, vector<16x256xf32>,
    } else {
    }
    %c0 = arith.constant 0 : index
    %c0_1 = arith.constant 0 : index
    %3 = vector.load %arg6[%c0, %c0_1] : memref<16x256xf32, #tpu.memory_space<vmem>>, vector<16x256xf32>
    %c0_2 = arith.constant 0 : index
    %c0_3 = arith.constant 0 : index
    %4 = vector.load %arg3[%c0_2, %c0_3] : memref<16x256xbf16, #tpu.memory_space<vmem>>, vector<16x256xbf16>
    %c0_4 = arith.constant 0 : index
    %c0_5 = arith.constant 0 : index
    %5 = vector.load %arg4[%c0_4, %c0_5] : memref<256x256xbf16, #tpu.memory_space<vmem>>, vector<256x256xbf16>
    %cst = arith.constant dense<0.000000e+00> : vector<16x256xf32>
    %6 = tpu.matmul %4, %5, %cst {dimension_numbers = #tpu.dot_dimension_numbers<[1], [0], [0], [1], [0, 0, 1, 1], [], []>} : vector<16x256xbf16>, vector<256x256xbf16>, vector<16x256xf32> -> vector<16x256xf32>
    %7 = arith.addf %3, %6 : vector<16x256xf32>
    %c0_6 = arith.constant 0 : index
    %c0_7 = arith.constant 0 : index
    %8 = vector.load %arg6[%c0_6, %c0_7] : memref<16x256xf32, #tpu.memory_space<vmem>>, vector<16x256xf32>
    tpu.vector_store %arg6[%c0_6, %c0_7], %7 {strides = array<i32>} : memref<16x256xf32, #tpu.memory_space<vmem>>, vector<16x256xf32>,
    %c8_i32 = arith.constant 8 : i32
    %9 = arith.cmpi eq, %arg2, %c8_i32 : i32
    %10 = arith.extui %9 : i1 to i32
    %c0_i32_8 = arith.constant 0 : i32
    %11 = arith.cmpi ne, %10, %c0_i32_8 : i32
    scf.if %11 {
      %c0_9 = arith.constant 0 : index
      %c0_10 = arith.constant 0 : index
      %12 = vector.load %arg6[%c0_9, %c0_10] : memref<16x256xf32, #tpu.memory_space<vmem>>, vector<16x256xf32>
      %c0_11 = arith.constant 0 : index
      %c0_12 = arith.constant 0 : index
      %13 = vector.load %arg5[%c0_11, %c0_12] : memref<1x256xf32, #tpu.memory_space<vmem>>, vector<1x256xf32>
      %14 = vector.broadcast %13 : vector<1x256xf32> to vector<16x256xf32>
      %15 = arith.addf %12, %14 : vector<16x256xf32>
      %cst_13 = arith.constant 0.000000e+00 : f32
      %16 = vector.broadcast %cst_13 : f32 to vector<16x256xf32>
      %17 = arith.maximumf %15, %16 : vector<16x256xf32>
      %c0_14 = arith.constant 0 : index
      %c0_15 = arith.constant 0 : index
      %18 = vector.load %arg6[%c0_14, %c0_15] : memref<16x256xf32, #tpu.memory_space<vmem>>, vector<16x256xf32>
      tpu.vector_store %arg6[%c0_14, %c0_15], %17 {strides = array<i32>} : memref<16x256xf32, #tpu.memory_space<vmem>>, vector<16x256xf32>,
    } else {
    }
    return
  }
  func.func @transform_0(%arg0: i32, %arg1: i32, %arg2: i32) -> (i32, i32) {
    %c0_i32 = arith.constant 0 : i32
    return %arg0, %arg2 : i32, i32
  }
  func.func @transform_1(%arg0: i32, %arg1: i32, %arg2: i32) -> (i32, i32) {
    %c0_i32 = arith.constant 0 : i32
    return %arg2, %arg1 : i32, i32
  }
  func.func @transform_2(%arg0: i32, %arg1: i32, %arg2: i32) -> (i32, i32) {
    %c0_i32 = arith.constant 0 : i32
    %c0_i32_0 = arith.constant 0 : i32
    return %c0_i32, %arg1 : i32, i32
  }
  func.func @transform_3(%arg0: i32, %arg1: i32, %arg2: i32) -> (i32, i32) {
    %c0_i32 = arith.constant 0 : i32
    return %arg0, %arg1 : i32, i32
  }
}

module attributes {stable_mosaic.version = 11 : i64} {
  func.func @_mm_kernel(%arg0: i32, %arg1: i32, %arg2: i32, %arg3: memref<16x256xbf16, #tpu.memory_space<vmem>>, %arg4: memref<256x256xbf16, #tpu.memory_space<vmem>>, %arg5: memref<1x256xf32, #tpu.memory_space<vmem>>, %arg6: memref<16x256xf32, #tpu.memory_space<vmem>>) attributes {dimension_semantics = [#tpu.dimension_semantics<parallel>, #tpu.dimension_semantics<parallel>, #tpu.dimension_semantics<arbitrary>], iteration_bounds = array<i64: 1, 2, 1>, scalar_prefetch = 0 : i64, scratch_operands = 0 : i64, tpu.core_type = #tpu.core_type<tc>, window_params = [{transform_indices = @transform_0, window_bounds = array<i64: 16, 256>}, {transform_indices = @transform_1, window_bounds = array<i64: 256, 256>}, {transform_indices = @transform_2, window_bounds = array<i64: 1, 256>}, {transform_indices = @transform_3, window_bounds = array<i64: 16, 256>}]} {
    %c0_i32 = arith.constant 0 : i32
    %0 = arith.cmpi eq, %arg2, %c0_i32 : i32
    %1 = arith.extui %0 : i1 to i32
    %c0_i32_0 = arith.constant 0 : i32
    %2 = arith.cmpi ne, %1, %c0_i32_0 : i32
    scf.if %2 {
      %cst_10 = arith.constant 0.000000e+00 : f32
      %12 = vector.broadcast %cst_10 : f32 to vector<16x256xf32>
      %c0_11 = arith.constant 0 : index
      %c0_12 = arith.constant 0 : index
      %13 = vector.load %arg6[%c0_11, %c0_12] : memref<16x256xf32, #tpu.memory_space<vmem>>, vector<16x256xf32>
      tpu.vector_store %arg6[%c0_11, %c0_12], %12 {strides = array<i32>} : memref<16x256xf32, #tpu.memory_space<vmem>>, vector<16x256xf32>,
    } else {
    }
    %c0 = arith.constant 0 : index
    %c0_1 = arith.constant 0 : index
    %3 = vector.load %arg6[%c0, %c0_1] : memref<16x256xf32, #tpu.memory_space<vmem>>, vector<16x256xf32>
    %c0_2 = arith.constant 0 : index
    %c0_3 = arith.constant 0 : index
    %4 = vector.load %arg3[%c0_2, %c0_3] : memref<16x256xbf16, #tpu.memory_space<vmem>>, vector<16x256xbf16>
    %c0_4 = arith.constant 0 : index
    %c0_5 = arith.constant 0 : index
    %5 = vector.load %arg4[%c0_4, %c0_5] : memref<256x256xbf16, #tpu.memory_space<vmem>>, vector<256x256xbf16>
    %cst = arith.constant dense<0.000000e+00> : vector<16x256xf32>
    %6 = tpu.matmul %4, %5, %cst {dimension_numbers = #tpu.dot_dimension_numbers<[1], [0], [0], [1], [0, 0, 1, 1], [], []>} : vector<16x256xbf16>, vector<256x256xbf16>, vector<16x256xf32> -> vector<16x256xf32>
    %7 = arith.addf %3, %6 : vector<16x256xf32>
    %c0_6 = arith.constant 0 : index
    %c0_7 = arith.constant 0 : index
    %8 = vector.load %arg6[%c0_6, %c0_7] : memref<16x256xf32, #tpu.memory_space<vmem>>, vector<16x256xf32>
    tpu.vector_store %arg6[%c0_6, %c0_7], %7 {strides = array<i32>} : memref<16x256xf32, #tpu.memory_space<vmem>>, vector<16x256xf32>,
    %c0_i32_8 = arith.constant 0 : i32
    %9 = arith.cmpi eq, %arg2, %c0_i32_8 : i32
    %10 = arith.extui %9 : i1 to i32
    %c0_i32_9 = arith.constant 0 : i32
    %11 = arith.cmpi ne, %10, %c0_i32_9 : i32
    scf.if %11 {
      %c0_10 = arith.constant 0 : index
      %c0_11 = arith.constant 0 : index
      %12 = vector.load %arg6[%c0_10, %c0_11] : memref<16x256xf32, #tpu.memory_space<vmem>>, vector<16x256xf32>
      %c0_12 = arith.constant 0 : index
      %c0_13 = arith.constant 0 : index
      %13 = vector.load %arg5[%c0_12, %c0_13] : memref<1x256xf32, #tpu.memory_space<vmem>>, vector<1x256xf32>
      %14 = vector.broadcast %13 : vector<1x256xf32> to vector<16x256xf32>
      %15 = arith.addf %12, %14 : vector<16x256xf32>
      %c0_14 = arith.constant 0 : index
      %c0_15 = arith.constant 0 : index
      %16 = vector.load %arg6[%c0_14, %c0_15] : memref<16x256xf32, #tpu.memory_space<vmem>>, vector<16x256xf32>
      tpu.vector_store %arg6[%c0_14, %c0_15], %15 {strides = array<i32>} : memref<16x256xf32, #tpu.memory_space<vmem>>, vector<16x256xf32>,
    } else {
    }
    return
  }
  func.func @transform_0(%arg0: i32, %arg1: i32, %arg2: i32) -> (i32, i32) {
    %c0_i32 = arith.constant 0 : i32
    return %arg0, %arg2 : i32, i32
  }
  func.func @transform_1(%arg0: i32, %arg1: i32, %arg2: i32) -> (i32, i32) {
    %c0_i32 = arith.constant 0 : i32
    return %arg2, %arg1 : i32, i32
  }
  func.func @transform_2(%arg0: i32, %arg1: i32, %arg2: i32) -> (i32, i32) {
    %c0_i32 = arith.constant 0 : i32
    %c0_i32_0 = arith.constant 0 : i32
    return %c0_i32, %arg1 : i32, i32
  }
  func.func @transform_3(%arg0: i32, %arg1: i32, %arg2: i32) -> (i32, i32) {
    %c0_i32 = arith.constant 0 : i32
    return %arg0, %arg1 : i32, i32
  }
}

module attributes {stable_mosaic.version = 11 : i64} {
  func.func @_mm_kernel(%arg0: i32, %arg1: i32, %arg2: i32, %arg3: memref<16x512xbf16, #tpu.memory_space<vmem>>, %arg4: memref<512x256xbf16, #tpu.memory_space<vmem>>, %arg5: memref<1x256xf32, #tpu.memory_space<vmem>>, %arg6: memref<16x256xf32, #tpu.memory_space<vmem>>, %arg7: memref<16x256xf32, #tpu.memory_space<vmem>>) attributes {dimension_semantics = [#tpu.dimension_semantics<parallel>, #tpu.dimension_semantics<parallel>, #tpu.dimension_semantics<arbitrary>], iteration_bounds = array<i64: 1, 2, 9>, scalar_prefetch = 0 : i64, scratch_operands = 0 : i64, tpu.core_type = #tpu.core_type<tc>, window_params = [{transform_indices = @transform_0, window_bounds = array<i64: 16, 512>}, {transform_indices = @transform_1, window_bounds = array<i64: 512, 256>}, {transform_indices = @transform_2, window_bounds = array<i64: 1, 256>}, {transform_indices = @transform_3, window_bounds = array<i64: 16, 256>}, {transform_indices = @transform_4, window_bounds = array<i64: 16, 256>}]} {
    %c0_i32 = arith.constant 0 : i32
    %0 = arith.cmpi eq, %arg2, %c0_i32 : i32
    %1 = arith.extui %0 : i1 to i32
    %c0_i32_0 = arith.constant 0 : i32
    %2 = arith.cmpi ne, %1, %c0_i32_0 : i32
    scf.if %2 {
      %cst_9 = arith.constant 0.000000e+00 : f32
      %12 = vector.broadcast %cst_9 : f32 to vector<16x256xf32>
      %c0_10 = arith.constant 0 : index
      %c0_11 = arith.constant 0 : index
      %13 = vector.load %arg7[%c0_10, %c0_11] : memref<16x256xf32, #tpu.memory_space<vmem>>, vector<16x256xf32>
      tpu.vector_store %arg7[%c0_10, %c0_11], %12 {strides = array<i32>} : memref<16x256xf32, #tpu.memory_space<vmem>>, vector<16x256xf32>,
    } else {
    }
    %c0 = arith.constant 0 : index
    %c0_1 = arith.constant 0 : index
    %3 = vector.load %arg7[%c0, %c0_1] : memref<16x256xf32, #tpu.memory_space<vmem>>, vector<16x256xf32>
    %c0_2 = arith.constant 0 : index
    %c0_3 = arith.constant 0 : index
    %4 = vector.load %arg3[%c0_2, %c0_3] : memref<16x512xbf16, #tpu.memory_space<vmem>>, vector<16x512xbf16>
    %c0_4 = arith.constant 0 : index
    %c0_5 = arith.constant 0 : index
    %5 = vector.load %arg4[%c0_4, %c0_5] : memref<512x256xbf16, #tpu.memory_space<vmem>>, vector<512x256xbf16>
    %cst = arith.constant dense<0.000000e+00> : vector<16x256xf32>
    %6 = tpu.matmul %4, %5, %cst {dimension_numbers = #tpu.dot_dimension_numbers<[1], [0], [0], [1], [0, 0, 1, 1], [], []>} : vector<16x512xbf16>, vector<512x256xbf16>, vector<16x256xf32> -> vector<16x256xf32>
    %7 = arith.addf %3, %6 : vector<16x256xf32>
    %c0_6 = arith.constant 0 : index
    %c0_7 = arith.constant 0 : index
    %8 = vector.load %arg7[%c0_6, %c0_7] : memref<16x256xf32, #tpu.memory_space<vmem>>, vector<16x256xf32>
    tpu.vector_store %arg7[%c0_6, %c0_7], %7 {strides = array<i32>} : memref<16x256xf32, #tpu.memory_space<vmem>>, vector<16x256xf32>,
    %c8_i32 = arith.constant 8 : i32
    %9 = arith.cmpi eq, %arg2, %c8_i32 : i32
    %10 = arith.extui %9 : i1 to i32
    %c0_i32_8 = arith.constant 0 : i32
    %11 = arith.cmpi ne, %10, %c0_i32_8 : i32
    scf.if %11 {
      %c0_9 = arith.constant 0 : index
      %c0_10 = arith.constant 0 : index
      %12 = vector.load %arg7[%c0_9, %c0_10] : memref<16x256xf32, #tpu.memory_space<vmem>>, vector<16x256xf32>
      %c0_11 = arith.constant 0 : index
      %c0_12 = arith.constant 0 : index
      %13 = vector.load %arg5[%c0_11, %c0_12] : memref<1x256xf32, #tpu.memory_space<vmem>>, vector<1x256xf32>
      %14 = vector.broadcast %13 : vector<1x256xf32> to vector<16x256xf32>
      %15 = arith.addf %12, %14 : vector<16x256xf32>
      %c0_13 = arith.constant 0 : index
      %c0_14 = arith.constant 0 : index
      %16 = vector.load %arg6[%c0_13, %c0_14] : memref<16x256xf32, #tpu.memory_space<vmem>>, vector<16x256xf32>
      %17 = arith.addf %15, %16 : vector<16x256xf32>
      %cst_15 = arith.constant 0.000000e+00 : f32
      %18 = vector.broadcast %cst_15 : f32 to vector<16x256xf32>
      %19 = arith.maximumf %17, %18 : vector<16x256xf32>
      %c0_16 = arith.constant 0 : index
      %c0_17 = arith.constant 0 : index
      %20 = vector.load %arg7[%c0_16, %c0_17] : memref<16x256xf32, #tpu.memory_space<vmem>>, vector<16x256xf32>
      tpu.vector_store %arg7[%c0_16, %c0_17], %19 {strides = array<i32>} : memref<16x256xf32, #tpu.memory_space<vmem>>, vector<16x256xf32>,
    } else {
    }
    return
  }
  func.func @transform_0(%arg0: i32, %arg1: i32, %arg2: i32) -> (i32, i32) {
    %c0_i32 = arith.constant 0 : i32
    return %arg0, %arg2 : i32, i32
  }
  func.func @transform_1(%arg0: i32, %arg1: i32, %arg2: i32) -> (i32, i32) {
    %c0_i32 = arith.constant 0 : i32
    return %arg2, %arg1 : i32, i32
  }
  func.func @transform_2(%arg0: i32, %arg1: i32, %arg2: i32) -> (i32, i32) {
    %c0_i32 = arith.constant 0 : i32
    %c0_i32_0 = arith.constant 0 : i32
    return %c0_i32, %arg1 : i32, i32
  }
  func.func @transform_3(%arg0: i32, %arg1: i32, %arg2: i32) -> (i32, i32) {
    %c0_i32 = arith.constant 0 : i32
    return %arg0, %arg1 : i32, i32
  }
  func.func @transform_4(%arg0: i32, %arg1: i32, %arg2: i32) -> (i32, i32) {
    %c0_i32 = arith.constant 0 : i32
    return %arg0, %arg1 : i32, i32
  }
}

module attributes {stable_mosaic.version = 11 : i64} {
  func.func @_mm_kernel(%arg0: i32, %arg1: i32, %arg2: i32, %arg3: memref<16x512xbf16, #tpu.memory_space<vmem>>, %arg4: memref<512x256xbf16, #tpu.memory_space<vmem>>, %arg5: memref<1x256xf32, #tpu.memory_space<vmem>>, %arg6: memref<16x256xf32, #tpu.memory_space<vmem>>) attributes {dimension_semantics = [#tpu.dimension_semantics<parallel>, #tpu.dimension_semantics<parallel>, #tpu.dimension_semantics<arbitrary>], iteration_bounds = array<i64: 1, 2, 9>, scalar_prefetch = 0 : i64, scratch_operands = 0 : i64, tpu.core_type = #tpu.core_type<tc>, window_params = [{transform_indices = @transform_0, window_bounds = array<i64: 16, 512>}, {transform_indices = @transform_1, window_bounds = array<i64: 512, 256>}, {transform_indices = @transform_2, window_bounds = array<i64: 1, 256>}, {transform_indices = @transform_3, window_bounds = array<i64: 16, 256>}]} {
    %c0_i32 = arith.constant 0 : i32
    %0 = arith.cmpi eq, %arg2, %c0_i32 : i32
    %1 = arith.extui %0 : i1 to i32
    %c0_i32_0 = arith.constant 0 : i32
    %2 = arith.cmpi ne, %1, %c0_i32_0 : i32
    scf.if %2 {
      %cst_9 = arith.constant 0.000000e+00 : f32
      %12 = vector.broadcast %cst_9 : f32 to vector<16x256xf32>
      %c0_10 = arith.constant 0 : index
      %c0_11 = arith.constant 0 : index
      %13 = vector.load %arg6[%c0_10, %c0_11] : memref<16x256xf32, #tpu.memory_space<vmem>>, vector<16x256xf32>
      tpu.vector_store %arg6[%c0_10, %c0_11], %12 {strides = array<i32>} : memref<16x256xf32, #tpu.memory_space<vmem>>, vector<16x256xf32>,
    } else {
    }
    %c0 = arith.constant 0 : index
    %c0_1 = arith.constant 0 : index
    %3 = vector.load %arg6[%c0, %c0_1] : memref<16x256xf32, #tpu.memory_space<vmem>>, vector<16x256xf32>
    %c0_2 = arith.constant 0 : index
    %c0_3 = arith.constant 0 : index
    %4 = vector.load %arg3[%c0_2, %c0_3] : memref<16x512xbf16, #tpu.memory_space<vmem>>, vector<16x512xbf16>
    %c0_4 = arith.constant 0 : index
    %c0_5 = arith.constant 0 : index
    %5 = vector.load %arg4[%c0_4, %c0_5] : memref<512x256xbf16, #tpu.memory_space<vmem>>, vector<512x256xbf16>
    %cst = arith.constant dense<0.000000e+00> : vector<16x256xf32>
    %6 = tpu.matmul %4, %5, %cst {dimension_numbers = #tpu.dot_dimension_numbers<[1], [0], [0], [1], [0, 0, 1, 1], [], []>} : vector<16x512xbf16>, vector<512x256xbf16>, vector<16x256xf32> -> vector<16x256xf32>
    %7 = arith.addf %3, %6 : vector<16x256xf32>
    %c0_6 = arith.constant 0 : index
    %c0_7 = arith.constant 0 : index
    %8 = vector.load %arg6[%c0_6, %c0_7] : memref<16x256xf32, #tpu.memory_space<vmem>>, vector<16x256xf32>
    tpu.vector_store %arg6[%c0_6, %c0_7], %7 {strides = array<i32>} : memref<16x256xf32, #tpu.memory_space<vmem>>, vector<16x256xf32>,
    %c8_i32 = arith.constant 8 : i32
    %9 = arith.cmpi eq, %arg2, %c8_i32 : i32
    %10 = arith.extui %9 : i1 to i32
    %c0_i32_8 = arith.constant 0 : i32
    %11 = arith.cmpi ne, %10, %c0_i32_8 : i32
    scf.if %11 {
      %c0_9 = arith.constant 0 : index
      %c0_10 = arith.constant 0 : index
      %12 = vector.load %arg6[%c0_9, %c0_10] : memref<16x256xf32, #tpu.memory_space<vmem>>, vector<16x256xf32>
      %c0_11 = arith.constant 0 : index
      %c0_12 = arith.constant 0 : index
      %13 = vector.load %arg5[%c0_11, %c0_12] : memref<1x256xf32, #tpu.memory_space<vmem>>, vector<1x256xf32>
      %14 = vector.broadcast %13 : vector<1x256xf32> to vector<16x256xf32>
      %15 = arith.addf %12, %14 : vector<16x256xf32>
      %cst_13 = arith.constant 0.000000e+00 : f32
      %16 = vector.broadcast %cst_13 : f32 to vector<16x256xf32>
      %17 = arith.maximumf %15, %16 : vector<16x256xf32>
      %c0_14 = arith.constant 0 : index
      %c0_15 = arith.constant 0 : index
      %18 = vector.load %arg6[%c0_14, %c0_15] : memref<16x256xf32, #tpu.memory_space<vmem>>, vector<16x256xf32>
      tpu.vector_store %arg6[%c0_14, %c0_15], %17 {strides = array<i32>} : memref<16x256xf32, #tpu.memory_space<vmem>>, vector<16x256xf32>,
    } else {
    }
    return
  }
  func.func @transform_0(%arg0: i32, %arg1: i32, %arg2: i32) -> (i32, i32) {
    %c0_i32 = arith.constant 0 : i32
    return %arg0, %arg2 : i32, i32
  }
  func.func @transform_1(%arg0: i32, %arg1: i32, %arg2: i32) -> (i32, i32) {
    %c0_i32 = arith.constant 0 : i32
    return %arg2, %arg1 : i32, i32
  }
  func.func @transform_2(%arg0: i32, %arg1: i32, %arg2: i32) -> (i32, i32) {
    %c0_i32 = arith.constant 0 : i32
    %c0_i32_0 = arith.constant 0 : i32
    return %c0_i32, %arg1 : i32, i32
  }
  func.func @transform_3(%arg0: i32, %arg1: i32, %arg2: i32) -> (i32, i32) {
    %c0_i32 = arith.constant 0 : i32
    return %arg0, %arg1 : i32, i32
  }
}

</mosaic_0001>

<bundles_post_ra>
// kernel: forward.20
= control target key start
LH: loop header
LB: loop body
LE: loop exit
PB: predicated region body
PF: predicated region fallthrough
CT: control target
= control target key end

     0   :  { %s1710_s12 = smov 0   ;;  %s1712_s13 = smov 0   ;;  %s2251_s0 = inlined_call_operand.vmem [shape: bf16[512,768], index: 0, kind: input, shape index: {}]   ;;  %s2252_s1 = inlined_call_operand.vmem [shape: bf16[768,64], index: 1, kind: input, shape index: {}]   ;;  %s2253_s2 = inlined_call_operand.vmem [shape: f32[1,64], index: 2, kind: input, shape index: {}]   ;;  %s2254_s3 = inlined_call_operand.vmem [shape: f32[512,64], index: 3, kind: output, shape index: {}]  }
   0x1   :  { %s1714_s14 = smov 0   ;;  %s1716_s15 = smov 0  }
   0x2   :  { %s1718_s16 = smov 0   ;;  %s1720_s17 = smov 0  }
   0x3   :  { %s1722_s18 = smov 0  }
   0x4 LB: > { %s25_s19 = sadd.s32 1, %s1679_s16  ;;  %s32_s20 = sadd.s32 1, %s1683_s17  ;;  %s1687_s18 = sphi %s1722_s18, %s13_s18   ;;  %s1683_s17 = sphi %s1720_s17, %s2260_s17   ;;  %s1679_s16 = sphi %s1718_s16, %s2259_s16   ;;  %s1675_s15 = sphi %s1716_s15, %s2258_s15   ;;  %s1671_s14 = sphi %s1714_s14, %s2257_s14   ;;  %s1667_s13 = sphi %s1712_s13, %s2256_s13   ;;  %s1663_s12 = sphi %s1710_s12, %s2255_s12  }
   0x5   : > { %p26_p0 = scmp.ge.s32.totalorder %s25_s19, 3  ;;  %p48_p1 = scmp.ne.s32.totalorder %s1667_s13, %s1663_s12 }
   0x6   : > { %p49_p2 = scmp.eq.s32.totalorder %s1687_s18, 0  ;;  %s41_s24 = sadd.s32 1, %s1667_s13 }
   0x7   : > { %s2262_s19 = smov (%p26_p0, %s25_s19), 0  ;;  %s2264_s20 = smov (!%p26_p0, %s32_s20), %s1683_s17 }
   0x8   : > { %p50_p3 = por %p49_p2, %p48_p1  ;;  %p34_p4 = scmp.ge.s32.totalorder %s2264_s20, 2 }
   0x9   : > { %s37_s21 = ssub.s32 %s1679_s16, %s2262_s19  ;;  %p1302_p6 = scmp.ge.s32.totalorder %s1687_s18, 6 }
   0xa   : > { %s2266_s20 = smov (%p34_p4, %s2264_s20), 0 }
   0xb   : > { %s36_s22 = ssub.s32 %s1683_s17, %s2266_s20  ;;  %162 = sbr.rel (%p1302_p6) target bundleno = 56 (0x38), region = 20 }
   0xc   : > { %s38_s23 = sor.u32 %s37_s21, %s36_s22 }
   0xd   : > { %p39_p5 = scmp.eq.s32.totalorder %s38_s23, 0 }
   0xf   : > { %s1761_s25 = scalar_select %p39_p5, %s1667_s13, %s41_s24  }
  0x10   : > { %165 = sbr.rel (!%p50_p3) target bundleno = 56 (0x38), region = 24  ;;  %s167_s26 = sand.u32 (%p50_p3), 1, %s1667_s13  }
  0x11   : > { %s1305_s27 = sshll.u32 (%p50_p3), %s1679_s16, 1  ;;  %s1303_s28 = sshll.u32 (%p50_p3), %s167_s26, 8 }
  0x12   : > { %s1574_s29 = smul.u32 (%p50_p3), 192, %s1683_s17  ;;  %s1775_s8 = scalar_lea.vmem (%p50_p3), [#allocation2], %s1303_s28 }
  0x14   : > { %s173_s30 = sadd.s32 (%p50_p3), %s1574_s29, %s1305_s27 }
  0x15   : > { %s1307_s4 = sshll.u32 %s173_s30, 2 }
  0x16   : > { %s1770_s7 = scalar_lea.vmem %s2251_s0, %s1307_s4 }
  0x17   : > { %v266_v0 = vld [vmem:[%s1770_s7] sm:$0xff]  ;;  %v268_v1 = vld [vmem:[%s1770_s7 + $0x18] sm:$0xff]  ;;  %v270_v2 = vld [vmem:[%s1770_s7 + $0x30] sm:$0xff] }
  0x18   : > { %267 = vst [vmem:[%s1775_s8] sm:$0xff] %v266_v0  ;;  %v272_v3 = vld [vmem:[%s1770_s7 + $0x48] sm:$0xff]  ;;  %v274_v4 = vld [vmem:[%s1770_s7 + $0x60] sm:$0xff]  ;;  %v276_v5 = vld [vmem:[%s1770_s7 + $0x78] sm:$0xff] }
  0x19   : > { %269 = vst [vmem:[%s1775_s8 + $0x8] sm:$0xff] %v268_v1  ;;  %v278_v6 = vld [vmem:[%s1770_s7 + $0x90] sm:$0xff]  ;;  %v280_v7 = vld [vmem:[%s1770_s7 + $0xa8] sm:$0xff]  ;;  %v282_v8 = vld [vmem:[%s1770_s7 + $0xc0] sm:$0xff] }
  0x1a   : > { %271 = vst [vmem:[%s1775_s8 + $0x10] sm:$0xff] %v270_v2  ;;  %v284_v9 = vld [vmem:[%s1770_s7 + $0xd8] sm:$0xff]  ;;  %v286_v10 = vld [vmem:[%s1770_s7 + $0xf0] sm:$0xff]  ;;  %v288_v11 = vld [vmem:[%s1770_s7 + $0x108] sm:$0xff] }
  0x1b   : > { %273 = vst [vmem:[%s1775_s8 + $0x18] sm:$0xff] %v272_v3  ;;  %v290_v12 = vld [vmem:[%s1770_s7 + $0x120] sm:$0xff]  ;;  %v292_v13 = vld [vmem:[%s1770_s7 + $0x138] sm:$0xff]  ;;  %v294_v14 = vld [vmem:[%s1770_s7 + $0x150] sm:$0xff] }
  0x1c   : > { %275 = vst [vmem:[%s1775_s8 + $0x20] sm:$0xff] %v274_v4  ;;  %v296_v15 = vld [vmem:[%s1770_s7 + $0x168] sm:$0xff]  ;;  %v298_v16 = vld [vmem:[%s1770_s7 + $0x180] sm:$0xff]  ;;  %v300_v17 = vld [vmem:[%s1770_s7 + $0x198] sm:$0xff] }
  0x1d   : > { %277 = vst [vmem:[%s1775_s8 + $0x28] sm:$0xff] %v276_v5  ;;  %v302_v18 = vld [vmem:[%s1770_s7 + $0x1b0] sm:$0xff]  ;;  %v304_v19 = vld [vmem:[%s1770_s7 + $0x1c8] sm:$0xff]  ;;  %v306_v20 = vld [vmem:[%s1770_s7 + $0x1e0] sm:$0xff] }
  0x1e   : > { %279 = vst [vmem:[%s1775_s8 + $0x30] sm:$0xff] %v278_v6  ;;  %v308_v21 = vld [vmem:[%s1770_s7 + $0x1f8] sm:$0xff]  ;;  %v310_v22 = vld [vmem:[%s1770_s7 + $0x210] sm:$0xff]  ;;  %v312_v23 = vld [vmem:[%s1770_s7 + $0x228] sm:$0xff] }
  0x1f   : > { %281 = vst [vmem:[%s1775_s8 + $0x38] sm:$0xff] %v280_v7  ;;  %v314_v24 = vld [vmem:[%s1770_s7 + $0x240] sm:$0xff]  ;;  %v316_v25 = vld [vmem:[%s1770_s7 + $0x258] sm:$0xff]  ;;  %v318_v26 = vld [vmem:[%s1770_s7 + $0x270] sm:$0xff] }
  0x20   : > { %283 = vst [vmem:[%s1775_s8 + $0x40] sm:$0xff] %v282_v8  ;;  %v320_v27 = vld [vmem:[%s1770_s7 + $0x288] sm:$0xff]  ;;  %v322_v28 = vld [vmem:[%s1770_s7 + $0x2a0] sm:$0xff]  ;;  %v324_v29 = vld [vmem:[%s1770_s7 + $0x2b8] sm:$0xff] }
  0x21   : > { %285 = vst [vmem:[%s1775_s8 + $0x48] sm:$0xff] %v284_v9  ;;  %v326_v30 = vld [vmem:[%s1770_s7 + $0x2d0] sm:$0xff]  ;;  %v328_v31 = vld [vmem:[%s1770_s7 + $0x2e8] sm:$0xff] }
  0x22   : > { %287 = vst [vmem:[%s1775_s8 + $0x50] sm:$0xff] %v286_v10 }
  0x23   : > { %289 = vst [vmem:[%s1775_s8 + $0x58] sm:$0xff] %v288_v11 }
  0x24   : > { %291 = vst [vmem:[%s1775_s8 + $0x60] sm:$0xff] %v290_v12 }
  0x25   : > { %293 = vst [vmem:[%s1775_s8 + $0x68] sm:$0xff] %v292_v13 }
  0x26   : > { %295 = vst [vmem:[%s1775_s8 + $0x70] sm:$0xff] %v294_v14 }
  0x27   : > { %297 = vst [vmem:[%s1775_s8 + $0x78] sm:$0xff] %v296_v15 }
  0x28   : > { %299 = vst [vmem:[%s1775_s8 + $0x80] sm:$0xff] %v298_v16 }
  0x29   : > { %301 = vst [vmem:[%s1775_s8 + $0x88] sm:$0xff] %v300_v17 }
  0x2a   : > { %303 = vst [vmem:[%s1775_s8 + $0x90] sm:$0xff] %v302_v18 }
  0x2b   : > { %305 = vst [vmem:[%s1775_s8 + $0x98] sm:$0xff] %v304_v19 }
  0x2c   : > { %307 = vst [vmem:[%s1775_s8 + $0xa0] sm:$0xff] %v306_v20 }
  0x2d   : > { %309 = vst [vmem:[%s1775_s8 + $0xa8] sm:$0xff] %v308_v21 }
  0x2e   : > { %311 = vst [vmem:[%s1775_s8 + $0xb0] sm:$0xff] %v310_v22 }
  0x2f   : > { %313 = vst [vmem:[%s1775_s8 + $0xb8] sm:$0xff] %v312_v23 }
  0x30   : > { %315 = vst [vmem:[%s1775_s8 + $0xc0] sm:$0xff] %v314_v24 }
  0x31   : > { %317 = vst [vmem:[%s1775_s8 + $0xc8] sm:$0xff] %v316_v25 }
  0x32   : > { %319 = vst [vmem:[%s1775_s8 + $0xd0] sm:$0xff] %v318_v26 }
  0x33   : > { %321 = vst [vmem:[%s1775_s8 + $0xd8] sm:$0xff] %v320_v27 }
  0x34   : > { %323 = vst [vmem:[%s1775_s8 + $0xe0] sm:$0xff] %v322_v28 }
  0x35   : > { %325 = vst [vmem:[%s1775_s8 + $0xe8] sm:$0xff] %v324_v29 }
  0x36   : > { %327 = vst [vmem:[%s1775_s8 + $0xf0] sm:$0xff] %v326_v30 }
  0x37   : > { %329 = vst [vmem:[%s1775_s8 + $0xf8] sm:$0xff] %v328_v31 }
  0x38 PF: > { %p1308_p7 = scmp.ge.s32.totalorder %s1687_s18, 1  ;;  %p346_p8 = scmp.lt.s32.totalorder %s1687_s18, 7 }
  0x3a   : > { %p347_p9 = pnand %p1308_p7, %p346_p8 }
  0x3b   : > { %s353_s9 = sand.u32 (!%p347_p9), 1, %s1663_s12   ;;  %s1310_s10 = sshll.u32 (!%p347_p9), %s1671_s14, 5 }
  0x3c   : > { %350 = sbr.rel (%p347_p9) target bundleno = 434 (0x1b2), region = 66  ;;  %s1309_s11 = sshll.u32 (!%p347_p9), %s353_s9, 8 }
  0x3d   : > { %p393_p10 = scmp.lt.s32.totalorder (!%p347_p9), %s1310_s10, 95  ;;  %s1312_s21 = sshll.u32 (!%p347_p9), %s1675_s15, 5 }
  0x3e   : > { %p405_p11 = scmp.lt.s32.totalorder (!%p347_p9), %s1312_s21, 63  ;;  %s1853_s12 = scalar_lea.vmem (!%p347_p9), [#allocation2], %s1309_s11 }
  0x3f   : > { %p1314_p12 = scmp.ne.s32.totalorder (!%p347_p9), %s1671_s14, 0 }
  0x41   : > { %s2268_s10 = smov (!%p393_p10, %s1310_s10), 95  ;;  %s2270_s21 = smov (!%p405_p11, %s1312_s21), 63 }
  0x42   : > { %s1311_s22 = sshll.u32 %s2268_s10, 2  ;;  %s1313_s27 = sshll.u32 %s2270_s21, 3 }
  0x43   : > { %s1846_s26 = scalar_lea.vmem %s2252_s1, %s1311_s22  ;;  %s1851_s30 = scalar_lea.vmem %s2254_s3, %s1313_s27 }
  0x44   : > { %416 = sbr.rel (%p1314_p12) target bundleno = 106 (0x6a), region = 74 }
  0x49   : > { %vm417_vm0 = vcmask 523264   ;;  %v1689_v32 = vmov 0.0  }
  0x4a   : > { %418 = vst.msk [vmem:[%s1851_s30] sm:$0xff] %vm417_vm0, %v1689_v32 }
  0x4b   : > { %419 = vst.msk [vmem:[%s1851_s30 + $0x8] sm:$0xff] %vm417_vm0, %v1689_v32 }
  0x4c   : > { %420 = vst.msk [vmem:[%s1851_s30 + $0x10] sm:$0xff] %vm417_vm0, %v1689_v32 }
  0x4d   : > { %421 = vst.msk [vmem:[%s1851_s30 + $0x18] sm:$0xff] %vm417_vm0, %v1689_v32 }
  0x4e   : > { %422 = vst.msk [vmem:[%s1851_s30 + $0x20] sm:$0xff] %vm417_vm0, %v1689_v32 }
  0x4f   : > { %423 = vst.msk [vmem:[%s1851_s30 + $0x28] sm:$0xff] %vm417_vm0, %v1689_v32 }
  0x50   : > { %424 = vst.msk [vmem:[%s1851_s30 + $0x30] sm:$0xff] %vm417_vm0, %v1689_v32 }
  0x51   : > { %425 = vst.msk [vmem:[%s1851_s30 + $0x38] sm:$0xff] %vm417_vm0, %v1689_v32 }
  0x52   : > { %426 = vst.msk [vmem:[%s1851_s30 + $0x40] sm:$0xff] %vm417_vm0, %v1689_v32 }
  0x53   : > { %427 = vst.msk [vmem:[%s1851_s30 + $0x48] sm:$0xff] %vm417_vm0, %v1689_v32 }
  0x54   : > { %428 = vst.msk [vmem:[%s1851_s30 + $0x50] sm:$0xff] %vm417_vm0, %v1689_v32 }
  0x55   : > { %429 = vst.msk [vmem:[%s1851_s30 + $0x58] sm:$0xff] %vm417_vm0, %v1689_v32 }
  0x56   : > { %430 = vst.msk [vmem:[%s1851_s30 + $0x60] sm:$0xff] %vm417_vm0, %v1689_v32 }
  0x57   : > { %431 = vst.msk [vmem:[%s1851_s30 + $0x68] sm:$0xff] %vm417_vm0, %v1689_v32 }
  0x58   : > { %432 = vst.msk [vmem:[%s1851_s30 + $0x70] sm:$0xff] %vm417_vm0, %v1689_v32 }
  0x59   : > { %433 = vst.msk [vmem:[%s1851_s30 + $0x78] sm:$0xff] %vm417_vm0, %v1689_v32 }
  0x5a   : > { %434 = vst.msk [vmem:[%s1851_s30 + $0x80] sm:$0xff] %vm417_vm0, %v1689_v32 }
  0x5b   : > { %435 = vst.msk [vmem:[%s1851_s30 + $0x88] sm:$0xff] %vm417_vm0, %v1689_v32 }
  0x5c   : > { %436 = vst.msk [vmem:[%s1851_s30 + $0x90] sm:$0xff] %vm417_vm0, %v1689_v32 }
  0x5d   : > { %437 = vst.msk [vmem:[%s1851_s30 + $0x98] sm:$0xff] %vm417_vm0, %v1689_v32 }
  0x5e   : > { %438 = vst.msk [vmem:[%s1851_s30 + $0xa0] sm:$0xff] %vm417_vm0, %v1689_v32 }
  0x5f   : > { %439 = vst.msk [vmem:[%s1851_s30 + $0xa8] sm:$0xff] %vm417_vm0, %v1689_v32 }
  0x60   : > { %440 = vst.msk [vmem:[%s1851_s30 + $0xb0] sm:$0xff] %vm417_vm0, %v1689_v32 }
  0x61   : > { %441 = vst.msk [vmem:[%s1851_s30 + $0xb8] sm:$0xff] %vm417_vm0, %v1689_v32 }
  0x62   : > { %442 = vst.msk [vmem:[%s1851_s30 + $0xc0] sm:$0xff] %vm417_vm0, %v1689_v32 }
  0x63   : > { %443 = vst.msk [vmem:[%s1851_s30 + $0xc8] sm:$0xff] %vm417_vm0, %v1689_v32 }
  0x64   : > { %444 = vst.msk [vmem:[%s1851_s30 + $0xd0] sm:$0xff] %vm417_vm0, %v1689_v32 }
  0x65   : > { %445 = vst.msk [vmem:[%s1851_s30 + $0xd8] sm:$0xff] %vm417_vm0, %v1689_v32 }
  0x66   : > { %446 = vst.msk [vmem:[%s1851_s30 + $0xe0] sm:$0xff] %vm417_vm0, %v1689_v32 }
  0x67   : > { %447 = vst.msk [vmem:[%s1851_s30 + $0xe8] sm:$0xff] %vm417_vm0, %v1689_v32 }
  0x68   : > { %448 = vst.msk [vmem:[%s1851_s30 + $0xf0] sm:$0xff] %vm417_vm0, %v1689_v32 }
  0x69   : > { %449 = vst.msk [vmem:[%s1851_s30 + $0xf8] sm:$0xff] %vm417_vm0, %v1689_v32 }
  0x6a PF: > { %v1549_v33 = vld [vmem:[%s1846_s26 + $0x38] sm:$0xff]  ;;  %v1548_v35 = vld [vmem:[%s1846_s26 + $0x30] sm:$0xff]  ;;  %v1547_v37 = vld [vmem:[%s1846_s26 + $0x28] sm:$0xff]  ;;  %vm1012_vm1 = vcmask 523264   ;;  %p1507_p13 = scmp.ne.s32.totalorder %s1671_s14, 2 }
  0x6b   : > { %v1557_v34 = vld [vmem:[%s1846_s26 + $0x78] sm:$0xff]  ;;  %802 = vmatpush.bf16.msra.mxu0 %v1549_v33  ;;  %1558 = vmatpush.bf16.msra.mxu2 %v1549_v33  ;;  %v1556_v36 = vld [vmem:[%s1846_s26 + $0x70] sm:$0xff]  ;;  %v1555_v38 = vld [vmem:[%s1846_s26 + $0x68] sm:$0xff] }
  0x6c   : > { %891 = vmatpush.bf16.msra.mxu1 %v1557_v34  ;;  %1566 = vmatpush.bf16.msra.mxu3 %v1557_v34  ;;  %v1546_v39 = vld [vmem:[%s1846_s26 + $0x20] sm:$0xff]  ;;  %v1545_v41 = vld [vmem:[%s1846_s26 + $0x18] sm:$0xff]  ;;  %v1544_v43 = vld [vmem:[%s1846_s26 + $0x10] sm:$0xff] }
  0x6d   : > { %v1554_v40 = vld [vmem:[%s1846_s26 + $0x60] sm:$0xff]  ;;  %v1553_v42 = vld [vmem:[%s1846_s26 + $0x58] sm:$0xff]  ;;  %v1552_v44 = vld [vmem:[%s1846_s26 + $0x50] sm:$0xff] }
  0x6e   : > { %v1543_v45 = vld [vmem:[%s1846_s26 + $0x8] sm:$0xff]  ;;  %v1542_v47 = vld [vmem:[%s1846_s26] sm:$0xff]  ;;  %v1325_v61 = vld [vmem:[%s1853_s12 + $0x10] sm:$0xf] }
  0x6f   : > { %803 = vmatpush.bf16.msra.mxu0 %v1548_v35  ;;  %1559 = vmatpush.bf16.msra.mxu2 %v1548_v35  ;;  %v1551_v46 = vld [vmem:[%s1846_s26 + $0x48] sm:$0xff]  ;;  %v1550_v48 = vld [vmem:[%s1846_s26 + $0x40] sm:$0xff]  ;;  %v1513_v62 = vld [vmem:[%s1853_s12 + $0x14] sm:$0xf0] }
  0x70   : > { %892 = vmatpush.bf16.msra.mxu1 %v1556_v36  ;;  %1567 = vmatpush.bf16.msra.mxu3 %v1556_v36  ;;  %v1317_v49 = vld [vmem:[%s1853_s12] sm:$0xf]  ;;  %v1511_v50 = vld [vmem:[%s1853_s12 + $0x4] sm:$0xf0]  ;;  %v1510_v53 = vld [vmem:[%s1853_s12 + $0x4] sm:$0xf]  ;;  %v1326_v5 = vor.u32 %v1513_v62, %v1325_v61 }
  0x71   : > { %v1381_v51 = vld [vmem:[%s1853_s12 + $0x80] sm:$0xf]  ;;  %v1527_v52 = vld [vmem:[%s1853_s12 + $0x84] sm:$0xf0]  ;;  %v1319_v54 = vld [vmem:[%s1853_s12 + $0x8] sm:$0xf0]  ;;  %v1318_v57 = vor.u32 %v1511_v50, %v1317_v49 }
  0x72   : > { %v1526_v55 = vld [vmem:[%s1853_s12 + $0x84] sm:$0xf]  ;;  %v1383_v56 = vld [vmem:[%s1853_s12 + $0x88] sm:$0xf0]  ;;  %v1382_v58 = vor.u32 %v1527_v52, %v1381_v51  ;;  %v1322_v59 = vor.u32 %v1510_v53, %v1319_v54  ;;  %v1389_v63 = vld [vmem:[%s1853_s12 + $0x90] sm:$0xf] }
  0x73   : > { %804 = vmatpush.bf16.msra.mxu0 %v1547_v37  ;;  %1560 = vmatpush.bf16.msra.mxu2 %v1547_v37  ;;  %v1386_v60 = vor.u32 %v1526_v55, %v1383_v56  ;;  %v1529_v0 = vld [vmem:[%s1853_s12 + $0x94] sm:$0xf0]  ;;  %v1512_v1 = vld [vmem:[%s1853_s12 + $0x14] sm:$0xf]  ;;  %v1327_v2 = vld [vmem:[%s1853_s12 + $0x18] sm:$0xf0] }
  0x74   : > { %893 = vmatpush.bf16.msra.mxu1 %v1555_v38  ;;  %1568 = vmatpush.bf16.msra.mxu3 %v1555_v38  ;;  %v1528_v3 = vld [vmem:[%s1853_s12 + $0x94] sm:$0xf]  ;;  %v1391_v4 = vld [vmem:[%s1853_s12 + $0x98] sm:$0xf0]  ;;  %v1390_v6 = vor.u32 %v1529_v0, %v1389_v63  ;;  %v1330_v7 = vor.u32 %v1512_v1, %v1327_v2  ;;  %v1333_v9 = vld [vmem:[%s1853_s12 + $0x20] sm:$0xf] }
  0x75   : > { %v1394_v8 = vor.u32 %v1528_v3, %v1391_v4  ;;  %v1515_v10 = vld [vmem:[%s1853_s12 + $0x24] sm:$0xf0]  ;;  %v1397_v11 = vld [vmem:[%s1853_s12 + $0xa0] sm:$0xf]  ;;  %v1514_v13 = vld [vmem:[%s1853_s12 + $0x24] sm:$0xf] }
  0x76   : > { %v1531_v12 = vld [vmem:[%s1853_s12 + $0xa4] sm:$0xf0]  ;;  %v1335_v14 = vld [vmem:[%s1853_s12 + $0x28] sm:$0xf0]  ;;  %v1530_v15 = vld [vmem:[%s1853_s12 + $0xa4] sm:$0xf]  ;;  %v1334_v17 = vor.u32 %v1515_v10, %v1333_v9 }
  0x77   : > { %805 = vmatpush.bf16.msra.mxu0 %v1546_v39  ;;  %1561 = vmatpush.bf16.msra.mxu2 %v1546_v39  ;;  %v1399_v16 = vld [vmem:[%s1853_s12 + $0xa8] sm:$0xf0]  ;;  %v1398_v18 = vor.u32 %v1531_v12, %v1397_v11  ;;  %v1338_v19 = vor.u32 %v1514_v13, %v1335_v14  ;;  %v1341_v21 = vld [vmem:[%s1853_s12 + $0x30] sm:$0xf]  ;;  %v1517_v22 = vld [vmem:[%s1853_s12 + $0x34] sm:$0xf0] }
  0x78   : > { %894 = vmatpush.bf16.msra.mxu1 %v1554_v40  ;;  %1569 = vmatpush.bf16.msra.mxu3 %v1554_v40  ;;  %v1402_v20 = vor.u32 %v1530_v15, %v1399_v16  ;;  %v1405_v23 = vld [vmem:[%s1853_s12 + $0xb0] sm:$0xf]  ;;  %v1533_v24 = vld [vmem:[%s1853_s12 + $0xb4] sm:$0xf0]  ;;  %v1516_v25 = vld [vmem:[%s1853_s12 + $0x34] sm:$0xf]  ;;  %v1342_v29 = vor.u32 %v1517_v22, %v1341_v21 }
  0x79   : > { %v1343_v26 = vld [vmem:[%s1853_s12 + $0x38] sm:$0xf0]  ;;  %v1532_v27 = vld [vmem:[%s1853_s12 + $0xb4] sm:$0xf]  ;;  %v1406_v30 = vor.u32 %v1533_v24, %v1405_v23  ;;  %v1349_v33 = vld [vmem:[%s1853_s12 + $0x40] sm:$0xf] }
  0x7a   : > { %v1407_v28 = vld [vmem:[%s1853_s12 + $0xb8] sm:$0xf0]  ;;  %v1346_v31 = vor.u32 %v1516_v25, %v1343_v26  ;;  %v1519_v34 = vld [vmem:[%s1853_s12 + $0x44] sm:$0xf0]  ;;  %v1413_v35 = vld [vmem:[%s1853_s12 + $0xc0] sm:$0xf] }
  0x7b   : > { %806 = vmatpush.bf16.msra.mxu0 %v1545_v41  ;;  %1562 = vmatpush.bf16.msra.mxu2 %v1545_v41  ;;  %v1410_v32 = vor.u32 %v1532_v27, %v1407_v28  ;;  %v1535_v36 = vld [vmem:[%s1853_s12 + $0xc4] sm:$0xf0]  ;;  %v1518_v37 = vld [vmem:[%s1853_s12 + $0x44] sm:$0xf]  ;;  %v1351_v38 = vld [vmem:[%s1853_s12 + $0x48] sm:$0xf0]  ;;  %v1350_v41 = vor.u32 %v1519_v34, %v1349_v33 }
  0x7c   : > { %895 = vmatpush.bf16.msra.mxu1 %v1553_v42  ;;  %1570 = vmatpush.bf16.msra.mxu3 %v1553_v42  ;;  %v1534_v39 = vld [vmem:[%s1853_s12 + $0xc4] sm:$0xf]  ;;  %v1415_v40 = vld [vmem:[%s1853_s12 + $0xc8] sm:$0xf0]  ;;  %v1414_v42 = vor.u32 %v1535_v36, %v1413_v35  ;;  %v1520_v49 = vld [vmem:[%s1853_s12 + $0x54] sm:$0xf] }
  0x7d   : > { %v1359_v50 = vld [vmem:[%s1853_s12 + $0x58] sm:$0xf0]  ;;  %v1536_v51 = vld [vmem:[%s1853_s12 + $0xd4] sm:$0xf]  ;;  %v1522_v61 = vld [vmem:[%s1853_s12 + $0x64] sm:$0xf] }
  0x7e   : > { %v1423_v52 = vld [vmem:[%s1853_s12 + $0xd8] sm:$0xf0]  ;;  %v1362_v55 = vor.u32 %v1520_v49, %v1359_v50  ;;  %v1367_v62 = vld [vmem:[%s1853_s12 + $0x68] sm:$0xf0]  ;;  %v1538_v63 = vld [vmem:[%s1853_s12 + $0xe4] sm:$0xf] }
  0x7f   : > { %807 = vmatpush.bf16.msra.mxu0 %v1544_v43  ;;  %1563 = vmatpush.bf16.msra.mxu2 %v1544_v43  ;;  %v1354_v43 = vor.u32 %v1518_v37, %v1351_v38  ;;  %v1426_v56 = vor.u32 %v1536_v51, %v1423_v52  ;;  %v1431_v0 = vld [vmem:[%s1853_s12 + $0xe8] sm:$0xf0]  ;;  %v1370_v3 = vor.u32 %v1522_v61, %v1367_v62  ;;  %v1524_v9 = vld [vmem:[%s1853_s12 + $0x74] sm:$0xf]  ;;  %v1375_v10 = vld [vmem:[%s1853_s12 + $0x78] sm:$0xf0] }
  0x80   : > { %896 = vmatpush.bf16.msra.mxu1 %v1552_v44  ;;  %1571 = vmatpush.bf16.msra.mxu3 %v1552_v44  ;;  %v1418_v44 = vor.u32 %v1534_v39, %v1415_v40  ;;  %v1434_v4 = vor.u32 %v1538_v63, %v1431_v0  ;;  %v1540_v11 = vld [vmem:[%s1853_s12 + $0xf4] sm:$0xf]  ;;  %v1439_v12 = vld [vmem:[%s1853_s12 + $0xf8] sm:$0xf0]  ;;  %v1378_v15 = vor.u32 %v1524_v9, %v1375_v10  ;;  %v466_v23 = vld [vmem:[%s1851_s30 + $0x80] sm:$0xff] }
  0x81   : > { %v1442_v16 = vor.u32 %v1540_v11, %v1439_v12  ;;  %v451_v27 = vld [vmem:[%s1851_s30 + $0x8] sm:$0xff]  ;;  %v452_v37 = vld [vmem:[%s1851_s30 + $0x10] sm:$0xff]  ;;  %v470_v63 = vld [vmem:[%s1851_s30 + $0xa0] sm:$0xff] }
  0x82   : > { %v467_v33 = vld [vmem:[%s1851_s30 + $0x88] sm:$0xff] }
  0x83   : > { %808 = vmatpush.bf16.msra.mxu0 %v1543_v45  ;;  %1564 = vmatpush.bf16.msra.mxu2 %v1543_v45  ;;  %v1357_v45 = vld [vmem:[%s1853_s12 + $0x50] sm:$0xf]  ;;  %v471_v9 = vld [vmem:[%s1851_s30 + $0xa8] sm:$0xff] }
  0x84   : > { %897 = vmatpush.bf16.msra.mxu1 %v1551_v46  ;;  %1572 = vmatpush.bf16.msra.mxu3 %v1551_v46  ;;  %v1521_v46 = vld [vmem:[%s1853_s12 + $0x54] sm:$0xf0] }
  0x85   : > { %v1358_v53 = vor.u32 %v1521_v46, %v1357_v45 }
  0x87   : > { %809 = vmatpush.bf16.msra.mxu0 %v1542_v47  ;;  %1565 = vmatpush.bf16.msra.mxu2 %v1542_v47  ;;  %v1421_v47 = vld [vmem:[%s1853_s12 + $0xd0] sm:$0xf] }
  0x88   : > { %898 = vmatpush.bf16.msra.mxu1 %v1550_v48  ;;  %1573 = vmatpush.bf16.msra.mxu3 %v1550_v48  ;;  %v1537_v48 = vld [vmem:[%s1853_s12 + $0xd4] sm:$0xf0] }
  0x89   : > { %v1422_v54 = vor.u32 %v1537_v48, %v1421_v47  ;;  %v453_v47 = vld [vmem:[%s1851_s30 + $0x18] sm:$0xff] }
  0x8a   : > { %810 = vmatmul.bf16.vlgmr.msra.gmra.mxu0 %v1318_v57  ;;  %850 = vmatmul.bf16.vlgmr.msra.gmra.mxu2 %v1382_v58  ;;  %v1365_v57 = vld [vmem:[%s1853_s12 + $0x60] sm:$0xf]  ;;  %v1523_v58 = vld [vmem:[%s1853_s12 + $0x64] sm:$0xf0] }
  0x8b   : > { %899 = vmatmul.bf16.vlgmr.msra.gmra.mxu1 %v1322_v59  ;;  %939 = vmatmul.bf16.vlgmr.msra.gmra.mxu3 %v1386_v60  ;;  %v1429_v59 = vld [vmem:[%s1853_s12 + $0xe0] sm:$0xf]  ;;  %v1539_v60 = vld [vmem:[%s1853_s12 + $0xe4] sm:$0xf0]  ;;  %v1366_v1 = vor.u32 %v1523_v58, %v1365_v57 }
  0x8c   : > { %v1430_v2 = vor.u32 %v1539_v60, %v1429_v59  ;;  %v454_v57 = vld [vmem:[%s1851_s30 + $0x20] sm:$0xff] }
  0x9a   : > { %815 = vmatmul.bf16.gmra.mxu0 %v1326_v5  ;;  %855 = vmatmul.bf16.gmra.mxu2 %v1390_v6  ;;  %v1373_v5 = vld [vmem:[%s1853_s12 + $0x70] sm:$0xf]  ;;  %v1525_v6 = vld [vmem:[%s1853_s12 + $0x74] sm:$0xf0] }
  0x9b   : > { %904 = vmatmul.bf16.gmra.mxu1 %v1330_v7  ;;  %944 = vmatmul.bf16.gmra.mxu3 %v1394_v8  ;;  %v1437_v7 = vld [vmem:[%s1853_s12 + $0xf0] sm:$0xf]  ;;  %v1541_v8 = vld [vmem:[%s1853_s12 + $0xf4] sm:$0xf0]  ;;  %v1374_v13 = vor.u32 %v1525_v6, %v1373_v5 }
  0x9c   : > { %v1438_v14 = vor.u32 %v1541_v8, %v1437_v7 }
  0xaa   : > { %820 = vmatmul.bf16.gmra.mxu0 %v1334_v17  ;;  %860 = vmatmul.bf16.gmra.mxu2 %v1398_v18  ;;  %v450_v18 = vld [vmem:[%s1851_s30] sm:$0xff] }
  0xab   : > { %909 = vmatmul.bf16.gmra.mxu1 %v1338_v19  ;;  %949 = vmatmul.bf16.gmra.mxu3 %v1402_v20 }
  0xba   : > { %825 = vmatmul.bf16.gmra.mxu0 %v1342_v29  ;;  %865 = vmatmul.bf16.gmra.mxu2 %v1406_v30 }
  0xbb   : > { %914 = vmatmul.bf16.gmra.mxu1 %v1346_v31  ;;  %954 = vmatmul.bf16.gmra.mxu3 %v1410_v32 }
  0xca   : > { %830 = vmatmul.bf16.gmra.mxu0 %v1350_v41  ;;  %870 = vmatmul.bf16.gmra.mxu2 %v1414_v42 }
  0xcb   : > { %919 = vmatmul.bf16.gmra.mxu1 %v1354_v43  ;;  %959 = vmatmul.bf16.gmra.mxu3 %v1418_v44  ;;  %v468_v43 = vld [vmem:[%s1851_s30 + $0x90] sm:$0xff] }
  0xda   : > { %835 = vmatmul.bf16.gmra.mxu0 %v1358_v53  ;;  %875 = vmatmul.bf16.gmra.mxu2 %v1422_v54  ;;  %v469_v53 = vld [vmem:[%s1851_s30 + $0x98] sm:$0xff] }
  0xdb   : > { %924 = vmatmul.bf16.gmra.mxu1 %v1362_v55  ;;  %964 = vmatmul.bf16.gmra.mxu3 %v1426_v56 }
  0xea   : > { %840 = vmatmul.bf16.gmra.mxu0 %v1366_v1  ;;  %880 = vmatmul.bf16.gmra.mxu2 %v1430_v2 }
  0xeb   : > { %929 = vmatmul.bf16.gmra.mxu1 %v1370_v3  ;;  %969 = vmatmul.bf16.gmra.mxu3 %v1434_v4  ;;  %v455_v3 = vld [vmem:[%s1851_s30 + $0x28] sm:$0xff] }
  0xfa   : > { %845 = vmatmul.bf16.gmra.mxu0 %v1374_v13  ;;  %885 = vmatmul.bf16.gmra.mxu2 %v1438_v14  ;;  %v456_v13 = vld [vmem:[%s1851_s30 + $0x30] sm:$0xff] }
  0xfb   : > { %934 = vmatmul.bf16.gmra.mxu1 %v1378_v15  ;;  %974 = vmatmul.bf16.gmra.mxu3 %v1442_v16 }
 0x107   : > { %v811_v17 = vpop.f32.mrf.mxu0 }
 0x108   : > { %v900_v19 = vpop.f32.mrf.mxu1 }
 0x109   : > { %v901_v20 = vadd.f32 %v900_v19, %v811_v17  ;;  %v472_v19 = vld [vmem:[%s1851_s30 + $0xb0] sm:$0xff] }
 0x10b   : > { %v980_v21 = vadd.f32 %v901_v20, %v450_v18 }
 0x10d   : > { %1013 = vst.msk [vmem:[%s1851_s30] sm:$0xff] %vm1012_vm1, %v980_v21  ;;  %v851_v22 = vpop.f32.mrf.mxu2 }
 0x10e   : > { %v940_v24 = vpop.f32.mrf.mxu3 }
 0x10f   : > { %v941_v25 = vadd.f32 %v940_v24, %v851_v22  ;;  %v813_v26 = vpop.f32.mrf.mxu0 }
 0x110   : > { %v902_v28 = vpop.f32.mrf.mxu1 }
 0x111   : > { %v996_v29 = vadd.f32 %v941_v25, %v466_v23  ;;  %v903_v30 = vadd.f32 %v902_v28, %v813_v26  ;;  %v457_v23 = vld [vmem:[%s1851_s30 + $0x38] sm:$0xff] }
 0x113   : > { %1029 = vst.msk [vmem:[%s1851_s30 + $0x80] sm:$0xff] %vm1012_vm1, %v996_v29  ;;  %v981_v31 = vadd.f32 %v903_v30, %v451_v27  ;;  %v473_v29 = vld [vmem:[%s1851_s30 + $0xb8] sm:$0xff] }
 0x115   : > { %1014 = vst.msk [vmem:[%s1851_s30 + $0x8] sm:$0xff] %vm1012_vm1, %v981_v31  ;;  %v853_v32 = vpop.f32.mrf.mxu2 }
 0x116   : > { %v942_v34 = vpop.f32.mrf.mxu3 }
 0x117   : > { %v943_v35 = vadd.f32 %v942_v34, %v853_v32  ;;  %v816_v36 = vpop.f32.mrf.mxu0 }
 0x118   : > { %v905_v38 = vpop.f32.mrf.mxu1 }
 0x119   : > { %v997_v39 = vadd.f32 %v943_v35, %v467_v33  ;;  %v906_v40 = vadd.f32 %v905_v38, %v816_v36  ;;  %v458_v33 = vld [vmem:[%s1851_s30 + $0x40] sm:$0xff] }
 0x11b   : > { %1030 = vst.msk [vmem:[%s1851_s30 + $0x88] sm:$0xff] %vm1012_vm1, %v997_v39  ;;  %v982_v41 = vadd.f32 %v906_v40, %v452_v37  ;;  %v474_v39 = vld [vmem:[%s1851_s30 + $0xc0] sm:$0xff] }
 0x11d   : > { %1015 = vst.msk [vmem:[%s1851_s30 + $0x10] sm:$0xff] %vm1012_vm1, %v982_v41  ;;  %v856_v42 = vpop.f32.mrf.mxu2 }
 0x11e   : > { %v945_v44 = vpop.f32.mrf.mxu3 }
 0x11f   : > { %v946_v45 = vadd.f32 %v945_v44, %v856_v42  ;;  %v818_v46 = vpop.f32.mrf.mxu0 }
 0x120   : > { %v907_v48 = vpop.f32.mrf.mxu1 }
 0x121   : > { %v998_v49 = vadd.f32 %v946_v45, %v468_v43  ;;  %v908_v50 = vadd.f32 %v907_v48, %v818_v46  ;;  %v459_v43 = vld [vmem:[%s1851_s30 + $0x48] sm:$0xff] }
 0x123   : > { %1031 = vst.msk [vmem:[%s1851_s30 + $0x90] sm:$0xff] %vm1012_vm1, %v998_v49  ;;  %v983_v51 = vadd.f32 %v908_v50, %v453_v47  ;;  %v475_v49 = vld [vmem:[%s1851_s30 + $0xc8] sm:$0xff] }
 0x125   : > { %1016 = vst.msk [vmem:[%s1851_s30 + $0x18] sm:$0xff] %vm1012_vm1, %v983_v51  ;;  %v858_v52 = vpop.f32.mrf.mxu2 }
 0x126   : > { %v947_v54 = vpop.f32.mrf.mxu3 }
 0x127   : > { %v948_v55 = vadd.f32 %v947_v54, %v858_v52  ;;  %v821_v56 = vpop.f32.mrf.mxu0 }
 0x128   : > { %v910_v58 = vpop.f32.mrf.mxu1 }
 0x129   : > { %v999_v59 = vadd.f32 %v948_v55, %v469_v53  ;;  %v911_v60 = vadd.f32 %v910_v58, %v821_v56  ;;  %v460_v53 = vld [vmem:[%s1851_s30 + $0x50] sm:$0xff] }
 0x12b   : > { %1032 = vst.msk [vmem:[%s1851_s30 + $0x98] sm:$0xff] %vm1012_vm1, %v999_v59  ;;  %v984_v61 = vadd.f32 %v911_v60, %v454_v57  ;;  %v476_v59 = vld [vmem:[%s1851_s30 + $0xd0] sm:$0xff] }
 0x12d   : > { %1017 = vst.msk [vmem:[%s1851_s30 + $0x20] sm:$0xff] %vm1012_vm1, %v984_v61  ;;  %v861_v62 = vpop.f32.mrf.mxu2 }
 0x12e   : > { %v950_v0 = vpop.f32.mrf.mxu3 }
 0x12f   : > { %v951_v1 = vadd.f32 %v950_v0, %v861_v62  ;;  %v823_v2 = vpop.f32.mrf.mxu0 }
 0x130   : > { %v912_v4 = vpop.f32.mrf.mxu1 }
 0x131   : > { %v1000_v5 = vadd.f32 %v951_v1, %v470_v63  ;;  %v913_v6 = vadd.f32 %v912_v4, %v823_v2  ;;  %v461_v63 = vld [vmem:[%s1851_s30 + $0x58] sm:$0xff] }
 0x133   : > { %1033 = vst.msk [vmem:[%s1851_s30 + $0xa0] sm:$0xff] %vm1012_vm1, %v1000_v5  ;;  %v985_v7 = vadd.f32 %v913_v6, %v455_v3  ;;  %v477_v5 = vld [vmem:[%s1851_s30 + $0xd8] sm:$0xff] }
 0x135   : > { %1018 = vst.msk [vmem:[%s1851_s30 + $0x28] sm:$0xff] %vm1012_vm1, %v985_v7  ;;  %v863_v8 = vpop.f32.mrf.mxu2 }
 0x136   : > { %v952_v10 = vpop.f32.mrf.mxu3 }
 0x137   : > { %v953_v11 = vadd.f32 %v952_v10, %v863_v8  ;;  %v826_v12 = vpop.f32.mrf.mxu0 }
 0x138   : > { %v915_v14 = vpop.f32.mrf.mxu1 }
 0x139   : > { %v1001_v15 = vadd.f32 %v953_v11, %v471_v9  ;;  %v916_v16 = vadd.f32 %v915_v14, %v826_v12  ;;  %v462_v9 = vld [vmem:[%s1851_s30 + $0x60] sm:$0xff] }
 0x13b   : > { %1034 = vst.msk [vmem:[%s1851_s30 + $0xa8] sm:$0xff] %vm1012_vm1, %v1001_v15  ;;  %v986_v17 = vadd.f32 %v916_v16, %v456_v13  ;;  %v478_v15 = vld [vmem:[%s1851_s30 + $0xe0] sm:$0xff] }
 0x13d   : > { %1019 = vst.msk [vmem:[%s1851_s30 + $0x30] sm:$0xff] %vm1012_vm1, %v986_v17  ;;  %v866_v18 = vpop.f32.mrf.mxu2 }
 0x13e   : > { %v955_v20 = vpop.f32.mrf.mxu3 }
 0x13f   : > { %v956_v21 = vadd.f32 %v955_v20, %v866_v18  ;;  %v828_v22 = vpop.f32.mrf.mxu0 }
 0x140   : > { %v917_v24 = vpop.f32.mrf.mxu1 }
 0x141   : > { %v1002_v25 = vadd.f32 %v956_v21, %v472_v19  ;;  %v918_v26 = vadd.f32 %v917_v24, %v828_v22  ;;  %v463_v19 = vld [vmem:[%s1851_s30 + $0x68] sm:$0xff] }
 0x143   : > { %1035 = vst.msk [vmem:[%s1851_s30 + $0xb0] sm:$0xff] %vm1012_vm1, %v1002_v25  ;;  %v987_v27 = vadd.f32 %v918_v26, %v457_v23  ;;  %v479_v25 = vld [vmem:[%s1851_s30 + $0xe8] sm:$0xff] }
 0x145   : > { %1020 = vst.msk [vmem:[%s1851_s30 + $0x38] sm:$0xff] %vm1012_vm1, %v987_v27  ;;  %v868_v28 = vpop.f32.mrf.mxu2 }
 0x146   : > { %v957_v30 = vpop.f32.mrf.mxu3 }
 0x147   : > { %v958_v31 = vadd.f32 %v957_v30, %v868_v28  ;;  %v831_v32 = vpop.f32.mrf.mxu0 }
 0x148   : > { %v920_v34 = vpop.f32.mrf.mxu1 }
 0x149   : > { %v1003_v35 = vadd.f32 %v958_v31, %v473_v29  ;;  %v921_v36 = vadd.f32 %v920_v34, %v831_v32  ;;  %v464_v29 = vld [vmem:[%s1851_s30 + $0x70] sm:$0xff] }
 0x14b   : > { %1036 = vst.msk [vmem:[%s1851_s30 + $0xb8] sm:$0xff] %vm1012_vm1, %v1003_v35  ;;  %v988_v37 = vadd.f32 %v921_v36, %v458_v33  ;;  %v480_v35 = vld [vmem:[%s1851_s30 + $0xf0] sm:$0xff] }
 0x14d   : > { %1021 = vst.msk [vmem:[%s1851_s30 + $0x40] sm:$0xff] %vm1012_vm1, %v988_v37  ;;  %v871_v38 = vpop.f32.mrf.mxu2 }
 0x14e   : > { %v960_v40 = vpop.f32.mrf.mxu3 }
 0x14f   : > { %v961_v41 = vadd.f32 %v960_v40, %v871_v38  ;;  %v833_v42 = vpop.f32.mrf.mxu0 }
 0x150   : > { %v922_v44 = vpop.f32.mrf.mxu1 }
 0x151   : > { %v1004_v45 = vadd.f32 %v961_v41, %v474_v39  ;;  %v923_v46 = vadd.f32 %v922_v44, %v833_v42  ;;  %v465_v39 = vld [vmem:[%s1851_s30 + $0x78] sm:$0xff] }
 0x153   : > { %1037 = vst.msk [vmem:[%s1851_s30 + $0xc0] sm:$0xff] %vm1012_vm1, %v1004_v45  ;;  %v989_v47 = vadd.f32 %v923_v46, %v459_v43  ;;  %v481_v45 = vld [vmem:[%s1851_s30 + $0xf8] sm:$0xff] }
 0x155   : > { %1022 = vst.msk [vmem:[%s1851_s30 + $0x48] sm:$0xff] %vm1012_vm1, %v989_v47  ;;  %v873_v48 = vpop.f32.mrf.mxu2 }
 0x156   : > { %v962_v50 = vpop.f32.mrf.mxu3 }
 0x157   : > { %v963_v51 = vadd.f32 %v962_v50, %v873_v48  ;;  %v836_v52 = vpop.f32.mrf.mxu0 }
 0x158   : > { %v925_v54 = vpop.f32.mrf.mxu1 }
 0x159   : > { %v1005_v55 = vadd.f32 %v963_v51, %v475_v49  ;;  %v926_v56 = vadd.f32 %v925_v54, %v836_v52 }
 0x15b   : > { %1038 = vst.msk [vmem:[%s1851_s30 + $0xc8] sm:$0xff] %vm1012_vm1, %v1005_v55  ;;  %v990_v57 = vadd.f32 %v926_v56, %v460_v53 }
 0x15d   : > { %1023 = vst.msk [vmem:[%s1851_s30 + $0x50] sm:$0xff] %vm1012_vm1, %v990_v57  ;;  %v876_v58 = vpop.f32.mrf.mxu2 }
 0x15e   : > { %v965_v60 = vpop.f32.mrf.mxu3 }
 0x15f   : > { %v966_v61 = vadd.f32 %v965_v60, %v876_v58  ;;  %v838_v62 = vpop.f32.mrf.mxu0 }
 0x160   : > { %v927_v0 = vpop.f32.mrf.mxu1 }
 0x161   : > { %v1006_v1 = vadd.f32 %v966_v61, %v476_v59  ;;  %v928_v2 = vadd.f32 %v927_v0, %v838_v62 }
 0x163   : > { %1039 = vst.msk [vmem:[%s1851_s30 + $0xd0] sm:$0xff] %vm1012_vm1, %v1006_v1  ;;  %v991_v3 = vadd.f32 %v928_v2, %v461_v63 }
 0x165   : > { %1024 = vst.msk [vmem:[%s1851_s30 + $0x58] sm:$0xff] %vm1012_vm1, %v991_v3  ;;  %v878_v4 = vpop.f32.mrf.mxu2 }
 0x166   : > { %v967_v6 = vpop.f32.mrf.mxu3 }
 0x167   : > { %v968_v7 = vadd.f32 %v967_v6, %v878_v4  ;;  %v841_v8 = vpop.f32.mrf.mxu0 }
 0x168   : > { %v930_v10 = vpop.f32.mrf.mxu1 }
 0x169   : > { %v1007_v11 = vadd.f32 %v968_v7, %v477_v5  ;;  %v931_v12 = vadd.f32 %v930_v10, %v841_v8 }
 0x16b   : > { %1040 = vst.msk [vmem:[%s1851_s30 + $0xd8] sm:$0xff] %vm1012_vm1, %v1007_v11  ;;  %v992_v13 = vadd.f32 %v931_v12, %v462_v9 }
 0x16d   : > { %1025 = vst.msk [vmem:[%s1851_s30 + $0x60] sm:$0xff] %vm1012_vm1, %v992_v13  ;;  %v881_v14 = vpop.f32.mrf.mxu2 }
 0x16e   : > { %v970_v16 = vpop.f32.mrf.mxu3 }
 0x16f   : > { %v971_v17 = vadd.f32 %v970_v16, %v881_v14  ;;  %v843_v18 = vpop.f32.mrf.mxu0 }
 0x170   : > { %v932_v20 = vpop.f32.mrf.mxu1 }
 0x171   : > { %v1008_v21 = vadd.f32 %v971_v17, %v478_v15  ;;  %v933_v22 = vadd.f32 %v932_v20, %v843_v18 }
 0x173   : > { %1041 = vst.msk [vmem:[%s1851_s30 + $0xe0] sm:$0xff] %vm1012_vm1, %v1008_v21  ;;  %v993_v23 = vadd.f32 %v933_v22, %v463_v19 }
 0x175   : > { %1026 = vst.msk [vmem:[%s1851_s30 + $0x68] sm:$0xff] %vm1012_vm1, %v993_v23  ;;  %v883_v24 = vpop.f32.mrf.mxu2 }
 0x176   : > { %v972_v26 = vpop.f32.mrf.mxu3 }
 0x177   : > { %v973_v27 = vadd.f32 %v972_v26, %v883_v24  ;;  %v846_v28 = vpop.f32.mrf.mxu0 }
 0x178   : > { %v935_v30 = vpop.f32.mrf.mxu1 }
 0x179   : > { %v1009_v31 = vadd.f32 %v973_v27, %v479_v25  ;;  %v936_v32 = vadd.f32 %v935_v30, %v846_v28 }
 0x17b   : > { %1042 = vst.msk [vmem:[%s1851_s30 + $0xe8] sm:$0xff] %vm1012_vm1, %v1009_v31  ;;  %v994_v33 = vadd.f32 %v936_v32, %v464_v29 }
 0x17d   : > { %1027 = vst.msk [vmem:[%s1851_s30 + $0x70] sm:$0xff] %vm1012_vm1, %v994_v33  ;;  %v886_v34 = vpop.f32.mrf.mxu2 }
 0x17e   : > { %v975_v36 = vpop.f32.mrf.mxu3 }
 0x17f   : > { %v976_v37 = vadd.f32 %v975_v36, %v886_v34  ;;  %v848_v38 = vpop.f32.mrf.mxu0 }
 0x180   : > { %v937_v40 = vpop.f32.mrf.mxu1 }
 0x181   : > { %v1010_v41 = vadd.f32 %v976_v37, %v480_v35  ;;  %v938_v42 = vadd.f32 %v937_v40, %v848_v38 }
 0x183   : > { %1043 = vst.msk [vmem:[%s1851_s30 + $0xf0] sm:$0xff] %vm1012_vm1, %v1010_v41  ;;  %v995_v43 = vadd.f32 %v938_v42, %v465_v39 }
 0x185   : > { %1028 = vst.msk [vmem:[%s1851_s30 + $0x78] sm:$0xff] %vm1012_vm1, %v995_v43  ;;  %v888_v44 = vpop.f32.mrf.mxu2 }
 0x186   : > { %v977_v46 = vpop.f32.mrf.mxu3 }
 0x187   : > { %v978_v47 = vadd.f32 %v977_v46, %v888_v44  ;;  %1048 = sbr.rel (%p1507_p13) target bundleno = 434 (0x1b2), region = 78 }
 0x189   : > { %v1011_v48 = vadd.f32 %v978_v47, %v481_v45 }
 0x18b   : > { %1044 = vst.msk [vmem:[%s1851_s30 + $0xf8] sm:$0xff] %vm1012_vm1, %v1011_v48 }
 0x18c   : > { %v1049_v49 = vld [vmem:[%s1851_s30] sm:$0xff]  ;;  %v1050_v51 = vld [vmem:[%s1851_s30 + $0x8] sm:$0xff]  ;;  %v1051_v52 = vld [vmem:[%s1851_s30 + $0x10] sm:$0xff] }
 0x18d   : > { %v2101_v50 = vld [vmem:[%s2253_s2] ss:$0 sm:$0xff]  ;;  %v1052_v53 = vld [vmem:[%s1851_s30 + $0x18] sm:$0xff]  ;;  %v1054_v59 = vld [vmem:[%s1851_s30 + $0x28] sm:$0xff] }
 0x18e   : > { %v1085_v54 = vadd.f32 %v2101_v50, %v1049_v49  ;;  %v1086_v55 = vadd.f32 %v2101_v50, %v1050_v51  ;;  %v1087_v56 = vadd.f32 %v2101_v50, %v1051_v52  ;;  %v1088_v57 = vadd.f32 %v2101_v50, %v1052_v53  ;;  %v1053_v58 = vld [vmem:[%s1851_s30 + $0x20] sm:$0xff]  ;;  %v1055_v60 = vld [vmem:[%s1851_s30 + $0x30] sm:$0xff]  ;;  %v1056_v63 = vld [vmem:[%s1851_s30 + $0x38] sm:$0xff] }
 0x18f   : > { %v1089_v61 = vadd.f32 %v2101_v50, %v1053_v58  ;;  %v1090_v62 = vadd.f32 %v2101_v50, %v1054_v59  ;;  %v1057_v0 = vld [vmem:[%s1851_s30 + $0x40] sm:$0xff]  ;;  %v1091_v4 = vadd.f32 %v2101_v50, %v1055_v60  ;;  %v1058_v5 = vld [vmem:[%s1851_s30 + $0x48] sm:$0xff]  ;;  %v1092_v7 = vadd.f32 %v2101_v50, %v1056_v63  ;;  %v1059_v8 = vld [vmem:[%s1851_s30 + $0x50] sm:$0xff] }
 0x190   : > { %v1117_v1 = vmax.f32 %v1085_v54, 0.0  ;;  %v1118_v2 = vmax.f32 %v1086_v55, 0.0  ;;  %v1119_v3 = vmax.f32 %v1087_v56, 0.0  ;;  %v1120_v6 = vmax.f32 %v1088_v57, 0.0  ;;  %v1060_v11 = vld [vmem:[%s1851_s30 + $0x58] sm:$0xff]  ;;  %v1061_v14 = vld [vmem:[%s1851_s30 + $0x60] sm:$0xff] }
 0x191   : > { %v1121_v9 = vmax.f32 %v1089_v61, 0.0  ;;  %v1093_v10 = vadd.f32 %v2101_v50, %v1057_v0  ;;  %v1122_v12 = vmax.f32 %v1090_v62, 0.0  ;;  %v1094_v13 = vadd.f32 %v2101_v50, %v1058_v5  ;;  %v1062_v17 = vld [vmem:[%s1851_s30 + $0x68] sm:$0xff]  ;;  %v1063_v20 = vld [vmem:[%s1851_s30 + $0x70] sm:$0xff]  ;;  %v1064_v23 = vld [vmem:[%s1851_s30 + $0x78] sm:$0xff] }
 0x192   : > { %1149 = vst.msk [vmem:[%s1851_s30] sm:$0xff] %vm1012_vm1, %v1117_v1  ;;  %v1123_v15 = vmax.f32 %v1091_v4, 0.0  ;;  %v1095_v16 = vadd.f32 %v2101_v50, %v1059_v8  ;;  %v1124_v18 = vmax.f32 %v1092_v7, 0.0  ;;  %v1096_v19 = vadd.f32 %v2101_v50, %v1060_v11  ;;  %v1065_v26 = vld [vmem:[%s1851_s30 + $0x80] sm:$0xff]  ;;  %v1066_v29 = vld [vmem:[%s1851_s30 + $0x88] sm:$0xff]  ;;  %v1067_v32 = vld [vmem:[%s1851_s30 + $0x90] sm:$0xff] }
 0x193   : > { %1150 = vst.msk [vmem:[%s1851_s30 + $0x8] sm:$0xff] %vm1012_vm1, %v1118_v2  ;;  %v1125_v21 = vmax.f32 %v1093_v10, 0.0  ;;  %v1097_v22 = vadd.f32 %v2101_v50, %v1061_v14  ;;  %v1126_v24 = vmax.f32 %v1094_v13, 0.0  ;;  %v1098_v25 = vadd.f32 %v2101_v50, %v1062_v17  ;;  %v1068_v35 = vld [vmem:[%s1851_s30 + $0x98] sm:$0xff]  ;;  %v1069_v38 = vld [vmem:[%s1851_s30 + $0xa0] sm:$0xff]  ;;  %v1070_v41 = vld [vmem:[%s1851_s30 + $0xa8] sm:$0xff] }
 0x194   : > { %1151 = vst.msk [vmem:[%s1851_s30 + $0x10] sm:$0xff] %vm1012_vm1, %v1119_v3  ;;  %v1127_v27 = vmax.f32 %v1095_v16, 0.0  ;;  %v1099_v28 = vadd.f32 %v2101_v50, %v1063_v20  ;;  %v1128_v30 = vmax.f32 %v1096_v19, 0.0  ;;  %v1100_v31 = vadd.f32 %v2101_v50, %v1064_v23  ;;  %v1071_v44 = vld [vmem:[%s1851_s30 + $0xb0] sm:$0xff]  ;;  %v1072_v47 = vld [vmem:[%s1851_s30 + $0xb8] sm:$0xff]  ;;  %v1073_v51 = vld [vmem:[%s1851_s30 + $0xc0] sm:$0xff] }
 0x195   : > { %1152 = vst.msk [vmem:[%s1851_s30 + $0x18] sm:$0xff] %vm1012_vm1, %v1120_v6  ;;  %v1129_v33 = vmax.f32 %v1097_v22, 0.0  ;;  %v1101_v34 = vadd.f32 %v2101_v50, %v1065_v26  ;;  %v1130_v36 = vmax.f32 %v1098_v25, 0.0  ;;  %v1102_v37 = vadd.f32 %v2101_v50, %v1066_v29  ;;  %v1074_v54 = vld [vmem:[%s1851_s30 + $0xc8] sm:$0xff]  ;;  %v1075_v57 = vld [vmem:[%s1851_s30 + $0xd0] sm:$0xff]  ;;  %v1076_v60 = vld [vmem:[%s1851_s30 + $0xd8] sm:$0xff] }
 0x196   : > { %1153 = vst.msk [vmem:[%s1851_s30 + $0x20] sm:$0xff] %vm1012_vm1, %v1121_v9  ;;  %v1131_v39 = vmax.f32 %v1099_v28, 0.0  ;;  %v1103_v40 = vadd.f32 %v2101_v50, %v1067_v32  ;;  %v1132_v42 = vmax.f32 %v1100_v31, 0.0  ;;  %v1104_v43 = vadd.f32 %v2101_v50, %v1068_v35  ;;  %v1077_v63 = vld [vmem:[%s1851_s30 + $0xe0] sm:$0xff]  ;;  %v1078_v2 = vld [vmem:[%s1851_s30 + $0xe8] sm:$0xff]  ;;  %v1079_v5 = vld [vmem:[%s1851_s30 + $0xf0] sm:$0xff] }
 0x197   : > { %1154 = vst.msk [vmem:[%s1851_s30 + $0x28] sm:$0xff] %vm1012_vm1, %v1122_v12  ;;  %v1133_v45 = vmax.f32 %v1101_v34, 0.0  ;;  %v1105_v46 = vadd.f32 %v2101_v50, %v1069_v38  ;;  %v1134_v48 = vmax.f32 %v1102_v37, 0.0  ;;  %v1106_v49 = vadd.f32 %v2101_v50, %v1070_v41  ;;  %v1080_v8 = vld [vmem:[%s1851_s30 + $0xf8] sm:$0xff] }
 0x198   : > { %1155 = vst.msk [vmem:[%s1851_s30 + $0x30] sm:$0xff] %vm1012_vm1, %v1123_v15  ;;  %v1135_v52 = vmax.f32 %v1103_v40, 0.0  ;;  %v1107_v53 = vadd.f32 %v2101_v50, %v1071_v44  ;;  %v1136_v55 = vmax.f32 %v1104_v43, 0.0  ;;  %v1108_v56 = vadd.f32 %v2101_v50, %v1072_v47 }
 0x199   : > { %1156 = vst.msk [vmem:[%s1851_s30 + $0x38] sm:$0xff] %vm1012_vm1, %v1124_v18  ;;  %v1137_v58 = vmax.f32 %v1105_v46, 0.0  ;;  %v1109_v59 = vadd.f32 %v2101_v50, %v1073_v51  ;;  %v1138_v61 = vmax.f32 %v1106_v49, 0.0  ;;  %v1110_v62 = vadd.f32 %v2101_v50, %v1074_v54 }
 0x19a   : > { %1157 = vst.msk [vmem:[%s1851_s30 + $0x40] sm:$0xff] %vm1012_vm1, %v1125_v21  ;;  %v1139_v0 = vmax.f32 %v1107_v53, 0.0  ;;  %v1111_v1 = vadd.f32 %v2101_v50, %v1075_v57  ;;  %v1140_v3 = vmax.f32 %v1108_v56, 0.0  ;;  %v1112_v4 = vadd.f32 %v2101_v50, %v1076_v60 }
 0x19b   : > { %1158 = vst.msk [vmem:[%s1851_s30 + $0x48] sm:$0xff] %vm1012_vm1, %v1126_v24  ;;  %v1141_v6 = vmax.f32 %v1109_v59, 0.0  ;;  %v1113_v7 = vadd.f32 %v2101_v50, %v1077_v63  ;;  %v1142_v9 = vmax.f32 %v1110_v62, 0.0  ;;  %v1114_v10 = vadd.f32 %v2101_v50, %v1078_v2 }
 0x19c   : > { %1159 = vst.msk [vmem:[%s1851_s30 + $0x50] sm:$0xff] %vm1012_vm1, %v1127_v27  ;;  %v1143_v11 = vmax.f32 %v1111_v1, 0.0  ;;  %v1115_v12 = vadd.f32 %v2101_v50, %v1079_v5  ;;  %v1144_v13 = vmax.f32 %v1112_v4, 0.0  ;;  %v1116_v14 = vadd.f32 %v2101_v50, %v1080_v8 }
 0x19d   : > { %1160 = vst.msk [vmem:[%s1851_s30 + $0x58] sm:$0xff] %vm1012_vm1, %v1128_v30  ;;  %v1145_v15 = vmax.f32 %v1113_v7, 0.0  ;;  %v1146_v16 = vmax.f32 %v1114_v10, 0.0 }
 0x19e   : > { %1161 = vst.msk [vmem:[%s1851_s30 + $0x60] sm:$0xff] %vm1012_vm1, %v1129_v33  ;;  %v1147_v17 = vmax.f32 %v1115_v12, 0.0  ;;  %v1148_v18 = vmax.f32 %v1116_v14, 0.0 }
 0x19f   : > { %1162 = vst.msk [vmem:[%s1851_s30 + $0x68] sm:$0xff] %vm1012_vm1, %v1130_v36 }
 0x1a0   : > { %1163 = vst.msk [vmem:[%s1851_s30 + $0x70] sm:$0xff] %vm1012_vm1, %v1131_v39 }
 0x1a1   : > { %1164 = vst.msk [vmem:[%s1851_s30 + $0x78] sm:$0xff] %vm1012_vm1, %v1132_v42 }
 0x1a2   : > { %1165 = vst.msk [vmem:[%s1851_s30 + $0x80] sm:$0xff] %vm1012_vm1, %v1133_v45 }
 0x1a3   : > { %1166 = vst.msk [vmem:[%s1851_s30 + $0x88] sm:$0xff] %vm1012_vm1, %v1134_v48 }
 0x1a4   : > { %1167 = vst.msk [vmem:[%s1851_s30 + $0x90] sm:$0xff] %vm1012_vm1, %v1135_v52 }
 0x1a5   : > { %1168 = vst.msk [vmem:[%s1851_s30 + $0x98] sm:$0xff] %vm1012_vm1, %v1136_v55 }
 0x1a6   : > { %1169 = vst.msk [vmem:[%s1851_s30 + $0xa0] sm:$0xff] %vm1012_vm1, %v1137_v58 }
 0x1a7   : > { %1170 = vst.msk [vmem:[%s1851_s30 + $0xa8] sm:$0xff] %vm1012_vm1, %v1138_v61 }
 0x1a8   : > { %1171 = vst.msk [vmem:[%s1851_s30 + $0xb0] sm:$0xff] %vm1012_vm1, %v1139_v0 }
 0x1a9   : > { %1172 = vst.msk [vmem:[%s1851_s30 + $0xb8] sm:$0xff] %vm1012_vm1, %v1140_v3 }
 0x1aa   : > { %1173 = vst.msk [vmem:[%s1851_s30 + $0xc0] sm:$0xff] %vm1012_vm1, %v1141_v6 }
 0x1ab   : > { %1174 = vst.msk [vmem:[%s1851_s30 + $0xc8] sm:$0xff] %vm1012_vm1, %v1142_v9 }
 0x1ac   : > { %1175 = vst.msk [vmem:[%s1851_s30 + $0xd0] sm:$0xff] %vm1012_vm1, %v1143_v11 }
 0x1ad   : > { %1176 = vst.msk [vmem:[%s1851_s30 + $0xd8] sm:$0xff] %vm1012_vm1, %v1144_v13 }
 0x1ae   : > { %1177 = vst.msk [vmem:[%s1851_s30 + $0xe0] sm:$0xff] %vm1012_vm1, %v1145_v15 }
 0x1af   : > { %1178 = vst.msk [vmem:[%s1851_s30 + $0xe8] sm:$0xff] %vm1012_vm1, %v1146_v16 }
 0x1b0   : > { %1179 = vst.msk [vmem:[%s1851_s30 + $0xf0] sm:$0xff] %vm1012_vm1, %v1147_v17 }
 0x1b1   : > { %1180 = vst.msk [vmem:[%s1851_s30 + $0xf8] sm:$0xff] %vm1012_vm1, %v1148_v18 }
 0x1b2 PF: > { %s13_s18 = sadd.s32 1, %s1687_s18   ;;  %s2255_s12 = smov %s1667_s13 }
 0x1b3   : > { %p10_p0 = scmp.ge.s32.totalorder %s13_s18, 8   ;;  %s2256_s13 = smov %s1761_s25 }
 0x1b4   : > { %s2257_s14 = smov %s1679_s16  ;;  %s2258_s15 = smov %s1683_s17 }
 0x1b5   : > { %s2259_s16 = smov %s2262_s19  ;;  %s2260_s17 = smov %s2266_s20 }
 0x1b6   :  { %12 = sbr.rel (!%p10_p0) target bundleno = 4 (0x4), region = 119 }

// kernel: forward.21
= control target key start
LH: loop header
LB: loop body
LE: loop exit
PB: predicated region body
PF: predicated region fallthrough
CT: control target
= control target key end

     0   :  { %s881_s12 = smov 0   ;;  %s883_s13 = smov 0   ;;  %s1052_s0 = inlined_call_operand.vmem [shape: bf16[128,640], index: 0, kind: input, shape index: {}]   ;;  %s1053_s1 = inlined_call_operand.vmem [shape: bf16[640,64], index: 1, kind: input, shape index: {}]   ;;  %s1054_s2 = inlined_call_operand.vmem [shape: f32[1,64], index: 2, kind: input, shape index: {}]   ;;  %s1055_s3 = inlined_call_operand.vmem [shape: f32[128,64], index: 3, kind: output, shape index: {}]  }
   0x1   :  { %s885_s14 = smov 0   ;;  %s887_s15 = smov 0  }
   0x2   :  { %s889_s16 = smov 0   ;;  %s891_s17 = smov 0  }
   0x3   :  { %s893_s18 = smov 0  }
   0x4 LB: > { %s25_s19 = sadd.s32 1, %s850_s16  ;;  %s32_s20 = sadd.s32 1, %s854_s17  ;;  %s858_s18 = sphi %s893_s18, %s13_s18   ;;  %s854_s17 = sphi %s891_s17, %s1061_s17   ;;  %s850_s16 = sphi %s889_s16, %s1060_s16   ;;  %s846_s15 = sphi %s887_s15, %s1059_s15   ;;  %s842_s14 = sphi %s885_s14, %s1058_s14   ;;  %s838_s13 = sphi %s883_s13, %s1057_s13   ;;  %s834_s12 = sphi %s881_s12, %s1056_s12  }
   0x5   : > { %p26_p0 = scmp.ge.s32.totalorder %s25_s19, 5  ;;  %p48_p1 = scmp.ne.s32.totalorder %s838_s13, %s834_s12 }
   0x6   : > { %p49_p2 = scmp.eq.s32.totalorder %s858_s18, 0  ;;  %s41_s24 = sadd.s32 1, %s838_s13 }
   0x7   : > { %s1063_s19 = smov (%p26_p0, %s25_s19), 0  ;;  %s1065_s20 = smov (!%p26_p0, %s32_s20), %s854_s17 }
   0x8   : > { %p50_p3 = por %p49_p2, %p48_p1  ;;  %p34_p4 = scmp.ge.s32.totalorder %s1065_s20, 2 }
   0x9   : > { %s37_s21 = ssub.s32 %s850_s16, %s1063_s19  ;;  %p646_p6 = scmp.ge.s32.totalorder %s858_s18, 10 }
   0xa   : > { %s1067_s20 = smov (%p34_p4, %s1065_s20), 0 }
   0xb   : > { %s36_s22 = ssub.s32 %s854_s17, %s1067_s20  ;;  %162 = sbr.rel (%p646_p6) target bundleno = 31 (0x1f), region = 20 }
   0xc   : > { %s38_s23 = sor.u32 %s37_s21, %s36_s22 }
   0xd   : > { %p39_p5 = scmp.eq.s32.totalorder %s38_s23, 0 }
   0xf   : > { %s932_s25 = scalar_select %p39_p5, %s838_s13, %s41_s24  }
  0x10   : > { %165 = sbr.rel (!%p50_p3) target bundleno = 31 (0x1f), region = 24  ;;  %s167_s26 = sand.u32 (%p50_p3), 1, %s838_s13  }
  0x11   : > { %s745_s27 = smul.u32 (%p50_p3), 40, %s854_s17  ;;  %s647_s28 = sshll.u32 (%p50_p3), %s167_s26, 5 }
  0x12   : > { %s169_s7 = scalar_lea.vmem (%p50_p3), [#allocation2], %s647_s28 }
  0x13   : > { %s172_s29 = sadd.s32 (%p50_p3), %s850_s16, %s745_s27 }
  0x14   : > { %s650_s30 = sshll.u32 (%p50_p3), %s172_s29, 2 }
  0x15   : > { %s174_s6 = scalar_lea.vmem %s1052_s0, %s650_s30 }
  0x16   : > { %v191_v0 = vld [vmem:[%s174_s6] sm:$0xf]  ;;  %v193_v1 = vld [vmem:[%s174_s6 + $0x14] sm:$0xf]  ;;  %v195_v2 = vld [vmem:[%s174_s6 + $0x28] sm:$0xf] }
  0x17   : > { %192 = vst [vmem:[%s169_s7] sm:$0xf] %v191_v0  ;;  %v197_v3 = vld [vmem:[%s174_s6 + $0x3c] sm:$0xf]  ;;  %v199_v4 = vld [vmem:[%s174_s6 + $0x50] sm:$0xf] }
  0x18   : > { %194 = vst [vmem:[%s169_s7 + $0x4] sm:$0xf] %v193_v1  ;;  %v201_v5 = vld [vmem:[%s174_s6 + $0x64] sm:$0xf]  ;;  %v203_v6 = vld [vmem:[%s174_s6 + $0x78] sm:$0xf] }
  0x19   : > { %196 = vst [vmem:[%s169_s7 + $0x8] sm:$0xf] %v195_v2  ;;  %v205_v7 = vld [vmem:[%s174_s6 + $0x8c] sm:$0xf] }
  0x1a   : > { %198 = vst [vmem:[%s169_s7 + $0xc] sm:$0xf] %v197_v3 }
  0x1b   : > { %200 = vst [vmem:[%s169_s7 + $0x10] sm:$0xf] %v199_v4 }
  0x1c   : > { %202 = vst [vmem:[%s169_s7 + $0x14] sm:$0xf] %v201_v5 }
  0x1d   : > { %204 = vst [vmem:[%s169_s7 + $0x18] sm:$0xf] %v203_v6 }
  0x1e   : > { %206 = vst [vmem:[%s169_s7 + $0x1c] sm:$0xf] %v205_v7 }
  0x1f PF: > { %p651_p7 = scmp.ge.s32.totalorder %s858_s18, 1  ;;  %p257_p8 = scmp.lt.s32.totalorder %s858_s18, 11 }
  0x21   : > { %p258_p9 = pnand %p651_p7, %p257_p8 }
  0x22   : > { %s264_s8 = sand.u32 (!%p258_p9), 1, %s834_s12   ;;  %s653_s9 = sshll.u32 (!%p258_p9), %s842_s14, 4 }
  0x23   : > { %261 = sbr.rel (%p258_p9) target bundleno = 248 (0xf8), region = 69  ;;  %s652_s10 = sshll.u32 (!%p258_p9), %s264_s8, 5 }
  0x24   : > { %p303_p10 = scmp.lt.s32.totalorder (!%p258_p9), %s653_s9, 79  ;;  %s655_s11 = sshll.u32 (!%p258_p9), %s846_s15, 3 }
  0x25   : > { %p315_p11 = scmp.lt.s32.totalorder (!%p258_p9), %s655_s11, 15  ;;  %s956_s12 = scalar_lea.vmem (!%p258_p9), [#allocation2], %s652_s10 }
  0x26   : > { %p657_p12 = scmp.ne.s32.totalorder (!%p258_p9), %s842_s14, 0 }
  0x28   : > { %s1069_s9 = smov (!%p303_p10, %s653_s9), 79  ;;  %s1071_s11 = smov (!%p315_p11, %s655_s11), 15 }
  0x29   : > { %s654_s21 = sshll.u32 %s1069_s9, 2  ;;  %s656_s26 = sshll.u32 %s1071_s11, 3 }
  0x2a   : > { %s949_s24 = scalar_lea.vmem %s1053_s1, %s654_s21  ;;  %s954_s29 = scalar_lea.vmem %s1055_s3, %s656_s26 }
  0x2b   : > { %326 = sbr.rel (%p657_p12) target bundleno = 57 (0x39), region = 77 }
  0x30   : > { %vm327_vm0 = vcmask 523264   ;;  %v860_v8 = vmov 0.0  }
  0x31   : > { %328 = vst.msk [vmem:[%s954_s29] sm:$0xff] %vm327_vm0, %v860_v8 }
  0x32   : > { %329 = vst.msk [vmem:[%s954_s29 + $0x8] sm:$0xff] %vm327_vm0, %v860_v8 }
  0x33   : > { %330 = vst.msk [vmem:[%s954_s29 + $0x10] sm:$0xff] %vm327_vm0, %v860_v8 }
  0x34   : > { %331 = vst.msk [vmem:[%s954_s29 + $0x18] sm:$0xff] %vm327_vm0, %v860_v8 }
  0x35   : > { %332 = vst.msk [vmem:[%s954_s29 + $0x20] sm:$0xff] %vm327_vm0, %v860_v8 }
  0x36   : > { %333 = vst.msk [vmem:[%s954_s29 + $0x28] sm:$0xff] %vm327_vm0, %v860_v8 }
  0x37   : > { %334 = vst.msk [vmem:[%s954_s29 + $0x30] sm:$0xff] %vm327_vm0, %v860_v8 }
  0x38   : > { %335 = vst.msk [vmem:[%s954_s29 + $0x38] sm:$0xff] %vm327_vm0, %v860_v8 }
  0x39 PF: > { %v720_v9 = vld [vmem:[%s949_s24 + $0x38] sm:$0xff]  ;;  %v719_v10 = vld [vmem:[%s949_s24 + $0x30] sm:$0xff]  ;;  %v718_v11 = vld [vmem:[%s949_s24 + $0x28] sm:$0xff]  ;;  %vm477_vm1 = vcmask 523264   ;;  %p706_p13 = scmp.ne.s32.totalorder %s842_s14, 4 }
  0x3a   : > { %440 = vmatpush.bf16.msra.mxu0 %v720_v9  ;;  %721 = vmatpush.bf16.msra.mxu1 %v720_v9  ;;  %v717_v12 = vld [vmem:[%s949_s24 + $0x20] sm:$0xff]  ;;  %v716_v13 = vld [vmem:[%s949_s24 + $0x18] sm:$0xff]  ;;  %v715_v14 = vld [vmem:[%s949_s24 + $0x10] sm:$0xff] }
  0x3b   : > { %722 = vmatpush.bf16.msra.mxu2 %v720_v9  ;;  %723 = vmatpush.bf16.msra.mxu3 %v720_v9  ;;  %v714_v15 = vld [vmem:[%s949_s24 + $0x8] sm:$0xff]  ;;  %v713_v16 = vld [vmem:[%s949_s24] sm:$0xff]  ;;  %v711_v19 = vld [vmem:[%s956_s12 + $0x10] sm:$0xff] }
  0x3c   : > { %v709_v17 = vld [vmem:[%s956_s12] sm:$0xff]  ;;  %v710_v18 = vld [vmem:[%s956_s12 + $0x8] sm:$0xff]  ;;  %v712_v20 = vld [vmem:[%s956_s12 + $0x18] sm:$0xff] }
  0x3d   : > { %v336_v21 = vld [vmem:[%s954_s29] sm:$0xff]  ;;  %v338_v22 = vld [vmem:[%s954_s29 + $0x10] sm:$0xff]  ;;  %v337_v29 = vld [vmem:[%s954_s29 + $0x8] sm:$0xff] }
  0x3e   : > { %441 = vmatpush.bf16.msra.mxu0 %v719_v10  ;;  %724 = vmatpush.bf16.msra.mxu1 %v719_v10  ;;  %v340_v27 = vld [vmem:[%s954_s29 + $0x20] sm:$0xff]  ;;  %v342_v28 = vld [vmem:[%s954_s29 + $0x30] sm:$0xff]  ;;  %v339_v30 = vld [vmem:[%s954_s29 + $0x18] sm:$0xff] }
  0x3f   : > { %725 = vmatpush.bf16.msra.mxu2 %v719_v10  ;;  %726 = vmatpush.bf16.msra.mxu3 %v719_v10  ;;  %v341_v39 = vld [vmem:[%s954_s29 + $0x28] sm:$0xff]  ;;  %v343_v40 = vld [vmem:[%s954_s29 + $0x38] sm:$0xff] }
  0x42   : > { %442 = vmatpush.bf16.msra.mxu0 %v718_v11  ;;  %727 = vmatpush.bf16.msra.mxu1 %v718_v11 }
  0x43   : > { %728 = vmatpush.bf16.msra.mxu2 %v718_v11  ;;  %729 = vmatpush.bf16.msra.mxu3 %v718_v11 }
  0x46   : > { %443 = vmatpush.bf16.msra.mxu0 %v717_v12  ;;  %730 = vmatpush.bf16.msra.mxu1 %v717_v12 }
  0x47   : > { %731 = vmatpush.bf16.msra.mxu2 %v717_v12  ;;  %732 = vmatpush.bf16.msra.mxu3 %v717_v12 }
  0x4a   : > { %444 = vmatpush.bf16.msra.mxu0 %v716_v13  ;;  %733 = vmatpush.bf16.msra.mxu1 %v716_v13 }
  0x4b   : > { %734 = vmatpush.bf16.msra.mxu2 %v716_v13  ;;  %735 = vmatpush.bf16.msra.mxu3 %v716_v13 }
  0x4e   : > { %445 = vmatpush.bf16.msra.mxu0 %v715_v14  ;;  %736 = vmatpush.bf16.msra.mxu1 %v715_v14 }
  0x4f   : > { %737 = vmatpush.bf16.msra.mxu2 %v715_v14  ;;  %738 = vmatpush.bf16.msra.mxu3 %v715_v14 }
  0x52   : > { %446 = vmatpush.bf16.msra.mxu0 %v714_v15  ;;  %739 = vmatpush.bf16.msra.mxu1 %v714_v15 }
  0x53   : > { %740 = vmatpush.bf16.msra.mxu2 %v714_v15  ;;  %741 = vmatpush.bf16.msra.mxu3 %v714_v15 }
  0x56   : > { %447 = vmatpush.bf16.msra.mxu0 %v713_v16  ;;  %742 = vmatpush.bf16.msra.mxu1 %v713_v16 }
  0x57   : > { %743 = vmatpush.bf16.msra.mxu2 %v713_v16  ;;  %744 = vmatpush.bf16.msra.mxu3 %v713_v16 }
  0x59   : > { %448 = vmatmul.bf16.vlgmr.msra.gmra.mxu0 %v709_v17  ;;  %453 = vmatmul.bf16.vlgmr.msra.gmra.mxu1 %v710_v18 }
  0x5a   : > { %458 = vmatmul.bf16.vlgmr.msra.gmra.mxu2 %v711_v19  ;;  %463 = vmatmul.bf16.vlgmr.msra.gmra.mxu3 %v712_v20 }
  0xd6   : > { %v449_v23 = vpop.f32.mrf.mxu0  ;;  %v454_v24 = vpop.f32.mrf.mxu1 }
  0xd7   : > { %v469_v25 = vadd.f32 %v449_v23, %v336_v21  ;;  %v471_v26 = vadd.f32 %v454_v24, %v338_v22 }
  0xd9   : > { %478 = vst.msk [vmem:[%s954_s29] sm:$0xff] %vm477_vm1, %v469_v25 }
  0xda   : > { %480 = vst.msk [vmem:[%s954_s29 + $0x10] sm:$0xff] %vm477_vm1, %v471_v26 }
  0xdd   : > { %v459_v31 = vpop.f32.mrf.mxu2  ;;  %v464_v32 = vpop.f32.mrf.mxu3 }
  0xde   : > { %v473_v33 = vadd.f32 %v459_v31, %v340_v27  ;;  %v475_v34 = vadd.f32 %v464_v32, %v342_v28  ;;  %v451_v35 = vpop.f32.mrf.mxu0  ;;  %v456_v36 = vpop.f32.mrf.mxu1 }
  0xdf   : > { %v470_v37 = vadd.f32 %v451_v35, %v337_v29  ;;  %v472_v38 = vadd.f32 %v456_v36, %v339_v30 }
  0xe0   : > { %482 = vst.msk [vmem:[%s954_s29 + $0x20] sm:$0xff] %vm477_vm1, %v473_v33 }
  0xe1   : > { %484 = vst.msk [vmem:[%s954_s29 + $0x30] sm:$0xff] %vm477_vm1, %v475_v34 }
  0xe2   : > { %479 = vst.msk [vmem:[%s954_s29 + $0x8] sm:$0xff] %vm477_vm1, %v470_v37 }
  0xe3   : > { %481 = vst.msk [vmem:[%s954_s29 + $0x18] sm:$0xff] %vm477_vm1, %v472_v38 }
  0xe5   : > { %v461_v41 = vpop.f32.mrf.mxu2  ;;  %v466_v42 = vpop.f32.mrf.mxu3  ;;  %489 = sbr.rel (%p706_p13) target bundleno = 248 (0xf8), region = 81 }
  0xe6   : > { %v474_v43 = vadd.f32 %v461_v41, %v341_v39  ;;  %v476_v44 = vadd.f32 %v466_v42, %v343_v40 }
  0xe8   : > { %483 = vst.msk [vmem:[%s954_s29 + $0x28] sm:$0xff] %vm477_vm1, %v474_v43 }
  0xe9   : > { %485 = vst.msk [vmem:[%s954_s29 + $0x38] sm:$0xff] %vm477_vm1, %v476_v44 }
  0xea   : > { %v490_v45 = vld [vmem:[%s954_s29] sm:$0xff]  ;;  %v491_v47 = vld [vmem:[%s954_s29 + $0x8] sm:$0xff]  ;;  %v492_v48 = vld [vmem:[%s954_s29 + $0x10] sm:$0xff] }
  0xeb   : > { %v803_v46 = vld [vmem:[%s1054_s2] ss:$0 sm:$0xff]  ;;  %v493_v49 = vld [vmem:[%s954_s29 + $0x18] sm:$0xff]  ;;  %v496_v56 = vld [vmem:[%s954_s29 + $0x30] sm:$0xff] }
  0xec   : > { %v502_v50 = vadd.f32 %v803_v46, %v490_v45  ;;  %v503_v51 = vadd.f32 %v803_v46, %v491_v47  ;;  %v504_v52 = vadd.f32 %v803_v46, %v492_v48  ;;  %v505_v53 = vadd.f32 %v803_v46, %v493_v49  ;;  %v494_v54 = vld [vmem:[%s954_s29 + $0x20] sm:$0xff] }
  0xed   : > { %v506_v57 = vadd.f32 %v803_v46, %v494_v54  ;;  %v508_v63 = vadd.f32 %v803_v46, %v496_v56 }
  0xee   : > { %v510_v60 = vmax.f32 %v502_v50, 0.0  ;;  %v511_v61 = vmax.f32 %v503_v51, 0.0  ;;  %v512_v62 = vmax.f32 %v504_v52, 0.0  ;;  %v513_v0 = vmax.f32 %v505_v53, 0.0 }
  0xef   : > { %v495_v55 = vld [vmem:[%s954_s29 + $0x28] sm:$0xff]  ;;  %v514_v2 = vmax.f32 %v506_v57, 0.0  ;;  %v516_v4 = vmax.f32 %v508_v63, 0.0 }
  0xf0   : > { %v507_v58 = vadd.f32 %v803_v46, %v495_v55  ;;  %v497_v59 = vld [vmem:[%s954_s29 + $0x38] sm:$0xff]  ;;  %518 = vst.msk [vmem:[%s954_s29] sm:$0xff] %vm477_vm1, %v510_v60 }
  0xf1   : > { %v509_v1 = vadd.f32 %v803_v46, %v497_v59  ;;  %519 = vst.msk [vmem:[%s954_s29 + $0x8] sm:$0xff] %vm477_vm1, %v511_v61 }
  0xf2   : > { %v515_v3 = vmax.f32 %v507_v58, 0.0  ;;  %520 = vst.msk [vmem:[%s954_s29 + $0x10] sm:$0xff] %vm477_vm1, %v512_v62 }
  0xf3   : > { %521 = vst.msk [vmem:[%s954_s29 + $0x18] sm:$0xff] %vm477_vm1, %v513_v0  ;;  %v517_v5 = vmax.f32 %v509_v1, 0.0 }
  0xf4   : > { %522 = vst.msk [vmem:[%s954_s29 + $0x20] sm:$0xff] %vm477_vm1, %v514_v2 }
  0xf5   : > { %523 = vst.msk [vmem:[%s954_s29 + $0x28] sm:$0xff] %vm477_vm1, %v515_v3 }
  0xf6   : > { %524 = vst.msk [vmem:[%s954_s29 + $0x30] sm:$0xff] %vm477_vm1, %v516_v4 }
  0xf7   : > { %525 = vst.msk [vmem:[%s954_s29 + $0x38] sm:$0xff] %vm477_vm1, %v517_v5 }
  0xf8 PF: > { %s13_s18 = sadd.s32 1, %s858_s18   ;;  %s1056_s12 = smov %s838_s13 }
  0xf9   : > { %p10_p0 = scmp.ge.s32.totalorder %s13_s18, 12   ;;  %s1057_s13 = smov %s932_s25 }
  0xfa   : > { %s1058_s14 = smov %s850_s16  ;;  %s1059_s15 = smov %s854_s17 }
  0xfb   : > { %s1060_s16 = smov %s1063_s19  ;;  %s1061_s17 = smov %s1067_s20 }
  0xfc   :  { %12 = sbr.rel (!%p10_p0) target bundleno = 4 (0x4), region = 122 }

// kernel: forward.22
= control target key start
LH: loop header
LB: loop body
LE: loop exit
PB: predicated region body
PF: predicated region fallthrough
CT: control target
= control target key end

     0   :  { %s979_s15 = smov 0   ;;  %s981_s16 = smov 0   ;;  %s1163_s0 = inlined_call_operand.vmem [shape: bf16[128,640], index: 0, kind: input, shape index: {}]   ;;  %s1164_s1 = inlined_call_operand.vmem [shape: bf16[640,64], index: 1, kind: input, shape index: {}]   ;;  %s1165_s2 = inlined_call_operand.vmem [shape: f32[1,64], index: 2, kind: input, shape index: {}]   ;;  %s1166_s3 = inlined_call_operand.vmem [shape: f32[128,64], index: 3, kind: input, shape index: {}]   ;;  %s1167_s4 = inlined_call_operand.vmem [shape: f32[128,64], index: 4, kind: output, shape index: {}]  }
   0x1   :  { %s983_s17 = smov 0   ;;  %s985_s18 = smov 0  }
   0x2   :  { %s987_s19 = smov 0   ;;  %s989_s20 = smov 0  }
   0x3   :  { %s991_s21 = smov 0  }
   0x4 LB: > { %s26_s22 = sadd.s32 1, %s943_s19  ;;  %s33_s23 = sadd.s32 1, %s947_s20  ;;  %s951_s21 = sphi %s991_s21, %s14_s21   ;;  %s947_s20 = sphi %s989_s20, %s1173_s20   ;;  %s943_s19 = sphi %s987_s19, %s1172_s19   ;;  %s939_s18 = sphi %s985_s18, %s1171_s18   ;;  %s935_s17 = sphi %s983_s17, %s1170_s17   ;;  %s931_s16 = sphi %s981_s16, %s1169_s16   ;;  %s927_s15 = sphi %s979_s15, %s1168_s15  }
   0x5   : > { %p27_p0 = scmp.ge.s32.totalorder %s26_s22, 5  ;;  %p49_p1 = scmp.ne.s32.totalorder %s931_s16, %s927_s15 }
   0x6   : > { %p50_p2 = scmp.eq.s32.totalorder %s951_s21, 0  ;;  %s42_s27 = sadd.s32 1, %s931_s16 }
   0x7   : > { %s1175_s22 = smov (%p27_p0, %s26_s22), 0  ;;  %s1177_s23 = smov (!%p27_p0, %s33_s23), %s947_s20 }
   0x8   : > { %p51_p3 = por %p50_p2, %p49_p1  ;;  %p35_p4 = scmp.ge.s32.totalorder %s1177_s23, 2 }
   0x9   : > { %s38_s24 = ssub.s32 %s943_s19, %s1175_s22  ;;  %p737_p6 = scmp.ge.s32.totalorder %s951_s21, 10 }
   0xa   : > { %s1179_s23 = smov (%p35_p4, %s1177_s23), 0 }
   0xb   : > { %s37_s25 = ssub.s32 %s947_s20, %s1179_s23  ;;  %191 = sbr.rel (%p737_p6) target bundleno = 31 (0x1f), region = 20 }
   0xc   : > { %s39_s26 = sor.u32 %s38_s24, %s37_s25 }
   0xd   : > { %p40_p5 = scmp.eq.s32.totalorder %s39_s26, 0 }
   0xf   : > { %s1030_s28 = scalar_select %p40_p5, %s931_s16, %s42_s27  }
  0x10   : > { %194 = sbr.rel (!%p51_p3) target bundleno = 31 (0x1f), region = 24  ;;  %s196_s29 = sand.u32 (%p51_p3), 1, %s931_s16  }
  0x11   : > { %s838_s30 = smul.u32 (%p51_p3), 40, %s947_s20  ;;  %s738_s5 = sshll.u32 (%p51_p3), %s196_s29, 5 }
  0x12   : > { %s198_s11 = scalar_lea.vmem (%p51_p3), [#allocation2], %s738_s5 }
  0x13   : > { %s201_s6 = sadd.s32 (%p51_p3), %s943_s19, %s838_s30 }
  0x14   : > { %s741_s7 = sshll.u32 (%p51_p3), %s201_s6, 2 }
  0x15   : > { %s203_s10 = scalar_lea.vmem %s1163_s0, %s741_s7 }
  0x16   : > { %v220_v0 = vld [vmem:[%s203_s10] sm:$0xf]  ;;  %v222_v1 = vld [vmem:[%s203_s10 + $0x14] sm:$0xf]  ;;  %v224_v2 = vld [vmem:[%s203_s10 + $0x28] sm:$0xf] }
  0x17   : > { %221 = vst [vmem:[%s198_s11] sm:$0xf] %v220_v0  ;;  %v226_v3 = vld [vmem:[%s203_s10 + $0x3c] sm:$0xf]  ;;  %v228_v4 = vld [vmem:[%s203_s10 + $0x50] sm:$0xf] }
  0x18   : > { %223 = vst [vmem:[%s198_s11 + $0x4] sm:$0xf] %v222_v1  ;;  %v230_v5 = vld [vmem:[%s203_s10 + $0x64] sm:$0xf]  ;;  %v232_v6 = vld [vmem:[%s203_s10 + $0x78] sm:$0xf] }
  0x19   : > { %225 = vst [vmem:[%s198_s11 + $0x8] sm:$0xf] %v224_v2  ;;  %v234_v7 = vld [vmem:[%s203_s10 + $0x8c] sm:$0xf] }
  0x1a   : > { %227 = vst [vmem:[%s198_s11 + $0xc] sm:$0xf] %v226_v3 }
  0x1b   : > { %229 = vst [vmem:[%s198_s11 + $0x10] sm:$0xf] %v228_v4 }
  0x1c   : > { %231 = vst [vmem:[%s198_s11 + $0x14] sm:$0xf] %v230_v5 }
  0x1d   : > { %233 = vst [vmem:[%s198_s11 + $0x18] sm:$0xf] %v232_v6 }
  0x1e   : > { %235 = vst [vmem:[%s198_s11 + $0x1c] sm:$0xf] %v234_v7 }
  0x1f PF: > { %p742_p7 = scmp.ge.s32.totalorder %s951_s21, 1  ;;  %p298_p8 = scmp.lt.s32.totalorder %s951_s21, 11 }
  0x21   : > { %p299_p9 = pnand %p742_p7, %p298_p8 }
  0x22   : > { %s305_s12 = sand.u32 (!%p299_p9), 1, %s927_s15   ;;  %s744_s13 = sshll.u32 (!%p299_p9), %s935_s17, 4 }
  0x23   : > { %302 = sbr.rel (%p299_p9) target bundleno = 250 (0xfa), region = 73  ;;  %s743_s14 = sshll.u32 (!%p299_p9), %s305_s12, 5 }
  0x24   : > { %p354_p10 = scmp.lt.s32.totalorder (!%p299_p9), %s744_s13, 79  ;;  %s746_s24 = sshll.u32 (!%p299_p9), %s939_s18, 3 }
  0x25   : > { %p366_p11 = scmp.lt.s32.totalorder (!%p299_p9), %s746_s24, 15  ;;  %s1059_s18 = scalar_lea.vmem (!%p299_p9), [#allocation2], %s743_s14 }
  0x26   : > { %p750_p12 = scmp.ne.s32.totalorder (!%p299_p9), %s935_s17, 0 }
  0x28   : > { %s1181_s13 = smov (!%p354_p10, %s744_s13), 79  ;;  %s1183_s24 = smov (!%p366_p11, %s746_s24), 15 }
  0x29   : > { %s745_s25 = sshll.u32 %s1181_s13, 2  ;;  %s747_s30 = sshll.u32 %s1183_s24, 3 }
  0x2a   : > { %s1047_s29 = scalar_lea.vmem %s1164_s1, %s745_s25  ;;  %s1052_s7 = scalar_lea.vmem %s1166_s3, %s747_s30 }
  0x2b   : > { %s1057_s9 = scalar_lea.vmem %s1167_s4, %s747_s30  ;;  %386 = sbr.rel (%p750_p12) target bundleno = 57 (0x39), region = 81 }
  0x30   : > { %vm387_vm0 = vcmask 523264   ;;  %v953_v8 = vmov 0.0  }
  0x31   : > { %388 = vst.msk [vmem:[%s1057_s9] sm:$0xff] %vm387_vm0, %v953_v8 }
  0x32   : > { %389 = vst.msk [vmem:[%s1057_s9 + $0x8] sm:$0xff] %vm387_vm0, %v953_v8 }
  0x33   : > { %390 = vst.msk [vmem:[%s1057_s9 + $0x10] sm:$0xff] %vm387_vm0, %v953_v8 }
  0x34   : > { %391 = vst.msk [vmem:[%s1057_s9 + $0x18] sm:$0xff] %vm387_vm0, %v953_v8 }
  0x35   : > { %392 = vst.msk [vmem:[%s1057_s9 + $0x20] sm:$0xff] %vm387_vm0, %v953_v8 }
  0x36   : > { %393 = vst.msk [vmem:[%s1057_s9 + $0x28] sm:$0xff] %vm387_vm0, %v953_v8 }
  0x37   : > { %394 = vst.msk [vmem:[%s1057_s9 + $0x30] sm:$0xff] %vm387_vm0, %v953_v8 }
  0x38   : > { %395 = vst.msk [vmem:[%s1057_s9 + $0x38] sm:$0xff] %vm387_vm0, %v953_v8 }
  0x39 PF: > { %v813_v9 = vld [vmem:[%s1047_s29 + $0x38] sm:$0xff]  ;;  %v812_v10 = vld [vmem:[%s1047_s29 + $0x30] sm:$0xff]  ;;  %v811_v11 = vld [vmem:[%s1047_s29 + $0x28] sm:$0xff]  ;;  %vm537_vm1 = vcmask 523264   ;;  %p799_p13 = scmp.ne.s32.totalorder %s935_s17, 4 }
  0x3a   : > { %500 = vmatpush.bf16.msra.mxu0 %v813_v9  ;;  %814 = vmatpush.bf16.msra.mxu1 %v813_v9  ;;  %v810_v12 = vld [vmem:[%s1047_s29 + $0x20] sm:$0xff]  ;;  %v809_v13 = vld [vmem:[%s1047_s29 + $0x18] sm:$0xff]  ;;  %v808_v14 = vld [vmem:[%s1047_s29 + $0x10] sm:$0xff] }
  0x3b   : > { %815 = vmatpush.bf16.msra.mxu2 %v813_v9  ;;  %816 = vmatpush.bf16.msra.mxu3 %v813_v9  ;;  %v807_v15 = vld [vmem:[%s1047_s29 + $0x8] sm:$0xff]  ;;  %v806_v16 = vld [vmem:[%s1047_s29] sm:$0xff]  ;;  %v804_v19 = vld [vmem:[%s1059_s18 + $0x10] sm:$0xff] }
  0x3c   : > { %v802_v17 = vld [vmem:[%s1059_s18] sm:$0xff]  ;;  %v803_v18 = vld [vmem:[%s1059_s18 + $0x8] sm:$0xff]  ;;  %v805_v20 = vld [vmem:[%s1059_s18 + $0x18] sm:$0xff] }
  0x3d   : > { %v396_v21 = vld [vmem:[%s1057_s9] sm:$0xff]  ;;  %v398_v22 = vld [vmem:[%s1057_s9 + $0x10] sm:$0xff]  ;;  %v397_v29 = vld [vmem:[%s1057_s9 + $0x8] sm:$0xff] }
  0x3e   : > { %501 = vmatpush.bf16.msra.mxu0 %v812_v10  ;;  %817 = vmatpush.bf16.msra.mxu1 %v812_v10  ;;  %v400_v27 = vld [vmem:[%s1057_s9 + $0x20] sm:$0xff]  ;;  %v402_v28 = vld [vmem:[%s1057_s9 + $0x30] sm:$0xff]  ;;  %v399_v30 = vld [vmem:[%s1057_s9 + $0x18] sm:$0xff] }
  0x3f   : > { %818 = vmatpush.bf16.msra.mxu2 %v812_v10  ;;  %819 = vmatpush.bf16.msra.mxu3 %v812_v10  ;;  %v401_v39 = vld [vmem:[%s1057_s9 + $0x28] sm:$0xff]  ;;  %v403_v40 = vld [vmem:[%s1057_s9 + $0x38] sm:$0xff] }
  0x42   : > { %502 = vmatpush.bf16.msra.mxu0 %v811_v11  ;;  %820 = vmatpush.bf16.msra.mxu1 %v811_v11 }
  0x43   : > { %821 = vmatpush.bf16.msra.mxu2 %v811_v11  ;;  %822 = vmatpush.bf16.msra.mxu3 %v811_v11 }
  0x46   : > { %503 = vmatpush.bf16.msra.mxu0 %v810_v12  ;;  %823 = vmatpush.bf16.msra.mxu1 %v810_v12 }
  0x47   : > { %824 = vmatpush.bf16.msra.mxu2 %v810_v12  ;;  %825 = vmatpush.bf16.msra.mxu3 %v810_v12 }
  0x4a   : > { %504 = vmatpush.bf16.msra.mxu0 %v809_v13  ;;  %826 = vmatpush.bf16.msra.mxu1 %v809_v13 }
  0x4b   : > { %827 = vmatpush.bf16.msra.mxu2 %v809_v13  ;;  %828 = vmatpush.bf16.msra.mxu3 %v809_v13 }
  0x4e   : > { %505 = vmatpush.bf16.msra.mxu0 %v808_v14  ;;  %829 = vmatpush.bf16.msra.mxu1 %v808_v14 }
  0x4f   : > { %830 = vmatpush.bf16.msra.mxu2 %v808_v14  ;;  %831 = vmatpush.bf16.msra.mxu3 %v808_v14 }
  0x52   : > { %506 = vmatpush.bf16.msra.mxu0 %v807_v15  ;;  %832 = vmatpush.bf16.msra.mxu1 %v807_v15 }
  0x53   : > { %833 = vmatpush.bf16.msra.mxu2 %v807_v15  ;;  %834 = vmatpush.bf16.msra.mxu3 %v807_v15 }
  0x56   : > { %507 = vmatpush.bf16.msra.mxu0 %v806_v16  ;;  %835 = vmatpush.bf16.msra.mxu1 %v806_v16 }
  0x57   : > { %836 = vmatpush.bf16.msra.mxu2 %v806_v16  ;;  %837 = vmatpush.bf16.msra.mxu3 %v806_v16 }
  0x59   : > { %508 = vmatmul.bf16.vlgmr.msra.gmra.mxu0 %v802_v17  ;;  %513 = vmatmul.bf16.vlgmr.msra.gmra.mxu1 %v803_v18 }
  0x5a   : > { %518 = vmatmul.bf16.vlgmr.msra.gmra.mxu2 %v804_v19  ;;  %523 = vmatmul.bf16.vlgmr.msra.gmra.mxu3 %v805_v20 }
  0xd6   : > { %v509_v23 = vpop.f32.mrf.mxu0  ;;  %v514_v24 = vpop.f32.mrf.mxu1 }
  0xd7   : > { %v529_v25 = vadd.f32 %v509_v23, %v396_v21  ;;  %v531_v26 = vadd.f32 %v514_v24, %v398_v22 }
  0xd9   : > { %538 = vst.msk [vmem:[%s1057_s9] sm:$0xff] %vm537_vm1, %v529_v25 }
  0xda   : > { %540 = vst.msk [vmem:[%s1057_s9 + $0x10] sm:$0xff] %vm537_vm1, %v531_v26 }
  0xdd   : > { %v519_v31 = vpop.f32.mrf.mxu2  ;;  %v524_v32 = vpop.f32.mrf.mxu3 }
  0xde   : > { %v533_v33 = vadd.f32 %v519_v31, %v400_v27  ;;  %v535_v34 = vadd.f32 %v524_v32, %v402_v28  ;;  %v511_v35 = vpop.f32.mrf.mxu0  ;;  %v516_v36 = vpop.f32.mrf.mxu1 }
  0xdf   : > { %v530_v37 = vadd.f32 %v511_v35, %v397_v29  ;;  %v532_v38 = vadd.f32 %v516_v36, %v399_v30 }
  0xe0   : > { %542 = vst.msk [vmem:[%s1057_s9 + $0x20] sm:$0xff] %vm537_vm1, %v533_v33 }
  0xe1   : > { %544 = vst.msk [vmem:[%s1057_s9 + $0x30] sm:$0xff] %vm537_vm1, %v535_v34 }
  0xe2   : > { %539 = vst.msk [vmem:[%s1057_s9 + $0x8] sm:$0xff] %vm537_vm1, %v530_v37 }
  0xe3   : > { %541 = vst.msk [vmem:[%s1057_s9 + $0x18] sm:$0xff] %vm537_vm1, %v532_v38 }
  0xe5   : > { %v521_v41 = vpop.f32.mrf.mxu2  ;;  %v526_v42 = vpop.f32.mrf.mxu3  ;;  %549 = sbr.rel (%p799_p13) target bundleno = 250 (0xfa), region = 85 }
  0xe6   : > { %v534_v43 = vadd.f32 %v521_v41, %v401_v39  ;;  %v536_v44 = vadd.f32 %v526_v42, %v403_v40 }
  0xe8   : > { %543 = vst.msk [vmem:[%s1057_s9 + $0x28] sm:$0xff] %vm537_vm1, %v534_v43 }
  0xe9   : > { %545 = vst.msk [vmem:[%s1057_s9 + $0x38] sm:$0xff] %vm537_vm1, %v536_v44 }
  0xea   : > { %v550_v45 = vld [vmem:[%s1057_s9] sm:$0xff]  ;;  %v551_v48 = vld [vmem:[%s1057_s9 + $0x8] sm:$0xff]  ;;  %v552_v52 = vld [vmem:[%s1057_s9 + $0x10] sm:$0xff] }
  0xeb   : > { %v896_v46 = vld [vmem:[%s1165_s2] ss:$0 sm:$0xff]  ;;  %v571_v49 = vld [vmem:[%s1052_s7 + $0x8] sm:$0xff]  ;;  %v572_v53 = vld [vmem:[%s1052_s7 + $0x10] sm:$0xff] }
  0xec   : > { %v570_v47 = vld [vmem:[%s1052_s7] sm:$0xff]  ;;  %v562_v50 = vadd.f32 %v896_v46, %v550_v45  ;;  %v563_v51 = vadd.f32 %v896_v46, %v551_v48  ;;  %v553_v54 = vld [vmem:[%s1057_s9 + $0x18] sm:$0xff]  ;;  %v564_v55 = vadd.f32 %v896_v46, %v552_v52  ;;  %v575_v0 = vld [vmem:[%s1052_s7 + $0x28] sm:$0xff] }
  0xed   : > { %v565_v56 = vadd.f32 %v896_v46, %v553_v54  ;;  %v573_v57 = vld [vmem:[%s1052_s7 + $0x18] sm:$0xff]  ;;  %v554_v58 = vld [vmem:[%s1057_s9 + $0x20] sm:$0xff]  ;;  %v556_v1 = vld [vmem:[%s1057_s9 + $0x30] sm:$0xff] }
  0xee   : > { %v574_v59 = vld [vmem:[%s1052_s7 + $0x20] sm:$0xff]  ;;  %v578_v60 = vadd.f32 %v570_v47, %v562_v50  ;;  %v579_v61 = vadd.f32 %v571_v49, %v563_v51  ;;  %v566_v62 = vadd.f32 %v896_v46, %v554_v58  ;;  %v580_v2 = vadd.f32 %v572_v53, %v564_v55  ;;  %v576_v6 = vld [vmem:[%s1052_s7 + $0x30] sm:$0xff]  ;;  %v577_v8 = vld [vmem:[%s1052_s7 + $0x38] sm:$0xff] }
  0xef   : > { %v555_v63 = vld [vmem:[%s1057_s9 + $0x28] sm:$0xff]  ;;  %v581_v3 = vadd.f32 %v573_v57, %v565_v56  ;;  %v568_v5 = vadd.f32 %v896_v46, %v556_v1 }
  0xf0   : > { %v567_v4 = vadd.f32 %v896_v46, %v555_v63  ;;  %v557_v7 = vld [vmem:[%s1057_s9 + $0x38] sm:$0xff]  ;;  %v586_v9 = vmax.f32 %v578_v60, 0.0  ;;  %v587_v10 = vmax.f32 %v579_v61, 0.0  ;;  %v582_v11 = vadd.f32 %v574_v59, %v566_v62 }
  0xf1   : > { %v569_v12 = vadd.f32 %v896_v46, %v557_v7  ;;  %v588_v13 = vmax.f32 %v580_v2, 0.0  ;;  %v589_v14 = vmax.f32 %v581_v3, 0.0  ;;  %v584_v16 = vadd.f32 %v576_v6, %v568_v5 }
  0xf2   : > { %v583_v15 = vadd.f32 %v575_v0, %v567_v4  ;;  %594 = vst.msk [vmem:[%s1057_s9] sm:$0xff] %vm537_vm1, %v586_v9  ;;  %v590_v17 = vmax.f32 %v582_v11, 0.0 }
  0xf3   : > { %v585_v18 = vadd.f32 %v577_v8, %v569_v12  ;;  %595 = vst.msk [vmem:[%s1057_s9 + $0x8] sm:$0xff] %vm537_vm1, %v587_v10  ;;  %v592_v20 = vmax.f32 %v584_v16, 0.0 }
  0xf4   : > { %v591_v19 = vmax.f32 %v583_v15, 0.0  ;;  %596 = vst.msk [vmem:[%s1057_s9 + $0x10] sm:$0xff] %vm537_vm1, %v588_v13 }
  0xf5   : > { %597 = vst.msk [vmem:[%s1057_s9 + $0x18] sm:$0xff] %vm537_vm1, %v589_v14  ;;  %v593_v21 = vmax.f32 %v585_v18, 0.0 }
  0xf6   : > { %598 = vst.msk [vmem:[%s1057_s9 + $0x20] sm:$0xff] %vm537_vm1, %v590_v17 }
  0xf7   : > { %599 = vst.msk [vmem:[%s1057_s9 + $0x28] sm:$0xff] %vm537_vm1, %v591_v19 }
  0xf8   : > { %600 = vst.msk [vmem:[%s1057_s9 + $0x30] sm:$0xff] %vm537_vm1, %v592_v20 }
  0xf9   : > { %601 = vst.msk [vmem:[%s1057_s9 + $0x38] sm:$0xff] %vm537_vm1, %v593_v21 }
  0xfa PF: > { %s14_s21 = sadd.s32 1, %s951_s21   ;;  %s1168_s15 = smov %s931_s16 }
  0xfb   : > { %p11_p0 = scmp.ge.s32.totalorder %s14_s21, 12   ;;  %s1169_s16 = smov %s1030_s28 }
  0xfc   : > { %s1170_s17 = smov %s943_s19  ;;  %s1171_s18 = smov %s947_s20 }
  0xfd   : > { %s1172_s19 = smov %s1175_s22  ;;  %s1173_s20 = smov %s1179_s23 }
  0xfe   :  { %13 = sbr.rel (!%p11_p0) target bundleno = 4 (0x4), region = 129 }

// kernel: forward.23
= control target key start
LH: loop header
LB: loop body
LE: loop exit
PB: predicated region body
PF: predicated region fallthrough
CT: control target
= control target key end

     0   :  { %8 = vsyncpa [#allocation4], 0  ;;  %s936_s12 = smov 0   ;;  %s938_s13 = smov 0   ;;  %s1132_s0 = inlined_call_operand.vmem [shape: bf16[128,640], index: 0, kind: input, shape index: {}]   ;;  %s1133_s1 = inlined_call_operand.vmem [shape: bf16[640,64], index: 1, kind: input, shape index: {}]   ;;  %s1134_s2 = inlined_call_operand.hbm [shape: f32[1,64], index: 2, kind: input, shape index: {}]   ;;  %s1135_s3 = inlined_call_operand.vmem [shape: f32[128,64], index: 3, kind: output, shape index: {}]  }
   0x1   :  { %s940_s14 = smov 0   ;;  %s942_s15 = smov 0  }
   0x2   :  { %s944_s16 = smov 0   ;;  %s946_s17 = smov 0  }
   0x3   :  { %s948_s18 = smov 0  }
   0x4 LB: > { %s650_s19 = sadd.s32 4294967295, %s912_s18   ;;  %s26_s20 = sadd.s32 1, %s904_s16  ;;  %s912_s18 = sphi %s948_s18, %s14_s18   ;;  %s908_s17 = sphi %s946_s17, %s1144_s17   ;;  %s904_s16 = sphi %s944_s16, %s1143_s16   ;;  %s900_s15 = sphi %s942_s15, %s1142_s15   ;;  %s896_s14 = sphi %s940_s14, %s1141_s14   ;;  %s892_s13 = sphi %s938_s13, %s1140_s13   ;;  %s888_s12 = sphi %s936_s12, %s1139_s12  }
   0x5   : > { %p27_p0 = scmp.ge.s32.totalorder %s26_s20, 5  ;;  %s33_s21 = sadd.s32 1, %s908_s17 }
   0x6   : > { %s42_s22 = sadd.s32 1, %s892_s13  ;;  %p49_p1 = scmp.ne.s32.totalorder %s892_s13, %s888_s12 }
   0x7   : > { %s1146_s20 = smov (%p27_p0, %s26_s20), 0  ;;  %s1148_s21 = smov (!%p27_p0, %s33_s21), %s908_s17 }
   0x8   : > { %s38_s23 = ssub.s32 %s904_s16, %s1146_s20  ;;  %p50_p2 = scmp.eq.s32.totalorder %s912_s18, 0 }
   0x9   : > { %p35_p3 = scmp.ge.s32.totalorder %s1148_s21, 2  ;;  %p652_p4 = scmp.ge.s32.totalorder %s912_s18, 1 }
   0xa   : > { %p984_p5 = por %p50_p2, %p49_p1  ;;  %p148_p6 = scmp.lt.s32.totalorder %s912_s18, 11 }
   0xb   : > { %s1150_s21 = smov (%p35_p3, %s1148_s21), 0  ;;  %p997_p8 = scmp.eq.s32.totalorder %s650_s19, 0 }
   0xc   : > { %p991_p7 = pnand %p652_p4, %p148_p6  ;;  %s37_s26 = ssub.s32 %s908_s17, %s1150_s21 }
   0xd   : > { %s39_s28 = sor.u32 %s38_s23, %s37_s26  ;;  %s161_s4 = sshll.u32 %s1134_s2, 4  ;;  %s162_s4 = int_to_ptr.hbm [resolvable:$true] %s161_s4 }
   0xe   : > { %p759_p9 = pneg %p991_p7  ;;  %p40_p10 = scmp.eq.s32.totalorder %s39_s28, 0 }
   0xf   : > { %s914_s6 = smov [#allocation3]   ;;  %p654_p12 = scmp.ge.s32.totalorder %s912_s18, 10 }
  0x10   : > { %s1007_s5 = scalar_select %p40_p10, %s892_s13, %s42_s22  }
  0x11   : > { %s163_s7 = sshll.u32 %s914_s6, 4  ;;  %p760_p11 = pnand %p997_p8, %p759_p9  ;;  %s164_s7 = int_to_ptr.vmem [resolvable:$true] %s163_s7 }
  0x12   : > { %170 = sbr.rel (%p654_p12) target bundleno = 38 (0x26), region = 20 }
  0x13   : > { %762 = dma.hbm_to_vmem [thread:$0]  (!%p760_p11), %s162_s4, 16, %s164_s7, [#allocation4]  }
  0x17   : > { %173 = sbr.rel (!%p984_p5) target bundleno = 38 (0x26), region = 24  ;;  %s175_s8 = sand.u32 (%p984_p5), 1, %s892_s13  }
  0x18   : > { %s754_s9 = smul.u32 (%p984_p5), 40, %s908_s17  ;;  %s655_s10 = sshll.u32 (%p984_p5), %s175_s8, 5 }
  0x19   : > { %s177_s28 = scalar_lea.vmem (%p984_p5), [#allocation2], %s655_s10 }
  0x1a   : > { %s180_s11 = sadd.s32 (%p984_p5), %s904_s16, %s754_s9 }
  0x1b   : > { %s658_s19 = sshll.u32 (%p984_p5), %s180_s11, 2 }
  0x1c   : > { %s182_s26 = scalar_lea.vmem %s1132_s0, %s658_s19 }
  0x1d   : > { %v199_v0 = vld [vmem:[%s182_s26] sm:$0xf]  ;;  %v201_v1 = vld [vmem:[%s182_s26 + $0x14] sm:$0xf]  ;;  %v203_v2 = vld [vmem:[%s182_s26 + $0x28] sm:$0xf] }
  0x1e   : > { %200 = vst [vmem:[%s177_s28] sm:$0xf] %v199_v0  ;;  %v205_v3 = vld [vmem:[%s182_s26 + $0x3c] sm:$0xf]  ;;  %v207_v4 = vld [vmem:[%s182_s26 + $0x50] sm:$0xf] }
  0x1f   : > { %202 = vst [vmem:[%s177_s28 + $0x4] sm:$0xf] %v201_v1  ;;  %v209_v5 = vld [vmem:[%s182_s26 + $0x64] sm:$0xf]  ;;  %v211_v6 = vld [vmem:[%s182_s26 + $0x78] sm:$0xf] }
  0x20   : > { %204 = vst [vmem:[%s177_s28 + $0x8] sm:$0xf] %v203_v2  ;;  %v213_v7 = vld [vmem:[%s182_s26 + $0x8c] sm:$0xf] }
  0x21   : > { %206 = vst [vmem:[%s177_s28 + $0xc] sm:$0xf] %v205_v3 }
  0x22   : > { %208 = vst [vmem:[%s177_s28 + $0x10] sm:$0xf] %v207_v4 }
  0x23   : > { %210 = vst [vmem:[%s177_s28 + $0x14] sm:$0xf] %v209_v5 }
  0x24   : > { %212 = vst [vmem:[%s177_s28 + $0x18] sm:$0xf] %v211_v6 }
  0x25   : > { %214 = vst [vmem:[%s177_s28 + $0x1c] sm:$0xf] %v213_v7 }
  0x26 PF: > { %269 = sbr.rel (%p991_p7) target bundleno = 255 (0xff), region = 69  ;;  %s272_s24 = sand.u32 (!%p991_p7), 1, %s888_s12  }
  0x27   : > { %s660_s29 = sshll.u32 (!%p991_p7), %s272_s24, 5 }
  0x28   : > { %s1023_s30 = scalar_lea.vmem (!%p991_p7), [#allocation2], %s660_s29 }
  0x2b   : > { %883 = dma.done.wait (%p997_p8), [#allocation4], 16  }
  0x2c   : > { %885 = vsyncadd (%p997_p8), [#allocation4], 4294967280  ;;  %s662_s4 = sshll.u32 %s896_s14, 4  ;;  %s664_s6 = sshll.u32 %s900_s15, 3 }
  0x2d   : > { %p313_p13 = scmp.lt.s32.totalorder %s662_s4, 79  ;;  %p322_p0 = scmp.lt.s32.totalorder %s664_s6, 15 }
  0x2e   : > { %p666_p1 = scmp.ne.s32.totalorder %s896_s14, 0 }
  0x2f   : > { %s1152_s4 = smov (!%p313_p13, %s662_s4), 79  ;;  %s1154_s6 = smov (!%p322_p0, %s664_s6), 15 }
  0x30   : > { %s663_s25 = sshll.u32 %s1152_s4, 2  ;;  %s665_s9 = sshll.u32 %s1154_s6, 3 }
  0x31   : > { %s1034_s12 = scalar_lea.vmem %s1133_s1, %s663_s25  ;;  %s1039_s27 = scalar_lea.vmem %s1135_s3, %s665_s9 }
  0x32   : > { %333 = sbr.rel (%p666_p1) target bundleno = 64 (0x40), region = 81 }
  0x37   : > { %vm334_vm0 = vcmask 523264   ;;  %v915_v8 = vmov 0.0  }
  0x38   : > { %335 = vst.msk [vmem:[%s1039_s27] sm:$0xff] %vm334_vm0, %v915_v8 }
  0x39   : > { %336 = vst.msk [vmem:[%s1039_s27 + $0x8] sm:$0xff] %vm334_vm0, %v915_v8 }
  0x3a   : > { %337 = vst.msk [vmem:[%s1039_s27 + $0x10] sm:$0xff] %vm334_vm0, %v915_v8 }
  0x3b   : > { %338 = vst.msk [vmem:[%s1039_s27 + $0x18] sm:$0xff] %vm334_vm0, %v915_v8 }
  0x3c   : > { %339 = vst.msk [vmem:[%s1039_s27 + $0x20] sm:$0xff] %vm334_vm0, %v915_v8 }
  0x3d   : > { %340 = vst.msk [vmem:[%s1039_s27 + $0x28] sm:$0xff] %vm334_vm0, %v915_v8 }
  0x3e   : > { %341 = vst.msk [vmem:[%s1039_s27 + $0x30] sm:$0xff] %vm334_vm0, %v915_v8 }
  0x3f   : > { %342 = vst.msk [vmem:[%s1039_s27 + $0x38] sm:$0xff] %vm334_vm0, %v915_v8 }
  0x40 PF: > { %v729_v9 = vld [vmem:[%s1034_s12 + $0x38] sm:$0xff]  ;;  %v728_v10 = vld [vmem:[%s1034_s12 + $0x30] sm:$0xff]  ;;  %v727_v11 = vld [vmem:[%s1034_s12 + $0x28] sm:$0xff]  ;;  %vm484_vm1 = vcmask 523264   ;;  %p715_p2 = scmp.ne.s32.totalorder %s896_s14, 4 }
  0x41   : > { %447 = vmatpush.bf16.msra.mxu0 %v729_v9  ;;  %730 = vmatpush.bf16.msra.mxu1 %v729_v9  ;;  %v726_v12 = vld [vmem:[%s1034_s12 + $0x20] sm:$0xff]  ;;  %v725_v13 = vld [vmem:[%s1034_s12 + $0x18] sm:$0xff]  ;;  %v724_v14 = vld [vmem:[%s1034_s12 + $0x10] sm:$0xff] }
  0x42   : > { %731 = vmatpush.bf16.msra.mxu2 %v729_v9  ;;  %732 = vmatpush.bf16.msra.mxu3 %v729_v9  ;;  %v723_v15 = vld [vmem:[%s1034_s12 + $0x8] sm:$0xff]  ;;  %v722_v16 = vld [vmem:[%s1034_s12] sm:$0xff]  ;;  %v720_v19 = vld [vmem:[%s1023_s30 + $0x10] sm:$0xff] }
  0x43   : > { %v718_v17 = vld [vmem:[%s1023_s30] sm:$0xff]  ;;  %v719_v18 = vld [vmem:[%s1023_s30 + $0x8] sm:$0xff]  ;;  %v721_v20 = vld [vmem:[%s1023_s30 + $0x18] sm:$0xff] }
  0x44   : > { %v343_v21 = vld [vmem:[%s1039_s27] sm:$0xff]  ;;  %v345_v22 = vld [vmem:[%s1039_s27 + $0x10] sm:$0xff]  ;;  %v344_v29 = vld [vmem:[%s1039_s27 + $0x8] sm:$0xff] }
  0x45   : > { %448 = vmatpush.bf16.msra.mxu0 %v728_v10  ;;  %733 = vmatpush.bf16.msra.mxu1 %v728_v10  ;;  %v347_v27 = vld [vmem:[%s1039_s27 + $0x20] sm:$0xff]  ;;  %v349_v28 = vld [vmem:[%s1039_s27 + $0x30] sm:$0xff]  ;;  %v346_v30 = vld [vmem:[%s1039_s27 + $0x18] sm:$0xff] }
  0x46   : > { %734 = vmatpush.bf16.msra.mxu2 %v728_v10  ;;  %735 = vmatpush.bf16.msra.mxu3 %v728_v10  ;;  %v348_v39 = vld [vmem:[%s1039_s27 + $0x28] sm:$0xff]  ;;  %v350_v40 = vld [vmem:[%s1039_s27 + $0x38] sm:$0xff] }
  0x49   : > { %449 = vmatpush.bf16.msra.mxu0 %v727_v11  ;;  %736 = vmatpush.bf16.msra.mxu1 %v727_v11 }
  0x4a   : > { %737 = vmatpush.bf16.msra.mxu2 %v727_v11  ;;  %738 = vmatpush.bf16.msra.mxu3 %v727_v11 }
  0x4d   : > { %450 = vmatpush.bf16.msra.mxu0 %v726_v12  ;;  %739 = vmatpush.bf16.msra.mxu1 %v726_v12 }
  0x4e   : > { %740 = vmatpush.bf16.msra.mxu2 %v726_v12  ;;  %741 = vmatpush.bf16.msra.mxu3 %v726_v12 }
  0x51   : > { %451 = vmatpush.bf16.msra.mxu0 %v725_v13  ;;  %742 = vmatpush.bf16.msra.mxu1 %v725_v13 }
  0x52   : > { %743 = vmatpush.bf16.msra.mxu2 %v725_v13  ;;  %744 = vmatpush.bf16.msra.mxu3 %v725_v13 }
  0x55   : > { %452 = vmatpush.bf16.msra.mxu0 %v724_v14  ;;  %745 = vmatpush.bf16.msra.mxu1 %v724_v14 }
  0x56   : > { %746 = vmatpush.bf16.msra.mxu2 %v724_v14  ;;  %747 = vmatpush.bf16.msra.mxu3 %v724_v14 }
  0x59   : > { %453 = vmatpush.bf16.msra.mxu0 %v723_v15  ;;  %748 = vmatpush.bf16.msra.mxu1 %v723_v15 }
  0x5a   : > { %749 = vmatpush.bf16.msra.mxu2 %v723_v15  ;;  %750 = vmatpush.bf16.msra.mxu3 %v723_v15 }
  0x5d   : > { %454 = vmatpush.bf16.msra.mxu0 %v722_v16  ;;  %751 = vmatpush.bf16.msra.mxu1 %v722_v16 }
  0x5e   : > { %752 = vmatpush.bf16.msra.mxu2 %v722_v16  ;;  %753 = vmatpush.bf16.msra.mxu3 %v722_v16 }
  0x60   : > { %455 = vmatmul.bf16.vlgmr.msra.gmra.mxu0 %v718_v17  ;;  %460 = vmatmul.bf16.vlgmr.msra.gmra.mxu1 %v719_v18 }
  0x61   : > { %465 = vmatmul.bf16.vlgmr.msra.gmra.mxu2 %v720_v19  ;;  %470 = vmatmul.bf16.vlgmr.msra.gmra.mxu3 %v721_v20 }
  0xdd   : > { %v456_v23 = vpop.f32.mrf.mxu0  ;;  %v461_v24 = vpop.f32.mrf.mxu1 }
  0xde   : > { %v476_v25 = vadd.f32 %v456_v23, %v343_v21  ;;  %v478_v26 = vadd.f32 %v461_v24, %v345_v22 }
  0xe0   : > { %485 = vst.msk [vmem:[%s1039_s27] sm:$0xff] %vm484_vm1, %v476_v25 }
  0xe1   : > { %487 = vst.msk [vmem:[%s1039_s27 + $0x10] sm:$0xff] %vm484_vm1, %v478_v26 }
  0xe4   : > { %v466_v31 = vpop.f32.mrf.mxu2  ;;  %v471_v32 = vpop.f32.mrf.mxu3 }
  0xe5   : > { %v480_v33 = vadd.f32 %v466_v31, %v347_v27  ;;  %v482_v34 = vadd.f32 %v471_v32, %v349_v28  ;;  %v458_v35 = vpop.f32.mrf.mxu0  ;;  %v463_v36 = vpop.f32.mrf.mxu1 }
  0xe6   : > { %v477_v37 = vadd.f32 %v458_v35, %v344_v29  ;;  %v479_v38 = vadd.f32 %v463_v36, %v346_v30 }
  0xe7   : > { %489 = vst.msk [vmem:[%s1039_s27 + $0x20] sm:$0xff] %vm484_vm1, %v480_v33 }
  0xe8   : > { %491 = vst.msk [vmem:[%s1039_s27 + $0x30] sm:$0xff] %vm484_vm1, %v482_v34 }
  0xe9   : > { %486 = vst.msk [vmem:[%s1039_s27 + $0x8] sm:$0xff] %vm484_vm1, %v477_v37 }
  0xea   : > { %488 = vst.msk [vmem:[%s1039_s27 + $0x18] sm:$0xff] %vm484_vm1, %v479_v38 }
  0xec   : > { %v468_v41 = vpop.f32.mrf.mxu2  ;;  %v473_v42 = vpop.f32.mrf.mxu3  ;;  %496 = sbr.rel (%p715_p2) target bundleno = 255 (0xff), region = 85 }
  0xed   : > { %v481_v43 = vadd.f32 %v468_v41, %v348_v39  ;;  %v483_v44 = vadd.f32 %v473_v42, %v350_v40 }
  0xef   : > { %490 = vst.msk [vmem:[%s1039_s27 + $0x28] sm:$0xff] %vm484_vm1, %v481_v43 }
  0xf0   : > { %492 = vst.msk [vmem:[%s1039_s27 + $0x38] sm:$0xff] %vm484_vm1, %v483_v44 }
  0xf1   : > { %v497_v45 = vld [vmem:[%s1039_s27] sm:$0xff]  ;;  %v498_v47 = vld [vmem:[%s1039_s27 + $0x8] sm:$0xff]  ;;  %v499_v48 = vld [vmem:[%s1039_s27 + $0x10] sm:$0xff] }
  0xf2   : > { %v823_v46 = vld [vmem:[#allocation3] ss:$0 sm:$0xff]  ;;  %v500_v49 = vld [vmem:[%s1039_s27 + $0x18] sm:$0xff]  ;;  %v503_v56 = vld [vmem:[%s1039_s27 + $0x30] sm:$0xff] }
  0xf3   : > { %v509_v50 = vadd.f32 %v823_v46, %v497_v45  ;;  %v510_v51 = vadd.f32 %v823_v46, %v498_v47  ;;  %v511_v52 = vadd.f32 %v823_v46, %v499_v48  ;;  %v512_v53 = vadd.f32 %v823_v46, %v500_v49  ;;  %v501_v54 = vld [vmem:[%s1039_s27 + $0x20] sm:$0xff] }
  0xf4   : > { %v513_v57 = vadd.f32 %v823_v46, %v501_v54  ;;  %v515_v63 = vadd.f32 %v823_v46, %v503_v56 }
  0xf5   : > { %v517_v60 = vmax.f32 %v509_v50, 0.0  ;;  %v518_v61 = vmax.f32 %v510_v51, 0.0  ;;  %v519_v62 = vmax.f32 %v511_v52, 0.0  ;;  %v520_v0 = vmax.f32 %v512_v53, 0.0 }
  0xf6   : > { %v502_v55 = vld [vmem:[%s1039_s27 + $0x28] sm:$0xff]  ;;  %v521_v2 = vmax.f32 %v513_v57, 0.0  ;;  %v523_v4 = vmax.f32 %v515_v63, 0.0 }
  0xf7   : > { %v514_v58 = vadd.f32 %v823_v46, %v502_v55  ;;  %v504_v59 = vld [vmem:[%s1039_s27 + $0x38] sm:$0xff]  ;;  %525 = vst.msk [vmem:[%s1039_s27] sm:$0xff] %vm484_vm1, %v517_v60 }
  0xf8   : > { %v516_v1 = vadd.f32 %v823_v46, %v504_v59  ;;  %526 = vst.msk [vmem:[%s1039_s27 + $0x8] sm:$0xff] %vm484_vm1, %v518_v61 }
  0xf9   : > { %v522_v3 = vmax.f32 %v514_v58, 0.0  ;;  %527 = vst.msk [vmem:[%s1039_s27 + $0x10] sm:$0xff] %vm484_vm1, %v519_v62 }
  0xfa   : > { %528 = vst.msk [vmem:[%s1039_s27 + $0x18] sm:$0xff] %vm484_vm1, %v520_v0  ;;  %v524_v5 = vmax.f32 %v516_v1, 0.0 }
  0xfb   : > { %529 = vst.msk [vmem:[%s1039_s27 + $0x20] sm:$0xff] %vm484_vm1, %v521_v2 }
  0xfc   : > { %530 = vst.msk [vmem:[%s1039_s27 + $0x28] sm:$0xff] %vm484_vm1, %v522_v3 }
  0xfd   : > { %531 = vst.msk [vmem:[%s1039_s27 + $0x30] sm:$0xff] %vm484_vm1, %v523_v4 }
  0xfe   : > { %532 = vst.msk [vmem:[%s1039_s27 + $0x38] sm:$0xff] %vm484_vm1, %v524_v5 }
  0xff PF: > { %s14_s18 = sadd.s32 1, %s912_s18   ;;  %s1139_s12 = smov %s892_s13 }
 0x100   : > { %p11_p3 = scmp.ge.s32.totalorder %s14_s18, 12   ;;  %s1140_s13 = smov %s1007_s5 }
 0x101   : > { %s1141_s14 = smov %s904_s16  ;;  %s1142_s15 = smov %s908_s17 }
 0x102   : > { %s1143_s16 = smov %s1146_s20  ;;  %s1144_s17 = smov %s1150_s21 }
 0x103   :  { %13 = sbr.rel (!%p11_p3) target bundleno = 4 (0x4), region = 125 }
 0x108   :  { %561 = vsyncpa [#allocation4], 1 }
 0x109   :  { %563 = vsyncpa [#allocation4 + $0x1], 1 }

// kernel: forward.24
= control target key start
LH: loop header
LB: loop body
LE: loop exit
PB: predicated region body
PF: predicated region fallthrough
CT: control target
= control target key end

     0   :  { %9 = vsyncpa [#allocation4], 0  ;;  %s1034_s15 = smov 0   ;;  %s1036_s16 = smov 0   ;;  %s1243_s0 = inlined_call_operand.vmem [shape: bf16[128,640], index: 0, kind: input, shape index: {}]   ;;  %s1244_s1 = inlined_call_operand.vmem [shape: bf16[640,64], index: 1, kind: input, shape index: {}]   ;;  %s1245_s2 = inlined_call_operand.hbm [shape: f32[1,64], index: 2, kind: input, shape index: {}]   ;;  %s1246_s3 = inlined_call_operand.vmem [shape: f32[128,64], index: 3, kind: input, shape index: {}]   ;;  %s1247_s4 = inlined_call_operand.vmem [shape: f32[128,64], index: 4, kind: output, shape index: {}]  }
   0x1   :  { %s1038_s17 = smov 0   ;;  %s1040_s18 = smov 0  }
   0x2   :  { %s1042_s19 = smov 0   ;;  %s1044_s20 = smov 0  }
   0x3   :  { %s1046_s21 = smov 0  }
   0x4 LB: > { %s741_s22 = sadd.s32 4294967295, %s1005_s21   ;;  %s27_s23 = sadd.s32 1, %s997_s19  ;;  %s1005_s21 = sphi %s1046_s21, %s15_s21   ;;  %s1001_s20 = sphi %s1044_s20, %s1256_s20   ;;  %s997_s19 = sphi %s1042_s19, %s1255_s19   ;;  %s993_s18 = sphi %s1040_s18, %s1254_s18   ;;  %s989_s17 = sphi %s1038_s17, %s1253_s17   ;;  %s985_s16 = sphi %s1036_s16, %s1252_s16   ;;  %s981_s15 = sphi %s1034_s15, %s1251_s15  }
   0x5   : > { %p28_p0 = scmp.ge.s32.totalorder %s27_s23, 5  ;;  %s34_s24 = sadd.s32 1, %s1001_s20 }
   0x6   : > { %s43_s25 = sadd.s32 1, %s985_s16  ;;  %p50_p1 = scmp.ne.s32.totalorder %s985_s16, %s981_s15 }
   0x7   : > { %s1258_s23 = smov (%p28_p0, %s27_s23), 0  ;;  %s1260_s24 = smov (!%p28_p0, %s34_s24), %s1001_s20 }
   0x8   : > { %s39_s26 = ssub.s32 %s997_s19, %s1258_s23  ;;  %p51_p2 = scmp.eq.s32.totalorder %s1005_s21, 0 }
   0x9   : > { %p36_p3 = scmp.ge.s32.totalorder %s1260_s24, 2  ;;  %p743_p4 = scmp.ge.s32.totalorder %s1005_s21, 1 }
   0xa   : > { %p1082_p5 = por %p51_p2, %p50_p1  ;;  %p177_p6 = scmp.lt.s32.totalorder %s1005_s21, 11 }
   0xb   : > { %s1262_s24 = smov (%p36_p3, %s1260_s24), 0  ;;  %p1095_p8 = scmp.eq.s32.totalorder %s741_s22, 0 }
   0xc   : > { %p1089_p7 = pnand %p743_p4, %p177_p6  ;;  %s38_s29 = ssub.s32 %s1001_s20, %s1262_s24 }
   0xd   : > { %s40_s5 = sor.u32 %s39_s26, %s38_s29  ;;  %s190_s8 = sshll.u32 %s1245_s2, 4  ;;  %s191_s8 = int_to_ptr.hbm [resolvable:$true] %s190_s8 }
   0xe   : > { %p852_p9 = pneg %p1089_p7  ;;  %p41_p10 = scmp.eq.s32.totalorder %s40_s5, 0 }
   0xf   : > { %s1007_s10 = smov [#allocation3]   ;;  %p745_p12 = scmp.ge.s32.totalorder %s1005_s21, 10 }
  0x10   : > { %s1105_s9 = scalar_select %p41_p10, %s985_s16, %s43_s25  }
  0x11   : > { %s192_s11 = sshll.u32 %s1007_s10, 4  ;;  %p853_p11 = pnand %p1095_p8, %p852_p9  ;;  %s193_s11 = int_to_ptr.vmem [resolvable:$true] %s192_s11 }
  0x12   : > { %199 = sbr.rel (%p745_p12) target bundleno = 38 (0x26), region = 20 }
  0x13   : > { %855 = dma.hbm_to_vmem [thread:$0]  (!%p853_p11), %s191_s8, 16, %s193_s11, [#allocation4]  }
  0x17   : > { %202 = sbr.rel (!%p1082_p5) target bundleno = 38 (0x26), region = 24  ;;  %s204_s12 = sand.u32 (%p1082_p5), 1, %s985_s16  }
  0x18   : > { %s847_s13 = smul.u32 (%p1082_p5), 40, %s1001_s20  ;;  %s746_s14 = sshll.u32 (%p1082_p5), %s204_s12, 5 }
  0x19   : > { %s206_s6 = scalar_lea.vmem (%p1082_p5), [#allocation2], %s746_s14 }
  0x1a   : > { %s209_s22 = sadd.s32 (%p1082_p5), %s997_s19, %s847_s13 }
  0x1b   : > { %s749_s25 = sshll.u32 (%p1082_p5), %s209_s22, 2 }
  0x1c   : > { %s211_s5 = scalar_lea.vmem %s1243_s0, %s749_s25 }
  0x1d   : > { %v228_v0 = vld [vmem:[%s211_s5] sm:$0xf]  ;;  %v230_v1 = vld [vmem:[%s211_s5 + $0x14] sm:$0xf]  ;;  %v232_v2 = vld [vmem:[%s211_s5 + $0x28] sm:$0xf] }
  0x1e   : > { %229 = vst [vmem:[%s206_s6] sm:$0xf] %v228_v0  ;;  %v234_v3 = vld [vmem:[%s211_s5 + $0x3c] sm:$0xf]  ;;  %v236_v4 = vld [vmem:[%s211_s5 + $0x50] sm:$0xf] }
  0x1f   : > { %231 = vst [vmem:[%s206_s6 + $0x4] sm:$0xf] %v230_v1  ;;  %v238_v5 = vld [vmem:[%s211_s5 + $0x64] sm:$0xf]  ;;  %v240_v6 = vld [vmem:[%s211_s5 + $0x78] sm:$0xf] }
  0x20   : > { %233 = vst [vmem:[%s206_s6 + $0x8] sm:$0xf] %v232_v2  ;;  %v242_v7 = vld [vmem:[%s211_s5 + $0x8c] sm:$0xf] }
  0x21   : > { %235 = vst [vmem:[%s206_s6 + $0xc] sm:$0xf] %v234_v3 }
  0x22   : > { %237 = vst [vmem:[%s206_s6 + $0x10] sm:$0xf] %v236_v4 }
  0x23   : > { %239 = vst [vmem:[%s206_s6 + $0x14] sm:$0xf] %v238_v5 }
  0x24   : > { %241 = vst [vmem:[%s206_s6 + $0x18] sm:$0xf] %v240_v6 }
  0x25   : > { %243 = vst [vmem:[%s206_s6 + $0x1c] sm:$0xf] %v242_v7 }
  0x26 PF: > { %310 = sbr.rel (%p1089_p7) target bundleno = 257 (0x101), region = 73  ;;  %s313_s27 = sand.u32 (!%p1089_p7), 1, %s981_s15  }
  0x27   : > { %s751_s7 = sshll.u32 (!%p1089_p7), %s313_s27, 5 }
  0x28   : > { %s1121_s8 = scalar_lea.vmem (!%p1089_p7), [#allocation2], %s751_s7 }
  0x2b   : > { %976 = dma.done.wait (%p1095_p8), [#allocation4], 16  }
  0x2c   : > { %978 = vsyncadd (%p1095_p8), [#allocation4], 4294967280  ;;  %s753_s10 = sshll.u32 %s989_s17, 4  ;;  %s755_s11 = sshll.u32 %s993_s18, 3 }
  0x2d   : > { %p364_p13 = scmp.lt.s32.totalorder %s753_s10, 79  ;;  %p373_p0 = scmp.lt.s32.totalorder %s755_s11, 15 }
  0x2e   : > { %p759_p1 = scmp.ne.s32.totalorder %s989_s17, 0 }
  0x2f   : > { %s1264_s10 = smov (!%p364_p13, %s753_s10), 79  ;;  %s1266_s11 = smov (!%p373_p0, %s755_s11), 15 }
  0x30   : > { %s754_s28 = sshll.u32 %s1264_s10, 2  ;;  %s756_s14 = sshll.u32 %s1266_s11, 3 }
  0x31   : > { %s1132_s15 = scalar_lea.vmem %s1244_s1, %s754_s28  ;;  %s1137_s30 = scalar_lea.vmem %s1246_s3, %s756_s14 }
  0x32   : > { %s1142_s18 = scalar_lea.vmem %s1247_s4, %s756_s14  ;;  %393 = sbr.rel (%p759_p1) target bundleno = 64 (0x40), region = 85 }
  0x37   : > { %vm394_vm0 = vcmask 523264   ;;  %v1008_v8 = vmov 0.0  }
  0x38   : > { %395 = vst.msk [vmem:[%s1142_s18] sm:$0xff] %vm394_vm0, %v1008_v8 }
  0x39   : > { %396 = vst.msk [vmem:[%s1142_s18 + $0x8] sm:$0xff] %vm394_vm0, %v1008_v8 }
  0x3a   : > { %397 = vst.msk [vmem:[%s1142_s18 + $0x10] sm:$0xff] %vm394_vm0, %v1008_v8 }
  0x3b   : > { %398 = vst.msk [vmem:[%s1142_s18 + $0x18] sm:$0xff] %vm394_vm0, %v1008_v8 }
  0x3c   : > { %399 = vst.msk [vmem:[%s1142_s18 + $0x20] sm:$0xff] %vm394_vm0, %v1008_v8 }
  0x3d   : > { %400 = vst.msk [vmem:[%s1142_s18 + $0x28] sm:$0xff] %vm394_vm0, %v1008_v8 }
  0x3e   : > { %401 = vst.msk [vmem:[%s1142_s18 + $0x30] sm:$0xff] %vm394_vm0, %v1008_v8 }
  0x3f   : > { %402 = vst.msk [vmem:[%s1142_s18 + $0x38] sm:$0xff] %vm394_vm0, %v1008_v8 }
  0x40 PF: > { %v822_v9 = vld [vmem:[%s1132_s15 + $0x38] sm:$0xff]  ;;  %v821_v10 = vld [vmem:[%s1132_s15 + $0x30] sm:$0xff]  ;;  %v820_v11 = vld [vmem:[%s1132_s15 + $0x28] sm:$0xff]  ;;  %vm544_vm1 = vcmask 523264   ;;  %p808_p2 = scmp.ne.s32.totalorder %s989_s17, 4 }
  0x41   : > { %507 = vmatpush.bf16.msra.mxu0 %v822_v9  ;;  %823 = vmatpush.bf16.msra.mxu1 %v822_v9  ;;  %v819_v12 = vld [vmem:[%s1132_s15 + $0x20] sm:$0xff]  ;;  %v818_v13 = vld [vmem:[%s1132_s15 + $0x18] sm:$0xff]  ;;  %v817_v14 = vld [vmem:[%s1132_s15 + $0x10] sm:$0xff] }
  0x42   : > { %824 = vmatpush.bf16.msra.mxu2 %v822_v9  ;;  %825 = vmatpush.bf16.msra.mxu3 %v822_v9  ;;  %v816_v15 = vld [vmem:[%s1132_s15 + $0x8] sm:$0xff]  ;;  %v815_v16 = vld [vmem:[%s1132_s15] sm:$0xff]  ;;  %v813_v19 = vld [vmem:[%s1121_s8 + $0x10] sm:$0xff] }
  0x43   : > { %v811_v17 = vld [vmem:[%s1121_s8] sm:$0xff]  ;;  %v812_v18 = vld [vmem:[%s1121_s8 + $0x8] sm:$0xff]  ;;  %v814_v20 = vld [vmem:[%s1121_s8 + $0x18] sm:$0xff] }
  0x44   : > { %v403_v21 = vld [vmem:[%s1142_s18] sm:$0xff]  ;;  %v405_v22 = vld [vmem:[%s1142_s18 + $0x10] sm:$0xff]  ;;  %v404_v29 = vld [vmem:[%s1142_s18 + $0x8] sm:$0xff] }
  0x45   : > { %508 = vmatpush.bf16.msra.mxu0 %v821_v10  ;;  %826 = vmatpush.bf16.msra.mxu1 %v821_v10  ;;  %v407_v27 = vld [vmem:[%s1142_s18 + $0x20] sm:$0xff]  ;;  %v409_v28 = vld [vmem:[%s1142_s18 + $0x30] sm:$0xff]  ;;  %v406_v30 = vld [vmem:[%s1142_s18 + $0x18] sm:$0xff] }
  0x46   : > { %827 = vmatpush.bf16.msra.mxu2 %v821_v10  ;;  %828 = vmatpush.bf16.msra.mxu3 %v821_v10  ;;  %v408_v39 = vld [vmem:[%s1142_s18 + $0x28] sm:$0xff]  ;;  %v410_v40 = vld [vmem:[%s1142_s18 + $0x38] sm:$0xff] }
  0x49   : > { %509 = vmatpush.bf16.msra.mxu0 %v820_v11  ;;  %829 = vmatpush.bf16.msra.mxu1 %v820_v11 }
  0x4a   : > { %830 = vmatpush.bf16.msra.mxu2 %v820_v11  ;;  %831 = vmatpush.bf16.msra.mxu3 %v820_v11 }
  0x4d   : > { %510 = vmatpush.bf16.msra.mxu0 %v819_v12  ;;  %832 = vmatpush.bf16.msra.mxu1 %v819_v12 }
  0x4e   : > { %833 = vmatpush.bf16.msra.mxu2 %v819_v12  ;;  %834 = vmatpush.bf16.msra.mxu3 %v819_v12 }
  0x51   : > { %511 = vmatpush.bf16.msra.mxu0 %v818_v13  ;;  %835 = vmatpush.bf16.msra.mxu1 %v818_v13 }
  0x52   : > { %836 = vmatpush.bf16.msra.mxu2 %v818_v13  ;;  %837 = vmatpush.bf16.msra.mxu3 %v818_v13 }
  0x55   : > { %512 = vmatpush.bf16.msra.mxu0 %v817_v14  ;;  %838 = vmatpush.bf16.msra.mxu1 %v817_v14 }
  0x56   : > { %839 = vmatpush.bf16.msra.mxu2 %v817_v14  ;;  %840 = vmatpush.bf16.msra.mxu3 %v817_v14 }
  0x59   : > { %513 = vmatpush.bf16.msra.mxu0 %v816_v15  ;;  %841 = vmatpush.bf16.msra.mxu1 %v816_v15 }
  0x5a   : > { %842 = vmatpush.bf16.msra.mxu2 %v816_v15  ;;  %843 = vmatpush.bf16.msra.mxu3 %v816_v15 }
  0x5d   : > { %514 = vmatpush.bf16.msra.mxu0 %v815_v16  ;;  %844 = vmatpush.bf16.msra.mxu1 %v815_v16 }
  0x5e   : > { %845 = vmatpush.bf16.msra.mxu2 %v815_v16  ;;  %846 = vmatpush.bf16.msra.mxu3 %v815_v16 }
  0x60   : > { %515 = vmatmul.bf16.vlgmr.msra.gmra.mxu0 %v811_v17  ;;  %520 = vmatmul.bf16.vlgmr.msra.gmra.mxu1 %v812_v18 }
  0x61   : > { %525 = vmatmul.bf16.vlgmr.msra.gmra.mxu2 %v813_v19  ;;  %530 = vmatmul.bf16.vlgmr.msra.gmra.mxu3 %v814_v20 }
  0xdd   : > { %v516_v23 = vpop.f32.mrf.mxu0  ;;  %v521_v24 = vpop.f32.mrf.mxu1 }
  0xde   : > { %v536_v25 = vadd.f32 %v516_v23, %v403_v21  ;;  %v538_v26 = vadd.f32 %v521_v24, %v405_v22 }
  0xe0   : > { %545 = vst.msk [vmem:[%s1142_s18] sm:$0xff] %vm544_vm1, %v536_v25 }
  0xe1   : > { %547 = vst.msk [vmem:[%s1142_s18 + $0x10] sm:$0xff] %vm544_vm1, %v538_v26 }
  0xe4   : > { %v526_v31 = vpop.f32.mrf.mxu2  ;;  %v531_v32 = vpop.f32.mrf.mxu3 }
  0xe5   : > { %v540_v33 = vadd.f32 %v526_v31, %v407_v27  ;;  %v542_v34 = vadd.f32 %v531_v32, %v409_v28  ;;  %v518_v35 = vpop.f32.mrf.mxu0  ;;  %v523_v36 = vpop.f32.mrf.mxu1 }
  0xe6   : > { %v537_v37 = vadd.f32 %v518_v35, %v404_v29  ;;  %v539_v38 = vadd.f32 %v523_v36, %v406_v30 }
  0xe7   : > { %549 = vst.msk [vmem:[%s1142_s18 + $0x20] sm:$0xff] %vm544_vm1, %v540_v33 }
  0xe8   : > { %551 = vst.msk [vmem:[%s1142_s18 + $0x30] sm:$0xff] %vm544_vm1, %v542_v34 }
  0xe9   : > { %546 = vst.msk [vmem:[%s1142_s18 + $0x8] sm:$0xff] %vm544_vm1, %v537_v37 }
  0xea   : > { %548 = vst.msk [vmem:[%s1142_s18 + $0x18] sm:$0xff] %vm544_vm1, %v539_v38 }
  0xec   : > { %v528_v41 = vpop.f32.mrf.mxu2  ;;  %v533_v42 = vpop.f32.mrf.mxu3  ;;  %556 = sbr.rel (%p808_p2) target bundleno = 257 (0x101), region = 89 }
  0xed   : > { %v541_v43 = vadd.f32 %v528_v41, %v408_v39  ;;  %v543_v44 = vadd.f32 %v533_v42, %v410_v40 }
  0xef   : > { %550 = vst.msk [vmem:[%s1142_s18 + $0x28] sm:$0xff] %vm544_vm1, %v541_v43 }
  0xf0   : > { %552 = vst.msk [vmem:[%s1142_s18 + $0x38] sm:$0xff] %vm544_vm1, %v543_v44 }
  0xf1   : > { %v557_v45 = vld [vmem:[%s1142_s18] sm:$0xff]  ;;  %v558_v48 = vld [vmem:[%s1142_s18 + $0x8] sm:$0xff]  ;;  %v559_v52 = vld [vmem:[%s1142_s18 + $0x10] sm:$0xff] }
  0xf2   : > { %v916_v46 = vld [vmem:[#allocation3] ss:$0 sm:$0xff]  ;;  %v578_v49 = vld [vmem:[%s1137_s30 + $0x8] sm:$0xff]  ;;  %v579_v53 = vld [vmem:[%s1137_s30 + $0x10] sm:$0xff] }
  0xf3   : > { %v577_v47 = vld [vmem:[%s1137_s30] sm:$0xff]  ;;  %v569_v50 = vadd.f32 %v916_v46, %v557_v45  ;;  %v570_v51 = vadd.f32 %v916_v46, %v558_v48  ;;  %v560_v54 = vld [vmem:[%s1142_s18 + $0x18] sm:$0xff]  ;;  %v571_v55 = vadd.f32 %v916_v46, %v559_v52  ;;  %v582_v0 = vld [vmem:[%s1137_s30 + $0x28] sm:$0xff] }
  0xf4   : > { %v572_v56 = vadd.f32 %v916_v46, %v560_v54  ;;  %v580_v57 = vld [vmem:[%s1137_s30 + $0x18] sm:$0xff]  ;;  %v561_v58 = vld [vmem:[%s1142_s18 + $0x20] sm:$0xff]  ;;  %v563_v1 = vld [vmem:[%s1142_s18 + $0x30] sm:$0xff] }
  0xf5   : > { %v581_v59 = vld [vmem:[%s1137_s30 + $0x20] sm:$0xff]  ;;  %v585_v60 = vadd.f32 %v577_v47, %v569_v50  ;;  %v586_v61 = vadd.f32 %v578_v49, %v570_v51  ;;  %v573_v62 = vadd.f32 %v916_v46, %v561_v58  ;;  %v587_v2 = vadd.f32 %v579_v53, %v571_v55  ;;  %v583_v6 = vld [vmem:[%s1137_s30 + $0x30] sm:$0xff]  ;;  %v584_v8 = vld [vmem:[%s1137_s30 + $0x38] sm:$0xff] }
  0xf6   : > { %v562_v63 = vld [vmem:[%s1142_s18 + $0x28] sm:$0xff]  ;;  %v588_v3 = vadd.f32 %v580_v57, %v572_v56  ;;  %v575_v5 = vadd.f32 %v916_v46, %v563_v1 }
  0xf7   : > { %v574_v4 = vadd.f32 %v916_v46, %v562_v63  ;;  %v564_v7 = vld [vmem:[%s1142_s18 + $0x38] sm:$0xff]  ;;  %v593_v9 = vmax.f32 %v585_v60, 0.0  ;;  %v594_v10 = vmax.f32 %v586_v61, 0.0  ;;  %v589_v11 = vadd.f32 %v581_v59, %v573_v62 }
  0xf8   : > { %v576_v12 = vadd.f32 %v916_v46, %v564_v7  ;;  %v595_v13 = vmax.f32 %v587_v2, 0.0  ;;  %v596_v14 = vmax.f32 %v588_v3, 0.0  ;;  %v591_v16 = vadd.f32 %v583_v6, %v575_v5 }
  0xf9   : > { %v590_v15 = vadd.f32 %v582_v0, %v574_v4  ;;  %601 = vst.msk [vmem:[%s1142_s18] sm:$0xff] %vm544_vm1, %v593_v9  ;;  %v597_v17 = vmax.f32 %v589_v11, 0.0 }
  0xfa   : > { %v592_v18 = vadd.f32 %v584_v8, %v576_v12  ;;  %602 = vst.msk [vmem:[%s1142_s18 + $0x8] sm:$0xff] %vm544_vm1, %v594_v10  ;;  %v599_v20 = vmax.f32 %v591_v16, 0.0 }
  0xfb   : > { %v598_v19 = vmax.f32 %v590_v15, 0.0  ;;  %603 = vst.msk [vmem:[%s1142_s18 + $0x10] sm:$0xff] %vm544_vm1, %v595_v13 }
  0xfc   : > { %604 = vst.msk [vmem:[%s1142_s18 + $0x18] sm:$0xff] %vm544_vm1, %v596_v14  ;;  %v600_v21 = vmax.f32 %v592_v18, 0.0 }
  0xfd   : > { %605 = vst.msk [vmem:[%s1142_s18 + $0x20] sm:$0xff] %vm544_vm1, %v597_v17 }
  0xfe   : > { %606 = vst.msk [vmem:[%s1142_s18 + $0x28] sm:$0xff] %vm544_vm1, %v598_v19 }
  0xff   : > { %607 = vst.msk [vmem:[%s1142_s18 + $0x30] sm:$0xff] %vm544_vm1, %v599_v20 }
 0x100   : > { %608 = vst.msk [vmem:[%s1142_s18 + $0x38] sm:$0xff] %vm544_vm1, %v600_v21 }
 0x101 PF: > { %s15_s21 = sadd.s32 1, %s1005_s21   ;;  %s1251_s15 = smov %s985_s16 }
 0x102   : > { %p12_p3 = scmp.ge.s32.totalorder %s15_s21, 12   ;;  %s1252_s16 = smov %s1105_s9 }
 0x103   : > { %s1253_s17 = smov %s997_s19  ;;  %s1254_s18 = smov %s1001_s20 }
 0x104   : > { %s1255_s19 = smov %s1258_s23  ;;  %s1256_s20 = smov %s1262_s24 }
 0x105   :  { %14 = sbr.rel (!%p12_p3) target bundleno = 4 (0x4), region = 132 }
 0x10a   :  { %637 = vsyncpa [#allocation4], 1 }
 0x10b   :  { %639 = vsyncpa [#allocation4 + $0x1], 1 }

// kernel: forward.26
= control target key start
LH: loop header
LB: loop body
LE: loop exit
PB: predicated region body
PF: predicated region fallthrough
CT: control target
= control target key end

     0   :  { %8 = vsyncpa [#allocation4], 0  ;;  %s784_s12 = smov 0   ;;  %s786_s13 = smov 0   ;;  %s923_s0 = inlined_call_operand.vmem [shape: bf16[32,640], index: 0, kind: input, shape index: {}]   ;;  %s924_s1 = inlined_call_operand.vmem [shape: bf16[640,128], index: 1, kind: input, shape index: {}]   ;;  %s925_s2 = inlined_call_operand.hbm [shape: f32[1,128], index: 2, kind: input, shape index: {}]   ;;  %s926_s3 = inlined_call_operand.vmem [shape: f32[32,128], index: 3, kind: output, shape index: {}]  }
   0x1   :  { %s788_s14 = smov 0   ;;  %s790_s15 = smov 0  }
   0x2   :  { %s792_s16 = smov 0   ;;  %s794_s17 = smov 0  }
   0x3   :  { %s796_s18 = smov 0  }
   0x4 LB: > { %s537_s19 = sadd.s32 4294967295, %s760_s18   ;;  %s26_s20 = sadd.s32 1, %s752_s16  ;;  %s760_s18 = sphi %s796_s18, %s14_s18   ;;  %s756_s17 = sphi %s794_s17, %s935_s17   ;;  %s752_s16 = sphi %s792_s16, %s934_s16   ;;  %s748_s15 = sphi %s790_s15, %s933_s15   ;;  %s744_s14 = sphi %s788_s14, %s932_s14   ;;  %s740_s13 = sphi %s786_s13, %s931_s13   ;;  %s736_s12 = sphi %s784_s12, %s930_s12  }
   0x5   : > { %p27_p0 = scmp.ge.s32.totalorder %s26_s20, 5  ;;  %s33_s21 = sadd.s32 1, %s756_s17 }
   0x6   : > { %s42_s22 = sadd.s32 1, %s740_s13  ;;  %p49_p1 = scmp.ne.s32.totalorder %s740_s13, %s736_s12 }
   0x7   : > { %s937_s20 = smov (%p27_p0, %s26_s20), 0  ;;  %s939_s21 = smov (!%p27_p0, %s33_s21), %s756_s17 }
   0x8   : > { %s38_s23 = ssub.s32 %s752_s16, %s937_s20  ;;  %p50_p2 = scmp.eq.s32.totalorder %s760_s18, 0 }
   0x9   : > { %p35_p3 = scmp.ge.s32.totalorder %s939_s21, 2  ;;  %p539_p4 = scmp.ge.s32.totalorder %s760_s18, 1 }
   0xa   : > { %p832_p5 = por %p50_p2, %p49_p1  ;;  %p148_p6 = scmp.lt.s32.totalorder %s760_s18, 11 }
   0xb   : > { %s941_s21 = smov (%p35_p3, %s939_s21), 0  ;;  %p845_p8 = scmp.eq.s32.totalorder %s537_s19, 0 }
   0xc   : > { %p839_p7 = pnand %p539_p4, %p148_p6  ;;  %s37_s26 = ssub.s32 %s756_s17, %s941_s21 }
   0xd   : > { %s39_s28 = sor.u32 %s38_s23, %s37_s26  ;;  %s161_s4 = sshll.u32 %s925_s2, 4  ;;  %s162_s4 = int_to_ptr.hbm [resolvable:$true] %s161_s4 }
   0xe   : > { %p607_p9 = pneg %p839_p7  ;;  %p40_p10 = scmp.eq.s32.totalorder %s39_s28, 0 }
   0xf   : > { %s762_s6 = smov [#allocation3]   ;;  %p541_p12 = scmp.ge.s32.totalorder %s760_s18, 10 }
  0x10   : > { %s855_s5 = scalar_select %p40_p10, %s740_s13, %s42_s22  }
  0x11   : > { %s163_s7 = sshll.u32 %s762_s6, 4  ;;  %p608_p11 = pnand %p845_p8, %p607_p9  ;;  %s164_s7 = int_to_ptr.vmem [resolvable:$true] %s163_s7 }
  0x12   : > { %170 = sbr.rel (%p541_p12) target bundleno = 32 (0x20), region = 20 }
  0x13   : > { %610 = dma.hbm_to_vmem [thread:$0]  (!%p608_p11), %s162_s4, 16, %s164_s7, [#allocation4]  }
  0x17   : > { %173 = sbr.rel (!%p832_p5) target bundleno = 32 (0x20), region = 24  ;;  %s175_s8 = sand.u32 (%p832_p5), 1, %s740_s13  }
  0x18   : > { %s602_s9 = smul.u32 (%p832_p5), 10, %s756_s17  ;;  %s542_s10 = sshll.u32 (%p832_p5), %s175_s8, 3 }
  0x19   : > { %s177_s28 = scalar_lea.vmem (%p832_p5), [#allocation2], %s542_s10 }
  0x1a   : > { %s180_s11 = sadd.s32 (%p832_p5), %s752_s16, %s602_s9 }
  0x1b   : > { %s545_s19 = sshll.u32 (%p832_p5), %s180_s11, 2 }
  0x1c   : > { %s182_s26 = scalar_lea.vmem %s923_s0, %s545_s19 }
  0x1d   : > { %v199_v0 = vld [vmem:[%s182_s26] sm:$0xf]  ;;  %v201_v1 = vld [vmem:[%s182_s26 + $0x14] sm:$0xf] }
  0x1e   : > { %200 = vst [vmem:[%s177_s28] sm:$0xf] %v199_v0 }
  0x1f   : > { %202 = vst [vmem:[%s177_s28 + $0x4] sm:$0xf] %v201_v1 }
  0x20 PF: > { %245 = sbr.rel (%p839_p7) target bundleno = 233 (0xe9), region = 69  ;;  %s248_s24 = sand.u32 (!%p839_p7), 1, %s736_s12  }
  0x21   : > { %s871_s29 = sshll.u32 (!%p839_p7), %s248_s24, 3 }
  0x22   : > { %s250_s30 = scalar_lea.vmem (!%p839_p7), [#allocation2], %s871_s29 }
  0x25   : > { %731 = dma.done.wait (%p845_p8), [#allocation4], 16  }
  0x26   : > { %733 = vsyncadd (%p845_p8), [#allocation4], 4294967280  ;;  %s549_s4 = sshll.u32 %s744_s14, 4  ;;  %s551_s6 = sshll.u32 %s748_s15, 1 }
  0x27   : > { %p289_p13 = scmp.lt.s32.totalorder %s549_s4, 79  ;;  %p298_p0 = scmp.lt.s32.totalorder %s551_s6, 3 }
  0x28   : > { %p553_p1 = scmp.ne.s32.totalorder %s744_s14, 0 }
  0x29   : > { %s943_s4 = smov (!%p289_p13, %s549_s4), 79  ;;  %s945_s6 = smov (!%p298_p0, %s551_s6), 3 }
  0x2a   : > { %s550_s25 = sshll.u32 %s943_s4, 2  ;;  %s552_s9 = sshll.u32 %s945_s6, 3 }
  0x2b   : > { %s295_s8 = scalar_lea.vmem %s924_s1, %s550_s25  ;;  %s886_s19 = scalar_lea.vmem %s926_s3, %s552_s9 }
  0x2c   : > { %309 = sbr.rel (%p553_p1) target bundleno = 52 (0x34), region = 81 }
  0x31   : > { %v763_v2 = vmov 0.0  }
  0x32   : > { %310 = vst [vmem:[%s886_s19] sm:$0xff] %v763_v2 }
  0x33   : > { %311 = vst [vmem:[%s886_s19 + $0x8] sm:$0xff] %v763_v2 }
  0x34 PF: > { %v601_v3 = vld [vmem:[%s295_s8 + $0x38] sm:$0xff]  ;;  %v600_v4 = vld [vmem:[%s295_s8 + $0x30] sm:$0xff]  ;;  %v599_v5 = vld [vmem:[%s295_s8 + $0x28] sm:$0xff]  ;;  %p590_p2 = scmp.ne.s32.totalorder %s744_s14, 4 }
  0x35   : > { %386 = vmatpush.bf16.msra.mxu0 %v601_v3  ;;  %v598_v6 = vld [vmem:[%s295_s8 + $0x20] sm:$0xff]  ;;  %v597_v7 = vld [vmem:[%s295_s8 + $0x18] sm:$0xff]  ;;  %v596_v8 = vld [vmem:[%s295_s8 + $0x10] sm:$0xff] }
  0x36   : > { %v595_v9 = vld [vmem:[%s295_s8 + $0x8] sm:$0xff]  ;;  %v594_v10 = vld [vmem:[%s295_s8] sm:$0xff] }
  0x37   : > { %v593_v11 = vld [vmem:[%s250_s30] sm:$0xff] }
  0x39   : > { %387 = vmatpush.bf16.msra.mxu0 %v600_v4  ;;  %v312_v12 = vld [vmem:[%s886_s19] sm:$0xff] }
  0x3a   : > { %v313_v14 = vld [vmem:[%s886_s19 + $0x8] sm:$0xff] }
  0x3d   : > { %388 = vmatpush.bf16.msra.mxu0 %v599_v5 }
  0x41   : > { %389 = vmatpush.bf16.msra.mxu0 %v598_v6 }
  0x45   : > { %390 = vmatpush.bf16.msra.mxu0 %v597_v7 }
  0x49   : > { %391 = vmatpush.bf16.msra.mxu0 %v596_v8 }
  0x4d   : > { %392 = vmatpush.bf16.msra.mxu0 %v595_v9 }
  0x51   : > { %393 = vmatpush.bf16.msra.mxu0 %v594_v10 }
  0x54   : > { %394 = vmatmul.bf16.vlgmr.msra.gmra.mxu0 %v593_v11 }
  0xd1   : > { %v395_v13 = vpop.f32.mrf.mxu0 }
  0xd2   : > { %v400_v15 = vadd.f32 %v395_v13, %v312_v12 }
  0xd4   : > { %402 = vst [vmem:[%s886_s19] sm:$0xff] %v400_v15 }
  0xd8   : > { %407 = sbr.rel (%p590_p2) target bundleno = 233 (0xe9), region = 85 }
  0xd9   : > { %v397_v16 = vpop.f32.mrf.mxu0 }
  0xda   : > { %v401_v17 = vadd.f32 %v397_v16, %v313_v14 }
  0xdc   : > { %403 = vst [vmem:[%s886_s19 + $0x8] sm:$0xff] %v401_v17 }
  0xdd   : > { %v408_v18 = vld [vmem:[%s886_s19] sm:$0xff]  ;;  %v671_v20 = vld [vmem:[#allocation3] ss:$0 sm:$0xff] }
  0xde   : > { %v414_v21 = vadd.f32 %v671_v20, %v408_v18 }
  0xe0   : > { %v416_v23 = vmax.f32 %v414_v21, 0.0 }
  0xe2   : > { %418 = vst [vmem:[%s886_s19] sm:$0xff] %v416_v23 }
  0xe3   : > { %v409_v19 = vld [vmem:[%s886_s19 + $0x8] sm:$0xff] }
  0xe4   : > { %v415_v22 = vadd.f32 %v671_v20, %v409_v19 }
  0xe6   : > { %v417_v24 = vmax.f32 %v415_v22, 0.0 }
  0xe8   : > { %419 = vst [vmem:[%s886_s19 + $0x8] sm:$0xff] %v417_v24 }
  0xe9 PF: > { %s14_s18 = sadd.s32 1, %s760_s18   ;;  %s930_s12 = smov %s740_s13 }
  0xea   : > { %p11_p3 = scmp.ge.s32.totalorder %s14_s18, 12   ;;  %s931_s13 = smov %s855_s5 }
  0xeb   : > { %s932_s14 = smov %s752_s16  ;;  %s933_s15 = smov %s756_s17 }
  0xec   : > { %s934_s16 = smov %s937_s20  ;;  %s935_s17 = smov %s941_s21 }
  0xed   :  { %13 = sbr.rel (!%p11_p3) target bundleno = 4 (0x4), region = 125 }
  0xf2   :  { %448 = vsyncpa [#allocation4], 1 }
  0xf3   :  { %450 = vsyncpa [#allocation4 + $0x1], 1 }

// kernel: forward.25
= control target key start
LH: loop header
LB: loop body
LE: loop exit
PB: predicated region body
PF: predicated region fallthrough
CT: control target
= control target key end

     0   :  { %8 = vsyncpa [#allocation3], 0  ;;  %s618_s12 = smov 0   ;;  %s620_s13 = smov 0   ;;  %s667_s0 = inlined_call_operand.vmem [shape: bf16[32,64], index: 0, kind: input, shape index: {}]   ;;  %s668_s1 = inlined_call_operand.vmem [shape: bf16[64,128], index: 1, kind: input, shape index: {}]   ;;  %s669_s2 = inlined_call_operand.hbm [shape: f32[1,128], index: 2, kind: input, shape index: {}]   ;;  %s670_s3 = inlined_call_operand.vmem [shape: f32[32,128], index: 3, kind: output, shape index: {}]  }
   0x1   :  { %s622_s14 = smov 0  }
   0x2 LB: > { %s461_s15 = sadd.s32 4294967295, %s594_s14   ;;  %s33_s16 = sadd.s32 1, %s590_s13  ;;  %s594_s14 = sphi %s622_s14, %s14_s14   ;;  %s590_s13 = sphi %s620_s13, %s672_s13   ;;  %s586_s12 = sphi %s618_s12, %s671_s12  }
   0x3   : > { %p35_p0 = scmp.ge.s32.totalorder %s33_s16, 2  ;;  %p463_p1 = scmp.ge.s32.totalorder %s594_s14, 1 }
   0x4   : > { %p148_p2 = scmp.lt.s32.totalorder %s594_s14, 3  ;;  %p509_p4 = scmp.eq.s32.totalorder %s461_s15, 0 }
   0x5   : > { %s674_s16 = smov (%p35_p0, %s33_s16), 0  ;;  %s173_s19 = sshll.u32 %s669_s2, 4  ;;  %s174_s19 = int_to_ptr.hbm [resolvable:$true] %s173_s19 }
   0x6   : > { %p149_p3 = pnand %p463_p1, %p148_p2  ;;  %s596_s20 = smov [#allocation2]  }
   0x7   : > { %s175_s21 = sshll.u32 %s596_s20, 4  ;;  %s176_s21 = int_to_ptr.vmem [resolvable:$true] %s175_s21 }
   0x8   : > { %p505_p5 = pneg %p149_p3  ;;  %200 = sbr.rel (%p149_p3) target bundleno = 169 (0xa9), region = 32 }
   0xa   : > { %p506_p6 = pnand %p509_p4, %p505_p5 }
   0xc   : > { %508 = dma.hbm_to_vmem [thread:$0]  (!%p506_p6), %s174_s19, 16, %s176_s21, [#allocation3]  }
   0xd   : > { %581 = dma.done.wait (%p509_p4), [#allocation3], 16  }
   0xe   : > { %583 = vsyncadd (%p509_p4), [#allocation3], 4294967280  ;;  %s469_s22 = sshll.u32 %s586_s12, 1  ;;  %v500_v0 = vld [vmem:[%s668_s1 + $0x18] sm:$0xff]  ;;  %v597_v1 = vmov 0.0   ;;  %v499_v2 = vld [vmem:[%s668_s1 + $0x10] sm:$0xff] }
   0xf   : > { %p240_p7 = scmp.lt.s32.totalorder %s469_s22, 3  ;;  %322 = vmatpush.bf16.msra.mxu0 %v500_v0  ;;  %v498_v3 = vld [vmem:[%s668_s1 + $0x8] sm:$0xff]  ;;  %v497_v4 = vld [vmem:[%s668_s1] sm:$0xff]  ;;  %vm314_vm0 = vcmask 523264  }
  0x10   : > { %v537_v10 = vld [vmem:[#allocation2] ss:$0 sm:$0xff] }
  0x11   : > { %s676_s22 = smov (!%p240_p7, %s469_s22), 3 }
  0x12   : > { %s472_s23 = sshll.u32 %s676_s22, 3  ;;  %s470_s6 = sshll.u32 %s676_s22, 2 }
  0x13   : > { %s264_s26 = scalar_lea.vmem %s670_s3, %s472_s23  ;;  %323 = vmatpush.bf16.msra.mxu0 %v499_v2  ;;  %s246_s11 = scalar_lea.vmem %s667_s0, %s470_s6 }
  0x14   : > { %271 = vst [vmem:[%s264_s26] sm:$0xff] %v597_v1  ;;  %v496_v5 = vld [vmem:[%s246_s11] sm:$0xff] }
  0x15   : > { %272 = vst [vmem:[%s264_s26 + $0x8] sm:$0xff] %v597_v1 }
  0x17   : > { %324 = vmatpush.bf16.msra.mxu0 %v498_v3 }
  0x1b   : > { %325 = vmatpush.bf16.msra.mxu0 %v497_v4  ;;  %v273_v6 = vld [vmem:[%s264_s26] sm:$0xff] }
  0x1e   : > { %493 = vmatmul.msk.bf16.vlgmr.msra.gmra.mxu0 %vm314_vm0, %v496_v5 }
  0x9b   : > { %v327_v7 = vpop.f32.mrf.mxu0 }
  0x9c   : > { %v332_v8 = vadd.f32 %v327_v7, %v273_v6 }
  0x9e   : > { %334 = vst [vmem:[%s264_s26] sm:$0xff] %v332_v8 }
  0xa3   : > { %v329_v9 = vpop.f32.mrf.mxu0 }
  0xa4   : > { %335 = vst [vmem:[%s264_s26 + $0x8] sm:$0xff] %v329_v9  ;;  %v346_v13 = vadd.f32 %v537_v10, %v329_v9 }
  0xa5   : > { %v339_v11 = vld [vmem:[%s264_s26] sm:$0xff] }
  0xa6   : > { %v345_v12 = vadd.f32 %v537_v10, %v339_v11  ;;  %348 = vst [vmem:[%s264_s26 + $0x8] sm:$0xff] %v346_v13 }
  0xa8   : > { %347 = vst [vmem:[%s264_s26] sm:$0xff] %v345_v12 }
  0xa9 PF: > { %s14_s14 = sadd.s32 1, %s594_s14   ;;  %s671_s12 = smov %s590_s13 }
  0xaa   : > { %p11_p8 = scmp.ge.s32.totalorder %s14_s14, 4   ;;  %s672_s13 = smov %s674_s16 }
  0xac   :  { %13 = sbr.rel (!%p11_p8) target bundleno = 2 (0x2), region = 79 }
  0xb1   :  { %377 = vsyncpa [#allocation3], 1 }
  0xb2   :  { %379 = vsyncpa [#allocation3 + $0x1], 1 }

// kernel: forward.27
= control target key start
LH: loop header
LB: loop body
LE: loop exit
PB: predicated region body
PF: predicated region fallthrough
CT: control target
= control target key end

     0   :  { %9 = vsyncpa [#allocation4], 0  ;;  %s870_s15 = smov 0   ;;  %s872_s16 = smov 0   ;;  %s1016_s0 = inlined_call_operand.vmem [shape: bf16[32,1152], index: 0, kind: input, shape index: {}]   ;;  %s1017_s1 = inlined_call_operand.vmem [shape: bf16[1152,128], index: 1, kind: input, shape index: {}]   ;;  %s1018_s2 = inlined_call_operand.hbm [shape: f32[1,128], index: 2, kind: input, shape index: {}]   ;;  %s1019_s3 = inlined_call_operand.vmem [shape: f32[32,128], index: 3, kind: input, shape index: {}]   ;;  %s1020_s4 = inlined_call_operand.vmem [shape: f32[32,128], index: 4, kind: output, shape index: {}]  }
   0x1   :  { %s874_s17 = smov 0   ;;  %s876_s18 = smov 0  }
   0x2   :  { %s878_s19 = smov 0   ;;  %s880_s20 = smov 0  }
   0x3   :  { %s882_s21 = smov 0  }
   0x4 LB: > { %s616_s22 = sadd.s32 4294967295, %s841_s21   ;;  %s27_s23 = sadd.s32 1, %s833_s19  ;;  %s841_s21 = sphi %s882_s21, %s15_s21   ;;  %s837_s20 = sphi %s880_s20, %s1029_s20   ;;  %s833_s19 = sphi %s878_s19, %s1028_s19   ;;  %s829_s18 = sphi %s876_s18, %s1027_s18   ;;  %s825_s17 = sphi %s874_s17, %s1026_s17   ;;  %s821_s16 = sphi %s872_s16, %s1025_s16   ;;  %s817_s15 = sphi %s870_s15, %s1024_s15  }
   0x5   : > { %p28_p0 = scmp.ge.s32.totalorder %s27_s23, 9  ;;  %s34_s24 = sadd.s32 1, %s837_s20 }
   0x6   : > { %s43_s25 = sadd.s32 1, %s821_s16  ;;  %p50_p1 = scmp.ne.s32.totalorder %s821_s16, %s817_s15 }
   0x7   : > { %s1031_s23 = smov (%p28_p0, %s27_s23), 0  ;;  %s1033_s24 = smov (!%p28_p0, %s34_s24), %s837_s20 }
   0x8   : > { %s39_s26 = ssub.s32 %s833_s19, %s1031_s23  ;;  %p51_p2 = scmp.eq.s32.totalorder %s841_s21, 0 }
   0x9   : > { %p36_p3 = scmp.ge.s32.totalorder %s1033_s24, 2  ;;  %p618_p4 = scmp.ge.s32.totalorder %s841_s21, 1 }
   0xa   : > { %p918_p5 = por %p51_p2, %p50_p1  ;;  %p177_p6 = scmp.lt.s32.totalorder %s841_s21, 19 }
   0xb   : > { %s1035_s24 = smov (%p36_p3, %s1033_s24), 0  ;;  %p931_p8 = scmp.eq.s32.totalorder %s616_s22, 0 }
   0xc   : > { %p925_p7 = pnand %p618_p4, %p177_p6  ;;  %s38_s29 = ssub.s32 %s837_s20, %s1035_s24 }
   0xd   : > { %s40_s5 = sor.u32 %s39_s26, %s38_s29  ;;  %s190_s8 = sshll.u32 %s1018_s2, 4  ;;  %s191_s8 = int_to_ptr.hbm [resolvable:$true] %s190_s8 }
   0xe   : > { %p688_p9 = pneg %p925_p7  ;;  %p41_p10 = scmp.eq.s32.totalorder %s40_s5, 0 }
   0xf   : > { %s843_s10 = smov [#allocation3]   ;;  %p620_p12 = scmp.ge.s32.totalorder %s841_s21, 18 }
  0x10   : > { %s941_s9 = scalar_select %p41_p10, %s821_s16, %s43_s25  }
  0x11   : > { %s192_s11 = sshll.u32 %s843_s10, 4  ;;  %p689_p11 = pnand %p931_p8, %p688_p9  ;;  %s193_s11 = int_to_ptr.vmem [resolvable:$true] %s192_s11 }
  0x12   : > { %199 = sbr.rel (%p620_p12) target bundleno = 32 (0x20), region = 20 }
  0x13   : > { %691 = dma.hbm_to_vmem [thread:$0]  (!%p689_p11), %s191_s8, 16, %s193_s11, [#allocation4]  }
  0x17   : > { %202 = sbr.rel (!%p918_p5) target bundleno = 32 (0x20), region = 24  ;;  %s204_s12 = sand.u32 (%p918_p5), 1, %s821_s16  }
  0x18   : > { %s683_s13 = smul.u32 (%p918_p5), 18, %s837_s20  ;;  %s621_s14 = sshll.u32 (%p918_p5), %s204_s12, 3 }
  0x19   : > { %s206_s6 = scalar_lea.vmem (%p918_p5), [#allocation2], %s621_s14 }
  0x1a   : > { %s209_s22 = sadd.s32 (%p918_p5), %s833_s19, %s683_s13 }
  0x1b   : > { %s624_s25 = sshll.u32 (%p918_p5), %s209_s22, 2 }
  0x1c   : > { %s211_s5 = scalar_lea.vmem %s1016_s0, %s624_s25 }
  0x1d   : > { %v228_v0 = vld [vmem:[%s211_s5] sm:$0xf]  ;;  %v230_v1 = vld [vmem:[%s211_s5 + $0x24] sm:$0xf] }
  0x1e   : > { %229 = vst [vmem:[%s206_s6] sm:$0xf] %v228_v0 }
  0x1f   : > { %231 = vst [vmem:[%s206_s6 + $0x4] sm:$0xf] %v230_v1 }
  0x20 PF: > { %286 = sbr.rel (%p925_p7) target bundleno = 235 (0xeb), region = 73  ;;  %s289_s27 = sand.u32 (!%p925_p7), 1, %s817_s15  }
  0x21   : > { %s957_s7 = sshll.u32 (!%p925_p7), %s289_s27, 3 }
  0x22   : > { %s291_s8 = scalar_lea.vmem (!%p925_p7), [#allocation2], %s957_s7 }
  0x25   : > { %812 = dma.done.wait (%p931_p8), [#allocation4], 16  }
  0x26   : > { %814 = vsyncadd (%p931_p8), [#allocation4], 4294967280  ;;  %s628_s10 = sshll.u32 %s825_s17, 4  ;;  %s630_s11 = sshll.u32 %s829_s18, 1 }
  0x27   : > { %p340_p13 = scmp.lt.s32.totalorder %s628_s10, 143  ;;  %p349_p0 = scmp.lt.s32.totalorder %s630_s11, 3 }
  0x28   : > { %p634_p1 = scmp.ne.s32.totalorder %s825_s17, 0 }
  0x29   : > { %s1037_s10 = smov (!%p340_p13, %s628_s10), 143  ;;  %s1039_s11 = smov (!%p349_p0, %s630_s11), 3 }
  0x2a   : > { %s629_s28 = sshll.u32 %s1037_s10, 2  ;;  %s631_s14 = sshll.u32 %s1039_s11, 3 }
  0x2b   : > { %s346_s13 = scalar_lea.vmem %s1017_s1, %s629_s28  ;;  %s972_s26 = scalar_lea.vmem %s1019_s3, %s631_s14 }
  0x2c   : > { %s977_s5 = scalar_lea.vmem %s1020_s4, %s631_s14  ;;  %369 = sbr.rel (%p634_p1) target bundleno = 52 (0x34), region = 85 }
  0x31   : > { %v844_v2 = vmov 0.0  }
  0x32   : > { %370 = vst [vmem:[%s977_s5] sm:$0xff] %v844_v2 }
  0x33   : > { %371 = vst [vmem:[%s977_s5 + $0x8] sm:$0xff] %v844_v2 }
  0x34 PF: > { %v682_v3 = vld [vmem:[%s346_s13 + $0x38] sm:$0xff]  ;;  %v681_v4 = vld [vmem:[%s346_s13 + $0x30] sm:$0xff]  ;;  %v680_v5 = vld [vmem:[%s346_s13 + $0x28] sm:$0xff]  ;;  %p671_p2 = scmp.ne.s32.totalorder %s825_s17, 8 }
  0x35   : > { %446 = vmatpush.bf16.msra.mxu0 %v682_v3  ;;  %v679_v6 = vld [vmem:[%s346_s13 + $0x20] sm:$0xff]  ;;  %v678_v7 = vld [vmem:[%s346_s13 + $0x18] sm:$0xff]  ;;  %v677_v8 = vld [vmem:[%s346_s13 + $0x10] sm:$0xff] }
  0x36   : > { %v676_v9 = vld [vmem:[%s346_s13 + $0x8] sm:$0xff]  ;;  %v675_v10 = vld [vmem:[%s346_s13] sm:$0xff] }
  0x37   : > { %v674_v11 = vld [vmem:[%s291_s8] sm:$0xff] }
  0x39   : > { %447 = vmatpush.bf16.msra.mxu0 %v681_v4  ;;  %v372_v12 = vld [vmem:[%s977_s5] sm:$0xff] }
  0x3a   : > { %v373_v14 = vld [vmem:[%s977_s5 + $0x8] sm:$0xff] }
  0x3d   : > { %448 = vmatpush.bf16.msra.mxu0 %v680_v5 }
  0x41   : > { %449 = vmatpush.bf16.msra.mxu0 %v679_v6 }
  0x45   : > { %450 = vmatpush.bf16.msra.mxu0 %v678_v7 }
  0x49   : > { %451 = vmatpush.bf16.msra.mxu0 %v677_v8 }
  0x4d   : > { %452 = vmatpush.bf16.msra.mxu0 %v676_v9 }
  0x51   : > { %453 = vmatpush.bf16.msra.mxu0 %v675_v10 }
  0x54   : > { %454 = vmatmul.bf16.vlgmr.msra.gmra.mxu0 %v674_v11 }
  0xd1   : > { %v455_v13 = vpop.f32.mrf.mxu0 }
  0xd2   : > { %v460_v15 = vadd.f32 %v455_v13, %v372_v12 }
  0xd4   : > { %462 = vst [vmem:[%s977_s5] sm:$0xff] %v460_v15 }
  0xd8   : > { %467 = sbr.rel (%p671_p2) target bundleno = 235 (0xeb), region = 89 }
  0xd9   : > { %v457_v16 = vpop.f32.mrf.mxu0 }
  0xda   : > { %v461_v17 = vadd.f32 %v457_v16, %v373_v14 }
  0xdc   : > { %463 = vst [vmem:[%s977_s5 + $0x8] sm:$0xff] %v461_v17 }
  0xdd   : > { %v468_v18 = vld [vmem:[%s977_s5] sm:$0xff]  ;;  %v752_v20 = vld [vmem:[#allocation3] ss:$0 sm:$0xff]  ;;  %v477_v22 = vld [vmem:[%s972_s26 + $0x8] sm:$0xff] }
  0xde   : > { %v476_v21 = vld [vmem:[%s972_s26] sm:$0xff]  ;;  %v474_v23 = vadd.f32 %v752_v20, %v468_v18 }
  0xe0   : > { %v478_v25 = vadd.f32 %v476_v21, %v474_v23 }
  0xe2   : > { %v480_v27 = vmax.f32 %v478_v25, 0.0 }
  0xe3   : > { %v469_v19 = vld [vmem:[%s977_s5 + $0x8] sm:$0xff] }
  0xe4   : > { %v475_v24 = vadd.f32 %v752_v20, %v469_v19  ;;  %482 = vst [vmem:[%s977_s5] sm:$0xff] %v480_v27 }
  0xe6   : > { %v479_v26 = vadd.f32 %v477_v22, %v475_v24 }
  0xe8   : > { %v481_v28 = vmax.f32 %v479_v26, 0.0 }
  0xea   : > { %483 = vst [vmem:[%s977_s5 + $0x8] sm:$0xff] %v481_v28 }
  0xeb PF: > { %s15_s21 = sadd.s32 1, %s841_s21   ;;  %s1024_s15 = smov %s821_s16 }
  0xec   : > { %p12_p3 = scmp.ge.s32.totalorder %s15_s21, 20   ;;  %s1025_s16 = smov %s941_s9 }
  0xed   : > { %s1026_s17 = smov %s833_s19  ;;  %s1027_s18 = smov %s837_s20 }
  0xee   : > { %s1028_s19 = smov %s1031_s23  ;;  %s1029_s20 = smov %s1035_s24 }
  0xef   :  { %14 = sbr.rel (!%p12_p3) target bundleno = 4 (0x4), region = 132 }
  0xf4   :  { %512 = vsyncpa [#allocation4], 1 }
  0xf5   :  { %514 = vsyncpa [#allocation4 + $0x1], 1 }

// kernel: forward.28
= control target key start
LH: loop header
LB: loop body
LE: loop exit
PB: predicated region body
PF: predicated region fallthrough
CT: control target
= control target key end

     0   :  { %8 = vsyncpa [#allocation4], 0  ;;  %s784_s12 = smov 0   ;;  %s786_s13 = smov 0   ;;  %s923_s0 = inlined_call_operand.vmem [shape: bf16[32,1152], index: 0, kind: input, shape index: {}]   ;;  %s924_s1 = inlined_call_operand.vmem [shape: bf16[1152,128], index: 1, kind: input, shape index: {}]   ;;  %s925_s2 = inlined_call_operand.hbm [shape: f32[1,128], index: 2, kind: input, shape index: {}]   ;;  %s926_s3 = inlined_call_operand.vmem [shape: f32[32,128], index: 3, kind: output, shape index: {}]  }
   0x1   :  { %s788_s14 = smov 0   ;;  %s790_s15 = smov 0  }
   0x2   :  { %s792_s16 = smov 0   ;;  %s794_s17 = smov 0  }
   0x3   :  { %s796_s18 = smov 0  }
   0x4 LB: > { %s537_s19 = sadd.s32 4294967295, %s760_s18   ;;  %s26_s20 = sadd.s32 1, %s752_s16  ;;  %s760_s18 = sphi %s796_s18, %s14_s18   ;;  %s756_s17 = sphi %s794_s17, %s935_s17   ;;  %s752_s16 = sphi %s792_s16, %s934_s16   ;;  %s748_s15 = sphi %s790_s15, %s933_s15   ;;  %s744_s14 = sphi %s788_s14, %s932_s14   ;;  %s740_s13 = sphi %s786_s13, %s931_s13   ;;  %s736_s12 = sphi %s784_s12, %s930_s12  }
   0x5   : > { %p27_p0 = scmp.ge.s32.totalorder %s26_s20, 9  ;;  %s33_s21 = sadd.s32 1, %s756_s17 }
   0x6   : > { %s42_s22 = sadd.s32 1, %s740_s13  ;;  %p49_p1 = scmp.ne.s32.totalorder %s740_s13, %s736_s12 }
   0x7   : > { %s937_s20 = smov (%p27_p0, %s26_s20), 0  ;;  %s939_s21 = smov (!%p27_p0, %s33_s21), %s756_s17 }
   0x8   : > { %s38_s23 = ssub.s32 %s752_s16, %s937_s20  ;;  %p50_p2 = scmp.eq.s32.totalorder %s760_s18, 0 }
   0x9   : > { %p35_p3 = scmp.ge.s32.totalorder %s939_s21, 2  ;;  %p539_p4 = scmp.ge.s32.totalorder %s760_s18, 1 }
   0xa   : > { %p832_p5 = por %p50_p2, %p49_p1  ;;  %p148_p6 = scmp.lt.s32.totalorder %s760_s18, 19 }
   0xb   : > { %s941_s21 = smov (%p35_p3, %s939_s21), 0  ;;  %p845_p8 = scmp.eq.s32.totalorder %s537_s19, 0 }
   0xc   : > { %p839_p7 = pnand %p539_p4, %p148_p6  ;;  %s37_s26 = ssub.s32 %s756_s17, %s941_s21 }
   0xd   : > { %s39_s28 = sor.u32 %s38_s23, %s37_s26  ;;  %s161_s4 = sshll.u32 %s925_s2, 4  ;;  %s162_s4 = int_to_ptr.hbm [resolvable:$true] %s161_s4 }
   0xe   : > { %p607_p9 = pneg %p839_p7  ;;  %p40_p10 = scmp.eq.s32.totalorder %s39_s28, 0 }
   0xf   : > { %s762_s6 = smov [#allocation3]   ;;  %p541_p12 = scmp.ge.s32.totalorder %s760_s18, 18 }
  0x10   : > { %s855_s5 = scalar_select %p40_p10, %s740_s13, %s42_s22  }
  0x11   : > { %s163_s7 = sshll.u32 %s762_s6, 4  ;;  %p608_p11 = pnand %p845_p8, %p607_p9  ;;  %s164_s7 = int_to_ptr.vmem [resolvable:$true] %s163_s7 }
  0x12   : > { %170 = sbr.rel (%p541_p12) target bundleno = 32 (0x20), region = 20 }
  0x13   : > { %610 = dma.hbm_to_vmem [thread:$0]  (!%p608_p11), %s162_s4, 16, %s164_s7, [#allocation4]  }
  0x17   : > { %173 = sbr.rel (!%p832_p5) target bundleno = 32 (0x20), region = 24  ;;  %s175_s8 = sand.u32 (%p832_p5), 1, %s740_s13  }
  0x18   : > { %s602_s9 = smul.u32 (%p832_p5), 18, %s756_s17  ;;  %s542_s10 = sshll.u32 (%p832_p5), %s175_s8, 3 }
  0x19   : > { %s177_s28 = scalar_lea.vmem (%p832_p5), [#allocation2], %s542_s10 }
  0x1a   : > { %s180_s11 = sadd.s32 (%p832_p5), %s752_s16, %s602_s9 }
  0x1b   : > { %s545_s19 = sshll.u32 (%p832_p5), %s180_s11, 2 }
  0x1c   : > { %s182_s26 = scalar_lea.vmem %s923_s0, %s545_s19 }
  0x1d   : > { %v199_v0 = vld [vmem:[%s182_s26] sm:$0xf]  ;;  %v201_v1 = vld [vmem:[%s182_s26 + $0x24] sm:$0xf] }
  0x1e   : > { %200 = vst [vmem:[%s177_s28] sm:$0xf] %v199_v0 }
  0x1f   : > { %202 = vst [vmem:[%s177_s28 + $0x4] sm:$0xf] %v201_v1 }
  0x20 PF: > { %245 = sbr.rel (%p839_p7) target bundleno = 233 (0xe9), region = 69  ;;  %s248_s24 = sand.u32 (!%p839_p7), 1, %s736_s12  }
  0x21   : > { %s871_s29 = sshll.u32 (!%p839_p7), %s248_s24, 3 }
  0x22   : > { %s250_s30 = scalar_lea.vmem (!%p839_p7), [#allocation2], %s871_s29 }
  0x25   : > { %731 = dma.done.wait (%p845_p8), [#allocation4], 16  }
  0x26   : > { %733 = vsyncadd (%p845_p8), [#allocation4], 4294967280  ;;  %s549_s4 = sshll.u32 %s744_s14, 4  ;;  %s551_s6 = sshll.u32 %s748_s15, 1 }
  0x27   : > { %p289_p13 = scmp.lt.s32.totalorder %s549_s4, 143  ;;  %p298_p0 = scmp.lt.s32.totalorder %s551_s6, 3 }
  0x28   : > { %p553_p1 = scmp.ne.s32.totalorder %s744_s14, 0 }
  0x29   : > { %s943_s4 = smov (!%p289_p13, %s549_s4), 143  ;;  %s945_s6 = smov (!%p298_p0, %s551_s6), 3 }
  0x2a   : > { %s550_s25 = sshll.u32 %s943_s4, 2  ;;  %s552_s9 = sshll.u32 %s945_s6, 3 }
  0x2b   : > { %s295_s8 = scalar_lea.vmem %s924_s1, %s550_s25  ;;  %s886_s19 = scalar_lea.vmem %s926_s3, %s552_s9 }
  0x2c   : > { %309 = sbr.rel (%p553_p1) target bundleno = 52 (0x34), region = 81 }
  0x31   : > { %v763_v2 = vmov 0.0  }
  0x32   : > { %310 = vst [vmem:[%s886_s19] sm:$0xff] %v763_v2 }
  0x33   : > { %311 = vst [vmem:[%s886_s19 + $0x8] sm:$0xff] %v763_v2 }
  0x34 PF: > { %v601_v3 = vld [vmem:[%s295_s8 + $0x38] sm:$0xff]  ;;  %v600_v4 = vld [vmem:[%s295_s8 + $0x30] sm:$0xff]  ;;  %v599_v5 = vld [vmem:[%s295_s8 + $0x28] sm:$0xff]  ;;  %p590_p2 = scmp.ne.s32.totalorder %s744_s14, 8 }
  0x35   : > { %386 = vmatpush.bf16.msra.mxu0 %v601_v3  ;;  %v598_v6 = vld [vmem:[%s295_s8 + $0x20] sm:$0xff]  ;;  %v597_v7 = vld [vmem:[%s295_s8 + $0x18] sm:$0xff]  ;;  %v596_v8 = vld [vmem:[%s295_s8 + $0x10] sm:$0xff] }
  0x36   : > { %v595_v9 = vld [vmem:[%s295_s8 + $0x8] sm:$0xff]  ;;  %v594_v10 = vld [vmem:[%s295_s8] sm:$0xff] }
  0x37   : > { %v593_v11 = vld [vmem:[%s250_s30] sm:$0xff] }
  0x39   : > { %387 = vmatpush.bf16.msra.mxu0 %v600_v4  ;;  %v312_v12 = vld [vmem:[%s886_s19] sm:$0xff] }
  0x3a   : > { %v313_v14 = vld [vmem:[%s886_s19 + $0x8] sm:$0xff] }
  0x3d   : > { %388 = vmatpush.bf16.msra.mxu0 %v599_v5 }
  0x41   : > { %389 = vmatpush.bf16.msra.mxu0 %v598_v6 }
  0x45   : > { %390 = vmatpush.bf16.msra.mxu0 %v597_v7 }
  0x49   : > { %391 = vmatpush.bf16.msra.mxu0 %v596_v8 }
  0x4d   : > { %392 = vmatpush.bf16.msra.mxu0 %v595_v9 }
  0x51   : > { %393 = vmatpush.bf16.msra.mxu0 %v594_v10 }
  0x54   : > { %394 = vmatmul.bf16.vlgmr.msra.gmra.mxu0 %v593_v11 }
  0xd1   : > { %v395_v13 = vpop.f32.mrf.mxu0 }
  0xd2   : > { %v400_v15 = vadd.f32 %v395_v13, %v312_v12 }
  0xd4   : > { %402 = vst [vmem:[%s886_s19] sm:$0xff] %v400_v15 }
  0xd8   : > { %407 = sbr.rel (%p590_p2) target bundleno = 233 (0xe9), region = 85 }
  0xd9   : > { %v397_v16 = vpop.f32.mrf.mxu0 }
  0xda   : > { %v401_v17 = vadd.f32 %v397_v16, %v313_v14 }
  0xdc   : > { %403 = vst [vmem:[%s886_s19 + $0x8] sm:$0xff] %v401_v17 }
  0xdd   : > { %v408_v18 = vld [vmem:[%s886_s19] sm:$0xff]  ;;  %v671_v20 = vld [vmem:[#allocation3] ss:$0 sm:$0xff] }
  0xde   : > { %v414_v21 = vadd.f32 %v671_v20, %v408_v18 }
  0xe0   : > { %v416_v23 = vmax.f32 %v414_v21, 0.0 }
  0xe2   : > { %418 = vst [vmem:[%s886_s19] sm:$0xff] %v416_v23 }
  0xe3   : > { %v409_v19 = vld [vmem:[%s886_s19 + $0x8] sm:$0xff] }
  0xe4   : > { %v415_v22 = vadd.f32 %v671_v20, %v409_v19 }
  0xe6   : > { %v417_v24 = vmax.f32 %v415_v22, 0.0 }
  0xe8   : > { %419 = vst [vmem:[%s886_s19 + $0x8] sm:$0xff] %v417_v24 }
  0xe9 PF: > { %s14_s18 = sadd.s32 1, %s760_s18   ;;  %s930_s12 = smov %s740_s13 }
  0xea   : > { %p11_p3 = scmp.ge.s32.totalorder %s14_s18, 20   ;;  %s931_s13 = smov %s855_s5 }
  0xeb   : > { %s932_s14 = smov %s752_s16  ;;  %s933_s15 = smov %s756_s17 }
  0xec   : > { %s934_s16 = smov %s937_s20  ;;  %s935_s17 = smov %s941_s21 }
  0xed   :  { %13 = sbr.rel (!%p11_p3) target bundleno = 4 (0x4), region = 125 }
  0xf2   :  { %448 = vsyncpa [#allocation4], 1 }
  0xf3   :  { %450 = vsyncpa [#allocation4 + $0x1], 1 }

// kernel: forward.31
= control target key start
LH: loop header
LB: loop body
LE: loop exit
PB: predicated region body
PF: predicated region fallthrough
CT: control target
= control target key end

     0   :  { %8 = vsyncpa [#allocation4], 0  ;;  %s875_s12 = smov 0   ;;  %s877_s13 = smov 0   ;;  %s1069_s0 = inlined_call_operand.vmem [shape: bf16[16,1152], index: 0, kind: input, shape index: {}]   ;;  %s1070_s1 = inlined_call_operand.vmem [shape: bf16[1152,256], index: 1, kind: input, shape index: {}]   ;;  %s1071_s2 = inlined_call_operand.hbm [shape: f32[1,256], index: 2, kind: input, shape index: {}]   ;;  %s1072_s3 = inlined_call_operand.vmem [shape: f32[16,256], index: 3, kind: output, shape index: {}]  }
   0x1   :  { %s879_s14 = smov 0   ;;  %s881_s15 = smov 0  }
   0x2   :  { %s883_s16 = smov 0  }
   0x3 LB: > { %s623_s17 = sadd.s32 4294967295, %s851_s16   ;;  %s26_s18 = sadd.s32 1, %s847_s15  ;;  %s851_s16 = sphi %s883_s16, %s14_s16   ;;  %s847_s15 = sphi %s881_s15, %s1079_s15   ;;  %s843_s14 = sphi %s879_s14, %s1078_s14   ;;  %s839_s13 = sphi %s877_s13, %s1077_s13   ;;  %s835_s12 = sphi %s875_s12, %s1076_s12  }
   0x4   : > { %p27_p0 = scmp.ge.s32.totalorder %s26_s18, 9  ;;  %s42_s19 = sadd.s32 1, %s839_s13 }
   0x5   : > { %p49_p1 = scmp.ne.s32.totalorder %s839_s13, %s835_s12  ;;  %p50_p2 = scmp.eq.s32.totalorder %s851_s16, 0 }
   0x6   : > { %s1081_s18 = smov (%p27_p0, %s26_s18), 0  ;;  %p624_p4 = scmp.ge.s32.totalorder %s851_s16, 1 }
   0x7   : > { %p908_p3 = por %p50_p2, %p49_p1  ;;  %s38_s21 = ssub.s32 %s847_s15, %s1081_s18 }
   0x8   : > { %p148_p5 = scmp.lt.s32.totalorder %s851_s16, 10  ;;  %p40_p6 = scmp.eq.s32.totalorder %s38_s21, 0 }
   0x9   : > { %p920_p8 = scmp.eq.s32.totalorder %s623_s17, 0  ;;  %s162_s27 = sshll.u32 %s1071_s2, 4  ;;  %s163_s27 = int_to_ptr.hbm [resolvable:$true] %s162_s27 }
   0xa   : > { %p916_p7 = pnand %p624_p4, %p148_p5  ;;  %s853_s28 = smov [#allocation3]  }
   0xb   : > { %s925_s24 = scalar_select %p40_p6, %s839_s13, %s42_s19  }
   0xc   : > { %p731_p9 = pneg %p916_p7  ;;  %s164_s29 = sshll.u32 %s853_s28, 4  ;;  %s165_s29 = int_to_ptr.vmem [resolvable:$true] %s164_s29 }
   0xd   : > { %p626_p11 = scmp.ge.s32.totalorder %s851_s16, 9 }
   0xe   : > { %p732_p10 = pnand %p920_p8, %p731_p9 }
   0xf   : > { %171 = sbr.rel (%p626_p11) target bundleno = 26 (0x1a), region = 20 }
  0x10   : > { %734 = dma.hbm_to_vmem [thread:$0]  (!%p732_p10), %s163_s27, 32, %s165_s29, [#allocation4]  }
  0x14   : > { %174 = sbr.rel (!%p908_p3) target bundleno = 26 (0x1a), region = 24  ;;  %s176_s30 = sand.u32 (%p908_p3), 1, %s839_s13  }
  0x15   : > { %s628_s4 = sshll.u32 (%p908_p3), %s847_s15, 2  ;;  %s627_s5 = sshll.u32 (%p908_p3), %s176_s30, 3 }
  0x16   : > { %s183_s8 = scalar_lea.vmem (%p908_p3), %s1069_s0, %s628_s4  ;;  %s178_s9 = scalar_lea.vmem (%p908_p3), [#allocation2], %s627_s5 }
  0x17   : > { %v200_v0 = vld [vmem:[%s183_s8] sm:$0xf] (%p908_p3)  ;;  %v202_v1 = vld [vmem:[%s183_s8 + $0x24] sm:$0xf] (%p908_p3) }
  0x18   : > { %201 = vst [vmem:[%s178_s9] sm:$0xf] (%p908_p3), %v200_v0 }
  0x19   : > { %203 = vst [vmem:[%s178_s9 + $0x4] sm:$0xf] %v202_v1 }
  0x1a PF: > { %249 = sbr.rel (%p916_p7) target bundleno = 228 (0xe4), region = 69  ;;  %s252_s10 = sand.u32 (!%p916_p7), 1, %s835_s12  }
  0x1b   : > { %s945_s11 = sshll.u32 (!%p916_p7), %s252_s10, 3 }
  0x1c   : > { %s254_s17 = scalar_lea.vmem (!%p916_p7), [#allocation2], %s945_s11 }
  0x1f   : > { %830 = dma.done.wait (%p920_p8), [#allocation4], 32  }
  0x20   : > { %832 = vsyncadd (%p920_p8), [#allocation4], 4294967264  ;;  %s632_s19 = sshll.u32 %s843_s14, 4  ;;  %p635_p13 = scmp.ne.s32.totalorder %s843_s14, 0 }
  0x21   : > { %p298_p12 = scmp.lt.s32.totalorder %s632_s19, 143 }
  0x22   : > { %324 = sbr.rel (%p635_p13) target bundleno = 44 (0x2c), region = 81 }
  0x23   : > { %s1083_s19 = smov (!%p298_p12, %s632_s19), 143 }
  0x24   : > { %s709_s20 = sshll.u32 %s1083_s19, 3 }
  0x25   : > { %s956_s25 = scalar_lea.vmem %s1070_s1, %s709_s20 }
  0x27   : > { %v854_v2 = vmov 0.0  }
  0x28   : > { %325 = vst [vmem:[%s1072_s3] sm:$0xff] %v854_v2 }
  0x29   : > { %326 = vst [vmem:[%s1072_s3 + $0x8] sm:$0xff] %v854_v2 }
  0x2a   : > { %327 = vst [vmem:[%s1072_s3 + $0x10] sm:$0xff] %v854_v2 }
  0x2b   : > { %328 = vst [vmem:[%s1072_s3 + $0x18] sm:$0xff] %v854_v2 }
  0x2c PF: > { %v698_v3 = vld [vmem:[%s956_s25 + $0x70] sm:$0xf]  ;;  %v726_v4 = vld [vmem:[%s956_s25 + $0x74] sm:$0xf0]  ;;  %v725_v5 = vld [vmem:[%s956_s25 + $0x74] sm:$0xf] }
  0x2d   : > { %v699_v6 = vor.u32 %v726_v4, %v698_v3  ;;  %v700_v7 = vld [vmem:[%s956_s25 + $0x78] sm:$0xf0]  ;;  %v690_v8 = vld [vmem:[%s956_s25 + $0x60] sm:$0xf]  ;;  %v724_v9 = vld [vmem:[%s956_s25 + $0x64] sm:$0xf0] }
  0x2e   : > { %v703_v10 = vor.u32 %v725_v5, %v700_v7  ;;  %v723_v11 = vld [vmem:[%s956_s25 + $0x64] sm:$0xf]  ;;  %v692_v12 = vld [vmem:[%s956_s25 + $0x68] sm:$0xf0]  ;;  %v691_v13 = vor.u32 %v724_v9, %v690_v8  ;;  %v682_v15 = vld [vmem:[%s956_s25 + $0x50] sm:$0xf] }
  0x2f   : > { %437 = vmatpush.bf16.msra.mxu0 %v699_v6  ;;  %v695_v14 = vor.u32 %v723_v11, %v692_v12  ;;  %v722_v16 = vld [vmem:[%s956_s25 + $0x54] sm:$0xf0]  ;;  %v721_v17 = vld [vmem:[%s956_s25 + $0x54] sm:$0xf]  ;;  %v684_v18 = vld [vmem:[%s956_s25 + $0x58] sm:$0xf0] }
  0x30   : > { %451 = vmatpush.bf16.msra.mxu1 %v703_v10  ;;  %v683_v19 = vor.u32 %v722_v16, %v682_v15  ;;  %v687_v20 = vor.u32 %v721_v17, %v684_v18  ;;  %v674_v21 = vld [vmem:[%s956_s25 + $0x40] sm:$0xf]  ;;  %v720_v22 = vld [vmem:[%s956_s25 + $0x44] sm:$0xf0]  ;;  %v719_v23 = vld [vmem:[%s956_s25 + $0x44] sm:$0xf] }
  0x31   : > { %v676_v24 = vld [vmem:[%s956_s25 + $0x48] sm:$0xf0]  ;;  %v675_v25 = vor.u32 %v720_v22, %v674_v21  ;;  %v666_v27 = vld [vmem:[%s956_s25 + $0x30] sm:$0xf]  ;;  %v718_v28 = vld [vmem:[%s956_s25 + $0x34] sm:$0xf0] }
  0x32   : > { %v679_v26 = vor.u32 %v719_v23, %v676_v24  ;;  %v717_v29 = vld [vmem:[%s956_s25 + $0x34] sm:$0xf]  ;;  %v668_v30 = vld [vmem:[%s956_s25 + $0x38] sm:$0xf0]  ;;  %v667_v31 = vor.u32 %v718_v28, %v666_v27  ;;  %v658_v33 = vld [vmem:[%s956_s25 + $0x20] sm:$0xf] }
  0x33   : > { %438 = vmatpush.bf16.msra.mxu0 %v691_v13  ;;  %v671_v32 = vor.u32 %v717_v29, %v668_v30  ;;  %v716_v34 = vld [vmem:[%s956_s25 + $0x24] sm:$0xf0]  ;;  %v715_v35 = vld [vmem:[%s956_s25 + $0x24] sm:$0xf]  ;;  %v660_v36 = vld [vmem:[%s956_s25 + $0x28] sm:$0xf0] }
  0x34   : > { %452 = vmatpush.bf16.msra.mxu1 %v695_v14  ;;  %v659_v37 = vor.u32 %v716_v34, %v658_v33  ;;  %v663_v38 = vor.u32 %v715_v35, %v660_v36  ;;  %v650_v39 = vld [vmem:[%s956_s25 + $0x10] sm:$0xf]  ;;  %v714_v40 = vld [vmem:[%s956_s25 + $0x14] sm:$0xf0]  ;;  %v713_v41 = vld [vmem:[%s956_s25 + $0x14] sm:$0xf] }
  0x35   : > { %v652_v42 = vld [vmem:[%s956_s25 + $0x18] sm:$0xf0]  ;;  %v651_v43 = vor.u32 %v714_v40, %v650_v39  ;;  %v642_v45 = vld [vmem:[%s956_s25] sm:$0xf]  ;;  %v712_v46 = vld [vmem:[%s956_s25 + $0x4] sm:$0xf0] }
  0x36   : > { %v655_v44 = vor.u32 %v713_v41, %v652_v42  ;;  %v711_v47 = vld [vmem:[%s956_s25 + $0x4] sm:$0xf]  ;;  %v644_v48 = vld [vmem:[%s956_s25 + $0x8] sm:$0xf0]  ;;  %v643_v49 = vor.u32 %v712_v46, %v642_v45  ;;  %v331_v58 = vld [vmem:[%s1072_s3 + $0x10] sm:$0xff]  ;;  %p704_p0 = scmp.ne.s32.totalorder %s843_s14, 8 }
  0x37   : > { %439 = vmatpush.bf16.msra.mxu0 %v683_v19  ;;  %v647_v50 = vor.u32 %v711_v47, %v644_v48  ;;  %v710_v51 = vld [vmem:[%s254_s17] sm:$0xff]  ;;  %v332_v59 = vld [vmem:[%s1072_s3 + $0x18] sm:$0xff] }
  0x38   : > { %453 = vmatpush.bf16.msra.mxu1 %v687_v20  ;;  %v329_v52 = vld [vmem:[%s1072_s3] sm:$0xff]  ;;  %v330_v53 = vld [vmem:[%s1072_s3 + $0x8] sm:$0xff] }
  0x3b   : > { %440 = vmatpush.bf16.msra.mxu0 %v675_v25 }
  0x3c   : > { %454 = vmatpush.bf16.msra.mxu1 %v679_v26 }
  0x3f   : > { %441 = vmatpush.bf16.msra.mxu0 %v667_v31 }
  0x40   : > { %455 = vmatpush.bf16.msra.mxu1 %v671_v32 }
  0x43   : > { %442 = vmatpush.bf16.msra.mxu0 %v659_v37 }
  0x44   : > { %456 = vmatpush.bf16.msra.mxu1 %v663_v38 }
  0x47   : > { %443 = vmatpush.bf16.msra.mxu0 %v651_v43 }
  0x48   : > { %457 = vmatpush.bf16.msra.mxu1 %v655_v44 }
  0x4b   : > { %444 = vmatpush.bf16.msra.mxu0 %v643_v49 }
  0x4c   : > { %458 = vmatpush.bf16.msra.mxu1 %v647_v50 }
  0x4e   : > { %445 = vmatmul.bf16.vlgmr.msra.gmra.mxu0 %v710_v51 }
  0x4f   : > { %459 = vmatmul.bf16.vlgmr.msra.gmra.mxu1 %v710_v51 }
  0xcb   : > { %v446_v54 = vpop.f32.mrf.mxu0 }
  0xcc   : > { %v465_v55 = vadd.f32 %v446_v54, %v329_v52  ;;  %v460_v56 = vpop.f32.mrf.mxu1 }
  0xcd   : > { %v466_v57 = vadd.f32 %v460_v56, %v330_v53 }
  0xce   : > { %469 = vst [vmem:[%s1072_s3] sm:$0xff] %v465_v55 }
  0xcf   : > { %470 = vst [vmem:[%s1072_s3 + $0x8] sm:$0xff] %v466_v57 }
  0xd3   : > { %v448_v60 = vpop.f32.mrf.mxu0  ;;  %476 = sbr.rel (%p704_p0) target bundleno = 228 (0xe4), region = 85 }
  0xd4   : > { %v467_v61 = vadd.f32 %v448_v60, %v331_v58  ;;  %v462_v62 = vpop.f32.mrf.mxu1 }
  0xd5   : > { %v468_v63 = vadd.f32 %v462_v62, %v332_v59 }
  0xd6   : > { %471 = vst [vmem:[%s1072_s3 + $0x10] sm:$0xff] %v467_v61 }
  0xd7   : > { %472 = vst [vmem:[%s1072_s3 + $0x18] sm:$0xff] %v468_v63 }
  0xd8   : > { %v477_v0 = vld [vmem:[%s1072_s3] sm:$0xff]  ;;  %v481_v1 = vld [vmem:[#allocation3] sm:$0x3]  ;;  %v478_v2 = vld [vmem:[%s1072_s3 + $0x8] sm:$0xff] }
  0xd9   : > { %v483_v3 = vperm.slane %v481_v1, 0  ;;  %v484_v4 = vperm.slane %v481_v1, 1 }
  0xdb   : > { %v487_v7 = vadd.f32 %v483_v3, %v477_v0  ;;  %v488_v8 = vadd.f32 %v484_v4, %v478_v2 }
  0xdd   : > { %v479_v5 = vld [vmem:[%s1072_s3 + $0x10] sm:$0xff]  ;;  %v491_v11 = vmax.f32 %v487_v7, 0.0  ;;  %v492_v12 = vmax.f32 %v488_v8, 0.0 }
  0xde   : > { %v480_v6 = vld [vmem:[%s1072_s3 + $0x18] sm:$0xff]  ;;  %v489_v9 = vadd.f32 %v483_v3, %v479_v5 }
  0xdf   : > { %v490_v10 = vadd.f32 %v484_v4, %v480_v6  ;;  %495 = vst [vmem:[%s1072_s3] sm:$0xff] %v491_v11 }
  0xe0   : > { %v493_v13 = vmax.f32 %v489_v9, 0.0  ;;  %496 = vst [vmem:[%s1072_s3 + $0x8] sm:$0xff] %v492_v12 }
  0xe1   : > { %v494_v14 = vmax.f32 %v490_v10, 0.0 }
  0xe2   : > { %497 = vst [vmem:[%s1072_s3 + $0x10] sm:$0xff] %v493_v13 }
  0xe3   : > { %498 = vst [vmem:[%s1072_s3 + $0x18] sm:$0xff] %v494_v14 }
  0xe4 PF: > { %s14_s16 = sadd.s32 1, %s851_s16   ;;  %s1076_s12 = smov %s839_s13 }
  0xe5   : > { %p11_p1 = scmp.ge.s32.totalorder %s14_s16, 11   ;;  %s1077_s13 = smov %s925_s24 }
  0xe6   : > { %s1078_s14 = smov %s847_s15  ;;  %s1079_s15 = smov %s1081_s18 }
  0xe7   :  { %13 = sbr.rel (!%p11_p1) target bundleno = 3 (0x3), region = 125 }
  0xec   :  { %532 = vsyncpa [#allocation4], 1 }
  0xed   :  { %534 = vsyncpa [#allocation4 + $0x1], 1 }

// kernel: forward.33
= control target key start
LH: loop header
LB: loop body
LE: loop exit
PB: predicated region body
PF: predicated region fallthrough
CT: control target
= control target key end

     0   :  { %8 = vsyncpa [#allocation4], 0  ;;  %s1085_s12 = smov 0   ;;  %s1087_s13 = smov 0   ;;  %s1312_s0 = inlined_call_operand.vmem [shape: bf16[16,2304], index: 0, kind: input, shape index: {}]   ;;  %s1313_s1 = inlined_call_operand.vmem [shape: bf16[2304,256], index: 1, kind: input, shape index: {}]   ;;  %s1314_s2 = inlined_call_operand.hbm [shape: f32[1,256], index: 2, kind: input, shape index: {}]   ;;  %s1315_s3 = inlined_call_operand.vmem [shape: f32[16,256], index: 3, kind: output, shape index: {}]  }
   0x1   :  { %s1089_s14 = smov 0   ;;  %s1091_s15 = smov 0  }
   0x2   :  { %s1093_s16 = smov 0  }
   0x3 LB: > { %s746_s17 = sadd.s32 4294967295, %s1061_s16   ;;  %s26_s18 = sadd.s32 1, %s1057_s15  ;;  %s1061_s16 = sphi %s1093_s16, %s14_s16   ;;  %s1057_s15 = sphi %s1091_s15, %s1322_s15   ;;  %s1053_s14 = sphi %s1089_s14, %s1321_s14   ;;  %s1049_s13 = sphi %s1087_s13, %s1320_s13   ;;  %s1045_s12 = sphi %s1085_s12, %s1319_s12  }
   0x4   : > { %p27_p0 = scmp.ge.s32.totalorder %s26_s18, 9  ;;  %s42_s19 = sadd.s32 1, %s1049_s13 }
   0x5   : > { %p49_p1 = scmp.ne.s32.totalorder %s1049_s13, %s1045_s12  ;;  %p50_p2 = scmp.eq.s32.totalorder %s1061_s16, 0 }
   0x6   : > { %s1324_s18 = smov (%p27_p0, %s26_s18), 0  ;;  %p747_p4 = scmp.ge.s32.totalorder %s1061_s16, 1 }
   0x7   : > { %p1118_p3 = por %p50_p2, %p49_p1  ;;  %s38_s21 = ssub.s32 %s1057_s15, %s1324_s18 }
   0x8   : > { %p148_p5 = scmp.lt.s32.totalorder %s1061_s16, 10  ;;  %p40_p6 = scmp.eq.s32.totalorder %s38_s21, 0 }
   0x9   : > { %p1130_p8 = scmp.eq.s32.totalorder %s746_s17, 0  ;;  %s162_s27 = sshll.u32 %s1314_s2, 4  ;;  %s163_s27 = int_to_ptr.hbm [resolvable:$true] %s162_s27 }
   0xa   : > { %p1126_p7 = pnand %p747_p4, %p148_p5  ;;  %s1063_s28 = smov [#allocation3]  }
   0xb   : > { %s1135_s24 = scalar_select %p40_p6, %s1049_s13, %s42_s19  }
   0xc   : > { %p941_p9 = pneg %p1126_p7  ;;  %s164_s29 = sshll.u32 %s1063_s28, 4  ;;  %s165_s29 = int_to_ptr.vmem [resolvable:$true] %s164_s29 }
   0xd   : > { %p749_p11 = scmp.ge.s32.totalorder %s1061_s16, 9 }
   0xe   : > { %p942_p10 = pnand %p1130_p8, %p941_p9 }
   0xf   : > { %171 = sbr.rel (%p749_p11) target bundleno = 26 (0x1a), region = 20 }
  0x10   : > { %944 = dma.hbm_to_vmem [thread:$0]  (!%p942_p10), %s163_s27, 32, %s165_s29, [#allocation4]  }
  0x14   : > { %174 = sbr.rel (!%p1118_p3) target bundleno = 26 (0x1a), region = 24  ;;  %s176_s30 = sand.u32 (%p1118_p3), 1, %s1049_s13  }
  0x15   : > { %s901_s4 = sshll.u32 (%p1118_p3), %s1057_s15, 3  ;;  %s750_s5 = sshll.u32 (%p1118_p3), %s176_s30, 4 }
  0x16   : > { %s184_s8 = scalar_lea.vmem (%p1118_p3), %s1312_s0, %s901_s4  ;;  %s178_s9 = scalar_lea.vmem (%p1118_p3), [#allocation2], %s750_s5 }
  0x17   : > { %v215_v0 = vld [vmem:[%s184_s8] sm:$0xff] (%p1118_p3)  ;;  %v217_v1 = vld [vmem:[%s184_s8 + $0x48] sm:$0xff] (%p1118_p3) }
  0x18   : > { %216 = vst [vmem:[%s178_s9] sm:$0xff] (%p1118_p3), %v215_v0 }
  0x19   : > { %218 = vst [vmem:[%s178_s9 + $0x8] sm:$0xff] %v217_v1 }
  0x1a PF: > { %242 = sbr.rel (%p1126_p7) target bundleno = 237 (0xed), region = 66  ;;  %s245_s10 = sand.u32 (!%p1126_p7), 1, %s1045_s12  }
  0x1b   : > { %s754_s11 = sshll.u32 (!%p1126_p7), %s245_s10, 4 }
  0x1c   : > { %s1155_s17 = scalar_lea.vmem (!%p1126_p7), [#allocation2], %s754_s11 }
  0x1f   : > { %1040 = dma.done.wait (%p1130_p8), [#allocation4], 32  }
  0x20   : > { %1042 = vsyncadd (%p1130_p8), [#allocation4], 4294967264  ;;  %s756_s19 = sshll.u32 %s1053_s14, 5  ;;  %p759_p13 = scmp.ne.s32.totalorder %s1053_s14, 0 }
  0x21   : > { %p292_p12 = scmp.lt.s32.totalorder %s756_s19, 287 }
  0x22   : > { %318 = sbr.rel (%p759_p13) target bundleno = 44 (0x2c), region = 78 }
  0x23   : > { %s1326_s19 = smov (!%p292_p12, %s756_s19), 287 }
  0x24   : > { %s902_s20 = sshll.u32 %s1326_s19, 3 }
  0x25   : > { %s1165_s22 = scalar_lea.vmem %s1313_s1, %s902_s20 }
  0x27   : > { %v1064_v2 = vmov 0.0  }
  0x28   : > { %319 = vst [vmem:[%s1315_s3] sm:$0xff] %v1064_v2 }
  0x29   : > { %320 = vst [vmem:[%s1315_s3 + $0x8] sm:$0xff] %v1064_v2 }
  0x2a   : > { %321 = vst [vmem:[%s1315_s3 + $0x10] sm:$0xff] %v1064_v2 }
  0x2b   : > { %322 = vst [vmem:[%s1315_s3 + $0x18] sm:$0xff] %v1064_v2 }
  0x2c PF: > { %v826_v3 = vld [vmem:[%s1165_s22 + $0x70] sm:$0xf]  ;;  %v920_v4 = vld [vmem:[%s1165_s22 + $0x74] sm:$0xf0]  ;;  %v919_v8 = vld [vmem:[%s1165_s22 + $0x74] sm:$0xf] }
  0x2d   : > { %v890_v5 = vld [vmem:[%s1165_s22 + $0xf0] sm:$0xf]  ;;  %v827_v6 = vor.u32 %v920_v4, %v826_v3  ;;  %v936_v7 = vld [vmem:[%s1165_s22 + $0xf4] sm:$0xf0]  ;;  %v828_v9 = vld [vmem:[%s1165_s22 + $0x78] sm:$0xf0] }
  0x2e   : > { %v891_v10 = vor.u32 %v936_v7, %v890_v5  ;;  %v831_v11 = vor.u32 %v919_v8, %v828_v9  ;;  %v935_v12 = vld [vmem:[%s1165_s22 + $0xf4] sm:$0xf]  ;;  %v892_v13 = vld [vmem:[%s1165_s22 + $0xf8] sm:$0xf0]  ;;  %v818_v14 = vld [vmem:[%s1165_s22 + $0x60] sm:$0xf] }
  0x2f   : > { %531 = vmatpush.bf16.msra.mxu0 %v827_v6  ;;  %v895_v15 = vor.u32 %v935_v12, %v892_v13  ;;  %v918_v16 = vld [vmem:[%s1165_s22 + $0x64] sm:$0xf0]  ;;  %v882_v17 = vld [vmem:[%s1165_s22 + $0xe0] sm:$0xf]  ;;  %v917_v21 = vld [vmem:[%s1165_s22 + $0x64] sm:$0xf] }
  0x30   : > { %v934_v18 = vld [vmem:[%s1165_s22 + $0xe4] sm:$0xf0]  ;;  %545 = vmatpush.bf16.msra.mxu1 %v891_v10  ;;  %559 = vmatpush.bf16.msra.mxu2 %v831_v11  ;;  %v819_v19 = vor.u32 %v918_v16, %v818_v14  ;;  %v820_v22 = vld [vmem:[%s1165_s22 + $0x68] sm:$0xf0]  ;;  %v933_v23 = vld [vmem:[%s1165_s22 + $0xe4] sm:$0xf] }
  0x31   : > { %v883_v20 = vor.u32 %v934_v18, %v882_v17  ;;  %573 = vmatpush.bf16.msra.mxu3 %v895_v15  ;;  %v823_v24 = vor.u32 %v917_v21, %v820_v22  ;;  %v884_v25 = vld [vmem:[%s1165_s22 + $0xe8] sm:$0xf0]  ;;  %v810_v26 = vld [vmem:[%s1165_s22 + $0x50] sm:$0xf]  ;;  %v916_v27 = vld [vmem:[%s1165_s22 + $0x54] sm:$0xf0] }
  0x32   : > { %v887_v28 = vor.u32 %v933_v23, %v884_v25  ;;  %v874_v29 = vld [vmem:[%s1165_s22 + $0xd0] sm:$0xf]  ;;  %v932_v30 = vld [vmem:[%s1165_s22 + $0xd4] sm:$0xf0]  ;;  %v915_v31 = vld [vmem:[%s1165_s22 + $0x54] sm:$0xf]  ;;  %v811_v32 = vor.u32 %v916_v27, %v810_v26 }
  0x33   : > { %532 = vmatpush.bf16.msra.mxu0 %v819_v19  ;;  %v812_v33 = vld [vmem:[%s1165_s22 + $0x58] sm:$0xf0]  ;;  %v931_v34 = vld [vmem:[%s1165_s22 + $0xd4] sm:$0xf]  ;;  %v875_v36 = vor.u32 %v932_v30, %v874_v29  ;;  %v802_v38 = vld [vmem:[%s1165_s22 + $0x40] sm:$0xf] }
  0x34   : > { %v876_v35 = vld [vmem:[%s1165_s22 + $0xd8] sm:$0xf0]  ;;  %546 = vmatpush.bf16.msra.mxu1 %v883_v20  ;;  %560 = vmatpush.bf16.msra.mxu2 %v823_v24  ;;  %v815_v37 = vor.u32 %v915_v31, %v812_v33  ;;  %v914_v39 = vld [vmem:[%s1165_s22 + $0x44] sm:$0xf0]  ;;  %v866_v40 = vld [vmem:[%s1165_s22 + $0xc0] sm:$0xf] }
  0x35   : > { %574 = vmatpush.bf16.msra.mxu3 %v887_v28  ;;  %v879_v41 = vor.u32 %v931_v34, %v876_v35  ;;  %v930_v42 = vld [vmem:[%s1165_s22 + $0xc4] sm:$0xf0]  ;;  %v913_v43 = vld [vmem:[%s1165_s22 + $0x44] sm:$0xf]  ;;  %v804_v44 = vld [vmem:[%s1165_s22 + $0x48] sm:$0xf0]  ;;  %v803_v47 = vor.u32 %v914_v39, %v802_v38 }
  0x36   : > { %v929_v45 = vld [vmem:[%s1165_s22 + $0xc4] sm:$0xf]  ;;  %v868_v46 = vld [vmem:[%s1165_s22 + $0xc8] sm:$0xf0]  ;;  %v867_v48 = vor.u32 %v930_v42, %v866_v40  ;;  %v807_v49 = vor.u32 %v913_v43, %v804_v44  ;;  %v794_v50 = vld [vmem:[%s1165_s22 + $0x30] sm:$0xf] }
  0x37   : > { %533 = vmatpush.bf16.msra.mxu0 %v811_v32  ;;  %v912_v51 = vld [vmem:[%s1165_s22 + $0x34] sm:$0xf0]  ;;  %v858_v52 = vld [vmem:[%s1165_s22 + $0xb0] sm:$0xf]  ;;  %v871_v53 = vor.u32 %v929_v45, %v868_v46  ;;  %v911_v55 = vld [vmem:[%s1165_s22 + $0x34] sm:$0xf] }
  0x38   : > { %547 = vmatpush.bf16.msra.mxu1 %v875_v36  ;;  %561 = vmatpush.bf16.msra.mxu2 %v815_v37  ;;  %v928_v54 = vld [vmem:[%s1165_s22 + $0xb4] sm:$0xf0]  ;;  %v796_v56 = vld [vmem:[%s1165_s22 + $0x38] sm:$0xf0]  ;;  %v927_v57 = vld [vmem:[%s1165_s22 + $0xb4] sm:$0xf]  ;;  %v795_v59 = vor.u32 %v912_v51, %v794_v50 }
  0x39   : > { %575 = vmatpush.bf16.msra.mxu3 %v879_v41  ;;  %v860_v58 = vld [vmem:[%s1165_s22 + $0xb8] sm:$0xf0]  ;;  %v859_v60 = vor.u32 %v928_v54, %v858_v52  ;;  %v799_v61 = vor.u32 %v911_v55, %v796_v56  ;;  %v786_v62 = vld [vmem:[%s1165_s22 + $0x20] sm:$0xf]  ;;  %v910_v63 = vld [vmem:[%s1165_s22 + $0x24] sm:$0xf0] }
  0x3a   : > { %v850_v0 = vld [vmem:[%s1165_s22 + $0xa0] sm:$0xf]  ;;  %v863_v1 = vor.u32 %v927_v57, %v860_v58  ;;  %v926_v2 = vld [vmem:[%s1165_s22 + $0xa4] sm:$0xf0]  ;;  %v909_v3 = vld [vmem:[%s1165_s22 + $0x24] sm:$0xf]  ;;  %v787_v7 = vor.u32 %v910_v63, %v786_v62 }
  0x3b   : > { %534 = vmatpush.bf16.msra.mxu0 %v803_v47  ;;  %v788_v4 = vld [vmem:[%s1165_s22 + $0x28] sm:$0xf0]  ;;  %v925_v5 = vld [vmem:[%s1165_s22 + $0xa4] sm:$0xf]  ;;  %v851_v8 = vor.u32 %v926_v2, %v850_v0  ;;  %v778_v10 = vld [vmem:[%s1165_s22 + $0x10] sm:$0xf] }
  0x3c   : > { %548 = vmatpush.bf16.msra.mxu1 %v867_v48  ;;  %562 = vmatpush.bf16.msra.mxu2 %v807_v49  ;;  %v852_v6 = vld [vmem:[%s1165_s22 + $0xa8] sm:$0xf0]  ;;  %v791_v9 = vor.u32 %v909_v3, %v788_v4  ;;  %v908_v11 = vld [vmem:[%s1165_s22 + $0x14] sm:$0xf0]  ;;  %v842_v12 = vld [vmem:[%s1165_s22 + $0x90] sm:$0xf] }
  0x3d   : > { %576 = vmatpush.bf16.msra.mxu3 %v871_v53  ;;  %v855_v13 = vor.u32 %v925_v5, %v852_v6  ;;  %v924_v14 = vld [vmem:[%s1165_s22 + $0x94] sm:$0xf0]  ;;  %v907_v15 = vld [vmem:[%s1165_s22 + $0x14] sm:$0xf]  ;;  %v780_v16 = vld [vmem:[%s1165_s22 + $0x18] sm:$0xf0]  ;;  %v779_v19 = vor.u32 %v908_v11, %v778_v10 }
  0x3e   : > { %v923_v17 = vld [vmem:[%s1165_s22 + $0x94] sm:$0xf]  ;;  %v844_v18 = vld [vmem:[%s1165_s22 + $0x98] sm:$0xf0]  ;;  %v843_v20 = vor.u32 %v924_v14, %v842_v12  ;;  %v783_v21 = vor.u32 %v907_v15, %v780_v16  ;;  %v770_v22 = vld [vmem:[%s1165_s22] sm:$0xf] }
  0x3f   : > { %535 = vmatpush.bf16.msra.mxu0 %v795_v59  ;;  %v906_v23 = vld [vmem:[%s1165_s22 + $0x4] sm:$0xf0]  ;;  %v834_v24 = vld [vmem:[%s1165_s22 + $0x80] sm:$0xf]  ;;  %v847_v25 = vor.u32 %v923_v17, %v844_v18  ;;  %v905_v27 = vld [vmem:[%s1165_s22 + $0x4] sm:$0xf] }
  0x40   : > { %549 = vmatpush.bf16.msra.mxu1 %v859_v60  ;;  %563 = vmatpush.bf16.msra.mxu2 %v799_v61  ;;  %v922_v26 = vld [vmem:[%s1165_s22 + $0x84] sm:$0xf0]  ;;  %v772_v28 = vld [vmem:[%s1165_s22 + $0x8] sm:$0xf0]  ;;  %v921_v29 = vld [vmem:[%s1165_s22 + $0x84] sm:$0xf]  ;;  %v771_v31 = vor.u32 %v906_v23, %v770_v22 }
  0x41   : > { %577 = vmatpush.bf16.msra.mxu3 %v863_v1  ;;  %v836_v30 = vld [vmem:[%s1165_s22 + $0x88] sm:$0xf0]  ;;  %v762_v32 = vld [vmem:[%s1155_s17] sm:$0xf]  ;;  %v904_v33 = vld [vmem:[%s1155_s17 + $0x4] sm:$0xf0]  ;;  %v835_v34 = vor.u32 %v922_v26, %v834_v24  ;;  %v775_v35 = vor.u32 %v905_v27, %v772_v28 }
  0x42   : > { %v903_v36 = vld [vmem:[%s1155_s17 + $0x4] sm:$0xf]  ;;  %v764_v37 = vld [vmem:[%s1155_s17 + $0x8] sm:$0xf0]  ;;  %v839_v38 = vor.u32 %v921_v29, %v836_v30  ;;  %v763_v39 = vor.u32 %v904_v33, %v762_v32  ;;  %p896_p0 = scmp.ne.s32.totalorder %s1053_s14, 8 }
  0x43   : > { %536 = vmatpush.bf16.msra.mxu0 %v787_v7  ;;  %v767_v40 = vor.u32 %v903_v36, %v764_v37  ;;  %v323_v42 = vld [vmem:[%s1315_s3] sm:$0xff]  ;;  %v324_v47 = vld [vmem:[%s1315_s3 + $0x8] sm:$0xff]  ;;  %v325_v51 = vld [vmem:[%s1315_s3 + $0x10] sm:$0xff] }
  0x44   : > { %550 = vmatpush.bf16.msra.mxu1 %v851_v8  ;;  %564 = vmatpush.bf16.msra.mxu2 %v791_v9  ;;  %v326_v57 = vld [vmem:[%s1315_s3 + $0x18] sm:$0xff] }
  0x45   : > { %578 = vmatpush.bf16.msra.mxu3 %v855_v13 }
  0x47   : > { %537 = vmatpush.bf16.msra.mxu0 %v779_v19 }
  0x48   : > { %551 = vmatpush.bf16.msra.mxu1 %v843_v20  ;;  %565 = vmatpush.bf16.msra.mxu2 %v783_v21 }
  0x49   : > { %579 = vmatpush.bf16.msra.mxu3 %v847_v25 }
  0x4b   : > { %538 = vmatpush.bf16.msra.mxu0 %v771_v31 }
  0x4c   : > { %552 = vmatpush.bf16.msra.mxu1 %v835_v34  ;;  %566 = vmatpush.bf16.msra.mxu2 %v775_v35 }
  0x4d   : > { %580 = vmatpush.bf16.msra.mxu3 %v839_v38 }
  0x4e   : > { %539 = vmatmul.bf16.vlgmr.msra.gmra.mxu0 %v763_v39 }
  0x4f   : > { %553 = vmatmul.bf16.vlgmr.msra.gmra.mxu1 %v767_v40  ;;  %567 = vmatmul.bf16.vlgmr.msra.gmra.mxu2 %v763_v39 }
  0x50   : > { %581 = vmatmul.bf16.vlgmr.msra.gmra.mxu3 %v767_v40 }
  0xcb   : > { %v540_v41 = vpop.f32.mrf.mxu0 }
  0xcc   : > { %v554_v43 = vpop.f32.mrf.mxu1 }
  0xcd   : > { %v555_v44 = vadd.f32 %v554_v43, %v540_v41 }
  0xcf   : > { %v587_v45 = vadd.f32 %v555_v44, %v323_v42 }
  0xd1   : > { %591 = vst [vmem:[%s1315_s3] sm:$0xff] %v587_v45 }
  0xd2   : > { %v568_v46 = vpop.f32.mrf.mxu2 }
  0xd3   : > { %v582_v48 = vpop.f32.mrf.mxu3  ;;  %v542_v49 = vpop.f32.mrf.mxu0 }
  0xd4   : > { %v583_v50 = vadd.f32 %v582_v48, %v568_v46  ;;  %v556_v52 = vpop.f32.mrf.mxu1 }
  0xd5   : > { %v557_v53 = vadd.f32 %v556_v52, %v542_v49 }
  0xd6   : > { %v588_v54 = vadd.f32 %v583_v50, %v324_v47 }
  0xd7   : > { %v589_v55 = vadd.f32 %v557_v53, %v325_v51 }
  0xd8   : > { %592 = vst [vmem:[%s1315_s3 + $0x8] sm:$0xff] %v588_v54 }
  0xd9   : > { %593 = vst [vmem:[%s1315_s3 + $0x10] sm:$0xff] %v589_v55 }
  0xda   : > { %v570_v56 = vpop.f32.mrf.mxu2 }
  0xdb   : > { %v584_v58 = vpop.f32.mrf.mxu3 }
  0xdc   : > { %v585_v59 = vadd.f32 %v584_v58, %v570_v56  ;;  %598 = sbr.rel (%p896_p0) target bundleno = 237 (0xed), region = 82 }
  0xde   : > { %v590_v60 = vadd.f32 %v585_v59, %v326_v57 }
  0xe0   : > { %594 = vst [vmem:[%s1315_s3 + $0x18] sm:$0xff] %v590_v60 }
  0xe1   : > { %v599_v61 = vld [vmem:[%s1315_s3] sm:$0xff]  ;;  %v600_v63 = vld [vmem:[%s1315_s3 + $0x8] sm:$0xff]  ;;  %v601_v2 = vld [vmem:[%s1315_s3 + $0x10] sm:$0xff] }
  0xe2   : > { %v603_v62 = vld [vmem:[#allocation3] sm:$0x3] }
  0xe3   : > { %v605_v0 = vperm.slane %v603_v62, 0  ;;  %v606_v1 = vperm.slane %v603_v62, 1 }
  0xe5   : > { %v609_v4 = vadd.f32 %v605_v0, %v599_v61  ;;  %v610_v5 = vadd.f32 %v606_v1, %v600_v63  ;;  %v611_v6 = vadd.f32 %v605_v0, %v601_v2 }
  0xe7   : > { %v602_v3 = vld [vmem:[%s1315_s3 + $0x18] sm:$0xff]  ;;  %v613_v8 = vmax.f32 %v609_v4, 0.0  ;;  %v614_v9 = vmax.f32 %v610_v5, 0.0  ;;  %v615_v10 = vmax.f32 %v611_v6, 0.0 }
  0xe8   : > { %v612_v7 = vadd.f32 %v606_v1, %v602_v3 }
  0xe9   : > { %617 = vst [vmem:[%s1315_s3] sm:$0xff] %v613_v8 }
  0xea   : > { %v616_v11 = vmax.f32 %v612_v7, 0.0  ;;  %618 = vst [vmem:[%s1315_s3 + $0x8] sm:$0xff] %v614_v9 }
  0xeb   : > { %619 = vst [vmem:[%s1315_s3 + $0x10] sm:$0xff] %v615_v10 }
  0xec   : > { %620 = vst [vmem:[%s1315_s3 + $0x18] sm:$0xff] %v616_v11 }
  0xed PF: > { %s14_s16 = sadd.s32 1, %s1061_s16   ;;  %s1319_s12 = smov %s1049_s13 }
  0xee   : > { %p11_p1 = scmp.ge.s32.totalorder %s14_s16, 11   ;;  %s1320_s13 = smov %s1135_s24 }
  0xef   : > { %s1321_s14 = smov %s1057_s15  ;;  %s1322_s15 = smov %s1324_s18 }
  0xf0   :  { %13 = sbr.rel (!%p11_p1) target bundleno = 3 (0x3), region = 122 }
  0xf5   :  { %654 = vsyncpa [#allocation4], 1 }
  0xf6   :  { %656 = vsyncpa [#allocation4 + $0x1], 1 }

// kernel: forward.30
= control target key start
LH: loop header
LB: loop body
LE: loop exit
PB: predicated region body
PF: predicated region fallthrough
CT: control target
= control target key end

     0   :  { %8 = vsyncpa [#allocation3], 0  ;;  %s410_s0 = inlined_call_operand.vmem [shape: bf16[16,128], index: 0, kind: input, shape index: {}]   ;;  %s411_s1 = inlined_call_operand.hbm [shape: bf16[128,256], index: 1, kind: input, shape index: {}]   ;;  %s412_s2 = inlined_call_operand.hbm [shape: f32[1,256], index: 2, kind: input, shape index: {}]   ;;  %s413_s3 = inlined_call_operand.vmem [shape: f32[16,256], index: 3, kind: output, shape index: {}]  }
   0x1   :  { %s16_s14 = sshll.u32 %s411_s1, 4  ;;  %s17_s14 = int_to_ptr.hbm [resolvable:$true] %s16_s14 }
   0x2   :  { %9 = vsyncpa [#allocation5], 0  ;;  %s365_s15 = smov [#allocation2]   ;;  %s30_s19 = sshll.u32 %s412_s2, 4  ;;  %s31_s19 = int_to_ptr.hbm [resolvable:$true] %s30_s19 }
   0x3   :  { %s18_s16 = sshll.u32 %s365_s15, 4  ;;  %s366_s20 = smov 128   ;;  %s19_s16 = int_to_ptr.vmem [resolvable:$true] %s18_s16 }
   0x4   :  { %s367_s21 = smov 8   ;;  %s368_s22 = smov [#allocation4]  }
   0x5   :  { %24 = dma.hbm_to_vmem [thread:$0]  %s17_s14, 2048, %s19_s16, [#allocation3], %s366_s20, %s366_s20, %s367_s21  }
   0x6   :  { %s32_s23 = sshll.u32 %s368_s22, 4  ;;  %s33_s23 = int_to_ptr.vmem [resolvable:$true] %s32_s23 }
   0x7   :  { %35 = dma.hbm_to_vmem [thread:$0]  %s31_s19, 32, %s33_s23, [#allocation5]  }
   0x8   :  { %361 = dma.done.wait [#allocation3], 2048  }
   0x9   :  { %362 = vsyncadd [#allocation3], 4294965248 }
   0xa   :  { %363 = dma.done.wait [#allocation5], 32  }
   0xb   :  { %364 = vsyncadd [#allocation5], 4294967264  ;;  %v285_v0 = vld [vmem:[#allocation2 + $0x70] sm:$0xf]  ;;  %v307_v1 = vld [vmem:[#allocation2 + $0x74] sm:$0xf0] }
   0xc   :  { %v306_v2 = vld [vmem:[#allocation2 + $0x74] sm:$0xf]  ;;  %v286_v3 = vor.u32 %v307_v1, %v285_v0  ;;  %v287_v4 = vld [vmem:[#allocation2 + $0x78] sm:$0xf0]  ;;  %v277_v5 = vld [vmem:[#allocation2 + $0x60] sm:$0xf] }
   0xd   :  { %v305_v6 = vld [vmem:[#allocation2 + $0x64] sm:$0xf0]  ;;  %v290_v7 = vor.u32 %v306_v2, %v287_v4  ;;  %v304_v8 = vld [vmem:[#allocation2 + $0x64] sm:$0xf]  ;;  %v279_v9 = vld [vmem:[#allocation2 + $0x68] sm:$0xf0] }
   0xe   :  { %160 = vmatpush.bf16.msra.mxu0 %v286_v3  ;;  %v278_v10 = vor.u32 %v305_v6, %v277_v5  ;;  %v282_v11 = vor.u32 %v304_v8, %v279_v9  ;;  %v269_v12 = vld [vmem:[#allocation2 + $0x50] sm:$0xf]  ;;  %v303_v13 = vld [vmem:[#allocation2 + $0x54] sm:$0xf0]  ;;  %v302_v14 = vld [vmem:[#allocation2 + $0x54] sm:$0xf] }
   0xf   :  { %174 = vmatpush.bf16.msra.mxu1 %v290_v7  ;;  %v271_v15 = vld [vmem:[#allocation2 + $0x58] sm:$0xf0]  ;;  %v270_v16 = vor.u32 %v303_v13, %v269_v12  ;;  %v261_v18 = vld [vmem:[#allocation2 + $0x40] sm:$0xf]  ;;  %v301_v19 = vld [vmem:[#allocation2 + $0x44] sm:$0xf0] }
  0x10   :  { %v274_v17 = vor.u32 %v302_v14, %v271_v15  ;;  %v300_v20 = vld [vmem:[#allocation2 + $0x44] sm:$0xf]  ;;  %v263_v21 = vld [vmem:[#allocation2 + $0x48] sm:$0xf0]  ;;  %v262_v22 = vor.u32 %v301_v19, %v261_v18  ;;  %v253_v24 = vld [vmem:[#allocation2 + $0x30] sm:$0xf] }
  0x11   :  { %v266_v23 = vor.u32 %v300_v20, %v263_v21  ;;  %v299_v25 = vld [vmem:[#allocation2 + $0x34] sm:$0xf0]  ;;  %v298_v26 = vld [vmem:[#allocation2 + $0x34] sm:$0xf]  ;;  %v255_v27 = vld [vmem:[#allocation2 + $0x38] sm:$0xf0] }
  0x12   :  { %161 = vmatpush.bf16.msra.mxu0 %v278_v10  ;;  %v254_v28 = vor.u32 %v299_v25, %v253_v24  ;;  %v258_v29 = vor.u32 %v298_v26, %v255_v27  ;;  %v245_v30 = vld [vmem:[#allocation2 + $0x20] sm:$0xf]  ;;  %v297_v31 = vld [vmem:[#allocation2 + $0x24] sm:$0xf0]  ;;  %v296_v32 = vld [vmem:[#allocation2 + $0x24] sm:$0xf] }
  0x13   :  { %175 = vmatpush.bf16.msra.mxu1 %v282_v11  ;;  %v247_v33 = vld [vmem:[#allocation2 + $0x28] sm:$0xf0]  ;;  %v246_v34 = vor.u32 %v297_v31, %v245_v30  ;;  %v237_v36 = vld [vmem:[#allocation2 + $0x10] sm:$0xf]  ;;  %v295_v37 = vld [vmem:[#allocation2 + $0x14] sm:$0xf0] }
  0x14   :  { %v250_v35 = vor.u32 %v296_v32, %v247_v33  ;;  %v294_v38 = vld [vmem:[#allocation2 + $0x14] sm:$0xf]  ;;  %v239_v39 = vld [vmem:[#allocation2 + $0x18] sm:$0xf0]  ;;  %v238_v40 = vor.u32 %v295_v37, %v237_v36  ;;  %v229_v42 = vld [vmem:[#allocation2] sm:$0xf] }
  0x15   :  { %v242_v41 = vor.u32 %v294_v38, %v239_v39  ;;  %v293_v43 = vld [vmem:[#allocation2 + $0x4] sm:$0xf0]  ;;  %v292_v44 = vld [vmem:[#allocation2 + $0x4] sm:$0xf]  ;;  %v231_v45 = vld [vmem:[#allocation2 + $0x8] sm:$0xf0] }
  0x16   :  { %162 = vmatpush.bf16.msra.mxu0 %v270_v16  ;;  %v230_v46 = vor.u32 %v293_v43, %v229_v42  ;;  %v234_v47 = vor.u32 %v292_v44, %v231_v45  ;;  %v291_v48 = vld [vmem:[%s410_s0] sm:$0xff] }
  0x17   :  { %176 = vmatpush.bf16.msra.mxu1 %v274_v17  ;;  %v203_v49 = vld [vmem:[#allocation4] sm:$0x3] }
  0x18   :  { %v205_v50 = vperm.slane %v203_v49, 0  ;;  %v206_v52 = vperm.slane %v203_v49, 1 }
  0x1a   :  { %163 = vmatpush.bf16.msra.mxu0 %v262_v22 }
  0x1b   :  { %177 = vmatpush.bf16.msra.mxu1 %v266_v23 }
  0x1e   :  { %164 = vmatpush.bf16.msra.mxu0 %v254_v28 }
  0x1f   :  { %178 = vmatpush.bf16.msra.mxu1 %v258_v29 }
  0x22   :  { %165 = vmatpush.bf16.msra.mxu0 %v246_v34 }
  0x23   :  { %179 = vmatpush.bf16.msra.mxu1 %v250_v35 }
  0x26   :  { %166 = vmatpush.bf16.msra.mxu0 %v238_v40 }
  0x27   :  { %180 = vmatpush.bf16.msra.mxu1 %v242_v41 }
  0x2a   :  { %167 = vmatpush.bf16.msra.mxu0 %v230_v46 }
  0x2b   :  { %181 = vmatpush.bf16.msra.mxu1 %v234_v47 }
  0x2d   :  { %168 = vmatmul.bf16.vlgmr.msra.gmra.mxu0 %v291_v48 }
  0x2e   :  { %182 = vmatmul.bf16.vlgmr.msra.gmra.mxu1 %v291_v48 }
  0xaa   :  { %v169_v51 = vpop.f32.mrf.mxu0 }
  0xab   :  { %v183_v53 = vpop.f32.mrf.mxu1  ;;  %v209_v54 = vadd.f32 %v205_v50, %v169_v51 }
  0xac   :  { %v210_v55 = vadd.f32 %v206_v52, %v183_v53 }
  0xad   :  { %213 = vst [vmem:[%s413_s3] sm:$0xff] %v209_v54 }
  0xae   :  { %214 = vst [vmem:[%s413_s3 + $0x8] sm:$0xff] %v210_v55 }
  0xb2   :  { %v171_v56 = vpop.f32.mrf.mxu0 }
  0xb3   :  { %v185_v57 = vpop.f32.mrf.mxu1  ;;  %v211_v58 = vadd.f32 %v205_v50, %v171_v56 }
  0xb4   :  { %v212_v59 = vadd.f32 %v206_v52, %v185_v57 }
  0xb5   :  { %215 = vst [vmem:[%s413_s3 + $0x10] sm:$0xff] %v211_v58 }
  0xb6   :  { %216 = vst [vmem:[%s413_s3 + $0x18] sm:$0xff] %v212_v59 }
  0xb7   :  { %221 = vsyncpa [#allocation3], 1 }
  0xb8   :  { %222 = vsyncpa [#allocation5], 1 }

// kernel: forward.32
= control target key start
LH: loop header
LB: loop body
LE: loop exit
PB: predicated region body
PF: predicated region fallthrough
CT: control target
= control target key end

     0   :  { %9 = vsyncpa [#allocation4], 0  ;;  %s1188_s15 = smov 0   ;;  %s1190_s16 = smov 0   ;;  %s1427_s0 = inlined_call_operand.vmem [shape: bf16[16,2304], index: 0, kind: input, shape index: {}]   ;;  %s1428_s1 = inlined_call_operand.vmem [shape: bf16[2304,256], index: 1, kind: input, shape index: {}]   ;;  %s1429_s2 = inlined_call_operand.hbm [shape: f32[1,256], index: 2, kind: input, shape index: {}]   ;;  %s1430_s3 = inlined_call_operand.vmem [shape: f32[16,256], index: 3, kind: input, shape index: {}]   ;;  %s1431_s4 = inlined_call_operand.vmem [shape: f32[16,256], index: 4, kind: output, shape index: {}]  }
   0x1   :  { %s1192_s17 = smov 0   ;;  %s1194_s18 = smov 0  }
   0x2   :  { %s1196_s19 = smov 0  }
   0x3 LB: > { %s843_s20 = sadd.s32 4294967295, %s1159_s19   ;;  %s27_s21 = sadd.s32 1, %s1155_s18  ;;  %s1159_s19 = sphi %s1196_s19, %s15_s19   ;;  %s1155_s18 = sphi %s1194_s18, %s1438_s18   ;;  %s1151_s17 = sphi %s1192_s17, %s1437_s17   ;;  %s1147_s16 = sphi %s1190_s16, %s1436_s16   ;;  %s1143_s15 = sphi %s1188_s15, %s1435_s15  }
   0x4   : > { %p28_p0 = scmp.ge.s32.totalorder %s27_s21, 9  ;;  %s43_s22 = sadd.s32 1, %s1147_s16 }
   0x5   : > { %p50_p1 = scmp.ne.s32.totalorder %s1147_s16, %s1143_s15  ;;  %p51_p2 = scmp.eq.s32.totalorder %s1159_s19, 0 }
   0x6   : > { %s1440_s21 = smov (%p28_p0, %s27_s21), 0  ;;  %p844_p4 = scmp.ge.s32.totalorder %s1159_s19, 1 }
   0x7   : > { %p1221_p3 = por %p51_p2, %p50_p1  ;;  %s39_s24 = ssub.s32 %s1155_s18, %s1440_s21 }
   0x8   : > { %p177_p5 = scmp.lt.s32.totalorder %s1159_s19, 10  ;;  %p41_p6 = scmp.eq.s32.totalorder %s39_s24, 0 }
   0x9   : > { %p1233_p8 = scmp.eq.s32.totalorder %s843_s20, 0  ;;  %s191_s30 = sshll.u32 %s1429_s2, 4  ;;  %s192_s30 = int_to_ptr.hbm [resolvable:$true] %s191_s30 }
   0xa   : > { %p1229_p7 = pnand %p844_p4, %p177_p5  ;;  %s1161_s5 = smov [#allocation3]  }
   0xb   : > { %s1238_s27 = scalar_select %p41_p6, %s1147_s16, %s43_s22  }
   0xc   : > { %p1039_p9 = pneg %p1229_p7  ;;  %s193_s6 = sshll.u32 %s1161_s5, 4  ;;  %s194_s6 = int_to_ptr.vmem [resolvable:$true] %s193_s6 }
   0xd   : > { %p847_p11 = scmp.ge.s32.totalorder %s1159_s19, 9 }
   0xe   : > { %p1040_p10 = pnand %p1233_p8, %p1039_p9 }
   0xf   : > { %215 = sbr.rel (%p847_p11) target bundleno = 26 (0x1a), region = 24 }
  0x10   : > { %1042 = dma.hbm_to_vmem [thread:$0]  (!%p1040_p10), %s192_s30, 32, %s194_s6, [#allocation4]  }
  0x14   : > { %218 = sbr.rel (!%p1221_p3) target bundleno = 26 (0x1a), region = 28  ;;  %s220_s7 = sand.u32 (%p1221_p3), 1, %s1147_s16  }
  0x15   : > { %s999_s8 = sshll.u32 (%p1221_p3), %s1155_s18, 3  ;;  %s848_s9 = sshll.u32 (%p1221_p3), %s220_s7, 4 }
  0x16   : > { %s228_s12 = scalar_lea.vmem (%p1221_p3), %s1427_s0, %s999_s8  ;;  %s222_s13 = scalar_lea.vmem (%p1221_p3), [#allocation2], %s848_s9 }
  0x17   : > { %v259_v0 = vld [vmem:[%s228_s12] sm:$0xff] (%p1221_p3)  ;;  %v261_v1 = vld [vmem:[%s228_s12 + $0x48] sm:$0xff] (%p1221_p3) }
  0x18   : > { %260 = vst [vmem:[%s222_s13] sm:$0xff] (%p1221_p3), %v259_v0 }
  0x19   : > { %262 = vst [vmem:[%s222_s13 + $0x8] sm:$0xff] %v261_v1 }
  0x1a PF: > { %286 = sbr.rel (%p1229_p7) target bundleno = 239 (0xef), region = 70  ;;  %s289_s14 = sand.u32 (!%p1229_p7), 1, %s1143_s15  }
  0x1b   : > { %s852_s20 = sshll.u32 (!%p1229_p7), %s289_s14, 4 }
  0x1c   : > { %s1258_s22 = scalar_lea.vmem (!%p1229_p7), [#allocation2], %s852_s20 }
  0x1f   : > { %1138 = dma.done.wait (%p1233_p8), [#allocation4], 32  }
  0x20   : > { %1140 = vsyncadd (%p1233_p8), [#allocation4], 4294967264  ;;  %s854_s23 = sshll.u32 %s1151_s17, 5  ;;  %p857_p13 = scmp.ne.s32.totalorder %s1151_s17, 0 }
  0x21   : > { %p348_p12 = scmp.lt.s32.totalorder %s854_s23, 287 }
  0x22   : > { %386 = sbr.rel (%p857_p13) target bundleno = 44 (0x2c), region = 82 }
  0x23   : > { %s1442_s23 = smov (!%p348_p12, %s854_s23), 287 }
  0x24   : > { %s1000_s24 = sshll.u32 %s1442_s23, 3 }
  0x25   : > { %s1268_s25 = scalar_lea.vmem %s1428_s1, %s1000_s24 }
  0x27   : > { %v1162_v2 = vmov 0.0  }
  0x28   : > { %387 = vst [vmem:[%s1431_s4] sm:$0xff] %v1162_v2 }
  0x29   : > { %388 = vst [vmem:[%s1431_s4 + $0x8] sm:$0xff] %v1162_v2 }
  0x2a   : > { %389 = vst [vmem:[%s1431_s4 + $0x10] sm:$0xff] %v1162_v2 }
  0x2b   : > { %390 = vst [vmem:[%s1431_s4 + $0x18] sm:$0xff] %v1162_v2 }
  0x2c PF: > { %v924_v3 = vld [vmem:[%s1268_s25 + $0x70] sm:$0xf]  ;;  %v1018_v4 = vld [vmem:[%s1268_s25 + $0x74] sm:$0xf0]  ;;  %v1017_v8 = vld [vmem:[%s1268_s25 + $0x74] sm:$0xf] }
  0x2d   : > { %v988_v5 = vld [vmem:[%s1268_s25 + $0xf0] sm:$0xf]  ;;  %v925_v6 = vor.u32 %v1018_v4, %v924_v3  ;;  %v1034_v7 = vld [vmem:[%s1268_s25 + $0xf4] sm:$0xf0]  ;;  %v926_v9 = vld [vmem:[%s1268_s25 + $0x78] sm:$0xf0] }
  0x2e   : > { %v989_v10 = vor.u32 %v1034_v7, %v988_v5  ;;  %v929_v11 = vor.u32 %v1017_v8, %v926_v9  ;;  %v1033_v12 = vld [vmem:[%s1268_s25 + $0xf4] sm:$0xf]  ;;  %v990_v13 = vld [vmem:[%s1268_s25 + $0xf8] sm:$0xf0]  ;;  %v916_v14 = vld [vmem:[%s1268_s25 + $0x60] sm:$0xf] }
  0x2f   : > { %599 = vmatpush.bf16.msra.mxu0 %v925_v6  ;;  %v993_v15 = vor.u32 %v1033_v12, %v990_v13  ;;  %v1016_v16 = vld [vmem:[%s1268_s25 + $0x64] sm:$0xf0]  ;;  %v980_v17 = vld [vmem:[%s1268_s25 + $0xe0] sm:$0xf]  ;;  %v1015_v21 = vld [vmem:[%s1268_s25 + $0x64] sm:$0xf] }
  0x30   : > { %v1032_v18 = vld [vmem:[%s1268_s25 + $0xe4] sm:$0xf0]  ;;  %613 = vmatpush.bf16.msra.mxu1 %v989_v10  ;;  %627 = vmatpush.bf16.msra.mxu2 %v929_v11  ;;  %v917_v19 = vor.u32 %v1016_v16, %v916_v14  ;;  %v918_v22 = vld [vmem:[%s1268_s25 + $0x68] sm:$0xf0]  ;;  %v1031_v23 = vld [vmem:[%s1268_s25 + $0xe4] sm:$0xf] }
  0x31   : > { %v981_v20 = vor.u32 %v1032_v18, %v980_v17  ;;  %641 = vmatpush.bf16.msra.mxu3 %v993_v15  ;;  %v921_v24 = vor.u32 %v1015_v21, %v918_v22  ;;  %v982_v25 = vld [vmem:[%s1268_s25 + $0xe8] sm:$0xf0]  ;;  %v908_v26 = vld [vmem:[%s1268_s25 + $0x50] sm:$0xf]  ;;  %v1014_v27 = vld [vmem:[%s1268_s25 + $0x54] sm:$0xf0] }
  0x32   : > { %v985_v28 = vor.u32 %v1031_v23, %v982_v25  ;;  %v972_v29 = vld [vmem:[%s1268_s25 + $0xd0] sm:$0xf]  ;;  %v1030_v30 = vld [vmem:[%s1268_s25 + $0xd4] sm:$0xf0]  ;;  %v1013_v31 = vld [vmem:[%s1268_s25 + $0x54] sm:$0xf]  ;;  %v909_v32 = vor.u32 %v1014_v27, %v908_v26 }
  0x33   : > { %600 = vmatpush.bf16.msra.mxu0 %v917_v19  ;;  %v910_v33 = vld [vmem:[%s1268_s25 + $0x58] sm:$0xf0]  ;;  %v1029_v34 = vld [vmem:[%s1268_s25 + $0xd4] sm:$0xf]  ;;  %v973_v36 = vor.u32 %v1030_v30, %v972_v29  ;;  %v900_v38 = vld [vmem:[%s1268_s25 + $0x40] sm:$0xf] }
  0x34   : > { %v974_v35 = vld [vmem:[%s1268_s25 + $0xd8] sm:$0xf0]  ;;  %614 = vmatpush.bf16.msra.mxu1 %v981_v20  ;;  %628 = vmatpush.bf16.msra.mxu2 %v921_v24  ;;  %v913_v37 = vor.u32 %v1013_v31, %v910_v33  ;;  %v1012_v39 = vld [vmem:[%s1268_s25 + $0x44] sm:$0xf0]  ;;  %v964_v40 = vld [vmem:[%s1268_s25 + $0xc0] sm:$0xf] }
  0x35   : > { %642 = vmatpush.bf16.msra.mxu3 %v985_v28  ;;  %v977_v41 = vor.u32 %v1029_v34, %v974_v35  ;;  %v1028_v42 = vld [vmem:[%s1268_s25 + $0xc4] sm:$0xf0]  ;;  %v1011_v43 = vld [vmem:[%s1268_s25 + $0x44] sm:$0xf]  ;;  %v902_v44 = vld [vmem:[%s1268_s25 + $0x48] sm:$0xf0]  ;;  %v901_v47 = vor.u32 %v1012_v39, %v900_v38 }
  0x36   : > { %v1027_v45 = vld [vmem:[%s1268_s25 + $0xc4] sm:$0xf]  ;;  %v966_v46 = vld [vmem:[%s1268_s25 + $0xc8] sm:$0xf0]  ;;  %v965_v48 = vor.u32 %v1028_v42, %v964_v40  ;;  %v905_v49 = vor.u32 %v1011_v43, %v902_v44  ;;  %v892_v50 = vld [vmem:[%s1268_s25 + $0x30] sm:$0xf] }
  0x37   : > { %601 = vmatpush.bf16.msra.mxu0 %v909_v32  ;;  %v1010_v51 = vld [vmem:[%s1268_s25 + $0x34] sm:$0xf0]  ;;  %v956_v52 = vld [vmem:[%s1268_s25 + $0xb0] sm:$0xf]  ;;  %v969_v53 = vor.u32 %v1027_v45, %v966_v46  ;;  %v1009_v55 = vld [vmem:[%s1268_s25 + $0x34] sm:$0xf] }
  0x38   : > { %615 = vmatpush.bf16.msra.mxu1 %v973_v36  ;;  %629 = vmatpush.bf16.msra.mxu2 %v913_v37  ;;  %v1026_v54 = vld [vmem:[%s1268_s25 + $0xb4] sm:$0xf0]  ;;  %v894_v56 = vld [vmem:[%s1268_s25 + $0x38] sm:$0xf0]  ;;  %v1025_v57 = vld [vmem:[%s1268_s25 + $0xb4] sm:$0xf]  ;;  %v893_v59 = vor.u32 %v1010_v51, %v892_v50 }
  0x39   : > { %643 = vmatpush.bf16.msra.mxu3 %v977_v41  ;;  %v958_v58 = vld [vmem:[%s1268_s25 + $0xb8] sm:$0xf0]  ;;  %v957_v60 = vor.u32 %v1026_v54, %v956_v52  ;;  %v897_v61 = vor.u32 %v1009_v55, %v894_v56  ;;  %v884_v62 = vld [vmem:[%s1268_s25 + $0x20] sm:$0xf]  ;;  %v1008_v63 = vld [vmem:[%s1268_s25 + $0x24] sm:$0xf0] }
  0x3a   : > { %v948_v0 = vld [vmem:[%s1268_s25 + $0xa0] sm:$0xf]  ;;  %v961_v1 = vor.u32 %v1025_v57, %v958_v58  ;;  %v1024_v2 = vld [vmem:[%s1268_s25 + $0xa4] sm:$0xf0]  ;;  %v1007_v3 = vld [vmem:[%s1268_s25 + $0x24] sm:$0xf]  ;;  %v885_v7 = vor.u32 %v1008_v63, %v884_v62 }
  0x3b   : > { %602 = vmatpush.bf16.msra.mxu0 %v901_v47  ;;  %v886_v4 = vld [vmem:[%s1268_s25 + $0x28] sm:$0xf0]  ;;  %v1023_v5 = vld [vmem:[%s1268_s25 + $0xa4] sm:$0xf]  ;;  %v949_v8 = vor.u32 %v1024_v2, %v948_v0  ;;  %v876_v10 = vld [vmem:[%s1268_s25 + $0x10] sm:$0xf] }
  0x3c   : > { %616 = vmatpush.bf16.msra.mxu1 %v965_v48  ;;  %630 = vmatpush.bf16.msra.mxu2 %v905_v49  ;;  %v950_v6 = vld [vmem:[%s1268_s25 + $0xa8] sm:$0xf0]  ;;  %v889_v9 = vor.u32 %v1007_v3, %v886_v4  ;;  %v1006_v11 = vld [vmem:[%s1268_s25 + $0x14] sm:$0xf0]  ;;  %v940_v12 = vld [vmem:[%s1268_s25 + $0x90] sm:$0xf] }
  0x3d   : > { %644 = vmatpush.bf16.msra.mxu3 %v969_v53  ;;  %v953_v13 = vor.u32 %v1023_v5, %v950_v6  ;;  %v1022_v14 = vld [vmem:[%s1268_s25 + $0x94] sm:$0xf0]  ;;  %v1005_v15 = vld [vmem:[%s1268_s25 + $0x14] sm:$0xf]  ;;  %v878_v16 = vld [vmem:[%s1268_s25 + $0x18] sm:$0xf0]  ;;  %v877_v19 = vor.u32 %v1006_v11, %v876_v10 }
  0x3e   : > { %v1021_v17 = vld [vmem:[%s1268_s25 + $0x94] sm:$0xf]  ;;  %v942_v18 = vld [vmem:[%s1268_s25 + $0x98] sm:$0xf0]  ;;  %v941_v20 = vor.u32 %v1022_v14, %v940_v12  ;;  %v881_v21 = vor.u32 %v1005_v15, %v878_v16  ;;  %v868_v22 = vld [vmem:[%s1268_s25] sm:$0xf] }
  0x3f   : > { %603 = vmatpush.bf16.msra.mxu0 %v893_v59  ;;  %v1004_v23 = vld [vmem:[%s1268_s25 + $0x4] sm:$0xf0]  ;;  %v932_v24 = vld [vmem:[%s1268_s25 + $0x80] sm:$0xf]  ;;  %v945_v25 = vor.u32 %v1021_v17, %v942_v18  ;;  %v1003_v27 = vld [vmem:[%s1268_s25 + $0x4] sm:$0xf] }
  0x40   : > { %617 = vmatpush.bf16.msra.mxu1 %v957_v60  ;;  %631 = vmatpush.bf16.msra.mxu2 %v897_v61  ;;  %v1020_v26 = vld [vmem:[%s1268_s25 + $0x84] sm:$0xf0]  ;;  %v870_v28 = vld [vmem:[%s1268_s25 + $0x8] sm:$0xf0]  ;;  %v1019_v29 = vld [vmem:[%s1268_s25 + $0x84] sm:$0xf]  ;;  %v869_v31 = vor.u32 %v1004_v23, %v868_v22 }
  0x41   : > { %645 = vmatpush.bf16.msra.mxu3 %v961_v1  ;;  %v934_v30 = vld [vmem:[%s1268_s25 + $0x88] sm:$0xf0]  ;;  %v860_v32 = vld [vmem:[%s1258_s22] sm:$0xf]  ;;  %v1002_v33 = vld [vmem:[%s1258_s22 + $0x4] sm:$0xf0]  ;;  %v933_v34 = vor.u32 %v1020_v26, %v932_v24  ;;  %v873_v35 = vor.u32 %v1003_v27, %v870_v28 }
  0x42   : > { %v1001_v36 = vld [vmem:[%s1258_s22 + $0x4] sm:$0xf]  ;;  %v862_v37 = vld [vmem:[%s1258_s22 + $0x8] sm:$0xf0]  ;;  %v937_v38 = vor.u32 %v1019_v29, %v934_v30  ;;  %v861_v39 = vor.u32 %v1002_v33, %v860_v32  ;;  %p994_p0 = scmp.ne.s32.totalorder %s1151_s17, 8 }
  0x43   : > { %604 = vmatpush.bf16.msra.mxu0 %v885_v7  ;;  %v865_v40 = vor.u32 %v1001_v36, %v862_v37  ;;  %v391_v42 = vld [vmem:[%s1431_s4] sm:$0xff]  ;;  %v392_v47 = vld [vmem:[%s1431_s4 + $0x8] sm:$0xff]  ;;  %v393_v51 = vld [vmem:[%s1431_s4 + $0x10] sm:$0xff] }
  0x44   : > { %618 = vmatpush.bf16.msra.mxu1 %v949_v8  ;;  %632 = vmatpush.bf16.msra.mxu2 %v889_v9  ;;  %v394_v57 = vld [vmem:[%s1431_s4 + $0x18] sm:$0xff] }
  0x45   : > { %646 = vmatpush.bf16.msra.mxu3 %v953_v13 }
  0x47   : > { %605 = vmatpush.bf16.msra.mxu0 %v877_v19 }
  0x48   : > { %619 = vmatpush.bf16.msra.mxu1 %v941_v20  ;;  %633 = vmatpush.bf16.msra.mxu2 %v881_v21 }
  0x49   : > { %647 = vmatpush.bf16.msra.mxu3 %v945_v25 }
  0x4b   : > { %606 = vmatpush.bf16.msra.mxu0 %v869_v31 }
  0x4c   : > { %620 = vmatpush.bf16.msra.mxu1 %v933_v34  ;;  %634 = vmatpush.bf16.msra.mxu2 %v873_v35 }
  0x4d   : > { %648 = vmatpush.bf16.msra.mxu3 %v937_v38 }
  0x4e   : > { %607 = vmatmul.bf16.vlgmr.msra.gmra.mxu0 %v861_v39 }
  0x4f   : > { %621 = vmatmul.bf16.vlgmr.msra.gmra.mxu1 %v865_v40  ;;  %635 = vmatmul.bf16.vlgmr.msra.gmra.mxu2 %v861_v39 }
  0x50   : > { %649 = vmatmul.bf16.vlgmr.msra.gmra.mxu3 %v865_v40 }
  0xcb   : > { %v608_v41 = vpop.f32.mrf.mxu0 }
  0xcc   : > { %v622_v43 = vpop.f32.mrf.mxu1 }
  0xcd   : > { %v623_v44 = vadd.f32 %v622_v43, %v608_v41 }
  0xcf   : > { %v655_v45 = vadd.f32 %v623_v44, %v391_v42 }
  0xd1   : > { %659 = vst [vmem:[%s1431_s4] sm:$0xff] %v655_v45 }
  0xd2   : > { %v636_v46 = vpop.f32.mrf.mxu2 }
  0xd3   : > { %v650_v48 = vpop.f32.mrf.mxu3  ;;  %v610_v49 = vpop.f32.mrf.mxu0 }
  0xd4   : > { %v651_v50 = vadd.f32 %v650_v48, %v636_v46  ;;  %v624_v52 = vpop.f32.mrf.mxu1 }
  0xd5   : > { %v625_v53 = vadd.f32 %v624_v52, %v610_v49 }
  0xd6   : > { %v656_v54 = vadd.f32 %v651_v50, %v392_v47 }
  0xd7   : > { %v657_v55 = vadd.f32 %v625_v53, %v393_v51 }
  0xd8   : > { %660 = vst [vmem:[%s1431_s4 + $0x8] sm:$0xff] %v656_v54 }
  0xd9   : > { %661 = vst [vmem:[%s1431_s4 + $0x10] sm:$0xff] %v657_v55 }
  0xda   : > { %v638_v56 = vpop.f32.mrf.mxu2 }
  0xdb   : > { %v652_v58 = vpop.f32.mrf.mxu3 }
  0xdc   : > { %v653_v59 = vadd.f32 %v652_v58, %v638_v56  ;;  %666 = sbr.rel (%p994_p0) target bundleno = 239 (0xef), region = 86 }
  0xde   : > { %v658_v60 = vadd.f32 %v653_v59, %v394_v57 }
  0xe0   : > { %662 = vst [vmem:[%s1431_s4 + $0x18] sm:$0xff] %v658_v60 }
  0xe1   : > { %v667_v61 = vld [vmem:[%s1431_s4] sm:$0xff]  ;;  %v668_v1 = vld [vmem:[%s1431_s4 + $0x8] sm:$0xff]  ;;  %v669_v4 = vld [vmem:[%s1431_s4 + $0x10] sm:$0xff] }
  0xe2   : > { %v671_v62 = vld [vmem:[#allocation3] sm:$0x3]  ;;  %v682_v3 = vld [vmem:[%s1430_s3 + $0x8] sm:$0xff]  ;;  %v683_v5 = vld [vmem:[%s1430_s3 + $0x10] sm:$0xff] }
  0xe3   : > { %v681_v63 = vld [vmem:[%s1430_s3] sm:$0xff]  ;;  %v673_v0 = vperm.slane %v671_v62, 0  ;;  %v674_v2 = vperm.slane %v671_v62, 1  ;;  %v684_v7 = vld [vmem:[%s1430_s3 + $0x18] sm:$0xff] }
  0xe5   : > { %v677_v8 = vadd.f32 %v673_v0, %v667_v61  ;;  %v678_v9 = vadd.f32 %v674_v2, %v668_v1  ;;  %v679_v10 = vadd.f32 %v673_v0, %v669_v4 }
  0xe7   : > { %v670_v6 = vld [vmem:[%s1431_s4 + $0x18] sm:$0xff]  ;;  %v685_v12 = vadd.f32 %v681_v63, %v677_v8  ;;  %v686_v13 = vadd.f32 %v682_v3, %v678_v9  ;;  %v687_v14 = vadd.f32 %v683_v5, %v679_v10 }
  0xe8   : > { %v680_v11 = vadd.f32 %v674_v2, %v670_v6 }
  0xe9   : > { %v689_v16 = vmax.f32 %v685_v12, 0.0  ;;  %v690_v17 = vmax.f32 %v686_v13, 0.0  ;;  %v691_v18 = vmax.f32 %v687_v14, 0.0 }
  0xea   : > { %v688_v15 = vadd.f32 %v684_v7, %v680_v11 }
  0xeb   : > { %693 = vst [vmem:[%s1431_s4] sm:$0xff] %v689_v16 }
  0xec   : > { %v692_v19 = vmax.f32 %v688_v15, 0.0  ;;  %694 = vst [vmem:[%s1431_s4 + $0x8] sm:$0xff] %v690_v17 }
  0xed   : > { %695 = vst [vmem:[%s1431_s4 + $0x10] sm:$0xff] %v691_v18 }
  0xee   : > { %696 = vst [vmem:[%s1431_s4 + $0x18] sm:$0xff] %v692_v19 }
  0xef PF: > { %s15_s19 = sadd.s32 1, %s1159_s19   ;;  %s1435_s15 = smov %s1147_s16 }
  0xf0   : > { %p12_p1 = scmp.ge.s32.totalorder %s15_s19, 11   ;;  %s1436_s16 = smov %s1238_s27 }
  0xf1   : > { %s1437_s17 = smov %s1155_s18  ;;  %s1438_s18 = smov %s1440_s21 }
  0xf2   :  { %14 = sbr.rel (!%p12_p1) target bundleno = 3 (0x3), region = 129 }
  0xf7   :  { %730 = vsyncpa [#allocation4], 1 }
  0xf8   :  { %732 = vsyncpa [#allocation4 + $0x1], 1 }

// kernel: forward.36
= control target key start
LH: loop header
LB: loop body
LE: loop exit
PB: predicated region body
PF: predicated region fallthrough
CT: control target
= control target key end

     0   :  { %s1285_s12 = smov 0   ;;  %s1287_s13 = smov 0   ;;  %s1623_s0 = inlined_call_operand.vmem [shape: bf16[16,2304], index: 0, kind: input, shape index: {}]   ;;  %s1624_s1 = inlined_call_operand.vmem [shape: bf16[2304,512], index: 1, kind: input, shape index: {}]   ;;  %s1625_s2 = inlined_call_operand.vmem [shape: f32[1,512], index: 2, kind: input, shape index: {}]   ;;  %s1626_s3 = inlined_call_operand.vmem [shape: f32[16,512], index: 3, kind: output, shape index: {}]  }
   0x1   :  { %s1289_s14 = smov 0   ;;  %s1291_s15 = smov 0  }
   0x2   :  { %s1293_s16 = smov 0   ;;  %s1295_s17 = smov 0  }
   0x3   :  { %s1297_s18 = smov 0   ;;  %s1299_s19 = smov 0  }
   0x4   :  { %s1301_s20 = smov 0   ;;  %s1303_s21 = smov 0  }
   0x5   :  { %s1305_s22 = smov 0  }
   0x6 LB: > { %s890_s23 = sadd.s32 4294967295, %s1262_s22   ;;  %s25_s24 = sadd.s32 1, %s1254_s20  ;;  %s1262_s22 = sphi %s1305_s22, %s13_s22   ;;  %s1258_s21 = sphi %s1303_s21, %s1647_s21   ;;  %s1254_s20 = sphi %s1301_s20, %s1646_s20   ;;  %s1250_s19 = sphi %s1299_s19, %s1645_s19   ;;  %s1246_s18 = sphi %s1297_s18, %s1644_s18   ;;  %s1242_s17 = sphi %s1295_s17, %s1643_s17   ;;  %s1238_s16 = sphi %s1293_s16, %s1642_s16   ;;  %s1234_s15 = sphi %s1291_s15, %s1641_s15   ;;  %s1230_s14 = sphi %s1289_s14, %s1640_s14   ;;  %s1226_s13 = sphi %s1287_s13, %s1639_s13   ;;  %s1222_s12 = sphi %s1285_s12, %s1638_s12  }
   0x7   : > { %p26_p0 = scmp.ge.s32.totalorder %s25_s24, 9  ;;  %s28_s25 = sadd.s32 1, %s1258_s21 }
   0x8   : > { %s41_s26 = sadd.s32 1, %s1242_s17  ;;  %p48_p1 = scmp.ne.s32.totalorder %s1242_s17, %s1238_s16 }
   0x9   : > { %s1649_s24 = smov (%p26_p0, %s25_s24), 0  ;;  %s1651_s25 = smov (!%p26_p0, %s28_s25), %s1258_s21 }
   0xa   : > { %1629 = sst [smem:[#allocation5_spill]] %s1649_s24  ;;  %s37_s27 = ssub.s32 %s1254_s20, %s1649_s24 }
   0xb   : > { %p49_p2 = scmp.eq.s32.totalorder %s1262_s22, 0  ;;  %p30_p3 = scmp.ge.s32.totalorder %s1651_s25, 2 }
   0xc   : > { %p39_p4 = scmp.eq.s32.totalorder %s37_s27, 0  ;;  %s69_s29 = sadd.s32 1, %s1234_s15 }
   0xd   : > { %p1352_p5 = por %p49_p2, %p48_p1  ;;  %s1653_s25 = smov (%p30_p3, %s1651_s25), 0 }
   0xe   : > { %1631 = sst [smem:[#allocation6_spill]] %s1653_s25  ;;  %s65_s4 = ssub.s32 %s1258_s21, %s1653_s25 }
   0xf   : > { %s1360_s30 = scalar_select %p39_p4, %s1242_s17, %s41_s26  }
  0x10   : > { %p76_p6 = scmp.ne.s32.totalorder %s1234_s15, %s1230_s14  ;;  %s66_s5 = sor.u32 %s65_s4, %s37_s27 }
  0x11   : > { %1632 = sst [smem:[#allocation7_spill]] %s1360_s30  ;;  %p121_p7 = scmp.eq.s32.totalorder %s65_s4, 0 }
  0x12   : > { %p67_p8 = scmp.eq.s32.totalorder %s66_s5, 0  ;;  %p1366_p9 = por %p76_p6, %p49_p2 }
  0x13   : > { %s123_s7 = sadd.s32 1, %s1226_s13  ;;  %p133_p10 = scmp.ne.s32.totalorder %s1226_s13, %s1222_s12 }
  0x14   : > { %s1374_s8 = scalar_select %p67_p8, %s1234_s15, %s69_s29  }
  0x15   : > { %s1377_s9 = scalar_select %p121_p7, %s1226_s13, %s123_s7  }
  0x16   : > { %p134_p11 = scmp.eq.s32.totalorder %s890_s23, 17  ;;  %p893_p13 = scmp.ge.s32.totalorder %s1262_s22, 18 }
  0x18   : > { %p1379_p12 = por %p134_p11, %p133_p10  ;;  %156 = sbr.rel (%p893_p13) target bundleno = 74 (0x4a), region = 16 }
  0x1d   : > { %159 = sbr.rel (!%p1352_p5) target bundleno = 35 (0x23), region = 20  ;;  %s161_s11 = sand.u32 (%p1352_p5), 1, %s1242_s17  }
  0x1e   : > { %s1050_s26 = sshll.u32 (%p1352_p5), %s1254_s20, 3  ;;  %s894_s27 = sshll.u32 (%p1352_p5), %s161_s11, 4 }
  0x1f   : > { %s169_s5 = scalar_lea.vmem (%p1352_p5), %s1623_s0, %s1050_s26  ;;  %s163_s23 = scalar_lea.vmem (%p1352_p5), [#allocation2], %s894_s27 }
  0x20   : > { %v200_v0 = vld [vmem:[%s169_s5] sm:$0xff] (%p1352_p5)  ;;  %v202_v1 = vld [vmem:[%s169_s5 + $0x48] sm:$0xff] (%p1352_p5) }
  0x21   : > { %201 = vst [vmem:[%s163_s23] sm:$0xff] (%p1352_p5), %v200_v0 }
  0x22   : > { %203 = vst [vmem:[%s163_s23 + $0x8] sm:$0xff] %v202_v1 }
  0x23 PF: > { %209 = sbr.rel (!%p1366_p9) target bundleno = 74 (0x4a), region = 58  ;;  %s211_s28 = sand.u32 (%p1366_p9), 1, %s1234_s15  }
  0x24   : > { %s899_s7 = sshll.u32 (%p1366_p9), %s1258_s21, 1  ;;  %s897_s25 = sshll.u32 (%p1366_p9), %s211_s28, 8 }
  0x25   : > { %s1051_s11 = sshll.u32 (%p1366_p9), %s1254_s20, 7  ;;  %s1404_s6 = scalar_lea.vmem (%p1366_p9), [#allocation3], %s897_s25 }
  0x26   : > { %s217_s24 = sadd.s32 (%p1366_p9), %s1051_s11, %s899_s7 }
  0x27   : > { %s901_s30 = sshll.u32 (%p1366_p9), %s217_s24, 2 }
  0x28   : > { %s1399_s4 = scalar_lea.vmem %s1624_s1, %s901_s30 }
  0x29   : > { %v310_v2 = vld [vmem:[%s1399_s4] sm:$0xff]  ;;  %v312_v3 = vld [vmem:[%s1399_s4 + $0x10] sm:$0xff] }
  0x2a   : > { %v314_v4 = vld [vmem:[%s1399_s4 + $0x20] sm:$0xff]  ;;  %311 = vst [vmem:[%s1404_s6] sm:$0xff] %v310_v2  ;;  %v316_v5 = vld [vmem:[%s1399_s4 + $0x30] sm:$0xff] }
  0x2b   : > { %313 = vst [vmem:[%s1404_s6 + $0x8] sm:$0xff] %v312_v3  ;;  %v318_v6 = vld [vmem:[%s1399_s4 + $0x40] sm:$0xff]  ;;  %v320_v7 = vld [vmem:[%s1399_s4 + $0x50] sm:$0xff] }
  0x2c   : > { %315 = vst [vmem:[%s1404_s6 + $0x10] sm:$0xff] %v314_v4  ;;  %v322_v8 = vld [vmem:[%s1399_s4 + $0x60] sm:$0xff]  ;;  %v324_v9 = vld [vmem:[%s1399_s4 + $0x70] sm:$0xff] }
  0x2d   : > { %317 = vst [vmem:[%s1404_s6 + $0x18] sm:$0xff] %v316_v5  ;;  %v326_v10 = vld [vmem:[%s1399_s4 + $0x80] sm:$0xff]  ;;  %v328_v11 = vld [vmem:[%s1399_s4 + $0x90] sm:$0xff] }
  0x2e   : > { %319 = vst [vmem:[%s1404_s6 + $0x20] sm:$0xff] %v318_v6  ;;  %v330_v12 = vld [vmem:[%s1399_s4 + $0xa0] sm:$0xff]  ;;  %v332_v13 = vld [vmem:[%s1399_s4 + $0xb0] sm:$0xff] }
  0x2f   : > { %321 = vst [vmem:[%s1404_s6 + $0x28] sm:$0xff] %v320_v7  ;;  %v334_v14 = vld [vmem:[%s1399_s4 + $0xc0] sm:$0xff]  ;;  %v336_v15 = vld [vmem:[%s1399_s4 + $0xd0] sm:$0xff] }
  0x30   : > { %323 = vst [vmem:[%s1404_s6 + $0x30] sm:$0xff] %v322_v8  ;;  %v338_v16 = vld [vmem:[%s1399_s4 + $0xe0] sm:$0xff]  ;;  %v340_v17 = vld [vmem:[%s1399_s4 + $0xf0] sm:$0xff] }
  0x31   : > { %325 = vst [vmem:[%s1404_s6 + $0x38] sm:$0xff] %v324_v9  ;;  %v342_v18 = vld [vmem:[%s1399_s4 + $0x100] sm:$0xff]  ;;  %v344_v19 = vld [vmem:[%s1399_s4 + $0x110] sm:$0xff] }
  0x32   : > { %327 = vst [vmem:[%s1404_s6 + $0x40] sm:$0xff] %v326_v10  ;;  %v346_v20 = vld [vmem:[%s1399_s4 + $0x120] sm:$0xff]  ;;  %v348_v21 = vld [vmem:[%s1399_s4 + $0x130] sm:$0xff] }
  0x33   : > { %329 = vst [vmem:[%s1404_s6 + $0x48] sm:$0xff] %v328_v11  ;;  %v350_v22 = vld [vmem:[%s1399_s4 + $0x140] sm:$0xff]  ;;  %v352_v23 = vld [vmem:[%s1399_s4 + $0x150] sm:$0xff] }
  0x34   : > { %331 = vst [vmem:[%s1404_s6 + $0x50] sm:$0xff] %v330_v12  ;;  %v354_v24 = vld [vmem:[%s1399_s4 + $0x160] sm:$0xff]  ;;  %v356_v25 = vld [vmem:[%s1399_s4 + $0x170] sm:$0xff] }
  0x35   : > { %333 = vst [vmem:[%s1404_s6 + $0x58] sm:$0xff] %v332_v13  ;;  %v358_v26 = vld [vmem:[%s1399_s4 + $0x180] sm:$0xff]  ;;  %v360_v27 = vld [vmem:[%s1399_s4 + $0x190] sm:$0xff] }
  0x36   : > { %335 = vst [vmem:[%s1404_s6 + $0x60] sm:$0xff] %v334_v14  ;;  %v362_v28 = vld [vmem:[%s1399_s4 + $0x1a0] sm:$0xff]  ;;  %v364_v29 = vld [vmem:[%s1399_s4 + $0x1b0] sm:$0xff] }
  0x37   : > { %337 = vst [vmem:[%s1404_s6 + $0x68] sm:$0xff] %v336_v15  ;;  %v366_v30 = vld [vmem:[%s1399_s4 + $0x1c0] sm:$0xff]  ;;  %v368_v31 = vld [vmem:[%s1399_s4 + $0x1d0] sm:$0xff] }
  0x38   : > { %339 = vst [vmem:[%s1404_s6 + $0x70] sm:$0xff] %v338_v16  ;;  %v370_v32 = vld [vmem:[%s1399_s4 + $0x1e0] sm:$0xff]  ;;  %v372_v33 = vld [vmem:[%s1399_s4 + $0x1f0] sm:$0xff] }
  0x39   : > { %341 = vst [vmem:[%s1404_s6 + $0x78] sm:$0xff] %v340_v17 }
  0x3a   : > { %343 = vst [vmem:[%s1404_s6 + $0x80] sm:$0xff] %v342_v18 }
  0x3b   : > { %345 = vst [vmem:[%s1404_s6 + $0x88] sm:$0xff] %v344_v19 }
  0x3c   : > { %347 = vst [vmem:[%s1404_s6 + $0x90] sm:$0xff] %v346_v20 }
  0x3d   : > { %349 = vst [vmem:[%s1404_s6 + $0x98] sm:$0xff] %v348_v21 }
  0x3e   : > { %351 = vst [vmem:[%s1404_s6 + $0xa0] sm:$0xff] %v350_v22 }
  0x3f   : > { %353 = vst [vmem:[%s1404_s6 + $0xa8] sm:$0xff] %v352_v23 }
  0x40   : > { %355 = vst [vmem:[%s1404_s6 + $0xb0] sm:$0xff] %v354_v24 }
  0x41   : > { %357 = vst [vmem:[%s1404_s6 + $0xb8] sm:$0xff] %v356_v25 }
  0x42   : > { %359 = vst [vmem:[%s1404_s6 + $0xc0] sm:$0xff] %v358_v26 }
  0x43   : > { %361 = vst [vmem:[%s1404_s6 + $0xc8] sm:$0xff] %v360_v27 }
  0x44   : > { %363 = vst [vmem:[%s1404_s6 + $0xd0] sm:$0xff] %v362_v28 }
  0x45   : > { %365 = vst [vmem:[%s1404_s6 + $0xd8] sm:$0xff] %v364_v29 }
  0x46   : > { %367 = vst [vmem:[%s1404_s6 + $0xe0] sm:$0xff] %v366_v30 }
  0x47   : > { %369 = vst [vmem:[%s1404_s6 + $0xe8] sm:$0xff] %v368_v31 }
  0x48   : > { %371 = vst [vmem:[%s1404_s6 + $0xf0] sm:$0xff] %v370_v32 }
  0x49   : > { %373 = vst [vmem:[%s1404_s6 + $0xf8] sm:$0xff] %v372_v33 }
  0x4a PF: > { %p902_p0 = scmp.ge.s32.totalorder %s1262_s22, 1  ;;  %p386_p1 = scmp.lt.s32.totalorder %s1262_s22, 19 }
  0x4c   : > { %p387_p2 = pnand %p902_p0, %p386_p1 }
  0x4d   : > { %s393_s24 = sand.u32 (!%p387_p2), 1, %s1238_s16   ;;  %s400_s25 = sand.u32 (!%p387_p2), 1, %s1230_s14  }
  0x4e   : > { %390 = sbr.rel (%p387_p2) target bundleno = 296 (0x128), region = 100  ;;  %s903_s30 = sshll.u32 (!%p387_p2), %s393_s24, 4 }
  0x4f   : > { %s904_s27 = sshll.u32 (!%p387_p2), %s400_s25, 8  ;;  %s427_s5 = sand.u32 (!%p387_p2), 1, %s1222_s12  }
  0x50   : > { %s906_s23 = sshll.u32 (!%p387_p2), %s1250_s19, 1  ;;  %s905_s28 = sshll.u32 (!%p387_p2), %s427_s5, 5 }
  0x51   : > { %p435_p3 = scmp.lt.s32.totalorder (!%p387_p2), %s906_s23, 3  ;;  %s1479_s26 = scalar_lea.vmem (!%p387_p2), [#allocation2], %s903_s30 }
  0x52   : > { %s1481_s4 = scalar_lea.vmem (!%p387_p2), [#allocation3], %s904_s27  ;;  %s1483_s6 = scalar_lea.vmem (!%p387_p2), [#allocation4], %s905_s28 }
  0x53   : > { %s1655_s23 = smov (!%p435_p3, %s906_s23), 3  ;;  %p907_p4 = scmp.ne.s32.totalorder %s1246_s18, 0 }
  0x54   : > { %s437_s29 = scalar_lea.vmem %s1625_s2, %s1655_s23 }
  0x55   : > { %444 = sbr.rel (%p907_p4) target bundleno = 95 (0x5f), region = 112 }
  0x5a   : > { %v1264_v34 = vmov 0.0  }
  0x5b   : > { %445 = vst [vmem:[%s1483_s6] sm:$0xff] %v1264_v34 }
  0x5c   : > { %446 = vst [vmem:[%s1483_s6 + $0x8] sm:$0xff] %v1264_v34 }
  0x5d   : > { %447 = vst [vmem:[%s1483_s6 + $0x10] sm:$0xff] %v1264_v34 }
  0x5e   : > { %448 = vst [vmem:[%s1483_s6 + $0x18] sm:$0xff] %v1264_v34 }
  0x5f PF: > { %v974_v35 = vld [vmem:[%s1481_s4 + $0x70] sm:$0xf]  ;;  %v1069_v36 = vld [vmem:[%s1481_s4 + $0x74] sm:$0xf0]  ;;  %v1068_v40 = vld [vmem:[%s1481_s4 + $0x74] sm:$0xf] }
  0x60   : > { %v1038_v37 = vld [vmem:[%s1481_s4 + $0xf0] sm:$0xf]  ;;  %v975_v38 = vor.u32 %v1069_v36, %v974_v35  ;;  %v1085_v39 = vld [vmem:[%s1481_s4 + $0xf4] sm:$0xf0]  ;;  %v976_v41 = vld [vmem:[%s1481_s4 + $0x78] sm:$0xf0] }
  0x61   : > { %v1039_v42 = vor.u32 %v1085_v39, %v1038_v37  ;;  %v979_v43 = vor.u32 %v1068_v40, %v976_v41  ;;  %v1084_v44 = vld [vmem:[%s1481_s4 + $0xf4] sm:$0xf]  ;;  %v1040_v45 = vld [vmem:[%s1481_s4 + $0xf8] sm:$0xf0]  ;;  %v966_v46 = vld [vmem:[%s1481_s4 + $0x60] sm:$0xf] }
  0x62   : > { %657 = vmatpush.bf16.msra.mxu0 %v975_v38  ;;  %v1043_v47 = vor.u32 %v1084_v44, %v1040_v45  ;;  %v1067_v48 = vld [vmem:[%s1481_s4 + $0x64] sm:$0xf0]  ;;  %v1030_v49 = vld [vmem:[%s1481_s4 + $0xe0] sm:$0xf]  ;;  %v1066_v53 = vld [vmem:[%s1481_s4 + $0x64] sm:$0xf] }
  0x63   : > { %v1083_v50 = vld [vmem:[%s1481_s4 + $0xe4] sm:$0xf0]  ;;  %671 = vmatpush.bf16.msra.mxu1 %v1039_v42  ;;  %685 = vmatpush.bf16.msra.mxu2 %v979_v43  ;;  %v967_v51 = vor.u32 %v1067_v48, %v966_v46  ;;  %v968_v54 = vld [vmem:[%s1481_s4 + $0x68] sm:$0xf0]  ;;  %v1082_v55 = vld [vmem:[%s1481_s4 + $0xe4] sm:$0xf] }
  0x64   : > { %v1031_v52 = vor.u32 %v1083_v50, %v1030_v49  ;;  %699 = vmatpush.bf16.msra.mxu3 %v1043_v47  ;;  %v971_v56 = vor.u32 %v1066_v53, %v968_v54  ;;  %v1032_v57 = vld [vmem:[%s1481_s4 + $0xe8] sm:$0xf0]  ;;  %v958_v58 = vld [vmem:[%s1481_s4 + $0x50] sm:$0xf]  ;;  %v1065_v59 = vld [vmem:[%s1481_s4 + $0x54] sm:$0xf0] }
  0x65   : > { %v1035_v60 = vor.u32 %v1082_v55, %v1032_v57  ;;  %v1022_v61 = vld [vmem:[%s1481_s4 + $0xd0] sm:$0xf]  ;;  %v1081_v62 = vld [vmem:[%s1481_s4 + $0xd4] sm:$0xf0]  ;;  %v1064_v63 = vld [vmem:[%s1481_s4 + $0x54] sm:$0xf]  ;;  %v959_v0 = vor.u32 %v1065_v59, %v958_v58 }
  0x66   : > { %658 = vmatpush.bf16.msra.mxu0 %v967_v51  ;;  %v960_v1 = vld [vmem:[%s1481_s4 + $0x58] sm:$0xf0]  ;;  %v1080_v2 = vld [vmem:[%s1481_s4 + $0xd4] sm:$0xf]  ;;  %v1023_v4 = vor.u32 %v1081_v62, %v1022_v61  ;;  %v950_v6 = vld [vmem:[%s1481_s4 + $0x40] sm:$0xf] }
  0x67   : > { %v1024_v3 = vld [vmem:[%s1481_s4 + $0xd8] sm:$0xf0]  ;;  %672 = vmatpush.bf16.msra.mxu1 %v1031_v52  ;;  %686 = vmatpush.bf16.msra.mxu2 %v971_v56  ;;  %v963_v5 = vor.u32 %v1064_v63, %v960_v1  ;;  %v1063_v7 = vld [vmem:[%s1481_s4 + $0x44] sm:$0xf0]  ;;  %v1014_v8 = vld [vmem:[%s1481_s4 + $0xc0] sm:$0xf] }
  0x68   : > { %700 = vmatpush.bf16.msra.mxu3 %v1035_v60  ;;  %v1027_v9 = vor.u32 %v1080_v2, %v1024_v3  ;;  %v1079_v10 = vld [vmem:[%s1481_s4 + $0xc4] sm:$0xf0]  ;;  %v1062_v11 = vld [vmem:[%s1481_s4 + $0x44] sm:$0xf]  ;;  %v952_v12 = vld [vmem:[%s1481_s4 + $0x48] sm:$0xf0]  ;;  %v951_v15 = vor.u32 %v1063_v7, %v950_v6 }
  0x69   : > { %v1078_v13 = vld [vmem:[%s1481_s4 + $0xc4] sm:$0xf]  ;;  %v1016_v14 = vld [vmem:[%s1481_s4 + $0xc8] sm:$0xf0]  ;;  %v1015_v16 = vor.u32 %v1079_v10, %v1014_v8  ;;  %v955_v17 = vor.u32 %v1062_v11, %v952_v12  ;;  %v942_v18 = vld [vmem:[%s1481_s4 + $0x30] sm:$0xf] }
  0x6a   : > { %659 = vmatpush.bf16.msra.mxu0 %v959_v0  ;;  %v1061_v19 = vld [vmem:[%s1481_s4 + $0x34] sm:$0xf0]  ;;  %v1006_v20 = vld [vmem:[%s1481_s4 + $0xb0] sm:$0xf]  ;;  %v1019_v21 = vor.u32 %v1078_v13, %v1016_v14  ;;  %v1060_v23 = vld [vmem:[%s1481_s4 + $0x34] sm:$0xf] }
  0x6b   : > { %673 = vmatpush.bf16.msra.mxu1 %v1023_v4  ;;  %687 = vmatpush.bf16.msra.mxu2 %v963_v5  ;;  %v1077_v22 = vld [vmem:[%s1481_s4 + $0xb4] sm:$0xf0]  ;;  %v944_v24 = vld [vmem:[%s1481_s4 + $0x38] sm:$0xf0]  ;;  %v1076_v25 = vld [vmem:[%s1481_s4 + $0xb4] sm:$0xf]  ;;  %v943_v27 = vor.u32 %v1061_v19, %v942_v18 }
  0x6c   : > { %701 = vmatpush.bf16.msra.mxu3 %v1027_v9  ;;  %v1008_v26 = vld [vmem:[%s1481_s4 + $0xb8] sm:$0xf0]  ;;  %v1007_v28 = vor.u32 %v1077_v22, %v1006_v20  ;;  %v947_v29 = vor.u32 %v1060_v23, %v944_v24  ;;  %v934_v30 = vld [vmem:[%s1481_s4 + $0x20] sm:$0xf]  ;;  %v1059_v31 = vld [vmem:[%s1481_s4 + $0x24] sm:$0xf0] }
  0x6d   : > { %v998_v32 = vld [vmem:[%s1481_s4 + $0xa0] sm:$0xf]  ;;  %v1011_v33 = vor.u32 %v1076_v25, %v1008_v26  ;;  %v1075_v34 = vld [vmem:[%s1481_s4 + $0xa4] sm:$0xf0]  ;;  %v1058_v35 = vld [vmem:[%s1481_s4 + $0x24] sm:$0xf]  ;;  %v935_v39 = vor.u32 %v1059_v31, %v934_v30 }
  0x6e   : > { %660 = vmatpush.bf16.msra.mxu0 %v951_v15  ;;  %v936_v36 = vld [vmem:[%s1481_s4 + $0x28] sm:$0xf0]  ;;  %v1074_v37 = vld [vmem:[%s1481_s4 + $0xa4] sm:$0xf]  ;;  %v999_v40 = vor.u32 %v1075_v34, %v998_v32  ;;  %v926_v42 = vld [vmem:[%s1481_s4 + $0x10] sm:$0xf] }
  0x6f   : > { %674 = vmatpush.bf16.msra.mxu1 %v1015_v16  ;;  %688 = vmatpush.bf16.msra.mxu2 %v955_v17  ;;  %v1000_v38 = vld [vmem:[%s1481_s4 + $0xa8] sm:$0xf0]  ;;  %v939_v41 = vor.u32 %v1058_v35, %v936_v36  ;;  %v1057_v43 = vld [vmem:[%s1481_s4 + $0x14] sm:$0xf0]  ;;  %v990_v44 = vld [vmem:[%s1481_s4 + $0x90] sm:$0xf] }
  0x70   : > { %702 = vmatpush.bf16.msra.mxu3 %v1019_v21  ;;  %v1003_v45 = vor.u32 %v1074_v37, %v1000_v38  ;;  %v1073_v46 = vld [vmem:[%s1481_s4 + $0x94] sm:$0xf0]  ;;  %v1056_v47 = vld [vmem:[%s1481_s4 + $0x14] sm:$0xf]  ;;  %v928_v48 = vld [vmem:[%s1481_s4 + $0x18] sm:$0xf0]  ;;  %v927_v51 = vor.u32 %v1057_v43, %v926_v42 }
  0x71   : > { %v1072_v49 = vld [vmem:[%s1481_s4 + $0x94] sm:$0xf]  ;;  %v992_v50 = vld [vmem:[%s1481_s4 + $0x98] sm:$0xf0]  ;;  %v991_v52 = vor.u32 %v1073_v46, %v990_v44  ;;  %v931_v53 = vor.u32 %v1056_v47, %v928_v48  ;;  %v918_v54 = vld [vmem:[%s1481_s4] sm:$0xf] }
  0x72   : > { %661 = vmatpush.bf16.msra.mxu0 %v943_v27  ;;  %v1055_v55 = vld [vmem:[%s1481_s4 + $0x4] sm:$0xf0]  ;;  %v982_v56 = vld [vmem:[%s1481_s4 + $0x80] sm:$0xf]  ;;  %v995_v57 = vor.u32 %v1072_v49, %v992_v50  ;;  %v1054_v59 = vld [vmem:[%s1481_s4 + $0x4] sm:$0xf] }
  0x73   : > { %675 = vmatpush.bf16.msra.mxu1 %v1007_v28  ;;  %689 = vmatpush.bf16.msra.mxu2 %v947_v29  ;;  %v1071_v58 = vld [vmem:[%s1481_s4 + $0x84] sm:$0xf0]  ;;  %v920_v60 = vld [vmem:[%s1481_s4 + $0x8] sm:$0xf0]  ;;  %v1070_v61 = vld [vmem:[%s1481_s4 + $0x84] sm:$0xf]  ;;  %v919_v63 = vor.u32 %v1055_v55, %v918_v54 }
  0x74   : > { %703 = vmatpush.bf16.msra.mxu3 %v1011_v33  ;;  %v984_v62 = vld [vmem:[%s1481_s4 + $0x88] sm:$0xf0]  ;;  %v910_v0 = vld [vmem:[%s1479_s26] sm:$0xf]  ;;  %v1053_v1 = vld [vmem:[%s1479_s26 + $0x4] sm:$0xf0]  ;;  %v983_v2 = vor.u32 %v1071_v58, %v982_v56  ;;  %v923_v3 = vor.u32 %v1054_v59, %v920_v60 }
  0x75   : > { %v1052_v4 = vld [vmem:[%s1479_s26 + $0x4] sm:$0xf]  ;;  %v912_v5 = vld [vmem:[%s1479_s26 + $0x8] sm:$0xf0]  ;;  %v987_v6 = vor.u32 %v1070_v61, %v984_v62  ;;  %v911_v7 = vor.u32 %v1053_v1, %v910_v0  ;;  %p1044_p5 = scmp.ne.s32.totalorder %s1246_s18, 8 }
  0x76   : > { %662 = vmatpush.bf16.msra.mxu0 %v935_v39  ;;  %v915_v8 = vor.u32 %v1052_v4, %v912_v5  ;;  %v449_v10 = vld [vmem:[%s1483_s6] sm:$0xff]  ;;  %v450_v15 = vld [vmem:[%s1483_s6 + $0x8] sm:$0xff]  ;;  %v451_v19 = vld [vmem:[%s1483_s6 + $0x10] sm:$0xff] }
  0x77   : > { %676 = vmatpush.bf16.msra.mxu1 %v999_v40  ;;  %690 = vmatpush.bf16.msra.mxu2 %v939_v41  ;;  %v452_v25 = vld [vmem:[%s1483_s6 + $0x18] sm:$0xff] }
  0x78   : > { %704 = vmatpush.bf16.msra.mxu3 %v1003_v45 }
  0x7a   : > { %663 = vmatpush.bf16.msra.mxu0 %v927_v51 }
  0x7b   : > { %677 = vmatpush.bf16.msra.mxu1 %v991_v52  ;;  %691 = vmatpush.bf16.msra.mxu2 %v931_v53 }
  0x7c   : > { %705 = vmatpush.bf16.msra.mxu3 %v995_v57 }
  0x7e   : > { %664 = vmatpush.bf16.msra.mxu0 %v919_v63 }
  0x7f   : > { %678 = vmatpush.bf16.msra.mxu1 %v983_v2  ;;  %692 = vmatpush.bf16.msra.mxu2 %v923_v3 }
  0x80   : > { %706 = vmatpush.bf16.msra.mxu3 %v987_v6 }
  0x81   : > { %665 = vmatmul.bf16.vlgmr.msra.gmra.mxu0 %v911_v7 }
  0x82   : > { %679 = vmatmul.bf16.vlgmr.msra.gmra.mxu1 %v915_v8  ;;  %693 = vmatmul.bf16.vlgmr.msra.gmra.mxu2 %v911_v7 }
  0x83   : > { %707 = vmatmul.bf16.vlgmr.msra.gmra.mxu3 %v915_v8 }
  0xfe   : > { %v666_v9 = vpop.f32.mrf.mxu0 }
  0xff   : > { %v680_v11 = vpop.f32.mrf.mxu1 }
 0x100   : > { %v681_v12 = vadd.f32 %v680_v11, %v666_v9 }
 0x102   : > { %v713_v13 = vadd.f32 %v681_v12, %v449_v10 }
 0x104   : > { %717 = vst [vmem:[%s1483_s6] sm:$0xff] %v713_v13 }
 0x105   : > { %v694_v14 = vpop.f32.mrf.mxu2 }
 0x106   : > { %v708_v16 = vpop.f32.mrf.mxu3  ;;  %v668_v17 = vpop.f32.mrf.mxu0 }
 0x107   : > { %v709_v18 = vadd.f32 %v708_v16, %v694_v14  ;;  %v682_v20 = vpop.f32.mrf.mxu1 }
 0x108   : > { %v683_v21 = vadd.f32 %v682_v20, %v668_v17 }
 0x109   : > { %v714_v22 = vadd.f32 %v709_v18, %v450_v15 }
 0x10a   : > { %v715_v23 = vadd.f32 %v683_v21, %v451_v19 }
 0x10b   : > { %718 = vst [vmem:[%s1483_s6 + $0x8] sm:$0xff] %v714_v22 }
 0x10c   : > { %719 = vst [vmem:[%s1483_s6 + $0x10] sm:$0xff] %v715_v23 }
 0x10d   : > { %v696_v24 = vpop.f32.mrf.mxu2 }
 0x10e   : > { %v710_v26 = vpop.f32.mrf.mxu3 }
 0x10f   : > { %v711_v27 = vadd.f32 %v710_v26, %v696_v24  ;;  %724 = sbr.rel (%p1044_p5) target bundleno = 288 (0x120), region = 116 }
 0x111   : > { %v716_v28 = vadd.f32 %v711_v27, %v452_v25 }
 0x113   : > { %720 = vst [vmem:[%s1483_s6 + $0x18] sm:$0xff] %v716_v28 }
 0x114   : > { %v725_v29 = vld [vmem:[%s1483_s6] sm:$0xff]  ;;  %v726_v31 = vld [vmem:[%s1483_s6 + $0x8] sm:$0xff]  ;;  %v727_v34 = vld [vmem:[%s1483_s6 + $0x10] sm:$0xff] }
 0x115   : > { %v729_v30 = vld [vmem:[%s437_s29] sm:$0x3] }
 0x116   : > { %v731_v32 = vperm.slane %v729_v30, 0  ;;  %v732_v33 = vperm.slane %v729_v30, 1 }
 0x118   : > { %v735_v36 = vadd.f32 %v731_v32, %v725_v29  ;;  %v736_v37 = vadd.f32 %v732_v33, %v726_v31  ;;  %v737_v38 = vadd.f32 %v731_v32, %v727_v34 }
 0x11a   : > { %v728_v35 = vld [vmem:[%s1483_s6 + $0x18] sm:$0xff]  ;;  %v739_v40 = vmax.f32 %v735_v36, 0.0  ;;  %v740_v41 = vmax.f32 %v736_v37, 0.0  ;;  %v741_v42 = vmax.f32 %v737_v38, 0.0 }
 0x11b   : > { %v738_v39 = vadd.f32 %v732_v33, %v728_v35 }
 0x11c   : > { %743 = vst [vmem:[%s1483_s6] sm:$0xff] %v739_v40 }
 0x11d   : > { %v742_v43 = vmax.f32 %v738_v39, 0.0  ;;  %744 = vst [vmem:[%s1483_s6 + $0x8] sm:$0xff] %v740_v41 }
 0x11e   : > { %745 = vst [vmem:[%s1483_s6 + $0x10] sm:$0xff] %v741_v42 }
 0x11f   : > { %746 = vst [vmem:[%s1483_s6 + $0x18] sm:$0xff] %v742_v43 }
 0x120 PF: > { %753 = sbr.rel (!%p1379_p12) target bundleno = 296 (0x128), region = 120  ;;  %s1086_s16 = sshll.u32 (%p1379_p12), %s1250_s19, 4 }
 0x121   : > { %s759_s25 = scalar_lea.vmem (%p1379_p12), %s1626_s3, %s1086_s16 }
 0x123   : > { %v772_v44 = vld [vmem:[%s1483_s6] sm:$0xff] (%p1379_p12) }
 0x124   : > { %v774_v45 = vld [vmem:[%s1483_s6 + $0x8] sm:$0xff] (%p1379_p12)  ;;  %773 = vst [vmem:[%s759_s25] sm:$0xff] (%p1379_p12), %v772_v44 }
 0x125   : > { %v776_v46 = vld [vmem:[%s1483_s6 + $0x10] sm:$0xff]  ;;  %775 = vst [vmem:[%s759_s25 + $0x8] sm:$0xff] %v774_v45 }
 0x126   : > { %v778_v47 = vld [vmem:[%s1483_s6 + $0x18] sm:$0xff]  ;;  %777 = vst [vmem:[%s759_s25 + $0x20] sm:$0xff] %v776_v46 }
 0x127   : > { %779 = vst [vmem:[%s759_s25 + $0x28] sm:$0xff] %v778_v47 }
 0x128 PF: > { %s13_s22 = sadd.s32 1, %s1262_s22   ;;  %s1635_s19 = sld [smem:[#allocation7_spill]] }
 0x129   : > { %p10_p6 = scmp.ge.s32.totalorder %s13_s22, 20   ;;  %s1636_s10 = sld [smem:[#allocation5_spill]] }
 0x12a   : > { %s1637_s30 = sld [smem:[#allocation6_spill]]  ;;  %s1638_s12 = smov %s1226_s13 }
 0x12b   : > { %s1639_s13 = smov %s1377_s9  ;;  %s1640_s14 = smov %s1234_s15 }
 0x12c   : > { %s1641_s15 = smov %s1374_s8  ;;  %s1642_s16 = smov %s1242_s17 }
 0x12d   : > { %s1644_s18 = smov %s1254_s20  ;;  %12 = sbr.rel (!%p10_p6) target bundleno = 6 (0x6), region = 185 }
 0x12e   : > { %s1643_s17 = smov %s1635_s19  ;;  %s1645_s19 = smov %s1258_s21 }
 0x12f   : > { %s1646_s20 = smov %s1636_s10 }
 0x130   : > { %s1647_s21 = smov %s1637_s30 }

// kernel: forward.35
= control target key start
LH: loop header
LB: loop body
LE: loop exit
PB: predicated region body
PF: predicated region fallthrough
CT: control target
= control target key end

     0   :  { %8 = vsyncpa [#allocation3], 0  ;;  %s1256_s0 = inlined_call_operand.vmem [shape: bf16[16,256], index: 0, kind: input, shape index: {}]   ;;  %s1257_s1 = inlined_call_operand.hbm [shape: bf16[256,512], index: 1, kind: input, shape index: {}]   ;;  %s1258_s2 = inlined_call_operand.vmem [shape: f32[1,512], index: 2, kind: input, shape index: {}]   ;;  %s1259_s3 = inlined_call_operand.vmem [shape: f32[16,512], index: 3, kind: output, shape index: {}]  }
   0x1   :  { %10 = vsyncpa [#allocation3 + $0x1], 0  ;;  %s1076_s12 = smov 0   ;;  %s1078_s13 = smov 0  }
   0x2   :  { %s1080_s14 = smov 0   ;;  %s1082_s15 = smov 0  }
   0x3   :  { %s1084_s16 = smov 0   ;;  %s1086_s17 = smov 0  }
   0x4 LB: > { %s723_s18 = sadd.s32 4294967295, %s1051_s17   ;;  %s31_s19 = sadd.s32 1, %s1047_s16  ;;  %s1051_s17 = sphi %s1086_s17, %s16_s17   ;;  %s1047_s16 = sphi %s1084_s16, %s1267_s16   ;;  %s1043_s15 = sphi %s1082_s15, %s1266_s15   ;;  %s1039_s14 = sphi %s1080_s14, %s1265_s14   ;;  %s1035_s13 = sphi %s1078_s13, %s1264_s13   ;;  %s1031_s12 = sphi %s1076_s12, %s1263_s12  }
   0x5   : > { %p33_p0 = scmp.ge.s32.totalorder %s31_s19, 2  ;;  %s72_s20 = sadd.s32 1, %s1039_s14 }
   0x6   : > { %p79_p1 = scmp.ne.s32.totalorder %s1039_s14, %s1035_s13  ;;  %p80_p2 = scmp.eq.s32.totalorder %s1051_s17, 0 }
   0x7   : > { %s1269_s19 = smov (%p33_p0, %s31_s19), 0  ;;  %p85_p4 = scmp.ne.s32.totalorder %s1035_s13, %s1031_s12 }
   0x8   : > { %p1112_p3 = por %p80_p2, %p79_p1  ;;  %s68_s22 = ssub.s32 %s1047_s16, %s1269_s19 }
   0x9   : > { %p86_p5 = scmp.eq.s32.totalorder %s723_s18, 0  ;;  %p70_p6 = scmp.eq.s32.totalorder %s68_s22, 0 }
   0xa   : > { %p137_p7 = scmp.eq.s32.totalorder %s723_s18, 1  ;;  %p918_p10 = scmp.lt.s32.totalorder %s1051_s17, 2 }
   0xb   : > { %p1119_p8 = por %p86_p5, %p85_p4  ;;  %s178_s26 = sand.u32 1, %s1039_s14  }
   0xc   : > { %s1124_s24 = scalar_select %p70_p6, %s1039_s14, %s72_s20  }
   0xd   : > { %p1126_p9 = por %p137_p7, %p79_p1  ;;  %s876_s27 = sshll.u32 %s1047_s16, 3 }
   0xe   : > { %s728_s28 = sshll.u32 %s178_s26, 8  ;;  %s190_s4 = scalar_lea.hbm %s1257_s1, %s876_s27 }
   0xf   : > { %s191_s5 = sshll.u32 %s190_s4, 4  ;;  %s182_s6 = scalar_lea.vmem [#allocation2], %s728_s28  ;;  %s192_s5 = int_to_ptr.hbm [resolvable:$true] %s191_s5 }
  0x10   : > { %s193_s7 = sshll.u32 %s182_s6, 4  ;;  %p915_p11 = pnand %p918_p10, %p1112_p3  ;;  %s194_s7 = int_to_ptr.vmem [resolvable:$true] %s193_s7 }
  0x11   : > { %p731_p12 = scmp.ge.s32.totalorder %s1051_s17, 1  ;;  %s179_s8 = scalar_lea.sflag [#allocation3], %s178_s26 }
  0x12   : > { %s1053_s9 = smov 256   ;;  %s1054_s10 = smov 128  }
  0x13   : > { %s1055_s11 = smov 8   ;;  %p209_p13 = scmp.lt.s32.totalorder %s1051_s17, 3 }
  0x14   : > { %917 = dma.hbm_to_vmem [thread:$0]  (!%p915_p11), %s192_s5, 4096, %s194_s7, %s179_s8, %s1053_s9, %s1054_s10, %s1055_s11  }
  0x15   : > { %p210_p0 = pnand %p731_p12, %p209_p13 }
  0x16   : > { %s1141_s12 = sand.u32 (!%p210_p0), 1, %s1035_s13  }
  0x17   : > { %213 = sbr.rel (%p210_p0) target bundleno = 219 (0xdb), region = 32  ;;  %s732_s18 = sshll.u32 (!%p210_p0), %s1141_s12, 8 }
  0x18   : > { %s216_s20 = scalar_lea.sflag (!%p210_p0), [#allocation3], %s1141_s12  ;;  %s1145_s22 = scalar_lea.vmem (!%p210_p0), [#allocation2], %s732_s18 }
  0x1c   : > { %1026 = dma.done.wait (%p1119_p8), %s216_s20, 4096  }
  0x1d   : > { %1028 = vsyncadd (%p1119_p8), %s216_s20, 4294963200  ;;  %v801_v0 = vld [vmem:[%s1145_s22 + $0x70] sm:$0xf]  ;;  %v894_v1 = vld [vmem:[%s1145_s22 + $0x74] sm:$0xf0]  ;;  %s734_s5 = sshll.u32 %s1043_s15, 1 }
  0x1e   : > { %v865_v2 = vld [vmem:[%s1145_s22 + $0xf0] sm:$0xf]  ;;  %v802_v3 = vor.u32 %v894_v1, %v801_v0  ;;  %v910_v4 = vld [vmem:[%s1145_s22 + $0xf4] sm:$0xf0]  ;;  %v893_v5 = vld [vmem:[%s1145_s22 + $0x74] sm:$0xf] }
  0x1f   : > { %v803_v6 = vld [vmem:[%s1145_s22 + $0x78] sm:$0xf0]  ;;  %v866_v7 = vor.u32 %v910_v4, %v865_v2  ;;  %v909_v9 = vld [vmem:[%s1145_s22 + $0xf4] sm:$0xf]  ;;  %v793_v11 = vld [vmem:[%s1145_s22 + $0x60] sm:$0xf] }
  0x20   : > { %v806_v8 = vor.u32 %v893_v5, %v803_v6  ;;  %v867_v10 = vld [vmem:[%s1145_s22 + $0xf8] sm:$0xf0]  ;;  %493 = vmatpush.bf16.msra.mxu0 %v802_v3  ;;  %v892_v13 = vld [vmem:[%s1145_s22 + $0x64] sm:$0xf0]  ;;  %v857_v14 = vld [vmem:[%s1145_s22 + $0xe0] sm:$0xf] }
  0x21   : > { %v870_v12 = vor.u32 %v909_v9, %v867_v10  ;;  %v908_v15 = vld [vmem:[%s1145_s22 + $0xe4] sm:$0xf0]  ;;  %507 = vmatpush.bf16.msra.mxu1 %v866_v7  ;;  %v794_v16 = vor.u32 %v892_v13, %v793_v11  ;;  %v891_v18 = vld [vmem:[%s1145_s22 + $0x64] sm:$0xf]  ;;  %v795_v19 = vld [vmem:[%s1145_s22 + $0x68] sm:$0xf0] }
  0x22   : > { %521 = vmatpush.bf16.msra.mxu2 %v806_v8  ;;  %v858_v17 = vor.u32 %v908_v15, %v857_v14  ;;  %v907_v20 = vld [vmem:[%s1145_s22 + $0xe4] sm:$0xf]  ;;  %v798_v21 = vor.u32 %v891_v18, %v795_v19  ;;  %v859_v22 = vld [vmem:[%s1145_s22 + $0xe8] sm:$0xf0]  ;;  %v785_v23 = vld [vmem:[%s1145_s22 + $0x50] sm:$0xf] }
  0x23   : > { %535 = vmatpush.bf16.msra.mxu3 %v870_v12  ;;  %v890_v24 = vld [vmem:[%s1145_s22 + $0x54] sm:$0xf0]  ;;  %v862_v25 = vor.u32 %v907_v20, %v859_v22  ;;  %v849_v26 = vld [vmem:[%s1145_s22 + $0xd0] sm:$0xf]  ;;  %v889_v28 = vld [vmem:[%s1145_s22 + $0x54] sm:$0xf] }
  0x24   : > { %v906_v27 = vld [vmem:[%s1145_s22 + $0xd4] sm:$0xf0]  ;;  %494 = vmatpush.bf16.msra.mxu0 %v794_v16  ;;  %v786_v29 = vor.u32 %v890_v24, %v785_v23  ;;  %v787_v30 = vld [vmem:[%s1145_s22 + $0x58] sm:$0xf0]  ;;  %v905_v31 = vld [vmem:[%s1145_s22 + $0xd4] sm:$0xf] }
  0x25   : > { %v851_v32 = vld [vmem:[%s1145_s22 + $0xd8] sm:$0xf0]  ;;  %508 = vmatpush.bf16.msra.mxu1 %v858_v17  ;;  %v850_v33 = vor.u32 %v906_v27, %v849_v26  ;;  %v790_v34 = vor.u32 %v889_v28, %v787_v30  ;;  %v777_v35 = vld [vmem:[%s1145_s22 + $0x40] sm:$0xf]  ;;  %v888_v36 = vld [vmem:[%s1145_s22 + $0x44] sm:$0xf0] }
  0x26   : > { %522 = vmatpush.bf16.msra.mxu2 %v798_v21  ;;  %v841_v37 = vld [vmem:[%s1145_s22 + $0xc0] sm:$0xf]  ;;  %v854_v38 = vor.u32 %v905_v31, %v851_v32  ;;  %v904_v39 = vld [vmem:[%s1145_s22 + $0xc4] sm:$0xf0]  ;;  %v887_v40 = vld [vmem:[%s1145_s22 + $0x44] sm:$0xf]  ;;  %v778_v44 = vor.u32 %v888_v36, %v777_v35 }
  0x27   : > { %536 = vmatpush.bf16.msra.mxu3 %v862_v25  ;;  %v779_v41 = vld [vmem:[%s1145_s22 + $0x48] sm:$0xf0]  ;;  %v903_v42 = vld [vmem:[%s1145_s22 + $0xc4] sm:$0xf]  ;;  %v842_v45 = vor.u32 %v904_v39, %v841_v37  ;;  %v769_v47 = vld [vmem:[%s1145_s22 + $0x30] sm:$0xf] }
  0x28   : > { %v843_v43 = vld [vmem:[%s1145_s22 + $0xc8] sm:$0xf0]  ;;  %495 = vmatpush.bf16.msra.mxu0 %v786_v29  ;;  %v782_v46 = vor.u32 %v887_v40, %v779_v41  ;;  %v886_v48 = vld [vmem:[%s1145_s22 + $0x34] sm:$0xf0]  ;;  %v833_v49 = vld [vmem:[%s1145_s22 + $0xb0] sm:$0xf] }
  0x29   : > { %509 = vmatpush.bf16.msra.mxu1 %v850_v33  ;;  %v846_v50 = vor.u32 %v903_v42, %v843_v43  ;;  %v902_v51 = vld [vmem:[%s1145_s22 + $0xb4] sm:$0xf0]  ;;  %v885_v52 = vld [vmem:[%s1145_s22 + $0x34] sm:$0xf]  ;;  %v771_v53 = vld [vmem:[%s1145_s22 + $0x38] sm:$0xf0]  ;;  %v770_v56 = vor.u32 %v886_v48, %v769_v47 }
  0x2a   : > { %523 = vmatpush.bf16.msra.mxu2 %v790_v34  ;;  %v901_v54 = vld [vmem:[%s1145_s22 + $0xb4] sm:$0xf]  ;;  %v835_v55 = vld [vmem:[%s1145_s22 + $0xb8] sm:$0xf0]  ;;  %v834_v57 = vor.u32 %v902_v51, %v833_v49  ;;  %v774_v58 = vor.u32 %v885_v52, %v771_v53  ;;  %v761_v59 = vld [vmem:[%s1145_s22 + $0x20] sm:$0xf] }
  0x2b   : > { %537 = vmatpush.bf16.msra.mxu3 %v854_v38  ;;  %v884_v60 = vld [vmem:[%s1145_s22 + $0x24] sm:$0xf0]  ;;  %v825_v61 = vld [vmem:[%s1145_s22 + $0xa0] sm:$0xf]  ;;  %v838_v62 = vor.u32 %v901_v54, %v835_v55  ;;  %v883_v0 = vld [vmem:[%s1145_s22 + $0x24] sm:$0xf] }
  0x2c   : > { %496 = vmatpush.bf16.msra.mxu0 %v778_v44  ;;  %v900_v63 = vld [vmem:[%s1145_s22 + $0xa4] sm:$0xf0]  ;;  %v763_v1 = vld [vmem:[%s1145_s22 + $0x28] sm:$0xf0]  ;;  %v899_v2 = vld [vmem:[%s1145_s22 + $0xa4] sm:$0xf]  ;;  %v762_v4 = vor.u32 %v884_v60, %v761_v59 }
  0x2d   : > { %510 = vmatpush.bf16.msra.mxu1 %v842_v45  ;;  %v827_v3 = vld [vmem:[%s1145_s22 + $0xa8] sm:$0xf0]  ;;  %v826_v5 = vor.u32 %v900_v63, %v825_v61  ;;  %v766_v6 = vor.u32 %v883_v0, %v763_v1  ;;  %v753_v7 = vld [vmem:[%s1145_s22 + $0x10] sm:$0xf]  ;;  %v882_v8 = vld [vmem:[%s1145_s22 + $0x14] sm:$0xf0] }
  0x2e   : > { %524 = vmatpush.bf16.msra.mxu2 %v782_v46  ;;  %v817_v9 = vld [vmem:[%s1145_s22 + $0x90] sm:$0xf]  ;;  %v830_v10 = vor.u32 %v899_v2, %v827_v3  ;;  %v898_v11 = vld [vmem:[%s1145_s22 + $0x94] sm:$0xf0]  ;;  %v881_v12 = vld [vmem:[%s1145_s22 + $0x14] sm:$0xf]  ;;  %v754_v16 = vor.u32 %v882_v8, %v753_v7 }
  0x2f   : > { %538 = vmatpush.bf16.msra.mxu3 %v846_v50  ;;  %v755_v13 = vld [vmem:[%s1145_s22 + $0x18] sm:$0xf0]  ;;  %v897_v14 = vld [vmem:[%s1145_s22 + $0x94] sm:$0xf]  ;;  %v818_v17 = vor.u32 %v898_v11, %v817_v9  ;;  %v745_v19 = vld [vmem:[%s1145_s22] sm:$0xf] }
  0x30   : > { %497 = vmatpush.bf16.msra.mxu0 %v770_v56  ;;  %v819_v15 = vld [vmem:[%s1145_s22 + $0x98] sm:$0xf0]  ;;  %v758_v18 = vor.u32 %v881_v12, %v755_v13  ;;  %v880_v20 = vld [vmem:[%s1145_s22 + $0x4] sm:$0xf0]  ;;  %v809_v21 = vld [vmem:[%s1145_s22 + $0x80] sm:$0xf] }
  0x31   : > { %511 = vmatpush.bf16.msra.mxu1 %v834_v57  ;;  %v822_v22 = vor.u32 %v897_v14, %v819_v15  ;;  %v896_v23 = vld [vmem:[%s1145_s22 + $0x84] sm:$0xf0]  ;;  %v879_v24 = vld [vmem:[%s1145_s22 + $0x4] sm:$0xf]  ;;  %v747_v25 = vld [vmem:[%s1145_s22 + $0x8] sm:$0xf0]  ;;  %v746_v28 = vor.u32 %v880_v20, %v745_v19 }
  0x32   : > { %525 = vmatpush.bf16.msra.mxu2 %v774_v58  ;;  %v895_v26 = vld [vmem:[%s1145_s22 + $0x84] sm:$0xf]  ;;  %v811_v27 = vld [vmem:[%s1145_s22 + $0x88] sm:$0xf0]  ;;  %v737_v29 = vld [vmem:[%s1256_s0] sm:$0xf]  ;;  %v810_v31 = vor.u32 %v896_v23, %v809_v21  ;;  %v750_v32 = vor.u32 %v879_v24, %v747_v25 }
  0x33   : > { %539 = vmatpush.bf16.msra.mxu3 %v838_v62  ;;  %v878_v30 = vld [vmem:[%s1256_s0 + $0x4] sm:$0xf0]  ;;  %v877_v33 = vld [vmem:[%s1256_s0 + $0x4] sm:$0xf]  ;;  %v739_v34 = vld [vmem:[%s1256_s0 + $0x8] sm:$0xf0]  ;;  %v814_v35 = vor.u32 %v895_v26, %v811_v27 }
  0x34   : > { %498 = vmatpush.bf16.msra.mxu0 %v762_v4  ;;  %v738_v36 = vor.u32 %v878_v30, %v737_v29  ;;  %v742_v37 = vor.u32 %v877_v33, %v739_v34  ;;  %p271_p1 = scmp.lt.s32.totalorder %s734_s5, 3  ;;  %s733_s9 = sshll.u32 %s1141_s12, 5 }
  0x35   : > { %512 = vmatpush.bf16.msra.mxu1 %v826_v5  ;;  %s255_s10 = scalar_lea.vmem [#allocation4], %s733_s9  ;;  %s911_s11 = sshll.u32 (%p1126_p9), %s1043_s15, 4 }
  0x36   : > { %526 = vmatpush.bf16.msra.mxu2 %v766_v6  ;;  %s1271_s5 = smov (!%p271_p1, %s734_s5), 3  ;;  %s590_s20 = scalar_lea.vmem (%p1126_p9), %s1259_s3, %s911_s11 }
  0x37   : > { %540 = vmatpush.bf16.msra.mxu3 %v830_v10  ;;  %s273_s8 = scalar_lea.vmem %s1258_s2, %s1271_s5 }
  0x38   : > { %499 = vmatpush.bf16.msra.mxu0 %v754_v16  ;;  %v564_v38 = vld [vmem:[%s273_s8] sm:$0x3] }
  0x39   : > { %513 = vmatpush.bf16.msra.mxu1 %v818_v17  ;;  %v566_v42 = vperm.slane %v564_v38, 0  ;;  %v567_v48 = vperm.slane %v564_v38, 1 }
  0x3a   : > { %527 = vmatpush.bf16.msra.mxu2 %v758_v18 }
  0x3b   : > { %541 = vmatpush.bf16.msra.mxu3 %v822_v22 }
  0x3c   : > { %500 = vmatpush.bf16.msra.mxu0 %v746_v28 }
  0x3d   : > { %514 = vmatpush.bf16.msra.mxu1 %v810_v31 }
  0x3e   : > { %528 = vmatpush.bf16.msra.mxu2 %v750_v32 }
  0x3f   : > { %542 = vmatpush.bf16.msra.mxu3 %v814_v35  ;;  %501 = vmatmul.bf16.vlgmr.msra.gmra.mxu0 %v738_v36 }
  0x40   : > { %515 = vmatmul.bf16.vlgmr.msra.gmra.mxu1 %v742_v37 }
  0x41   : > { %529 = vmatmul.bf16.vlgmr.msra.gmra.mxu2 %v738_v36 }
  0x42   : > { %543 = vmatmul.bf16.vlgmr.msra.gmra.mxu3 %v742_v37 }
  0xbc   : > { %v502_v39 = vpop.f32.mrf.mxu0 }
  0xbd   : > { %v516_v40 = vpop.f32.mrf.mxu1 }
  0xbe   : > { %v517_v41 = vadd.f32 %v516_v40, %v502_v39 }
  0xc0   : > { %v570_v43 = vadd.f32 %v566_v42, %v517_v41 }
  0xc2   : > { %574 = vst [vmem:[%s255_s10] sm:$0xff] %v570_v43 }
  0xc4   : > { %v530_v44 = vpop.f32.mrf.mxu2  ;;  %v504_v46 = vpop.f32.mrf.mxu0 }
  0xc5   : > { %v544_v45 = vpop.f32.mrf.mxu3  ;;  %v518_v49 = vpop.f32.mrf.mxu1 }
  0xc6   : > { %v545_v47 = vadd.f32 %v544_v45, %v530_v44  ;;  %v519_v50 = vadd.f32 %v518_v49, %v504_v46 }
  0xc8   : > { %v571_v51 = vadd.f32 %v567_v48, %v545_v47  ;;  %v572_v52 = vadd.f32 %v566_v42, %v519_v50 }
  0xc9   : > { %v603_v57 = vld [vmem:[%s255_s10] sm:$0xff] (%p1126_p9) }
  0xca   : > { %575 = vst [vmem:[%s255_s10 + $0x8] sm:$0xff] %v571_v51 }
  0xcb   : > { %576 = vst [vmem:[%s255_s10 + $0x10] sm:$0xff] %v572_v52 }
  0xcc   : > { %v532_v53 = vpop.f32.mrf.mxu2  ;;  %604 = vst [vmem:[%s590_s20] sm:$0xff] (%p1126_p9), %v603_v57 }
  0xcd   : > { %v546_v54 = vpop.f32.mrf.mxu3 }
  0xce   : > { %v547_v55 = vadd.f32 %v546_v54, %v532_v53  ;;  %584 = sbr.rel (!%p1126_p9) target bundleno = 219 (0xdb), region = 48 }
  0xd0   : > { %v573_v56 = vadd.f32 %v567_v48, %v547_v55 }
  0xd1   : > { %v605_v58 = vld [vmem:[%s255_s10 + $0x8] sm:$0xff] (%p1126_p9) }
  0xd2   : > { %577 = vst [vmem:[%s255_s10 + $0x18] sm:$0xff] %v573_v56  ;;  %v607_v59 = vld [vmem:[%s255_s10 + $0x10] sm:$0xff] (%p1126_p9) }
  0xd3   : > { %606 = vst [vmem:[%s590_s20 + $0x8] sm:$0xff] %v605_v58 }
  0xd4   : > { %608 = vst [vmem:[%s590_s20 + $0x20] sm:$0xff] %v607_v59 }
  0xd9   : > { %v609_v60 = vld [vmem:[%s255_s10 + $0x18] sm:$0xff] }
  0xda   : > { %610 = vst [vmem:[%s590_s20 + $0x28] sm:$0xff] %v609_v60 }
  0xdb PF: > { %s16_s17 = sadd.s32 1, %s1051_s17   ;;  %s1263_s12 = smov %s1035_s13 }
  0xdc   : > { %p13_p2 = scmp.ge.s32.totalorder %s16_s17, 4   ;;  %s1264_s13 = smov %s1039_s14 }
  0xdd   : > { %s1265_s14 = smov %s1124_s24  ;;  %s1266_s15 = smov %s1047_s16 }
  0xde   : > { %s1267_s16 = smov %s1269_s19  ;;  %15 = sbr.rel (!%p13_p2) target bundleno = 4 (0x4), region = 109 }
  0xe3   :  { %626 = vsyncpa [#allocation3], 1 }
  0xe4   :  { %628 = vsyncpa [#allocation3 + $0x1], 1 }

// kernel: forward.37
= control target key start
LH: loop header
LB: loop body
LE: loop exit
PB: predicated region body
PF: predicated region fallthrough
CT: control target
= control target key end

     0   :  { %s2457_s0 = inlined_call_operand.vmem [shape: bf16[16,4608], index: 0, kind: input, shape index: {}]   ;;  %s2458_s1 = inlined_call_operand.vmem [shape: bf16[4608,512], index: 1, kind: input, shape index: {}]   ;;  %s2459_s2 = inlined_call_operand.vmem [shape: f32[1,512], index: 2, kind: input, shape index: {}]   ;;  %s2460_s3 = inlined_call_operand.vmem [shape: f32[16,512], index: 3, kind: input, shape index: {}]   ;;  %s2461_s4 = inlined_call_operand.vmem [shape: f32[16,512], index: 4, kind: output, shape index: {}]  }
   0x1   :  { %2464 = sst [smem:[#allocation8_spill]] %s2457_s0 }
   0x2   :  { %2465 = sst [smem:[#allocation9_spill]] %s2458_s1 }
   0x3   :  { %s1948_s15 = smov 0   ;;  %s1950_s16 = smov 0  }
   0x4   :  { %s1952_s17 = smov 0   ;;  %s1954_s18 = smov 0  }
   0x5   :  { %s1956_s19 = smov 0   ;;  %s1958_s20 = smov 0  }
   0x6   :  { %s1960_s21 = smov 0   ;;  %s1962_s22 = smov 0  }
   0x7   :  { %s1964_s23 = smov 0   ;;  %s1966_s24 = smov 0  }
   0x8   :  { %s1968_s25 = smov 0  }
   0x9 LB: > { %s1373_s26 = sadd.s32 4294967295, %s1920_s25   ;;  %s26_s27 = sadd.s32 1, %s1912_s23  ;;  %s1920_s25 = sphi %s1968_s25, %s14_s25   ;;  %s1916_s24 = sphi %s1966_s24, %s2485_s24   ;;  %s1912_s23 = sphi %s1964_s23, %s2484_s23   ;;  %s1908_s22 = sphi %s1962_s22, %s2483_s22   ;;  %s1904_s21 = sphi %s1960_s21, %s2482_s21   ;;  %s1900_s20 = sphi %s1958_s20, %s2481_s20   ;;  %s1896_s19 = sphi %s1956_s19, %s2480_s19   ;;  %s1892_s18 = sphi %s1954_s18, %s2479_s18   ;;  %s1888_s17 = sphi %s1952_s17, %s2478_s17   ;;  %s1884_s16 = sphi %s1950_s16, %s2477_s16   ;;  %s1880_s15 = sphi %s1948_s15, %s2476_s15  }
   0xa   : > { %p27_p0 = scmp.ge.s32.totalorder %s26_s27, 9  ;;  %s29_s28 = sadd.s32 1, %s1916_s24 }
   0xb   : > { %s42_s29 = sadd.s32 1, %s1900_s20  ;;  %p49_p1 = scmp.ne.s32.totalorder %s1900_s20, %s1896_s19 }
   0xc   : > { %s2487_s27 = smov (%p27_p0, %s26_s27), 0  ;;  %s2489_s28 = smov (!%p27_p0, %s29_s28), %s1916_s24 }
   0xd   : > { %2466 = sst [smem:[#allocation6_spill]] %s2487_s27  ;;  %s38_s30 = ssub.s32 %s1912_s23, %s2487_s27 }
   0xe   : > { %p50_p2 = scmp.eq.s32.totalorder %s1920_s25, 0  ;;  %p31_p3 = scmp.ge.s32.totalorder %s2489_s28, 2 }
   0xf   : > { %p40_p4 = scmp.eq.s32.totalorder %s38_s30, 0  ;;  %s70_s6 = sadd.s32 1, %s1892_s18 }
  0x10   : > { %p2017_p5 = por %p50_p2, %p49_p1  ;;  %s2491_s28 = smov (%p31_p3, %s2489_s28), 0 }
  0x11   : > { %2468 = sst [smem:[#allocation7_spill]] %s2491_s28  ;;  %s66_s8 = ssub.s32 %s1916_s24, %s2491_s28 }
  0x12   : > { %s2025_s7 = scalar_select %p40_p4, %s1900_s20, %s42_s29  }
  0x13   : > { %p77_p6 = scmp.ne.s32.totalorder %s1892_s18, %s1888_s17  ;;  %s67_s9 = sor.u32 %s66_s8, %s38_s30 }
  0x14   : > { %p122_p7 = scmp.eq.s32.totalorder %s66_s8, 0  ;;  %p68_p8 = scmp.eq.s32.totalorder %s67_s9, 0 }
  0x15   : > { %p2033_p9 = por %p77_p6, %p50_p2  ;;  %s124_s11 = sadd.s32 1, %s1884_s16 }
  0x16   : > { %p131_p10 = scmp.ne.s32.totalorder %s1884_s16, %s1880_s15  ;;  %p163_p12 = scmp.eq.s32.totalorder %s1373_s26, 17 }
  0x17   : > { %s2041_s12 = scalar_select %p68_p8, %s1892_s18, %s70_s6  }
  0x18   : > { %s2044_s13 = scalar_select %p122_p7, %s1884_s16, %s124_s11  }
  0x19   : > { %p2048_p11 = por %p131_p10, %p50_p2  ;;  %p2052_p13 = por %p163_p12, %p131_p10 }
  0x1a   : > { %p1376_p0 = scmp.ge.s32.totalorder %s1920_s25, 18 }
  0x1c   : > { %185 = sbr.rel (%p1376_p0) target bundleno = 129 (0x81), region = 16 }
  0x21   : > { %188 = sbr.rel (!%p2017_p5) target bundleno = 47 (0x2f), region = 20  ;;  %s190_s30 = sand.u32 (%p2017_p5), 1, %s1900_s20  }
  0x22   : > { %s1673_s6 = sshll.u32 (%p2017_p5), %s1912_s23, 4  ;;  %s1377_s8 = sshll.u32 (%p2017_p5), %s190_s30, 5 }
  0x23   : > { %s2472_s0 = sld [smem:[#allocation8_spill]] (%p2017_p5)  ;;  %s192_s26 = scalar_lea.vmem (%p2017_p5), [#allocation2], %s1377_s8 }
  0x29   : > { %s198_s28 = scalar_lea.vmem %s2472_s0, %s1673_s6 }
  0x2a   : > { %v211_v0 = vld [vmem:[%s198_s28] sm:$0xff]  ;;  %v213_v1 = vld [vmem:[%s198_s28 + $0x8] sm:$0xff]  ;;  %v215_v2 = vld [vmem:[%s198_s28 + $0x90] sm:$0xff] }
  0x2b   : > { %212 = vst [vmem:[%s192_s26] sm:$0xff] %v211_v0  ;;  %v217_v3 = vld [vmem:[%s198_s28 + $0x98] sm:$0xff] }
  0x2c   : > { %214 = vst [vmem:[%s192_s26 + $0x8] sm:$0xff] %v213_v1 }
  0x2d   : > { %216 = vst [vmem:[%s192_s26 + $0x10] sm:$0xff] %v215_v2 }
  0x2e   : > { %218 = vst [vmem:[%s192_s26 + $0x18] sm:$0xff] %v217_v3 }
  0x2f PF: > { %224 = sbr.rel (!%p2033_p9) target bundleno = 121 (0x79), region = 43  ;;  %s226_s5 = sand.u32 (%p2033_p9), 1, %s1892_s18  }
  0x30   : > { %s1382_s30 = sshll.u32 (%p2033_p9), %s1916_s24, 1  ;;  %s1380_s9 = sshll.u32 (%p2033_p9), %s226_s5, 9 }
  0x31   : > { %s1674_s6 = sshll.u32 (%p2033_p9), %s1912_s23, 8  ;;  %s2473_s1 = sld [smem:[#allocation9_spill]] (%p2033_p9) }
  0x32   : > { %s232_s11 = sadd.s32 (%p2033_p9), %s1674_s6, %s1382_s30  ;;  %s2077_s10 = scalar_lea.vmem (%p2033_p9), [#allocation3], %s1380_s9 }
  0x33   : > { %s1384_s0 = sshll.u32 (%p2033_p9), %s232_s11, 2 }
  0x37   : > { %s2072_s28 = scalar_lea.vmem %s2473_s1, %s1384_s0 }
  0x38   : > { %v389_v4 = vld [vmem:[%s2072_s28] sm:$0xff]  ;;  %v391_v5 = vld [vmem:[%s2072_s28 + $0x10] sm:$0xff] }
  0x39   : > { %v393_v6 = vld [vmem:[%s2072_s28 + $0x20] sm:$0xff]  ;;  %390 = vst [vmem:[%s2077_s10] sm:$0xff] %v389_v4  ;;  %v395_v7 = vld [vmem:[%s2072_s28 + $0x30] sm:$0xff] }
  0x3a   : > { %392 = vst [vmem:[%s2077_s10 + $0x8] sm:$0xff] %v391_v5  ;;  %v397_v8 = vld [vmem:[%s2072_s28 + $0x40] sm:$0xff]  ;;  %v399_v9 = vld [vmem:[%s2072_s28 + $0x50] sm:$0xff] }
  0x3b   : > { %394 = vst [vmem:[%s2077_s10 + $0x10] sm:$0xff] %v393_v6  ;;  %v401_v10 = vld [vmem:[%s2072_s28 + $0x60] sm:$0xff]  ;;  %v403_v11 = vld [vmem:[%s2072_s28 + $0x70] sm:$0xff] }
  0x3c   : > { %396 = vst [vmem:[%s2077_s10 + $0x18] sm:$0xff] %v395_v7  ;;  %v405_v12 = vld [vmem:[%s2072_s28 + $0x80] sm:$0xff]  ;;  %v407_v13 = vld [vmem:[%s2072_s28 + $0x90] sm:$0xff] }
  0x3d   : > { %398 = vst [vmem:[%s2077_s10 + $0x20] sm:$0xff] %v397_v8  ;;  %v409_v14 = vld [vmem:[%s2072_s28 + $0xa0] sm:$0xff]  ;;  %v411_v15 = vld [vmem:[%s2072_s28 + $0xb0] sm:$0xff] }
  0x3e   : > { %400 = vst [vmem:[%s2077_s10 + $0x28] sm:$0xff] %v399_v9  ;;  %v413_v16 = vld [vmem:[%s2072_s28 + $0xc0] sm:$0xff]  ;;  %v415_v17 = vld [vmem:[%s2072_s28 + $0xd0] sm:$0xff] }
  0x3f   : > { %402 = vst [vmem:[%s2077_s10 + $0x30] sm:$0xff] %v401_v10  ;;  %v417_v18 = vld [vmem:[%s2072_s28 + $0xe0] sm:$0xff]  ;;  %v419_v19 = vld [vmem:[%s2072_s28 + $0xf0] sm:$0xff] }
  0x40   : > { %404 = vst [vmem:[%s2077_s10 + $0x38] sm:$0xff] %v403_v11  ;;  %v421_v20 = vld [vmem:[%s2072_s28 + $0x100] sm:$0xff]  ;;  %v423_v21 = vld [vmem:[%s2072_s28 + $0x110] sm:$0xff] }
  0x41   : > { %406 = vst [vmem:[%s2077_s10 + $0x40] sm:$0xff] %v405_v12  ;;  %v425_v22 = vld [vmem:[%s2072_s28 + $0x120] sm:$0xff]  ;;  %v427_v23 = vld [vmem:[%s2072_s28 + $0x130] sm:$0xff] }
  0x42   : > { %408 = vst [vmem:[%s2077_s10 + $0x48] sm:$0xff] %v407_v13  ;;  %v429_v24 = vld [vmem:[%s2072_s28 + $0x140] sm:$0xff]  ;;  %v431_v25 = vld [vmem:[%s2072_s28 + $0x150] sm:$0xff] }
  0x43   : > { %410 = vst [vmem:[%s2077_s10 + $0x50] sm:$0xff] %v409_v14  ;;  %v433_v26 = vld [vmem:[%s2072_s28 + $0x160] sm:$0xff]  ;;  %v435_v27 = vld [vmem:[%s2072_s28 + $0x170] sm:$0xff] }
  0x44   : > { %412 = vst [vmem:[%s2077_s10 + $0x58] sm:$0xff] %v411_v15  ;;  %v437_v28 = vld [vmem:[%s2072_s28 + $0x180] sm:$0xff]  ;;  %v439_v29 = vld [vmem:[%s2072_s28 + $0x190] sm:$0xff] }
  0x45   : > { %414 = vst [vmem:[%s2077_s10 + $0x60] sm:$0xff] %v413_v16  ;;  %v441_v30 = vld [vmem:[%s2072_s28 + $0x1a0] sm:$0xff]  ;;  %v443_v31 = vld [vmem:[%s2072_s28 + $0x1b0] sm:$0xff] }
  0x46   : > { %416 = vst [vmem:[%s2077_s10 + $0x68] sm:$0xff] %v415_v17  ;;  %v445_v32 = vld [vmem:[%s2072_s28 + $0x1c0] sm:$0xff]  ;;  %v447_v33 = vld [vmem:[%s2072_s28 + $0x1d0] sm:$0xff] }
  0x47   : > { %418 = vst [vmem:[%s2077_s10 + $0x70] sm:$0xff] %v417_v18  ;;  %v449_v34 = vld [vmem:[%s2072_s28 + $0x1e0] sm:$0xff]  ;;  %v451_v35 = vld [vmem:[%s2072_s28 + $0x1f0] sm:$0xff] }
  0x48   : > { %420 = vst [vmem:[%s2077_s10 + $0x78] sm:$0xff] %v419_v19  ;;  %v453_v36 = vld [vmem:[%s2072_s28 + $0x200] sm:$0xff]  ;;  %v455_v37 = vld [vmem:[%s2072_s28 + $0x210] sm:$0xff] }
  0x49   : > { %422 = vst [vmem:[%s2077_s10 + $0x80] sm:$0xff] %v421_v20  ;;  %v457_v38 = vld [vmem:[%s2072_s28 + $0x220] sm:$0xff]  ;;  %v459_v39 = vld [vmem:[%s2072_s28 + $0x230] sm:$0xff] }
  0x4a   : > { %424 = vst [vmem:[%s2077_s10 + $0x88] sm:$0xff] %v423_v21  ;;  %v461_v40 = vld [vmem:[%s2072_s28 + $0x240] sm:$0xff]  ;;  %v463_v41 = vld [vmem:[%s2072_s28 + $0x250] sm:$0xff] }
  0x4b   : > { %426 = vst [vmem:[%s2077_s10 + $0x90] sm:$0xff] %v425_v22  ;;  %v465_v42 = vld [vmem:[%s2072_s28 + $0x260] sm:$0xff]  ;;  %v467_v43 = vld [vmem:[%s2072_s28 + $0x270] sm:$0xff] }
  0x4c   : > { %428 = vst [vmem:[%s2077_s10 + $0x98] sm:$0xff] %v427_v23  ;;  %v469_v44 = vld [vmem:[%s2072_s28 + $0x280] sm:$0xff]  ;;  %v471_v45 = vld [vmem:[%s2072_s28 + $0x290] sm:$0xff] }
  0x4d   : > { %430 = vst [vmem:[%s2077_s10 + $0xa0] sm:$0xff] %v429_v24  ;;  %v473_v46 = vld [vmem:[%s2072_s28 + $0x2a0] sm:$0xff]  ;;  %v475_v47 = vld [vmem:[%s2072_s28 + $0x2b0] sm:$0xff] }
  0x4e   : > { %432 = vst [vmem:[%s2077_s10 + $0xa8] sm:$0xff] %v431_v25  ;;  %v477_v48 = vld [vmem:[%s2072_s28 + $0x2c0] sm:$0xff]  ;;  %v479_v49 = vld [vmem:[%s2072_s28 + $0x2d0] sm:$0xff] }
  0x4f   : > { %434 = vst [vmem:[%s2077_s10 + $0xb0] sm:$0xff] %v433_v26  ;;  %v481_v50 = vld [vmem:[%s2072_s28 + $0x2e0] sm:$0xff]  ;;  %v483_v51 = vld [vmem:[%s2072_s28 + $0x2f0] sm:$0xff] }
  0x50   : > { %436 = vst [vmem:[%s2077_s10 + $0xb8] sm:$0xff] %v435_v27  ;;  %v485_v52 = vld [vmem:[%s2072_s28 + $0x300] sm:$0xff]  ;;  %v487_v53 = vld [vmem:[%s2072_s28 + $0x310] sm:$0xff] }
  0x51   : > { %438 = vst [vmem:[%s2077_s10 + $0xc0] sm:$0xff] %v437_v28  ;;  %v489_v54 = vld [vmem:[%s2072_s28 + $0x320] sm:$0xff]  ;;  %v491_v55 = vld [vmem:[%s2072_s28 + $0x330] sm:$0xff] }
  0x52   : > { %440 = vst [vmem:[%s2077_s10 + $0xc8] sm:$0xff] %v439_v29  ;;  %v493_v56 = vld [vmem:[%s2072_s28 + $0x340] sm:$0xff]  ;;  %v495_v57 = vld [vmem:[%s2072_s28 + $0x350] sm:$0xff] }
  0x53   : > { %442 = vst [vmem:[%s2077_s10 + $0xd0] sm:$0xff] %v441_v30  ;;  %v497_v58 = vld [vmem:[%s2072_s28 + $0x360] sm:$0xff]  ;;  %v499_v59 = vld [vmem:[%s2072_s28 + $0x370] sm:$0xff] }
  0x54   : > { %444 = vst [vmem:[%s2077_s10 + $0xd8] sm:$0xff] %v443_v31  ;;  %v501_v60 = vld [vmem:[%s2072_s28 + $0x380] sm:$0xff]  ;;  %v503_v61 = vld [vmem:[%s2072_s28 + $0x390] sm:$0xff] }
  0x55   : > { %446 = vst [vmem:[%s2077_s10 + $0xe0] sm:$0xff] %v445_v32  ;;  %v505_v62 = vld [vmem:[%s2072_s28 + $0x3a0] sm:$0xff]  ;;  %v507_v63 = vld [vmem:[%s2072_s28 + $0x3b0] sm:$0xff] }
  0x56   : > { %448 = vst [vmem:[%s2077_s10 + $0xe8] sm:$0xff] %v447_v33  ;;  %v509_v0 = vld [vmem:[%s2072_s28 + $0x3c0] sm:$0xff]  ;;  %v511_v1 = vld [vmem:[%s2072_s28 + $0x3d0] sm:$0xff] }
  0x57   : > { %450 = vst [vmem:[%s2077_s10 + $0xf0] sm:$0xff] %v449_v34  ;;  %v513_v2 = vld [vmem:[%s2072_s28 + $0x3e0] sm:$0xff]  ;;  %v515_v3 = vld [vmem:[%s2072_s28 + $0x3f0] sm:$0xff] }
  0x58   : > { %452 = vst [vmem:[%s2077_s10 + $0xf8] sm:$0xff] %v451_v35 }
  0x59   : > { %454 = vst [vmem:[%s2077_s10 + $0x100] sm:$0xff] %v453_v36 }
  0x5a   : > { %456 = vst [vmem:[%s2077_s10 + $0x108] sm:$0xff] %v455_v37 }
  0x5b   : > { %458 = vst [vmem:[%s2077_s10 + $0x110] sm:$0xff] %v457_v38 }
  0x5c   : > { %460 = vst [vmem:[%s2077_s10 + $0x118] sm:$0xff] %v459_v39 }
  0x5d   : > { %462 = vst [vmem:[%s2077_s10 + $0x120] sm:$0xff] %v461_v40 }
  0x5e   : > { %464 = vst [vmem:[%s2077_s10 + $0x128] sm:$0xff] %v463_v41 }
  0x5f   : > { %466 = vst [vmem:[%s2077_s10 + $0x130] sm:$0xff] %v465_v42 }
  0x60   : > { %468 = vst [vmem:[%s2077_s10 + $0x138] sm:$0xff] %v467_v43 }
  0x61   : > { %470 = vst [vmem:[%s2077_s10 + $0x140] sm:$0xff] %v469_v44 }
  0x62   : > { %472 = vst [vmem:[%s2077_s10 + $0x148] sm:$0xff] %v471_v45 }
  0x63   : > { %474 = vst [vmem:[%s2077_s10 + $0x150] sm:$0xff] %v473_v46 }
  0x64   : > { %476 = vst [vmem:[%s2077_s10 + $0x158] sm:$0xff] %v475_v47 }
  0x65   : > { %478 = vst [vmem:[%s2077_s10 + $0x160] sm:$0xff] %v477_v48 }
  0x66   : > { %480 = vst [vmem:[%s2077_s10 + $0x168] sm:$0xff] %v479_v49 }
  0x67   : > { %482 = vst [vmem:[%s2077_s10 + $0x170] sm:$0xff] %v481_v50 }
  0x68   : > { %484 = vst [vmem:[%s2077_s10 + $0x178] sm:$0xff] %v483_v51 }
  0x69   : > { %486 = vst [vmem:[%s2077_s10 + $0x180] sm:$0xff] %v485_v52 }
  0x6a   : > { %488 = vst [vmem:[%s2077_s10 + $0x188] sm:$0xff] %v487_v53 }
  0x6b   : > { %490 = vst [vmem:[%s2077_s10 + $0x190] sm:$0xff] %v489_v54 }
  0x6c   : > { %492 = vst [vmem:[%s2077_s10 + $0x198] sm:$0xff] %v491_v55 }
  0x6d   : > { %494 = vst [vmem:[%s2077_s10 + $0x1a0] sm:$0xff] %v493_v56 }
  0x6e   : > { %496 = vst [vmem:[%s2077_s10 + $0x1a8] sm:$0xff] %v495_v57 }
  0x6f   : > { %498 = vst [vmem:[%s2077_s10 + $0x1b0] sm:$0xff] %v497_v58 }
  0x70   : > { %500 = vst [vmem:[%s2077_s10 + $0x1b8] sm:$0xff] %v499_v59 }
  0x71   : > { %502 = vst [vmem:[%s2077_s10 + $0x1c0] sm:$0xff] %v501_v60 }
  0x72   : > { %504 = vst [vmem:[%s2077_s10 + $0x1c8] sm:$0xff] %v503_v61 }
  0x73   : > { %506 = vst [vmem:[%s2077_s10 + $0x1d0] sm:$0xff] %v505_v62 }
  0x74   : > { %508 = vst [vmem:[%s2077_s10 + $0x1d8] sm:$0xff] %v507_v63 }
  0x75   : > { %510 = vst [vmem:[%s2077_s10 + $0x1e0] sm:$0xff] %v509_v0 }
  0x76   : > { %512 = vst [vmem:[%s2077_s10 + $0x1e8] sm:$0xff] %v511_v1 }
  0x77   : > { %514 = vst [vmem:[%s2077_s10 + $0x1f0] sm:$0xff] %v513_v2 }
  0x78   : > { %516 = vst [vmem:[%s2077_s10 + $0x1f8] sm:$0xff] %v515_v3 }
  0x79 PF: > { %530 = sbr.rel (!%p2048_p11) target bundleno = 129 (0x81), region = 85  ;;  %s532_s0 = sand.u32 (%p2048_p11), 1, %s1884_s16  }
  0x7a   : > { %s1675_s27 = sshll.u32 (%p2048_p11), %s1916_s24, 4  ;;  %s1385_s26 = sshll.u32 (%p2048_p11), %s532_s0, 5 }
  0x7b   : > { %s540_s9 = scalar_lea.vmem (%p2048_p11), %s2460_s3, %s1675_s27  ;;  %s534_s6 = scalar_lea.vmem (%p2048_p11), [#allocation4], %s1385_s26 }
  0x7c   : > { %v553_v4 = vld [vmem:[%s540_s9] sm:$0xff] (%p2048_p11)  ;;  %v555_v5 = vld [vmem:[%s540_s9 + $0x8] sm:$0xff] (%p2048_p11) }
  0x7d   : > { %v557_v6 = vld [vmem:[%s540_s9 + $0x20] sm:$0xff] (%p2048_p11)  ;;  %554 = vst [vmem:[%s534_s6] sm:$0xff] (%p2048_p11), %v553_v4  ;;  %v559_v7 = vld [vmem:[%s540_s9 + $0x28] sm:$0xff] (%p2048_p11) }
  0x7e   : > { %556 = vst [vmem:[%s534_s6 + $0x8] sm:$0xff] %v555_v5 }
  0x7f   : > { %558 = vst [vmem:[%s534_s6 + $0x10] sm:$0xff] %v557_v6 }
  0x80   : > { %560 = vst [vmem:[%s534_s6 + $0x18] sm:$0xff] %v559_v7 }
  0x81 PF: > { %p1388_p1 = scmp.ge.s32.totalorder %s1920_s25, 1  ;;  %p565_p2 = scmp.lt.s32.totalorder %s1920_s25, 19 }
  0x83   : > { %p566_p3 = pnand %p1388_p1, %p565_p2 }
  0x84   : > { %s572_s14 = sand.u32 (!%p566_p3), 1, %s1896_s19   ;;  %s579_s11 = sand.u32 (!%p566_p3), 1, %s1888_s17  }
  0x85   : > { %569 = sbr.rel (%p566_p3) target bundleno = 388 (0x184), region = 108  ;;  %s1389_s8 = sshll.u32 (!%p566_p3), %s572_s14, 5 }
  0x86   : > { %s1390_s28 = sshll.u32 (!%p566_p3), %s579_s11, 9  ;;  %s586_s10 = sand.u32 (!%p566_p3), 1, %s1880_s15  }
  0x87   : > { %s1393_s0 = sshll.u32 (!%p566_p3), %s1908_s22, 1  ;;  %s1391_s27 = sshll.u32 (!%p566_p3), %s586_s10, 5 }
  0x88   : > { %p627_p4 = scmp.lt.s32.totalorder (!%p566_p3), %s1393_s0, 3  ;;  %s2223_s9 = scalar_lea.vmem (!%p566_p3), [#allocation2], %s1389_s8 }
  0x89   : > { %s2225_s6 = scalar_lea.vmem (!%p566_p3), [#allocation3], %s1390_s28  ;;  %s2227_s1 = scalar_lea.vmem (!%p566_p3), [#allocation4], %s1391_s27 }
  0x8a   : > { %s2493_s0 = smov (!%p627_p4, %s1393_s0), 3  ;;  %s2229_s17 = scalar_lea.vmem [#allocation5], %s1391_s27 }
  0x8b   : > { %s629_s30 = scalar_lea.vmem %s2459_s2, %s2493_s0  ;;  %p1394_p5 = scmp.ne.s32.totalorder %s1904_s21, 0 }
  0x8d   : > { %638 = sbr.rel (%p1394_p5) target bundleno = 151 (0x97), region = 124 }
  0x92   : > { %v1922_v8 = vmov 0.0  }
  0x93   : > { %639 = vst [vmem:[%s2229_s17] sm:$0xff] %v1922_v8 }
  0x94   : > { %640 = vst [vmem:[%s2229_s17 + $0x8] sm:$0xff] %v1922_v8 }
  0x95   : > { %641 = vst [vmem:[%s2229_s17 + $0x10] sm:$0xff] %v1922_v8 }
  0x96   : > { %642 = vst [vmem:[%s2229_s17 + $0x18] sm:$0xff] %v1922_v8 }
  0x97 PF: > { %v1469_v9 = vld [vmem:[%s2225_s6 + $0x70] sm:$0xf]  ;;  %v1695_v10 = vld [vmem:[%s2225_s6 + $0x74] sm:$0xf0]  ;;  %v1461_v20 = vld [vmem:[%s2225_s6 + $0x60] sm:$0xf] }
  0x98   : > { %v1533_v11 = vld [vmem:[%s2225_s6 + $0xf0] sm:$0xf]  ;;  %v1470_v12 = vor.u32 %v1695_v10, %v1469_v9  ;;  %v1711_v13 = vld [vmem:[%s2225_s6 + $0xf4] sm:$0xf0]  ;;  %v1693_v22 = vld [vmem:[%s2225_s6 + $0x64] sm:$0xf0] }
  0x99   : > { %v1597_v14 = vld [vmem:[%s2225_s6 + $0x170] sm:$0xf]  ;;  %v1727_v15 = vld [vmem:[%s2225_s6 + $0x174] sm:$0xf0]  ;;  %v1534_v16 = vor.u32 %v1711_v13, %v1533_v11  ;;  %v1525_v23 = vld [vmem:[%s2225_s6 + $0xe0] sm:$0xf]  ;;  %v1462_v25 = vor.u32 %v1693_v22, %v1461_v20 }
  0x9a   : > { %v1598_v17 = vor.u32 %v1727_v15, %v1597_v14  ;;  %v1661_v18 = vld [vmem:[%s2225_s6 + $0x1f0] sm:$0xf]  ;;  %v1743_v19 = vld [vmem:[%s2225_s6 + $0x1f4] sm:$0xf0]  ;;  %1055 = vmatpush.bf16.msra.mxu0 %v1470_v12  ;;  %v1709_v24 = vld [vmem:[%s2225_s6 + $0xe4] sm:$0xf0] }
  0x9b   : > { %v1662_v21 = vor.u32 %v1743_v19, %v1661_v18  ;;  %1069 = vmatpush.bf16.msra.mxu1 %v1534_v16  ;;  %v1526_v26 = vor.u32 %v1709_v24, %v1525_v23  ;;  %v1589_v27 = vld [vmem:[%s2225_s6 + $0x160] sm:$0xf]  ;;  %v1725_v28 = vld [vmem:[%s2225_s6 + $0x164] sm:$0xf0]  ;;  %v1453_v32 = vld [vmem:[%s2225_s6 + $0x50] sm:$0xf] }
  0x9c   : > { %1083 = vmatpush.bf16.msra.mxu2 %v1598_v17  ;;  %v1653_v29 = vld [vmem:[%s2225_s6 + $0x1e0] sm:$0xf]  ;;  %v1590_v30 = vor.u32 %v1725_v28, %v1589_v27  ;;  %v1741_v31 = vld [vmem:[%s2225_s6 + $0x1e4] sm:$0xf0]  ;;  %v1691_v33 = vld [vmem:[%s2225_s6 + $0x54] sm:$0xf0] }
  0x9d   : > { %1097 = vmatpush.bf16.msra.mxu3 %v1662_v21  ;;  %v1654_v34 = vor.u32 %v1741_v31, %v1653_v29  ;;  %v1517_v35 = vld [vmem:[%s2225_s6 + $0xd0] sm:$0xf]  ;;  %v1707_v36 = vld [vmem:[%s2225_s6 + $0xd4] sm:$0xf0]  ;;  %v1454_v38 = vor.u32 %v1691_v33, %v1453_v32  ;;  %v1445_v44 = vld [vmem:[%s2225_s6 + $0x40] sm:$0xf] }
  0x9e   : > { %v1581_v37 = vld [vmem:[%s2225_s6 + $0x150] sm:$0xf]  ;;  %1056 = vmatpush.bf16.msra.mxu0 %v1462_v25  ;;  %v1723_v39 = vld [vmem:[%s2225_s6 + $0x154] sm:$0xf0]  ;;  %v1518_v42 = vor.u32 %v1707_v36, %v1517_v35  ;;  %v1689_v45 = vld [vmem:[%s2225_s6 + $0x44] sm:$0xf0] }
  0x9f   : > { %v1645_v40 = vld [vmem:[%s2225_s6 + $0x1d0] sm:$0xf]  ;;  %v1739_v41 = vld [vmem:[%s2225_s6 + $0x1d4] sm:$0xf0]  ;;  %1070 = vmatpush.bf16.msra.mxu1 %v1526_v26  ;;  %v1582_v43 = vor.u32 %v1723_v39, %v1581_v37  ;;  %v1509_v46 = vld [vmem:[%s2225_s6 + $0xc0] sm:$0xf]  ;;  %v1446_v53 = vor.u32 %v1689_v45, %v1445_v44 }
  0xa0   : > { %1084 = vmatpush.bf16.msra.mxu2 %v1590_v30  ;;  %v1646_v47 = vor.u32 %v1739_v41, %v1645_v40  ;;  %v1705_v48 = vld [vmem:[%s2225_s6 + $0xc4] sm:$0xf0]  ;;  %v1573_v49 = vld [vmem:[%s2225_s6 + $0x140] sm:$0xf]  ;;  %v1437_v56 = vld [vmem:[%s2225_s6 + $0x30] sm:$0xf] }
  0xa1   : > { %1098 = vmatpush.bf16.msra.mxu3 %v1654_v34  ;;  %v1721_v50 = vld [vmem:[%s2225_s6 + $0x144] sm:$0xf0]  ;;  %v1637_v51 = vld [vmem:[%s2225_s6 + $0x1c0] sm:$0xf]  ;;  %v1510_v54 = vor.u32 %v1705_v48, %v1509_v46  ;;  %v1687_v57 = vld [vmem:[%s2225_s6 + $0x34] sm:$0xf0] }
  0xa2   : > { %v1737_v52 = vld [vmem:[%s2225_s6 + $0x1c4] sm:$0xf0]  ;;  %1057 = vmatpush.bf16.msra.mxu0 %v1454_v38  ;;  %v1574_v55 = vor.u32 %v1721_v50, %v1573_v49  ;;  %v1501_v58 = vld [vmem:[%s2225_s6 + $0xb0] sm:$0xf]  ;;  %v1703_v60 = vld [vmem:[%s2225_s6 + $0xb4] sm:$0xf0]  ;;  %v1438_v1 = vor.u32 %v1687_v57, %v1437_v56 }
  0xa3   : > { %1071 = vmatpush.bf16.msra.mxu1 %v1518_v42  ;;  %v1638_v59 = vor.u32 %v1737_v52, %v1637_v51  ;;  %v1565_v61 = vld [vmem:[%s2225_s6 + $0x130] sm:$0xf]  ;;  %v1719_v62 = vld [vmem:[%s2225_s6 + $0x134] sm:$0xf0]  ;;  %v1502_v2 = vor.u32 %v1703_v60, %v1501_v58  ;;  %v1429_v4 = vld [vmem:[%s2225_s6 + $0x20] sm:$0xf] }
  0xa4   : > { %1085 = vmatpush.bf16.msra.mxu2 %v1582_v43  ;;  %v1629_v63 = vld [vmem:[%s2225_s6 + $0x1b0] sm:$0xf]  ;;  %v1735_v0 = vld [vmem:[%s2225_s6 + $0x1b4] sm:$0xf0]  ;;  %v1566_v3 = vor.u32 %v1719_v62, %v1565_v61  ;;  %v1685_v5 = vld [vmem:[%s2225_s6 + $0x24] sm:$0xf0] }
  0xa5   : > { %1099 = vmatpush.bf16.msra.mxu3 %v1646_v47  ;;  %v1493_v6 = vld [vmem:[%s2225_s6 + $0xa0] sm:$0xf]  ;;  %v1630_v7 = vor.u32 %v1735_v0, %v1629_v63  ;;  %v1701_v8 = vld [vmem:[%s2225_s6 + $0xa4] sm:$0xf0]  ;;  %v1430_v13 = vor.u32 %v1685_v5, %v1429_v4  ;;  %v1421_v16 = vld [vmem:[%s2225_s6 + $0x10] sm:$0xf] }
  0xa6   : > { %1058 = vmatpush.bf16.msra.mxu0 %v1446_v53  ;;  %v1557_v9 = vld [vmem:[%s2225_s6 + $0x120] sm:$0xf]  ;;  %v1717_v10 = vld [vmem:[%s2225_s6 + $0x124] sm:$0xf0]  ;;  %v1494_v14 = vor.u32 %v1701_v8, %v1493_v6  ;;  %v1683_v17 = vld [vmem:[%s2225_s6 + $0x14] sm:$0xf0] }
  0xa7   : > { %1072 = vmatpush.bf16.msra.mxu1 %v1510_v54  ;;  %v1621_v11 = vld [vmem:[%s2225_s6 + $0x1a0] sm:$0xf]  ;;  %v1733_v12 = vld [vmem:[%s2225_s6 + $0x1a4] sm:$0xf0]  ;;  %v1558_v15 = vor.u32 %v1717_v10, %v1557_v9  ;;  %v1485_v18 = vld [vmem:[%s2225_s6 + $0x90] sm:$0xf]  ;;  %v1422_v26 = vor.u32 %v1683_v17, %v1421_v16 }
  0xa8   : > { %1086 = vmatpush.bf16.msra.mxu2 %v1574_v55  ;;  %v1622_v19 = vor.u32 %v1733_v12, %v1621_v11  ;;  %v1699_v20 = vld [vmem:[%s2225_s6 + $0x94] sm:$0xf0]  ;;  %v1549_v21 = vld [vmem:[%s2225_s6 + $0x110] sm:$0xf]  ;;  %v1413_v25 = vld [vmem:[%s2225_s6] sm:$0xf] }
  0xa9   : > { %1100 = vmatpush.bf16.msra.mxu3 %v1638_v59  ;;  %v1715_v22 = vld [vmem:[%s2225_s6 + $0x114] sm:$0xf0]  ;;  %v1613_v23 = vld [vmem:[%s2225_s6 + $0x190] sm:$0xf]  ;;  %v1681_v27 = vld [vmem:[%s2225_s6 + $0x4] sm:$0xf0]  ;;  %v1486_v30 = vor.u32 %v1699_v20, %v1485_v18 }
  0xaa   : > { %1059 = vmatpush.bf16.msra.mxu0 %v1438_v1  ;;  %v1731_v24 = vld [vmem:[%s2225_s6 + $0x194] sm:$0xf0]  ;;  %v1477_v28 = vld [vmem:[%s2225_s6 + $0x80] sm:$0xf]  ;;  %v1697_v29 = vld [vmem:[%s2225_s6 + $0x84] sm:$0xf0]  ;;  %v1550_v31 = vor.u32 %v1715_v22, %v1549_v21  ;;  %v1414_v42 = vor.u32 %v1681_v27, %v1413_v25 }
  0xab   : > { %1073 = vmatpush.bf16.msra.mxu1 %v1502_v2  ;;  %v1541_v32 = vld [vmem:[%s2225_s6 + $0x100] sm:$0xf]  ;;  %v1713_v33 = vld [vmem:[%s2225_s6 + $0x104] sm:$0xf0]  ;;  %v1614_v35 = vor.u32 %v1731_v24, %v1613_v23  ;;  %v1694_v37 = vld [vmem:[%s2225_s6 + $0x74] sm:$0xf]  ;;  %v1478_v46 = vor.u32 %v1697_v29, %v1477_v28 }
  0xac   : > { %1087 = vmatpush.bf16.msra.mxu2 %v1566_v3  ;;  %v1605_v34 = vld [vmem:[%s2225_s6 + $0x180] sm:$0xf]  ;;  %v1729_v36 = vld [vmem:[%s2225_s6 + $0x184] sm:$0xf0]  ;;  %v1471_v38 = vld [vmem:[%s2225_s6 + $0x78] sm:$0xf0]  ;;  %v1542_v47 = vor.u32 %v1713_v33, %v1541_v32 }
  0xad   : > { %1101 = vmatpush.bf16.msra.mxu3 %v1630_v7  ;;  %v1710_v39 = vld [vmem:[%s2225_s6 + $0xf4] sm:$0xf]  ;;  %v1535_v40 = vld [vmem:[%s2225_s6 + $0xf8] sm:$0xf0]  ;;  %v1692_v48 = vld [vmem:[%s2225_s6 + $0x64] sm:$0xf]  ;;  %v1606_v52 = vor.u32 %v1729_v36, %v1605_v34  ;;  %v1474_v53 = vor.u32 %v1694_v37, %v1471_v38 }
  0xae   : > { %1060 = vmatpush.bf16.msra.mxu0 %v1430_v13  ;;  %v1726_v41 = vld [vmem:[%s2225_s6 + $0x174] sm:$0xf]  ;;  %v1599_v43 = vld [vmem:[%s2225_s6 + $0x178] sm:$0xf0]  ;;  %v1463_v49 = vld [vmem:[%s2225_s6 + $0x68] sm:$0xf0]  ;;  %v1538_v58 = vor.u32 %v1710_v39, %v1535_v40 }
  0xaf   : > { %1074 = vmatpush.bf16.msra.mxu1 %v1494_v14  ;;  %v1742_v44 = vld [vmem:[%s2225_s6 + $0x1f4] sm:$0xf]  ;;  %v1663_v45 = vld [vmem:[%s2225_s6 + $0x1f8] sm:$0xf0]  ;;  %v1405_v50 = vld [vmem:[%s2223_s9 + $0x8] sm:$0xf]  ;;  %v1602_v59 = vor.u32 %v1726_v41, %v1599_v43  ;;  %v1466_v8 = vor.u32 %v1692_v48, %v1463_v49 }
  0xb0   : > { %1088 = vmatpush.bf16.msra.mxu2 %v1558_v15  ;;  %v1679_v51 = vld [vmem:[%s2223_s9 + $0x14] sm:$0xf0]  ;;  %v1708_v54 = vld [vmem:[%s2225_s6 + $0xe4] sm:$0xf]  ;;  %v1527_v55 = vld [vmem:[%s2225_s6 + $0xe8] sm:$0xf0]  ;;  %v1666_v63 = vor.u32 %v1742_v44, %v1663_v45 }
  0xb1   : > { %1102 = vmatpush.bf16.msra.mxu3 %v1622_v19  ;;  %v1724_v56 = vld [vmem:[%s2225_s6 + $0x164] sm:$0xf]  ;;  %v1591_v57 = vld [vmem:[%s2225_s6 + $0x168] sm:$0xf0]  ;;  %v1407_v61 = vld [vmem:[%s2223_s9 + $0x18] sm:$0xf0]  ;;  %v2319_v0 = vor.u32 %v1679_v51, %v1405_v50  ;;  %v1530_v10 = vor.u32 %v1708_v54, %v1527_v55 }
  0xb2   : > { %1061 = vmatpush.bf16.msra.mxu0 %v1422_v26  ;;  %v1677_v60 = vld [vmem:[%s2223_s9 + $0xc] sm:$0xf]  ;;  %v1397_v62 = vld [vmem:[%s2223_s9] sm:$0xf]  ;;  %v1678_v1 = vld [vmem:[%s2223_s9 + $0xc] sm:$0xf0]  ;;  %v1594_v11 = vor.u32 %v1724_v56, %v1591_v57 }
  0xb3   : > { %1075 = vmatpush.bf16.msra.mxu1 %v1486_v30  ;;  %v1676_v2 = vld [vmem:[%s2223_s9 + $0x4] sm:$0xf]  ;;  %v1399_v3 = vld [vmem:[%s2223_s9 + $0x10] sm:$0xf0]  ;;  %v1655_v5 = vld [vmem:[%s2225_s6 + $0x1e8] sm:$0xf0]  ;;  %v2326_v6 = vor.u32 %v1677_v60, %v1407_v61  ;;  %v2328_v7 = vor.u32 %v1678_v1, %v1397_v62 }
  0xb4   : > { %1089 = vmatpush.bf16.msra.mxu2 %v1550_v31  ;;  %v1740_v4 = vld [vmem:[%s2225_s6 + $0x1e4] sm:$0xf]  ;;  %v2330_v9 = vor.u32 %v1676_v2, %v1399_v3  ;;  %v1690_v12 = vld [vmem:[%s2225_s6 + $0x54] sm:$0xf]  ;;  %v1455_v13 = vld [vmem:[%s2225_s6 + $0x58] sm:$0xf0] }
  0xb5   : > { %1103 = vmatpush.bf16.msra.mxu3 %v1614_v35  ;;  %v1706_v14 = vld [vmem:[%s2225_s6 + $0xd4] sm:$0xf]  ;;  %v1658_v15 = vor.u32 %v1740_v4, %v1655_v5  ;;  %v1519_v16 = vld [vmem:[%s2225_s6 + $0xd8] sm:$0xf0]  ;;  %v1458_v21 = vor.u32 %v1690_v12, %v1455_v13  ;;  %v1688_v24 = vld [vmem:[%s2225_s6 + $0x44] sm:$0xf] }
  0xb6   : > { %1062 = vmatpush.bf16.msra.mxu0 %v1414_v42  ;;  %v1722_v17 = vld [vmem:[%s2225_s6 + $0x154] sm:$0xf]  ;;  %v1583_v18 = vld [vmem:[%s2225_s6 + $0x158] sm:$0xf0]  ;;  %v1522_v22 = vor.u32 %v1706_v14, %v1519_v16  ;;  %v1447_v25 = vld [vmem:[%s2225_s6 + $0x48] sm:$0xf0] }
  0xb7   : > { %1076 = vmatpush.bf16.msra.mxu1 %v1478_v46  ;;  %v1738_v19 = vld [vmem:[%s2225_s6 + $0x1d4] sm:$0xf]  ;;  %v1647_v20 = vld [vmem:[%s2225_s6 + $0x1d8] sm:$0xf0]  ;;  %v1586_v23 = vor.u32 %v1722_v17, %v1583_v18  ;;  %v1704_v26 = vld [vmem:[%s2225_s6 + $0xc4] sm:$0xf]  ;;  %v1450_v33 = vor.u32 %v1688_v24, %v1447_v25 }
  0xb8   : > { %1090 = vmatpush.bf16.msra.mxu2 %v1542_v47  ;;  %v1650_v27 = vor.u32 %v1738_v19, %v1647_v20  ;;  %v1511_v28 = vld [vmem:[%s2225_s6 + $0xc8] sm:$0xf0]  ;;  %v1720_v29 = vld [vmem:[%s2225_s6 + $0x144] sm:$0xf]  ;;  %v1686_v36 = vld [vmem:[%s2225_s6 + $0x34] sm:$0xf] }
  0xb9   : > { %1104 = vmatpush.bf16.msra.mxu3 %v1606_v52  ;;  %1063 = vmatmul.bf16.vlgmr.msra.gmra.mxu0 %v2328_v7  ;;  %v1575_v30 = vld [vmem:[%s2225_s6 + $0x148] sm:$0xf0]  ;;  %v1736_v31 = vld [vmem:[%s2225_s6 + $0x1c4] sm:$0xf]  ;;  %v1514_v34 = vor.u32 %v1704_v26, %v1511_v28  ;;  %v1439_v37 = vld [vmem:[%s2225_s6 + $0x38] sm:$0xf0] }
  0xba   : > { %1111 = vmatpush.bf16.msrb.mxu0 %v1474_v53  ;;  %1077 = vmatmul.bf16.vlgmr.msra.gmra.mxu1 %v2330_v9  ;;  %v1639_v32 = vld [vmem:[%s2225_s6 + $0x1c8] sm:$0xf0]  ;;  %v1578_v35 = vor.u32 %v1720_v29, %v1575_v30  ;;  %v1702_v38 = vld [vmem:[%s2225_s6 + $0xb4] sm:$0xf]  ;;  %v1503_v40 = vld [vmem:[%s2225_s6 + $0xb8] sm:$0xf0]  ;;  %v1442_v45 = vor.u32 %v1686_v36, %v1439_v37 }
  0xbb   : > { %1125 = vmatpush.bf16.msrb.mxu1 %v1538_v58  ;;  %1091 = vmatmul.bf16.vlgmr.msra.gmra.mxu2 %v2319_v0  ;;  %v1642_v39 = vor.u32 %v1736_v31, %v1639_v32  ;;  %v1718_v41 = vld [vmem:[%s2225_s6 + $0x134] sm:$0xf]  ;;  %v1567_v42 = vld [vmem:[%s2225_s6 + $0x138] sm:$0xf0]  ;;  %v1506_v46 = vor.u32 %v1702_v38, %v1503_v40  ;;  %v1684_v48 = vld [vmem:[%s2225_s6 + $0x24] sm:$0xf] }
  0xbc   : > { %1139 = vmatpush.bf16.msrb.mxu2 %v1602_v59  ;;  %1105 = vmatmul.bf16.vlgmr.msra.gmra.mxu3 %v2326_v6  ;;  %v1734_v43 = vld [vmem:[%s2225_s6 + $0x1b4] sm:$0xf]  ;;  %v1631_v44 = vld [vmem:[%s2225_s6 + $0x1b8] sm:$0xf0]  ;;  %v1570_v47 = vor.u32 %v1718_v41, %v1567_v42  ;;  %v1431_v49 = vld [vmem:[%s2225_s6 + $0x28] sm:$0xf0] }
  0xbd   : > { %1153 = vmatpush.bf16.msrb.mxu3 %v1666_v63  ;;  %v1700_v50 = vld [vmem:[%s2225_s6 + $0xa4] sm:$0xf]  ;;  %v1634_v51 = vor.u32 %v1734_v43, %v1631_v44  ;;  %v1495_v52 = vld [vmem:[%s2225_s6 + $0xa8] sm:$0xf0]  ;;  %v1434_v57 = vor.u32 %v1684_v48, %v1431_v49  ;;  %v1682_v60 = vld [vmem:[%s2225_s6 + $0x14] sm:$0xf] }
  0xbe   : > { %1112 = vmatpush.bf16.msrb.mxu0 %v1466_v8  ;;  %v1716_v53 = vld [vmem:[%s2225_s6 + $0x124] sm:$0xf]  ;;  %v1559_v54 = vld [vmem:[%s2225_s6 + $0x128] sm:$0xf0]  ;;  %v1498_v58 = vor.u32 %v1700_v50, %v1495_v52  ;;  %v1423_v61 = vld [vmem:[%s2225_s6 + $0x18] sm:$0xf0] }
  0xbf   : > { %1126 = vmatpush.bf16.msrb.mxu1 %v1530_v10  ;;  %v1732_v55 = vld [vmem:[%s2225_s6 + $0x1a4] sm:$0xf]  ;;  %v1623_v56 = vld [vmem:[%s2225_s6 + $0x1a8] sm:$0xf0]  ;;  %v1562_v59 = vor.u32 %v1716_v53, %v1559_v54  ;;  %v1698_v62 = vld [vmem:[%s2225_s6 + $0x94] sm:$0xf]  ;;  %v1426_v8 = vor.u32 %v1682_v60, %v1423_v61 }
  0xc0   : > { %1140 = vmatpush.bf16.msrb.mxu2 %v1594_v11  ;;  %v1626_v63 = vor.u32 %v1732_v55, %v1623_v56  ;;  %v1487_v1 = vld [vmem:[%s2225_s6 + $0x98] sm:$0xf0]  ;;  %v1714_v2 = vld [vmem:[%s2225_s6 + $0x114] sm:$0xf]  ;;  %v1680_v12 = vld [vmem:[%s2225_s6 + $0x4] sm:$0xf] }
  0xc1   : > { %1154 = vmatpush.bf16.msrb.mxu3 %v1658_v15  ;;  %v1551_v3 = vld [vmem:[%s2225_s6 + $0x118] sm:$0xf0]  ;;  %v1730_v4 = vld [vmem:[%s2225_s6 + $0x194] sm:$0xf]  ;;  %v1490_v10 = vor.u32 %v1698_v62, %v1487_v1  ;;  %v1415_v13 = vld [vmem:[%s2225_s6 + $0x8] sm:$0xf0] }
  0xc2   : > { %1113 = vmatpush.bf16.msrb.mxu0 %v1458_v21  ;;  %v1615_v5 = vld [vmem:[%s2225_s6 + $0x198] sm:$0xf0]  ;;  %v1554_v11 = vor.u32 %v1714_v2, %v1551_v3  ;;  %v1696_v14 = vld [vmem:[%s2225_s6 + $0x84] sm:$0xf]  ;;  %v1479_v16 = vld [vmem:[%s2225_s6 + $0x88] sm:$0xf0]  ;;  %v1418_v21 = vor.u32 %v1680_v12, %v1415_v13 }
  0xc3   : > { %1127 = vmatpush.bf16.msrb.mxu1 %v1522_v22  ;;  %v1618_v15 = vor.u32 %v1730_v4, %v1615_v5  ;;  %v1712_v17 = vld [vmem:[%s2225_s6 + $0x104] sm:$0xf]  ;;  %v1543_v18 = vld [vmem:[%s2225_s6 + $0x108] sm:$0xf0]  ;;  %v1482_v22 = vor.u32 %v1696_v14, %v1479_v16  ;;  %v646_v53 = vld [vmem:[%s2229_s17 + $0x18] sm:$0xff]  ;;  %p1667_p6 = scmp.ne.s32.totalorder %s1904_s21, 8 }
  0xc4   : > { %1141 = vmatpush.bf16.msrb.mxu2 %v1586_v23  ;;  %v1728_v19 = vld [vmem:[%s2225_s6 + $0x184] sm:$0xf]  ;;  %v1607_v20 = vld [vmem:[%s2225_s6 + $0x188] sm:$0xf0]  ;;  %v1546_v23 = vor.u32 %v1712_v17, %v1543_v18 }
  0xc5   : > { %1155 = vmatpush.bf16.msrb.mxu3 %v1650_v27  ;;  %v1610_v24 = vor.u32 %v1728_v19, %v1607_v20  ;;  %v643_v31 = vld [vmem:[%s2229_s17] sm:$0xff] }
  0xc6   : > { %1114 = vmatpush.bf16.msrb.mxu0 %v1450_v33 }
  0xc7   : > { %1128 = vmatpush.bf16.msrb.mxu1 %v1514_v34 }
  0xc8   : > { %1142 = vmatpush.bf16.msrb.mxu2 %v1578_v35 }
  0xc9   : > { %1156 = vmatpush.bf16.msrb.mxu3 %v1642_v39 }
  0xca   : > { %1115 = vmatpush.bf16.msrb.mxu0 %v1442_v45  ;;  %v644_v45 = vld [vmem:[%s2229_s17 + $0x8] sm:$0xff] }
  0xcb   : > { %1129 = vmatpush.bf16.msrb.mxu1 %v1506_v46 }
  0xcc   : > { %1143 = vmatpush.bf16.msrb.mxu2 %v1570_v47 }
  0xcd   : > { %1157 = vmatpush.bf16.msrb.mxu3 %v1634_v51 }
  0xce   : > { %1116 = vmatpush.bf16.msrb.mxu0 %v1434_v57 }
  0xcf   : > { %1130 = vmatpush.bf16.msrb.mxu1 %v1498_v58 }
  0xd0   : > { %1144 = vmatpush.bf16.msrb.mxu2 %v1562_v59 }
  0xd1   : > { %1158 = vmatpush.bf16.msrb.mxu3 %v1626_v63 }
  0xd2   : > { %1117 = vmatpush.bf16.msrb.mxu0 %v1426_v8 }
  0xd3   : > { %1131 = vmatpush.bf16.msrb.mxu1 %v1490_v10 }
  0xd4   : > { %1145 = vmatpush.bf16.msrb.mxu2 %v1554_v11 }
  0xd5   : > { %1159 = vmatpush.bf16.msrb.mxu3 %v1618_v15 }
  0xd6   : > { %1118 = vmatpush.bf16.msrb.mxu0 %v1418_v21 }
  0xd7   : > { %1132 = vmatpush.bf16.msrb.mxu1 %v1482_v22 }
  0xd8   : > { %1146 = vmatpush.bf16.msrb.mxu2 %v1546_v23 }
  0xd9   : > { %1160 = vmatpush.bf16.msrb.mxu3 %v1610_v24  ;;  %1119 = vmatmul.bf16.vlgmr.msrb.gmra.mxu0 %v2328_v7 }
  0xda   : > { %1133 = vmatmul.bf16.vlgmr.msrb.gmra.mxu1 %v2330_v9 }
  0xdb   : > { %1147 = vmatmul.bf16.vlgmr.msrb.gmra.mxu2 %v2319_v0 }
  0xdc   : > { %1161 = vmatmul.bf16.vlgmr.msrb.gmra.mxu3 %v2326_v6  ;;  %v645_v6 = vld [vmem:[%s2229_s17 + $0x10] sm:$0xff] }
 0x136   : > { %v1064_v25 = vpop.f32.mrf.mxu0 }
 0x137   : > { %v1078_v26 = vpop.f32.mrf.mxu1 }
 0x138   : > { %v1079_v27 = vadd.f32 %v1078_v26, %v1064_v25 }
 0x13e   : > { %v1092_v28 = vpop.f32.mrf.mxu2  ;;  %v1066_v33 = vpop.f32.mrf.mxu0 }
 0x13f   : > { %v1093_v29 = vadd.f32 %v1092_v28, %v1079_v27  ;;  %v1106_v30 = vpop.f32.mrf.mxu3  ;;  %v1080_v34 = vpop.f32.mrf.mxu1 }
 0x140   : > { %v1081_v35 = vadd.f32 %v1080_v34, %v1066_v33 }
 0x141   : > { %v1107_v32 = vadd.f32 %v1106_v30, %v1093_v29 }
 0x143   : > { %v1167_v7 = vadd.f32 %v1107_v32, %v643_v31 }
 0x145   : > { %1171 = vst [vmem:[%s2229_s17] sm:$0xff] %v1167_v7 }
 0x146   : > { %v1094_v9 = vpop.f32.mrf.mxu2 }
 0x147   : > { %v1095_v0 = vadd.f32 %v1094_v9, %v1081_v35  ;;  %v1108_v36 = vpop.f32.mrf.mxu3 }
 0x149   : > { %v1109_v37 = vadd.f32 %v1108_v36, %v1095_v0 }
 0x14b   : > { %v1169_v38 = vadd.f32 %v1109_v37, %v645_v6 }
 0x14d   : > { %1173 = vst [vmem:[%s2229_s17 + $0x10] sm:$0xff] %v1169_v38 }
 0x156   : > { %v1120_v39 = vpop.f32.mrf.mxu0 }
 0x157   : > { %v1134_v40 = vpop.f32.mrf.mxu1 }
 0x158   : > { %v1135_v41 = vadd.f32 %v1134_v40, %v1120_v39 }
 0x15e   : > { %v1148_v42 = vpop.f32.mrf.mxu2  ;;  %v1122_v47 = vpop.f32.mrf.mxu0 }
 0x15f   : > { %v1149_v43 = vadd.f32 %v1148_v42, %v1135_v41  ;;  %v1162_v44 = vpop.f32.mrf.mxu3  ;;  %v1136_v48 = vpop.f32.mrf.mxu1 }
 0x160   : > { %v1137_v50 = vadd.f32 %v1136_v48, %v1122_v47 }
 0x161   : > { %v1163_v46 = vadd.f32 %v1162_v44, %v1149_v43 }
 0x163   : > { %v1168_v49 = vadd.f32 %v1163_v46, %v644_v45 }
 0x165   : > { %1172 = vst [vmem:[%s2229_s17 + $0x8] sm:$0xff] %v1168_v49 }
 0x166   : > { %v1150_v51 = vpop.f32.mrf.mxu2 }
 0x167   : > { %v1151_v52 = vadd.f32 %v1150_v51, %v1137_v50  ;;  %v1164_v54 = vpop.f32.mrf.mxu3 }
 0x169   : > { %v1165_v55 = vadd.f32 %v1164_v54, %v1151_v52  ;;  %1178 = sbr.rel (%p1667_p6) target bundleno = 380 (0x17c), region = 128 }
 0x16b   : > { %v1170_v56 = vadd.f32 %v1165_v55, %v646_v53 }
 0x16d   : > { %1174 = vst [vmem:[%s2229_s17 + $0x18] sm:$0xff] %v1170_v56 }
 0x16e   : > { %v1179_v57 = vld [vmem:[%s2229_s17] sm:$0xff]  ;;  %v1180_v61 = vld [vmem:[%s2229_s17 + $0x8] sm:$0xff]  ;;  %v1181_v1 = vld [vmem:[%s2229_s17 + $0x10] sm:$0xff] }
 0x16f   : > { %v1183_v58 = vld [vmem:[%s629_s30] sm:$0x3]  ;;  %v1194_v63 = vld [vmem:[%s2227_s1 + $0x8] sm:$0xff]  ;;  %v1195_v2 = vld [vmem:[%s2227_s1 + $0x10] sm:$0xff] }
 0x170   : > { %v1193_v59 = vld [vmem:[%s2227_s1] sm:$0xff]  ;;  %v1185_v60 = vperm.slane %v1183_v58, 0  ;;  %v1186_v62 = vperm.slane %v1183_v58, 1  ;;  %v1196_v4 = vld [vmem:[%s2227_s1 + $0x18] sm:$0xff] }
 0x172   : > { %v1189_v5 = vadd.f32 %v1185_v60, %v1179_v57  ;;  %v1190_v8 = vadd.f32 %v1186_v62, %v1180_v61  ;;  %v1191_v10 = vadd.f32 %v1185_v60, %v1181_v1 }
 0x174   : > { %v1182_v3 = vld [vmem:[%s2229_s17 + $0x18] sm:$0xff]  ;;  %v1197_v12 = vadd.f32 %v1193_v59, %v1189_v5  ;;  %v1198_v13 = vadd.f32 %v1194_v63, %v1190_v8  ;;  %v1199_v14 = vadd.f32 %v1195_v2, %v1191_v10 }
 0x175   : > { %v1192_v11 = vadd.f32 %v1186_v62, %v1182_v3 }
 0x176   : > { %v1201_v16 = vmax.f32 %v1197_v12, 0.0  ;;  %v1202_v17 = vmax.f32 %v1198_v13, 0.0  ;;  %v1203_v18 = vmax.f32 %v1199_v14, 0.0 }
 0x177   : > { %v1200_v15 = vadd.f32 %v1196_v4, %v1192_v11 }
 0x178   : > { %1205 = vst [vmem:[%s2229_s17] sm:$0xff] %v1201_v16 }
 0x179   : > { %v1204_v19 = vmax.f32 %v1200_v15, 0.0  ;;  %1206 = vst [vmem:[%s2229_s17 + $0x8] sm:$0xff] %v1202_v17 }
 0x17a   : > { %1207 = vst [vmem:[%s2229_s17 + $0x10] sm:$0xff] %v1203_v18 }
 0x17b   : > { %1208 = vst [vmem:[%s2229_s17 + $0x18] sm:$0xff] %v1204_v19 }
 0x17c PF: > { %1215 = sbr.rel (!%p2052_p13) target bundleno = 388 (0x184), region = 132  ;;  %s1744_s1 = sshll.u32 (%p2052_p13), %s1908_s22, 4 }
 0x17d   : > { %s1221_s11 = scalar_lea.vmem (%p2052_p13), %s2461_s4, %s1744_s1 }
 0x17f   : > { %v1234_v20 = vld [vmem:[%s2229_s17] sm:$0xff] (%p2052_p13) }
 0x180   : > { %v1236_v21 = vld [vmem:[%s2229_s17 + $0x8] sm:$0xff] (%p2052_p13)  ;;  %1235 = vst [vmem:[%s1221_s11] sm:$0xff] (%p2052_p13), %v1234_v20 }
 0x181   : > { %v1238_v22 = vld [vmem:[%s2229_s17 + $0x10] sm:$0xff]  ;;  %1237 = vst [vmem:[%s1221_s11 + $0x8] sm:$0xff] %v1236_v21 }
 0x182   : > { %v1240_v23 = vld [vmem:[%s2229_s17 + $0x18] sm:$0xff]  ;;  %1239 = vst [vmem:[%s1221_s11 + $0x20] sm:$0xff] %v1238_v22 }
 0x183   : > { %1241 = vst [vmem:[%s1221_s11 + $0x28] sm:$0xff] %v1240_v23 }
 0x184 PF: > { %s14_s25 = sadd.s32 1, %s1920_s25   ;;  %s2474_s29 = sld [smem:[#allocation6_spill]] }
 0x185   : > { %p11_p7 = scmp.ge.s32.totalorder %s14_s25, 20   ;;  %s2475_s8 = sld [smem:[#allocation7_spill]] }
 0x186   : > { %s2476_s15 = smov %s1884_s16  ;;  %s2477_s16 = smov %s2044_s13 }
 0x187   : > { %s2478_s17 = smov %s1892_s18  ;;  %s2479_s18 = smov %s2041_s12 }
 0x188   : > { %s2480_s19 = smov %s1900_s20  ;;  %s2481_s20 = smov %s2025_s7 }
 0x189   : > { %s2482_s21 = smov %s1912_s23  ;;  %s2483_s22 = smov %s1916_s24 }
 0x18a   : > { %s2484_s23 = smov %s2474_s29  ;;  %13 = sbr.rel (!%p11_p7) target bundleno = 9 (0x9), region = 205 }
 0x18b   : > { %s2485_s24 = smov %s2475_s8 }

// kernel: forward.38
= control target key start
LH: loop header
LB: loop body
LE: loop exit
PB: predicated region body
PF: predicated region fallthrough
CT: control target
= control target key end

     0   :  { %s2315_s0 = inlined_call_operand.vmem [shape: bf16[16,4608], index: 0, kind: input, shape index: {}]   ;;  %s2316_s1 = inlined_call_operand.vmem [shape: bf16[4608,512], index: 1, kind: input, shape index: {}]   ;;  %s2317_s2 = inlined_call_operand.vmem [shape: f32[1,512], index: 2, kind: input, shape index: {}]   ;;  %s2318_s3 = inlined_call_operand.vmem [shape: f32[16,512], index: 3, kind: output, shape index: {}]  }
   0x1   :  { %2320 = sst [smem:[#allocation6_spill]] %s2315_s0 }
   0x2   :  { %2321 = sst [smem:[#allocation7_spill]] %s2316_s1 }
   0x3   :  { %s1829_s12 = smov 0   ;;  %s1831_s13 = smov 0  }
   0x4   :  { %s1833_s14 = smov 0   ;;  %s1835_s15 = smov 0  }
   0x5   :  { %s1837_s16 = smov 0   ;;  %s1839_s17 = smov 0  }
   0x6   :  { %s1841_s18 = smov 0   ;;  %s1843_s19 = smov 0  }
   0x7   :  { %s1845_s20 = smov 0   ;;  %s1847_s21 = smov 0  }
   0x8   :  { %s1849_s22 = smov 0  }
   0x9 LB: > { %s1264_s23 = sadd.s32 4294967295, %s1806_s22   ;;  %s25_s24 = sadd.s32 1, %s1798_s20  ;;  %s1806_s22 = sphi %s1849_s22, %s13_s22   ;;  %s1802_s21 = sphi %s1847_s21, %s2338_s21   ;;  %s1798_s20 = sphi %s1845_s20, %s2337_s20   ;;  %s1794_s19 = sphi %s1843_s19, %s2336_s19   ;;  %s1790_s18 = sphi %s1841_s18, %s2335_s18   ;;  %s1786_s17 = sphi %s1839_s17, %s2334_s17   ;;  %s1782_s16 = sphi %s1837_s16, %s2333_s16   ;;  %s1778_s15 = sphi %s1835_s15, %s2332_s15   ;;  %s1774_s14 = sphi %s1833_s14, %s2331_s14   ;;  %s1770_s13 = sphi %s1831_s13, %s2330_s13   ;;  %s1766_s12 = sphi %s1829_s12, %s2329_s12  }
   0xa   : > { %p26_p0 = scmp.ge.s32.totalorder %s25_s24, 9  ;;  %s28_s25 = sadd.s32 1, %s1802_s21 }
   0xb   : > { %s41_s26 = sadd.s32 1, %s1786_s17  ;;  %p48_p1 = scmp.ne.s32.totalorder %s1786_s17, %s1782_s16 }
   0xc   : > { %s2340_s24 = smov (%p26_p0, %s25_s24), 0  ;;  %s2342_s25 = smov (!%p26_p0, %s28_s25), %s1802_s21 }
   0xd   : > { %s37_s27 = ssub.s32 %s1798_s20, %s2340_s24  ;;  %p49_p2 = scmp.eq.s32.totalorder %s1806_s22, 0 }
   0xe   : > { %p30_p3 = scmp.ge.s32.totalorder %s2342_s25, 2  ;;  %p39_p4 = scmp.eq.s32.totalorder %s37_s27, 0 }
   0xf   : > { %p1896_p5 = por %p49_p2, %p48_p1  ;;  %s69_s29 = sadd.s32 1, %s1778_s15 }
  0x10   : > { %s2344_s25 = smov (%p30_p3, %s2342_s25), 0  ;;  %p76_p6 = scmp.ne.s32.totalorder %s1778_s15, %s1774_s14 }
  0x11   : > { %2323 = sst [smem:[#allocation5_spill]] %s2344_s25  ;;  %s65_s4 = ssub.s32 %s1802_s21, %s2344_s25 }
  0x12   : > { %s1904_s30 = scalar_select %p39_p4, %s1786_s17, %s41_s26  }
  0x13   : > { %s66_s5 = sor.u32 %s65_s4, %s37_s27  ;;  %p121_p7 = scmp.eq.s32.totalorder %s65_s4, 0 }
  0x14   : > { %p67_p8 = scmp.eq.s32.totalorder %s66_s5, 0  ;;  %p1910_p9 = por %p76_p6, %p49_p2 }
  0x15   : > { %s123_s7 = sadd.s32 1, %s1770_s13  ;;  %p133_p10 = scmp.ne.s32.totalorder %s1770_s13, %s1766_s12 }
  0x16   : > { %s1918_s8 = scalar_select %p67_p8, %s1778_s15, %s69_s29  }
  0x17   : > { %s1921_s9 = scalar_select %p121_p7, %s1770_s13, %s123_s7  }
  0x18   : > { %p134_p11 = scmp.eq.s32.totalorder %s1264_s23, 17  ;;  %p1267_p13 = scmp.ge.s32.totalorder %s1806_s22, 18 }
  0x1a   : > { %p1923_p12 = por %p134_p11, %p133_p10  ;;  %156 = sbr.rel (%p1267_p13) target bundleno = 119 (0x77), region = 16 }
  0x1f   : > { %159 = sbr.rel (!%p1896_p5) target bundleno = 45 (0x2d), region = 20  ;;  %s161_s11 = sand.u32 (%p1896_p5), 1, %s1786_s17  }
  0x20   : > { %s1560_s26 = sshll.u32 (%p1896_p5), %s1798_s20, 4  ;;  %s1268_s27 = sshll.u32 (%p1896_p5), %s161_s11, 5 }
  0x21   : > { %s2326_s0 = sld [smem:[#allocation6_spill]] (%p1896_p5)  ;;  %s163_s23 = scalar_lea.vmem (%p1896_p5), [#allocation2], %s1268_s27 }
  0x27   : > { %s169_s5 = scalar_lea.vmem %s2326_s0, %s1560_s26 }
  0x28   : > { %v182_v0 = vld [vmem:[%s169_s5] sm:$0xff]  ;;  %v184_v1 = vld [vmem:[%s169_s5 + $0x8] sm:$0xff]  ;;  %v186_v2 = vld [vmem:[%s169_s5 + $0x90] sm:$0xff] }
  0x29   : > { %183 = vst [vmem:[%s163_s23] sm:$0xff] %v182_v0  ;;  %v188_v3 = vld [vmem:[%s169_s5 + $0x98] sm:$0xff] }
  0x2a   : > { %185 = vst [vmem:[%s163_s23 + $0x8] sm:$0xff] %v184_v1 }
  0x2b   : > { %187 = vst [vmem:[%s163_s23 + $0x10] sm:$0xff] %v186_v2 }
  0x2c   : > { %189 = vst [vmem:[%s163_s23 + $0x18] sm:$0xff] %v188_v3 }
  0x2d PF: > { %195 = sbr.rel (!%p1910_p9) target bundleno = 119 (0x77), region = 43  ;;  %s197_s28 = sand.u32 (%p1910_p9), 1, %s1778_s15  }
  0x2e   : > { %s1273_s7 = sshll.u32 (%p1910_p9), %s1802_s21, 1  ;;  %s1271_s11 = sshll.u32 (%p1910_p9), %s197_s28, 9 }
  0x2f   : > { %s1561_s26 = sshll.u32 (%p1910_p9), %s1798_s20, 8  ;;  %s2327_s1 = sld [smem:[#allocation7_spill]] (%p1910_p9) }
  0x30   : > { %s203_s29 = sadd.s32 (%p1910_p9), %s1561_s26, %s1273_s7  ;;  %s1948_s6 = scalar_lea.vmem (%p1910_p9), [#allocation3], %s1271_s11 }
  0x31   : > { %s1275_s4 = sshll.u32 (%p1910_p9), %s203_s29, 2 }
  0x35   : > { %s1943_s5 = scalar_lea.vmem %s2327_s1, %s1275_s4 }
  0x36   : > { %v360_v4 = vld [vmem:[%s1943_s5] sm:$0xff]  ;;  %v362_v5 = vld [vmem:[%s1943_s5 + $0x10] sm:$0xff] }
  0x37   : > { %v364_v6 = vld [vmem:[%s1943_s5 + $0x20] sm:$0xff]  ;;  %361 = vst [vmem:[%s1948_s6] sm:$0xff] %v360_v4  ;;  %v366_v7 = vld [vmem:[%s1943_s5 + $0x30] sm:$0xff] }
  0x38   : > { %363 = vst [vmem:[%s1948_s6 + $0x8] sm:$0xff] %v362_v5  ;;  %v368_v8 = vld [vmem:[%s1943_s5 + $0x40] sm:$0xff]  ;;  %v370_v9 = vld [vmem:[%s1943_s5 + $0x50] sm:$0xff] }
  0x39   : > { %365 = vst [vmem:[%s1948_s6 + $0x10] sm:$0xff] %v364_v6  ;;  %v372_v10 = vld [vmem:[%s1943_s5 + $0x60] sm:$0xff]  ;;  %v374_v11 = vld [vmem:[%s1943_s5 + $0x70] sm:$0xff] }
  0x3a   : > { %367 = vst [vmem:[%s1948_s6 + $0x18] sm:$0xff] %v366_v7  ;;  %v376_v12 = vld [vmem:[%s1943_s5 + $0x80] sm:$0xff]  ;;  %v378_v13 = vld [vmem:[%s1943_s5 + $0x90] sm:$0xff] }
  0x3b   : > { %369 = vst [vmem:[%s1948_s6 + $0x20] sm:$0xff] %v368_v8  ;;  %v380_v14 = vld [vmem:[%s1943_s5 + $0xa0] sm:$0xff]  ;;  %v382_v15 = vld [vmem:[%s1943_s5 + $0xb0] sm:$0xff] }
  0x3c   : > { %371 = vst [vmem:[%s1948_s6 + $0x28] sm:$0xff] %v370_v9  ;;  %v384_v16 = vld [vmem:[%s1943_s5 + $0xc0] sm:$0xff]  ;;  %v386_v17 = vld [vmem:[%s1943_s5 + $0xd0] sm:$0xff] }
  0x3d   : > { %373 = vst [vmem:[%s1948_s6 + $0x30] sm:$0xff] %v372_v10  ;;  %v388_v18 = vld [vmem:[%s1943_s5 + $0xe0] sm:$0xff]  ;;  %v390_v19 = vld [vmem:[%s1943_s5 + $0xf0] sm:$0xff] }
  0x3e   : > { %375 = vst [vmem:[%s1948_s6 + $0x38] sm:$0xff] %v374_v11  ;;  %v392_v20 = vld [vmem:[%s1943_s5 + $0x100] sm:$0xff]  ;;  %v394_v21 = vld [vmem:[%s1943_s5 + $0x110] sm:$0xff] }
  0x3f   : > { %377 = vst [vmem:[%s1948_s6 + $0x40] sm:$0xff] %v376_v12  ;;  %v396_v22 = vld [vmem:[%s1943_s5 + $0x120] sm:$0xff]  ;;  %v398_v23 = vld [vmem:[%s1943_s5 + $0x130] sm:$0xff] }
  0x40   : > { %379 = vst [vmem:[%s1948_s6 + $0x48] sm:$0xff] %v378_v13  ;;  %v400_v24 = vld [vmem:[%s1943_s5 + $0x140] sm:$0xff]  ;;  %v402_v25 = vld [vmem:[%s1943_s5 + $0x150] sm:$0xff] }
  0x41   : > { %381 = vst [vmem:[%s1948_s6 + $0x50] sm:$0xff] %v380_v14  ;;  %v404_v26 = vld [vmem:[%s1943_s5 + $0x160] sm:$0xff]  ;;  %v406_v27 = vld [vmem:[%s1943_s5 + $0x170] sm:$0xff] }
  0x42   : > { %383 = vst [vmem:[%s1948_s6 + $0x58] sm:$0xff] %v382_v15  ;;  %v408_v28 = vld [vmem:[%s1943_s5 + $0x180] sm:$0xff]  ;;  %v410_v29 = vld [vmem:[%s1943_s5 + $0x190] sm:$0xff] }
  0x43   : > { %385 = vst [vmem:[%s1948_s6 + $0x60] sm:$0xff] %v384_v16  ;;  %v412_v30 = vld [vmem:[%s1943_s5 + $0x1a0] sm:$0xff]  ;;  %v414_v31 = vld [vmem:[%s1943_s5 + $0x1b0] sm:$0xff] }
  0x44   : > { %387 = vst [vmem:[%s1948_s6 + $0x68] sm:$0xff] %v386_v17  ;;  %v416_v32 = vld [vmem:[%s1943_s5 + $0x1c0] sm:$0xff]  ;;  %v418_v33 = vld [vmem:[%s1943_s5 + $0x1d0] sm:$0xff] }
  0x45   : > { %389 = vst [vmem:[%s1948_s6 + $0x70] sm:$0xff] %v388_v18  ;;  %v420_v34 = vld [vmem:[%s1943_s5 + $0x1e0] sm:$0xff]  ;;  %v422_v35 = vld [vmem:[%s1943_s5 + $0x1f0] sm:$0xff] }
  0x46   : > { %391 = vst [vmem:[%s1948_s6 + $0x78] sm:$0xff] %v390_v19  ;;  %v424_v36 = vld [vmem:[%s1943_s5 + $0x200] sm:$0xff]  ;;  %v426_v37 = vld [vmem:[%s1943_s5 + $0x210] sm:$0xff] }
  0x47   : > { %393 = vst [vmem:[%s1948_s6 + $0x80] sm:$0xff] %v392_v20  ;;  %v428_v38 = vld [vmem:[%s1943_s5 + $0x220] sm:$0xff]  ;;  %v430_v39 = vld [vmem:[%s1943_s5 + $0x230] sm:$0xff] }
  0x48   : > { %395 = vst [vmem:[%s1948_s6 + $0x88] sm:$0xff] %v394_v21  ;;  %v432_v40 = vld [vmem:[%s1943_s5 + $0x240] sm:$0xff]  ;;  %v434_v41 = vld [vmem:[%s1943_s5 + $0x250] sm:$0xff] }
  0x49   : > { %397 = vst [vmem:[%s1948_s6 + $0x90] sm:$0xff] %v396_v22  ;;  %v436_v42 = vld [vmem:[%s1943_s5 + $0x260] sm:$0xff]  ;;  %v438_v43 = vld [vmem:[%s1943_s5 + $0x270] sm:$0xff] }
  0x4a   : > { %399 = vst [vmem:[%s1948_s6 + $0x98] sm:$0xff] %v398_v23  ;;  %v440_v44 = vld [vmem:[%s1943_s5 + $0x280] sm:$0xff]  ;;  %v442_v45 = vld [vmem:[%s1943_s5 + $0x290] sm:$0xff] }
  0x4b   : > { %401 = vst [vmem:[%s1948_s6 + $0xa0] sm:$0xff] %v400_v24  ;;  %v444_v46 = vld [vmem:[%s1943_s5 + $0x2a0] sm:$0xff]  ;;  %v446_v47 = vld [vmem:[%s1943_s5 + $0x2b0] sm:$0xff] }
  0x4c   : > { %403 = vst [vmem:[%s1948_s6 + $0xa8] sm:$0xff] %v402_v25  ;;  %v448_v48 = vld [vmem:[%s1943_s5 + $0x2c0] sm:$0xff]  ;;  %v450_v49 = vld [vmem:[%s1943_s5 + $0x2d0] sm:$0xff] }
  0x4d   : > { %405 = vst [vmem:[%s1948_s6 + $0xb0] sm:$0xff] %v404_v26  ;;  %v452_v50 = vld [vmem:[%s1943_s5 + $0x2e0] sm:$0xff]  ;;  %v454_v51 = vld [vmem:[%s1943_s5 + $0x2f0] sm:$0xff] }
  0x4e   : > { %407 = vst [vmem:[%s1948_s6 + $0xb8] sm:$0xff] %v406_v27  ;;  %v456_v52 = vld [vmem:[%s1943_s5 + $0x300] sm:$0xff]  ;;  %v458_v53 = vld [vmem:[%s1943_s5 + $0x310] sm:$0xff] }
  0x4f   : > { %409 = vst [vmem:[%s1948_s6 + $0xc0] sm:$0xff] %v408_v28  ;;  %v460_v54 = vld [vmem:[%s1943_s5 + $0x320] sm:$0xff]  ;;  %v462_v55 = vld [vmem:[%s1943_s5 + $0x330] sm:$0xff] }
  0x50   : > { %411 = vst [vmem:[%s1948_s6 + $0xc8] sm:$0xff] %v410_v29  ;;  %v464_v56 = vld [vmem:[%s1943_s5 + $0x340] sm:$0xff]  ;;  %v466_v57 = vld [vmem:[%s1943_s5 + $0x350] sm:$0xff] }
  0x51   : > { %413 = vst [vmem:[%s1948_s6 + $0xd0] sm:$0xff] %v412_v30  ;;  %v468_v58 = vld [vmem:[%s1943_s5 + $0x360] sm:$0xff]  ;;  %v470_v59 = vld [vmem:[%s1943_s5 + $0x370] sm:$0xff] }
  0x52   : > { %415 = vst [vmem:[%s1948_s6 + $0xd8] sm:$0xff] %v414_v31  ;;  %v472_v60 = vld [vmem:[%s1943_s5 + $0x380] sm:$0xff]  ;;  %v474_v61 = vld [vmem:[%s1943_s5 + $0x390] sm:$0xff] }
  0x53   : > { %417 = vst [vmem:[%s1948_s6 + $0xe0] sm:$0xff] %v416_v32  ;;  %v476_v62 = vld [vmem:[%s1943_s5 + $0x3a0] sm:$0xff]  ;;  %v478_v63 = vld [vmem:[%s1943_s5 + $0x3b0] sm:$0xff] }
  0x54   : > { %419 = vst [vmem:[%s1948_s6 + $0xe8] sm:$0xff] %v418_v33  ;;  %v480_v0 = vld [vmem:[%s1943_s5 + $0x3c0] sm:$0xff]  ;;  %v482_v1 = vld [vmem:[%s1943_s5 + $0x3d0] sm:$0xff] }
  0x55   : > { %421 = vst [vmem:[%s1948_s6 + $0xf0] sm:$0xff] %v420_v34  ;;  %v484_v2 = vld [vmem:[%s1943_s5 + $0x3e0] sm:$0xff]  ;;  %v486_v3 = vld [vmem:[%s1943_s5 + $0x3f0] sm:$0xff] }
  0x56   : > { %423 = vst [vmem:[%s1948_s6 + $0xf8] sm:$0xff] %v422_v35 }
  0x57   : > { %425 = vst [vmem:[%s1948_s6 + $0x100] sm:$0xff] %v424_v36 }
  0x58   : > { %427 = vst [vmem:[%s1948_s6 + $0x108] sm:$0xff] %v426_v37 }
  0x59   : > { %429 = vst [vmem:[%s1948_s6 + $0x110] sm:$0xff] %v428_v38 }
  0x5a   : > { %431 = vst [vmem:[%s1948_s6 + $0x118] sm:$0xff] %v430_v39 }
  0x5b   : > { %433 = vst [vmem:[%s1948_s6 + $0x120] sm:$0xff] %v432_v40 }
  0x5c   : > { %435 = vst [vmem:[%s1948_s6 + $0x128] sm:$0xff] %v434_v41 }
  0x5d   : > { %437 = vst [vmem:[%s1948_s6 + $0x130] sm:$0xff] %v436_v42 }
  0x5e   : > { %439 = vst [vmem:[%s1948_s6 + $0x138] sm:$0xff] %v438_v43 }
  0x5f   : > { %441 = vst [vmem:[%s1948_s6 + $0x140] sm:$0xff] %v440_v44 }
  0x60   : > { %443 = vst [vmem:[%s1948_s6 + $0x148] sm:$0xff] %v442_v45 }
  0x61   : > { %445 = vst [vmem:[%s1948_s6 + $0x150] sm:$0xff] %v444_v46 }
  0x62   : > { %447 = vst [vmem:[%s1948_s6 + $0x158] sm:$0xff] %v446_v47 }
  0x63   : > { %449 = vst [vmem:[%s1948_s6 + $0x160] sm:$0xff] %v448_v48 }
  0x64   : > { %451 = vst [vmem:[%s1948_s6 + $0x168] sm:$0xff] %v450_v49 }
  0x65   : > { %453 = vst [vmem:[%s1948_s6 + $0x170] sm:$0xff] %v452_v50 }
  0x66   : > { %455 = vst [vmem:[%s1948_s6 + $0x178] sm:$0xff] %v454_v51 }
  0x67   : > { %457 = vst [vmem:[%s1948_s6 + $0x180] sm:$0xff] %v456_v52 }
  0x68   : > { %459 = vst [vmem:[%s1948_s6 + $0x188] sm:$0xff] %v458_v53 }
  0x69   : > { %461 = vst [vmem:[%s1948_s6 + $0x190] sm:$0xff] %v460_v54 }
  0x6a   : > { %463 = vst [vmem:[%s1948_s6 + $0x198] sm:$0xff] %v462_v55 }
  0x6b   : > { %465 = vst [vmem:[%s1948_s6 + $0x1a0] sm:$0xff] %v464_v56 }
  0x6c   : > { %467 = vst [vmem:[%s1948_s6 + $0x1a8] sm:$0xff] %v466_v57 }
  0x6d   : > { %469 = vst [vmem:[%s1948_s6 + $0x1b0] sm:$0xff] %v468_v58 }
  0x6e   : > { %471 = vst [vmem:[%s1948_s6 + $0x1b8] sm:$0xff] %v470_v59 }
  0x6f   : > { %473 = vst [vmem:[%s1948_s6 + $0x1c0] sm:$0xff] %v472_v60 }
  0x70   : > { %475 = vst [vmem:[%s1948_s6 + $0x1c8] sm:$0xff] %v474_v61 }
  0x71   : > { %477 = vst [vmem:[%s1948_s6 + $0x1d0] sm:$0xff] %v476_v62 }
  0x72   : > { %479 = vst [vmem:[%s1948_s6 + $0x1d8] sm:$0xff] %v478_v63 }
  0x73   : > { %481 = vst [vmem:[%s1948_s6 + $0x1e0] sm:$0xff] %v480_v0 }
  0x74   : > { %483 = vst [vmem:[%s1948_s6 + $0x1e8] sm:$0xff] %v482_v1 }
  0x75   : > { %485 = vst [vmem:[%s1948_s6 + $0x1f0] sm:$0xff] %v484_v2 }
  0x76   : > { %487 = vst [vmem:[%s1948_s6 + $0x1f8] sm:$0xff] %v486_v3 }
  0x77 PF: > { %p1276_p0 = scmp.ge.s32.totalorder %s1806_s22, 1  ;;  %p500_p1 = scmp.lt.s32.totalorder %s1806_s22, 19 }
  0x79   : > { %p501_p2 = pnand %p1276_p0, %p500_p1 }
  0x7a   : > { %s507_s0 = sand.u32 (!%p501_p2), 1, %s1782_s16   ;;  %s514_s23 = sand.u32 (!%p501_p2), 1, %s1774_s14  }
  0x7b   : > { %504 = sbr.rel (%p501_p2) target bundleno = 375 (0x177), region = 85  ;;  %s1277_s28 = sshll.u32 (!%p501_p2), %s507_s0, 5 }
  0x7c   : > { %s1278_s7 = sshll.u32 (!%p501_p2), %s514_s23, 9  ;;  %s541_s11 = sand.u32 (!%p501_p2), 1, %s1766_s12  }
  0x7d   : > { %s1280_s26 = sshll.u32 (!%p501_p2), %s1794_s19, 1  ;;  %s1279_s29 = sshll.u32 (!%p501_p2), %s541_s11, 5 }
  0x7e   : > { %p549_p3 = scmp.lt.s32.totalorder (!%p501_p2), %s1280_s26, 3  ;;  %s2087_s6 = scalar_lea.vmem (!%p501_p2), [#allocation2], %s1277_s28 }
  0x7f   : > { %s2089_s1 = scalar_lea.vmem (!%p501_p2), [#allocation3], %s1278_s7  ;;  %s2091_s25 = scalar_lea.vmem (!%p501_p2), [#allocation4], %s1279_s29 }
  0x80   : > { %s2346_s26 = smov (!%p549_p3, %s1280_s26), 3  ;;  %p1281_p4 = scmp.ne.s32.totalorder %s1790_s18, 0 }
  0x81   : > { %s551_s5 = scalar_lea.vmem %s2317_s2, %s2346_s26 }
  0x82   : > { %558 = sbr.rel (%p1281_p4) target bundleno = 140 (0x8c), region = 97 }
  0x87   : > { %v1808_v4 = vmov 0.0  }
  0x88   : > { %559 = vst [vmem:[%s2091_s25] sm:$0xff] %v1808_v4 }
  0x89   : > { %560 = vst [vmem:[%s2091_s25 + $0x8] sm:$0xff] %v1808_v4 }
  0x8a   : > { %561 = vst [vmem:[%s2091_s25 + $0x10] sm:$0xff] %v1808_v4 }
  0x8b   : > { %562 = vst [vmem:[%s2091_s25 + $0x18] sm:$0xff] %v1808_v4 }
  0x8c PF: > { %v1356_v5 = vld [vmem:[%s2089_s1 + $0x70] sm:$0xf]  ;;  %v1581_v6 = vld [vmem:[%s2089_s1 + $0x74] sm:$0xf0]  ;;  %v1348_v16 = vld [vmem:[%s2089_s1 + $0x60] sm:$0xf] }
  0x8d   : > { %v1420_v7 = vld [vmem:[%s2089_s1 + $0xf0] sm:$0xf]  ;;  %v1357_v8 = vor.u32 %v1581_v6, %v1356_v5  ;;  %v1597_v9 = vld [vmem:[%s2089_s1 + $0xf4] sm:$0xf0]  ;;  %v1579_v18 = vld [vmem:[%s2089_s1 + $0x64] sm:$0xf0] }
  0x8e   : > { %v1484_v10 = vld [vmem:[%s2089_s1 + $0x170] sm:$0xf]  ;;  %v1613_v11 = vld [vmem:[%s2089_s1 + $0x174] sm:$0xf0]  ;;  %v1421_v12 = vor.u32 %v1597_v9, %v1420_v7  ;;  %v1412_v19 = vld [vmem:[%s2089_s1 + $0xe0] sm:$0xf]  ;;  %v1349_v21 = vor.u32 %v1579_v18, %v1348_v16 }
  0x8f   : > { %v1485_v13 = vor.u32 %v1613_v11, %v1484_v10  ;;  %v1548_v14 = vld [vmem:[%s2089_s1 + $0x1f0] sm:$0xf]  ;;  %v1629_v15 = vld [vmem:[%s2089_s1 + $0x1f4] sm:$0xf0]  ;;  %975 = vmatpush.bf16.msra.mxu0 %v1357_v8  ;;  %v1595_v20 = vld [vmem:[%s2089_s1 + $0xe4] sm:$0xf0] }
  0x90   : > { %v1549_v17 = vor.u32 %v1629_v15, %v1548_v14  ;;  %989 = vmatpush.bf16.msra.mxu1 %v1421_v12  ;;  %v1413_v22 = vor.u32 %v1595_v20, %v1412_v19  ;;  %v1476_v23 = vld [vmem:[%s2089_s1 + $0x160] sm:$0xf]  ;;  %v1611_v24 = vld [vmem:[%s2089_s1 + $0x164] sm:$0xf0]  ;;  %v1340_v28 = vld [vmem:[%s2089_s1 + $0x50] sm:$0xf] }
  0x91   : > { %1003 = vmatpush.bf16.msra.mxu2 %v1485_v13  ;;  %v1540_v25 = vld [vmem:[%s2089_s1 + $0x1e0] sm:$0xf]  ;;  %v1477_v26 = vor.u32 %v1611_v24, %v1476_v23  ;;  %v1627_v27 = vld [vmem:[%s2089_s1 + $0x1e4] sm:$0xf0]  ;;  %v1577_v29 = vld [vmem:[%s2089_s1 + $0x54] sm:$0xf0] }
  0x92   : > { %1017 = vmatpush.bf16.msra.mxu3 %v1549_v17  ;;  %v1541_v30 = vor.u32 %v1627_v27, %v1540_v25  ;;  %v1404_v31 = vld [vmem:[%s2089_s1 + $0xd0] sm:$0xf]  ;;  %v1593_v32 = vld [vmem:[%s2089_s1 + $0xd4] sm:$0xf0]  ;;  %v1341_v34 = vor.u32 %v1577_v29, %v1340_v28  ;;  %v1332_v40 = vld [vmem:[%s2089_s1 + $0x40] sm:$0xf] }
  0x93   : > { %v1468_v33 = vld [vmem:[%s2089_s1 + $0x150] sm:$0xf]  ;;  %976 = vmatpush.bf16.msra.mxu0 %v1349_v21  ;;  %v1609_v35 = vld [vmem:[%s2089_s1 + $0x154] sm:$0xf0]  ;;  %v1405_v38 = vor.u32 %v1593_v32, %v1404_v31  ;;  %v1575_v41 = vld [vmem:[%s2089_s1 + $0x44] sm:$0xf0] }
  0x94   : > { %v1532_v36 = vld [vmem:[%s2089_s1 + $0x1d0] sm:$0xf]  ;;  %v1625_v37 = vld [vmem:[%s2089_s1 + $0x1d4] sm:$0xf0]  ;;  %990 = vmatpush.bf16.msra.mxu1 %v1413_v22  ;;  %v1469_v39 = vor.u32 %v1609_v35, %v1468_v33  ;;  %v1396_v42 = vld [vmem:[%s2089_s1 + $0xc0] sm:$0xf]  ;;  %v1333_v49 = vor.u32 %v1575_v41, %v1332_v40 }
  0x95   : > { %1004 = vmatpush.bf16.msra.mxu2 %v1477_v26  ;;  %v1533_v43 = vor.u32 %v1625_v37, %v1532_v36  ;;  %v1591_v44 = vld [vmem:[%s2089_s1 + $0xc4] sm:$0xf0]  ;;  %v1460_v45 = vld [vmem:[%s2089_s1 + $0x140] sm:$0xf]  ;;  %v1324_v52 = vld [vmem:[%s2089_s1 + $0x30] sm:$0xf] }
  0x96   : > { %1018 = vmatpush.bf16.msra.mxu3 %v1541_v30  ;;  %v1607_v46 = vld [vmem:[%s2089_s1 + $0x144] sm:$0xf0]  ;;  %v1524_v47 = vld [vmem:[%s2089_s1 + $0x1c0] sm:$0xf]  ;;  %v1397_v50 = vor.u32 %v1591_v44, %v1396_v42  ;;  %v1573_v53 = vld [vmem:[%s2089_s1 + $0x34] sm:$0xf0] }
  0x97   : > { %v1623_v48 = vld [vmem:[%s2089_s1 + $0x1c4] sm:$0xf0]  ;;  %977 = vmatpush.bf16.msra.mxu0 %v1341_v34  ;;  %v1461_v51 = vor.u32 %v1607_v46, %v1460_v45  ;;  %v1388_v54 = vld [vmem:[%s2089_s1 + $0xb0] sm:$0xf]  ;;  %v1589_v56 = vld [vmem:[%s2089_s1 + $0xb4] sm:$0xf0]  ;;  %v1325_v61 = vor.u32 %v1573_v53, %v1324_v52 }
  0x98   : > { %991 = vmatpush.bf16.msra.mxu1 %v1405_v38  ;;  %v1525_v55 = vor.u32 %v1623_v48, %v1524_v47  ;;  %v1452_v57 = vld [vmem:[%s2089_s1 + $0x130] sm:$0xf]  ;;  %v1605_v58 = vld [vmem:[%s2089_s1 + $0x134] sm:$0xf0]  ;;  %v1389_v62 = vor.u32 %v1589_v56, %v1388_v54  ;;  %v1316_v0 = vld [vmem:[%s2089_s1 + $0x20] sm:$0xf] }
  0x99   : > { %1005 = vmatpush.bf16.msra.mxu2 %v1469_v39  ;;  %v1516_v59 = vld [vmem:[%s2089_s1 + $0x1b0] sm:$0xf]  ;;  %v1621_v60 = vld [vmem:[%s2089_s1 + $0x1b4] sm:$0xf0]  ;;  %v1453_v63 = vor.u32 %v1605_v58, %v1452_v57  ;;  %v1571_v1 = vld [vmem:[%s2089_s1 + $0x24] sm:$0xf0] }
  0x9a   : > { %1019 = vmatpush.bf16.msra.mxu3 %v1533_v43  ;;  %v1380_v2 = vld [vmem:[%s2089_s1 + $0xa0] sm:$0xf]  ;;  %v1517_v3 = vor.u32 %v1621_v60, %v1516_v59  ;;  %v1587_v4 = vld [vmem:[%s2089_s1 + $0xa4] sm:$0xf0]  ;;  %v1317_v9 = vor.u32 %v1571_v1, %v1316_v0  ;;  %v1308_v12 = vld [vmem:[%s2089_s1 + $0x10] sm:$0xf] }
  0x9b   : > { %978 = vmatpush.bf16.msra.mxu0 %v1333_v49  ;;  %v1444_v5 = vld [vmem:[%s2089_s1 + $0x120] sm:$0xf]  ;;  %v1603_v6 = vld [vmem:[%s2089_s1 + $0x124] sm:$0xf0]  ;;  %v1381_v10 = vor.u32 %v1587_v4, %v1380_v2  ;;  %v1569_v13 = vld [vmem:[%s2089_s1 + $0x14] sm:$0xf0] }
  0x9c   : > { %992 = vmatpush.bf16.msra.mxu1 %v1397_v50  ;;  %v1508_v7 = vld [vmem:[%s2089_s1 + $0x1a0] sm:$0xf]  ;;  %v1619_v8 = vld [vmem:[%s2089_s1 + $0x1a4] sm:$0xf0]  ;;  %v1445_v11 = vor.u32 %v1603_v6, %v1444_v5  ;;  %v1372_v14 = vld [vmem:[%s2089_s1 + $0x90] sm:$0xf]  ;;  %v1309_v22 = vor.u32 %v1569_v13, %v1308_v12 }
  0x9d   : > { %1006 = vmatpush.bf16.msra.mxu2 %v1461_v51  ;;  %v1509_v15 = vor.u32 %v1619_v8, %v1508_v7  ;;  %v1585_v16 = vld [vmem:[%s2089_s1 + $0x94] sm:$0xf0]  ;;  %v1436_v17 = vld [vmem:[%s2089_s1 + $0x110] sm:$0xf]  ;;  %v1300_v21 = vld [vmem:[%s2089_s1] sm:$0xf] }
  0x9e   : > { %1020 = vmatpush.bf16.msra.mxu3 %v1525_v55  ;;  %v1601_v18 = vld [vmem:[%s2089_s1 + $0x114] sm:$0xf0]  ;;  %v1500_v19 = vld [vmem:[%s2089_s1 + $0x190] sm:$0xf]  ;;  %v1567_v23 = vld [vmem:[%s2089_s1 + $0x4] sm:$0xf0]  ;;  %v1373_v26 = vor.u32 %v1585_v16, %v1372_v14 }
  0x9f   : > { %979 = vmatpush.bf16.msra.mxu0 %v1325_v61  ;;  %v1617_v20 = vld [vmem:[%s2089_s1 + $0x194] sm:$0xf0]  ;;  %v1364_v24 = vld [vmem:[%s2089_s1 + $0x80] sm:$0xf]  ;;  %v1583_v25 = vld [vmem:[%s2089_s1 + $0x84] sm:$0xf0]  ;;  %v1437_v27 = vor.u32 %v1601_v18, %v1436_v17  ;;  %v1301_v38 = vor.u32 %v1567_v23, %v1300_v21 }
  0xa0   : > { %993 = vmatpush.bf16.msra.mxu1 %v1389_v62  ;;  %v1428_v28 = vld [vmem:[%s2089_s1 + $0x100] sm:$0xf]  ;;  %v1599_v29 = vld [vmem:[%s2089_s1 + $0x104] sm:$0xf0]  ;;  %v1501_v31 = vor.u32 %v1617_v20, %v1500_v19  ;;  %v1580_v33 = vld [vmem:[%s2089_s1 + $0x74] sm:$0xf]  ;;  %v1365_v42 = vor.u32 %v1583_v25, %v1364_v24 }
  0xa1   : > { %1007 = vmatpush.bf16.msra.mxu2 %v1453_v63  ;;  %v1492_v30 = vld [vmem:[%s2089_s1 + $0x180] sm:$0xf]  ;;  %v1615_v32 = vld [vmem:[%s2089_s1 + $0x184] sm:$0xf0]  ;;  %v1358_v34 = vld [vmem:[%s2089_s1 + $0x78] sm:$0xf0]  ;;  %v1429_v43 = vor.u32 %v1599_v29, %v1428_v28 }
  0xa2   : > { %1021 = vmatpush.bf16.msra.mxu3 %v1517_v3  ;;  %v1596_v35 = vld [vmem:[%s2089_s1 + $0xf4] sm:$0xf]  ;;  %v1422_v36 = vld [vmem:[%s2089_s1 + $0xf8] sm:$0xf0]  ;;  %v1578_v44 = vld [vmem:[%s2089_s1 + $0x64] sm:$0xf]  ;;  %v1493_v48 = vor.u32 %v1615_v32, %v1492_v30  ;;  %v1361_v49 = vor.u32 %v1580_v33, %v1358_v34 }
  0xa3   : > { %980 = vmatpush.bf16.msra.mxu0 %v1317_v9  ;;  %v1612_v37 = vld [vmem:[%s2089_s1 + $0x174] sm:$0xf]  ;;  %v1486_v39 = vld [vmem:[%s2089_s1 + $0x178] sm:$0xf0]  ;;  %v1350_v45 = vld [vmem:[%s2089_s1 + $0x68] sm:$0xf0]  ;;  %v1425_v54 = vor.u32 %v1596_v35, %v1422_v36 }
  0xa4   : > { %994 = vmatpush.bf16.msra.mxu1 %v1381_v10  ;;  %v1628_v40 = vld [vmem:[%s2089_s1 + $0x1f4] sm:$0xf]  ;;  %v1550_v41 = vld [vmem:[%s2089_s1 + $0x1f8] sm:$0xf0]  ;;  %v1292_v46 = vld [vmem:[%s2087_s6 + $0x8] sm:$0xf]  ;;  %v1489_v55 = vor.u32 %v1612_v37, %v1486_v39  ;;  %v1353_v4 = vor.u32 %v1578_v44, %v1350_v45 }
  0xa5   : > { %1008 = vmatpush.bf16.msra.mxu2 %v1445_v11  ;;  %v1565_v47 = vld [vmem:[%s2087_s6 + $0x14] sm:$0xf0]  ;;  %v1594_v50 = vld [vmem:[%s2089_s1 + $0xe4] sm:$0xf]  ;;  %v1414_v51 = vld [vmem:[%s2089_s1 + $0xe8] sm:$0xf0]  ;;  %v1553_v59 = vor.u32 %v1628_v40, %v1550_v41 }
  0xa6   : > { %1022 = vmatpush.bf16.msra.mxu3 %v1509_v15  ;;  %v1610_v52 = vld [vmem:[%s2089_s1 + $0x164] sm:$0xf]  ;;  %v1478_v53 = vld [vmem:[%s2089_s1 + $0x168] sm:$0xf0]  ;;  %v1294_v57 = vld [vmem:[%s2087_s6 + $0x18] sm:$0xf0]  ;;  %v2181_v60 = vor.u32 %v1565_v47, %v1292_v46  ;;  %v1417_v6 = vor.u32 %v1594_v50, %v1414_v51 }
  0xa7   : > { %981 = vmatpush.bf16.msra.mxu0 %v1309_v22  ;;  %v1563_v56 = vld [vmem:[%s2087_s6 + $0xc] sm:$0xf]  ;;  %v1284_v58 = vld [vmem:[%s2087_s6] sm:$0xf]  ;;  %v1564_v61 = vld [vmem:[%s2087_s6 + $0xc] sm:$0xf0]  ;;  %v1481_v7 = vor.u32 %v1610_v52, %v1478_v53 }
  0xa8   : > { %995 = vmatpush.bf16.msra.mxu1 %v1373_v26  ;;  %v1562_v62 = vld [vmem:[%s2087_s6 + $0x4] sm:$0xf]  ;;  %v1286_v63 = vld [vmem:[%s2087_s6 + $0x10] sm:$0xf0]  ;;  %v1542_v1 = vld [vmem:[%s2089_s1 + $0x1e8] sm:$0xf0]  ;;  %v2188_v2 = vor.u32 %v1563_v56, %v1294_v57  ;;  %v2190_v3 = vor.u32 %v1564_v61, %v1284_v58 }
  0xa9   : > { %1009 = vmatpush.bf16.msra.mxu2 %v1437_v27  ;;  %v1626_v0 = vld [vmem:[%s2089_s1 + $0x1e4] sm:$0xf]  ;;  %v2192_v5 = vor.u32 %v1562_v62, %v1286_v63  ;;  %v1576_v8 = vld [vmem:[%s2089_s1 + $0x54] sm:$0xf]  ;;  %v1342_v9 = vld [vmem:[%s2089_s1 + $0x58] sm:$0xf0] }
  0xaa   : > { %1023 = vmatpush.bf16.msra.mxu3 %v1501_v31  ;;  %v1592_v10 = vld [vmem:[%s2089_s1 + $0xd4] sm:$0xf]  ;;  %v1545_v11 = vor.u32 %v1626_v0, %v1542_v1  ;;  %v1406_v12 = vld [vmem:[%s2089_s1 + $0xd8] sm:$0xf0]  ;;  %v1345_v17 = vor.u32 %v1576_v8, %v1342_v9  ;;  %v1574_v20 = vld [vmem:[%s2089_s1 + $0x44] sm:$0xf] }
  0xab   : > { %982 = vmatpush.bf16.msra.mxu0 %v1301_v38  ;;  %v1608_v13 = vld [vmem:[%s2089_s1 + $0x154] sm:$0xf]  ;;  %v1470_v14 = vld [vmem:[%s2089_s1 + $0x158] sm:$0xf0]  ;;  %v1409_v18 = vor.u32 %v1592_v10, %v1406_v12  ;;  %v1334_v21 = vld [vmem:[%s2089_s1 + $0x48] sm:$0xf0] }
  0xac   : > { %996 = vmatpush.bf16.msra.mxu1 %v1365_v42  ;;  %v1624_v15 = vld [vmem:[%s2089_s1 + $0x1d4] sm:$0xf]  ;;  %v1534_v16 = vld [vmem:[%s2089_s1 + $0x1d8] sm:$0xf0]  ;;  %v1473_v19 = vor.u32 %v1608_v13, %v1470_v14  ;;  %v1590_v22 = vld [vmem:[%s2089_s1 + $0xc4] sm:$0xf]  ;;  %v1337_v29 = vor.u32 %v1574_v20, %v1334_v21 }
  0xad   : > { %1010 = vmatpush.bf16.msra.mxu2 %v1429_v43  ;;  %v1537_v23 = vor.u32 %v1624_v15, %v1534_v16  ;;  %v1398_v24 = vld [vmem:[%s2089_s1 + $0xc8] sm:$0xf0]  ;;  %v1606_v25 = vld [vmem:[%s2089_s1 + $0x144] sm:$0xf]  ;;  %v1572_v32 = vld [vmem:[%s2089_s1 + $0x34] sm:$0xf] }
  0xae   : > { %1024 = vmatpush.bf16.msra.mxu3 %v1493_v48  ;;  %983 = vmatmul.bf16.vlgmr.msra.gmra.mxu0 %v2190_v3  ;;  %v1462_v26 = vld [vmem:[%s2089_s1 + $0x148] sm:$0xf0]  ;;  %v1622_v27 = vld [vmem:[%s2089_s1 + $0x1c4] sm:$0xf]  ;;  %v1401_v30 = vor.u32 %v1590_v22, %v1398_v24  ;;  %v1326_v33 = vld [vmem:[%s2089_s1 + $0x38] sm:$0xf0] }
  0xaf   : > { %1031 = vmatpush.bf16.msrb.mxu0 %v1361_v49  ;;  %997 = vmatmul.bf16.vlgmr.msra.gmra.mxu1 %v2192_v5  ;;  %v1526_v28 = vld [vmem:[%s2089_s1 + $0x1c8] sm:$0xf0]  ;;  %v1465_v31 = vor.u32 %v1606_v25, %v1462_v26  ;;  %v1588_v34 = vld [vmem:[%s2089_s1 + $0xb4] sm:$0xf]  ;;  %v1390_v36 = vld [vmem:[%s2089_s1 + $0xb8] sm:$0xf0]  ;;  %v1329_v41 = vor.u32 %v1572_v32, %v1326_v33 }
  0xb0   : > { %1045 = vmatpush.bf16.msrb.mxu1 %v1425_v54  ;;  %1011 = vmatmul.bf16.vlgmr.msra.gmra.mxu2 %v2181_v60  ;;  %v1529_v35 = vor.u32 %v1622_v27, %v1526_v28  ;;  %v1604_v37 = vld [vmem:[%s2089_s1 + $0x134] sm:$0xf]  ;;  %v1454_v38 = vld [vmem:[%s2089_s1 + $0x138] sm:$0xf0]  ;;  %v1393_v42 = vor.u32 %v1588_v34, %v1390_v36  ;;  %v1570_v44 = vld [vmem:[%s2089_s1 + $0x24] sm:$0xf] }
  0xb1   : > { %1059 = vmatpush.bf16.msrb.mxu2 %v1489_v55  ;;  %1025 = vmatmul.bf16.vlgmr.msra.gmra.mxu3 %v2188_v2  ;;  %v1620_v39 = vld [vmem:[%s2089_s1 + $0x1b4] sm:$0xf]  ;;  %v1518_v40 = vld [vmem:[%s2089_s1 + $0x1b8] sm:$0xf0]  ;;  %v1457_v43 = vor.u32 %v1604_v37, %v1454_v38  ;;  %v1318_v45 = vld [vmem:[%s2089_s1 + $0x28] sm:$0xf0] }
  0xb2   : > { %1073 = vmatpush.bf16.msrb.mxu3 %v1553_v59  ;;  %v1586_v46 = vld [vmem:[%s2089_s1 + $0xa4] sm:$0xf]  ;;  %v1521_v47 = vor.u32 %v1620_v39, %v1518_v40  ;;  %v1382_v48 = vld [vmem:[%s2089_s1 + $0xa8] sm:$0xf0]  ;;  %v1321_v53 = vor.u32 %v1570_v44, %v1318_v45  ;;  %v1568_v56 = vld [vmem:[%s2089_s1 + $0x14] sm:$0xf] }
  0xb3   : > { %1032 = vmatpush.bf16.msrb.mxu0 %v1353_v4  ;;  %v1602_v49 = vld [vmem:[%s2089_s1 + $0x124] sm:$0xf]  ;;  %v1446_v50 = vld [vmem:[%s2089_s1 + $0x128] sm:$0xf0]  ;;  %v1385_v54 = vor.u32 %v1586_v46, %v1382_v48  ;;  %v1310_v57 = vld [vmem:[%s2089_s1 + $0x18] sm:$0xf0] }
  0xb4   : > { %1046 = vmatpush.bf16.msrb.mxu1 %v1417_v6  ;;  %v1618_v51 = vld [vmem:[%s2089_s1 + $0x1a4] sm:$0xf]  ;;  %v1510_v52 = vld [vmem:[%s2089_s1 + $0x1a8] sm:$0xf0]  ;;  %v1449_v55 = vor.u32 %v1602_v49, %v1446_v50  ;;  %v1584_v58 = vld [vmem:[%s2089_s1 + $0x94] sm:$0xf]  ;;  %v1313_v4 = vor.u32 %v1568_v56, %v1310_v57 }
  0xb5   : > { %1060 = vmatpush.bf16.msrb.mxu2 %v1481_v7  ;;  %v1513_v59 = vor.u32 %v1618_v51, %v1510_v52  ;;  %v1374_v61 = vld [vmem:[%s2089_s1 + $0x98] sm:$0xf0]  ;;  %v1600_v62 = vld [vmem:[%s2089_s1 + $0x114] sm:$0xf]  ;;  %v1566_v8 = vld [vmem:[%s2089_s1 + $0x4] sm:$0xf] }
  0xb6   : > { %1074 = vmatpush.bf16.msrb.mxu3 %v1545_v11  ;;  %v1438_v63 = vld [vmem:[%s2089_s1 + $0x118] sm:$0xf0]  ;;  %v1616_v0 = vld [vmem:[%s2089_s1 + $0x194] sm:$0xf]  ;;  %v1377_v6 = vor.u32 %v1584_v58, %v1374_v61  ;;  %v1302_v9 = vld [vmem:[%s2089_s1 + $0x8] sm:$0xf0] }
  0xb7   : > { %1033 = vmatpush.bf16.msrb.mxu0 %v1345_v17  ;;  %v1502_v1 = vld [vmem:[%s2089_s1 + $0x198] sm:$0xf0]  ;;  %v1441_v7 = vor.u32 %v1600_v62, %v1438_v63  ;;  %v1582_v10 = vld [vmem:[%s2089_s1 + $0x84] sm:$0xf]  ;;  %v1366_v12 = vld [vmem:[%s2089_s1 + $0x88] sm:$0xf0]  ;;  %v1305_v17 = vor.u32 %v1566_v8, %v1302_v9 }
  0xb8   : > { %1047 = vmatpush.bf16.msrb.mxu1 %v1409_v18  ;;  %v1505_v11 = vor.u32 %v1616_v0, %v1502_v1  ;;  %v1598_v13 = vld [vmem:[%s2089_s1 + $0x104] sm:$0xf]  ;;  %v1430_v14 = vld [vmem:[%s2089_s1 + $0x108] sm:$0xf0]  ;;  %v1369_v18 = vor.u32 %v1582_v10, %v1366_v12  ;;  %v566_v49 = vld [vmem:[%s2091_s25 + $0x18] sm:$0xff]  ;;  %p1554_p5 = scmp.ne.s32.totalorder %s1790_s18, 8 }
  0xb9   : > { %1061 = vmatpush.bf16.msrb.mxu2 %v1473_v19  ;;  %v1614_v15 = vld [vmem:[%s2089_s1 + $0x184] sm:$0xf]  ;;  %v1494_v16 = vld [vmem:[%s2089_s1 + $0x188] sm:$0xf0]  ;;  %v1433_v19 = vor.u32 %v1598_v13, %v1430_v14 }
  0xba   : > { %1075 = vmatpush.bf16.msrb.mxu3 %v1537_v23  ;;  %v1497_v20 = vor.u32 %v1614_v15, %v1494_v16  ;;  %v563_v27 = vld [vmem:[%s2091_s25] sm:$0xff] }
  0xbb   : > { %1034 = vmatpush.bf16.msrb.mxu0 %v1337_v29 }
  0xbc   : > { %1048 = vmatpush.bf16.msrb.mxu1 %v1401_v30 }
  0xbd   : > { %1062 = vmatpush.bf16.msrb.mxu2 %v1465_v31 }
  0xbe   : > { %1076 = vmatpush.bf16.msrb.mxu3 %v1529_v35 }
  0xbf   : > { %1035 = vmatpush.bf16.msrb.mxu0 %v1329_v41  ;;  %v564_v41 = vld [vmem:[%s2091_s25 + $0x8] sm:$0xff] }
  0xc0   : > { %1049 = vmatpush.bf16.msrb.mxu1 %v1393_v42 }
  0xc1   : > { %1063 = vmatpush.bf16.msrb.mxu2 %v1457_v43 }
  0xc2   : > { %1077 = vmatpush.bf16.msrb.mxu3 %v1521_v47 }
  0xc3   : > { %1036 = vmatpush.bf16.msrb.mxu0 %v1321_v53 }
  0xc4   : > { %1050 = vmatpush.bf16.msrb.mxu1 %v1385_v54 }
  0xc5   : > { %1064 = vmatpush.bf16.msrb.mxu2 %v1449_v55 }
  0xc6   : > { %1078 = vmatpush.bf16.msrb.mxu3 %v1513_v59 }
  0xc7   : > { %1037 = vmatpush.bf16.msrb.mxu0 %v1313_v4 }
  0xc8   : > { %1051 = vmatpush.bf16.msrb.mxu1 %v1377_v6 }
  0xc9   : > { %1065 = vmatpush.bf16.msrb.mxu2 %v1441_v7 }
  0xca   : > { %1079 = vmatpush.bf16.msrb.mxu3 %v1505_v11 }
  0xcb   : > { %1038 = vmatpush.bf16.msrb.mxu0 %v1305_v17 }
  0xcc   : > { %1052 = vmatpush.bf16.msrb.mxu1 %v1369_v18 }
  0xcd   : > { %1066 = vmatpush.bf16.msrb.mxu2 %v1433_v19 }
  0xce   : > { %1080 = vmatpush.bf16.msrb.mxu3 %v1497_v20  ;;  %1039 = vmatmul.bf16.vlgmr.msrb.gmra.mxu0 %v2190_v3 }
  0xcf   : > { %1053 = vmatmul.bf16.vlgmr.msrb.gmra.mxu1 %v2192_v5 }
  0xd0   : > { %1067 = vmatmul.bf16.vlgmr.msrb.gmra.mxu2 %v2181_v60 }
  0xd1   : > { %1081 = vmatmul.bf16.vlgmr.msrb.gmra.mxu3 %v2188_v2  ;;  %v565_v2 = vld [vmem:[%s2091_s25 + $0x10] sm:$0xff] }
 0x12b   : > { %v984_v21 = vpop.f32.mrf.mxu0 }
 0x12c   : > { %v998_v22 = vpop.f32.mrf.mxu1 }
 0x12d   : > { %v999_v23 = vadd.f32 %v998_v22, %v984_v21 }
 0x133   : > { %v1012_v24 = vpop.f32.mrf.mxu2  ;;  %v986_v29 = vpop.f32.mrf.mxu0 }
 0x134   : > { %v1013_v25 = vadd.f32 %v1012_v24, %v999_v23  ;;  %v1026_v26 = vpop.f32.mrf.mxu3  ;;  %v1000_v30 = vpop.f32.mrf.mxu1 }
 0x135   : > { %v1001_v31 = vadd.f32 %v1000_v30, %v986_v29 }
 0x136   : > { %v1027_v28 = vadd.f32 %v1026_v26, %v1013_v25 }
 0x138   : > { %v1087_v3 = vadd.f32 %v1027_v28, %v563_v27 }
 0x13a   : > { %1091 = vst [vmem:[%s2091_s25] sm:$0xff] %v1087_v3 }
 0x13b   : > { %v1014_v5 = vpop.f32.mrf.mxu2 }
 0x13c   : > { %v1015_v60 = vadd.f32 %v1014_v5, %v1001_v31  ;;  %v1028_v32 = vpop.f32.mrf.mxu3 }
 0x13e   : > { %v1029_v33 = vadd.f32 %v1028_v32, %v1015_v60 }
 0x140   : > { %v1089_v34 = vadd.f32 %v1029_v33, %v565_v2 }
 0x142   : > { %1093 = vst [vmem:[%s2091_s25 + $0x10] sm:$0xff] %v1089_v34 }
 0x14b   : > { %v1040_v35 = vpop.f32.mrf.mxu0 }
 0x14c   : > { %v1054_v36 = vpop.f32.mrf.mxu1 }
 0x14d   : > { %v1055_v37 = vadd.f32 %v1054_v36, %v1040_v35 }
 0x153   : > { %v1068_v38 = vpop.f32.mrf.mxu2  ;;  %v1042_v43 = vpop.f32.mrf.mxu0 }
 0x154   : > { %v1069_v39 = vadd.f32 %v1068_v38, %v1055_v37  ;;  %v1082_v40 = vpop.f32.mrf.mxu3  ;;  %v1056_v44 = vpop.f32.mrf.mxu1 }
 0x155   : > { %v1057_v46 = vadd.f32 %v1056_v44, %v1042_v43 }
 0x156   : > { %v1083_v42 = vadd.f32 %v1082_v40, %v1069_v39 }
 0x158   : > { %v1088_v45 = vadd.f32 %v1083_v42, %v564_v41 }
 0x15a   : > { %1092 = vst [vmem:[%s2091_s25 + $0x8] sm:$0xff] %v1088_v45 }
 0x15b   : > { %v1070_v47 = vpop.f32.mrf.mxu2 }
 0x15c   : > { %v1071_v48 = vadd.f32 %v1070_v47, %v1057_v46  ;;  %v1084_v50 = vpop.f32.mrf.mxu3 }
 0x15e   : > { %v1085_v51 = vadd.f32 %v1084_v50, %v1071_v48  ;;  %1098 = sbr.rel (%p1554_p5) target bundleno = 367 (0x16f), region = 101 }
 0x160   : > { %v1090_v52 = vadd.f32 %v1085_v51, %v566_v49 }
 0x162   : > { %1094 = vst [vmem:[%s2091_s25 + $0x18] sm:$0xff] %v1090_v52 }
 0x163   : > { %v1099_v53 = vld [vmem:[%s2091_s25] sm:$0xff]  ;;  %v1100_v55 = vld [vmem:[%s2091_s25 + $0x8] sm:$0xff]  ;;  %v1101_v58 = vld [vmem:[%s2091_s25 + $0x10] sm:$0xff] }
 0x164   : > { %v1103_v54 = vld [vmem:[%s551_s5] sm:$0x3] }
 0x165   : > { %v1105_v56 = vperm.slane %v1103_v54, 0  ;;  %v1106_v57 = vperm.slane %v1103_v54, 1 }
 0x167   : > { %v1109_v61 = vadd.f32 %v1105_v56, %v1099_v53  ;;  %v1110_v62 = vadd.f32 %v1106_v57, %v1100_v55  ;;  %v1111_v63 = vadd.f32 %v1105_v56, %v1101_v58 }
 0x169   : > { %v1102_v59 = vld [vmem:[%s2091_s25 + $0x18] sm:$0xff]  ;;  %v1113_v1 = vmax.f32 %v1109_v61, 0.0  ;;  %v1114_v4 = vmax.f32 %v1110_v62, 0.0  ;;  %v1115_v6 = vmax.f32 %v1111_v63, 0.0 }
 0x16a   : > { %v1112_v0 = vadd.f32 %v1106_v57, %v1102_v59 }
 0x16b   : > { %1117 = vst [vmem:[%s2091_s25] sm:$0xff] %v1113_v1 }
 0x16c   : > { %v1116_v7 = vmax.f32 %v1112_v0, 0.0  ;;  %1118 = vst [vmem:[%s2091_s25 + $0x8] sm:$0xff] %v1114_v4 }
 0x16d   : > { %1119 = vst [vmem:[%s2091_s25 + $0x10] sm:$0xff] %v1115_v6 }
 0x16e   : > { %1120 = vst [vmem:[%s2091_s25 + $0x18] sm:$0xff] %v1116_v7 }
 0x16f PF: > { %1127 = sbr.rel (!%p1923_p12) target bundleno = 375 (0x177), region = 105  ;;  %s1630_s14 = sshll.u32 (%p1923_p12), %s1794_s19, 4 }
 0x170   : > { %s1133_s0 = scalar_lea.vmem (%p1923_p12), %s2318_s3, %s1630_s14 }
 0x172   : > { %v1146_v8 = vld [vmem:[%s2091_s25] sm:$0xff] (%p1923_p12) }
 0x173   : > { %v1148_v9 = vld [vmem:[%s2091_s25 + $0x8] sm:$0xff] (%p1923_p12)  ;;  %1147 = vst [vmem:[%s1133_s0] sm:$0xff] (%p1923_p12), %v1146_v8 }
 0x174   : > { %v1150_v10 = vld [vmem:[%s2091_s25 + $0x10] sm:$0xff]  ;;  %1149 = vst [vmem:[%s1133_s0 + $0x8] sm:$0xff] %v1148_v9 }
 0x175   : > { %v1152_v11 = vld [vmem:[%s2091_s25 + $0x18] sm:$0xff]  ;;  %1151 = vst [vmem:[%s1133_s0 + $0x20] sm:$0xff] %v1150_v10 }
 0x176   : > { %1153 = vst [vmem:[%s1133_s0 + $0x28] sm:$0xff] %v1152_v11 }
 0x177 PF: > { %s13_s22 = sadd.s32 1, %s1806_s22   ;;  %s2328_s10 = sld [smem:[#allocation5_spill]] }
 0x178   : > { %p10_p6 = scmp.ge.s32.totalorder %s13_s22, 20   ;;  %s2329_s12 = smov %s1770_s13 }
 0x179   : > { %s2330_s13 = smov %s1921_s9  ;;  %s2331_s14 = smov %s1778_s15 }
 0x17a   : > { %s2332_s15 = smov %s1918_s8  ;;  %s2333_s16 = smov %s1786_s17 }
 0x17b   : > { %s2334_s17 = smov %s1904_s30  ;;  %s2335_s18 = smov %s1798_s20 }
 0x17c   : > { %s2336_s19 = smov %s1802_s21  ;;  %s2337_s20 = smov %s2340_s24 }
 0x17d   : > { %s2338_s21 = smov %s2328_s10  ;;  %12 = sbr.rel (!%p10_p6) target bundleno = 9 (0x9), region = 170 }

</bundles_post_ra>
